<compile_context>
chip_gen: v5e
topology: v5e:2x2
jax: 0.10.0
libtpu: 0.0.40
codegen_flags: <defaults>
</compile_context>

<pallas_src>
import functools
import math

import jax
import jax.numpy as jnp
from jax.experimental import pallas as pl
from jax.experimental.pallas import tpu as pltpu

BN_EPS = 1e-5
_SQRT_HALF = 0.7071067811865476


def _gelu_exact(x):
    # nn.GELU() default: exact erf-based GELU.
    return 0.5 * x * (1.0 + jax.lax.erf(x * _SQRT_HALF))


# ---------------------------------------------------------------------------
# Fused conv (+ BN shift, + residual / fused 1x1 downsample, + GELU) kernel
# ---------------------------------------------------------------------------
def _fused_conv_kernel(*refs, kh, kw, stride, oh, ow, hq, apply_gelu, res_mode):
    """One grid step = (one image) x (one Cout tile).

    refs:
      res_mode 0: x, w, shift, out
      res_mode 1: x, w, shift, residual, out
      res_mode 2: x, w, shift, res_x, res_w, res_shift, out
    x     : (1, S*S*hq, wq, Cin)  bf16  phase-split, spatially padded NHWC input
    w     : (kh*kw, Cin, TCO)     bf16  BN-scale-folded weights, tap-major
    shift : (1, TCO)              f32   folded conv-bias / BN shift
    out   : (1, oh, ow, TCO)
    """
    if res_mode == 0:
        x_ref, w_ref, sh_ref, o_ref = refs
    elif res_mode == 1:
        x_ref, w_ref, sh_ref, r_ref, o_ref = refs
    else:
        x_ref, w_ref, sh_ref, rx_ref, rw_ref, rsh_ref, o_ref = refs

    cin = x_ref.shape[-1]
    tco = o_ref.shape[-1]

    acc = jnp.zeros((oh * ow, tco), jnp.float32)
    for di in range(kh):                      # taps unrolled: no K grid axis
        for dj in range(kw):
            t = di * kw + dj
            phase = (di % stride) * stride + (dj % stride)
            r0 = phase * hq + di // stride
            c0 = dj // stride
            win = x_ref[0, r0:r0 + oh, c0:c0 + ow, :]       # (oh, ow, cin) bf16
            acc += jnp.dot(win.reshape(oh * ow, cin), w_ref[t],
                           preferred_element_type=jnp.float32)

    y = acc + sh_ref[...]                                   # f32 epilogue
    if res_mode == 1:
        y = y + r_ref[0].reshape(oh * ow, tco).astype(jnp.float32)
    elif res_mode == 2:                                     # fused 1x1 downsample
        rcin = rx_ref.shape[-1]
        ident = jnp.dot(rx_ref[0].reshape(oh * ow, rcin), rw_ref[...],
                        preferred_element_type=jnp.float32) + rsh_ref[...]
        y = y + ident
    if apply_gelu:
        y = _gelu_exact(y)
    o_ref[0] = y.reshape(oh, ow, tco).astype(o_ref.dtype)


# ---------------------------------------------------------------------------
# Wrapper
# ---------------------------------------------------------------------------
def _fold_bn(bias, bn):
    """Return (per-channel scale folded into W, per-channel shift for epilogue)."""
    # TODO(synk): BatchNorm2d is folded with eval-mode running statistics;
    # training-mode batch statistics are not reproduced.
    bias = bias.astype(jnp.float32)
    if bn is None:
        return jnp.ones_like(bias), bias
    gamma, beta, mean, var = (a.astype(jnp.float32) for a in bn)
    scale = gamma * jax.lax.rsqrt(var + BN_EPS)
    return scale, (bias - mean) * scale + beta


def _phase_split(xp, s):
    """(N, Hp, Wp, C) -> stride phases stacked along H: (N, s*s*hq, wq, C)."""
    if s == 1:
        return xp, xp.shape[1], xp.shape[2]
    n, hp, wp, c = xp.shape
    hq, wq = -(-hp // s), -(-wp // s)
    xp = jnp.pad(xp, ((0, 0), (0, hq * s - hp), (0, wq * s - wp), (0, 0)))
    xp = xp.reshape(n, hq, s, wq, s, c).transpose(0, 2, 4, 1, 3, 5)
    return xp.reshape(n, s * s * hq, wq, c), hq, wq


def fused_conv(x, w, b, *, stride=1, pad=0, gelu=False, bn=None,
               residual=None, res_conv=None, out_dtype=jnp.float32):
    """y = gelu?( BN(conv(x)) [+ residual | + 1x1 downsample conv] ); NHWC in/out."""
    n, h, w_in, cin = x.shape
    cout, cin_w, kh, kw = w.shape
    assert cin == cin_w
    oh = (h + 2 * pad - kh) // stride + 1
    ow = (w_in + 2 * pad - kw) // stride + 1

    xp = jnp.pad(x, ((0, 0), (pad, pad), (pad, pad), (0, 0))) if pad else x
    xph, hq, wq = _phase_split(xp.astype(jnp.bfloat16), stride)

    scale, shift = _fold_bn(b, bn)
    wm = jnp.transpose(w, (2, 3, 1, 0)).reshape(kh * kw, cin, cout)
    wm = (wm * scale[None, None, :]).astype(jnp.bfloat16)
    shift = shift.reshape(1, cout)

    # Cout tiling: full extent unless large and lane/sublane aligned.
    tco = 128 if (cout % 128 == 0 and cout > 128 and ow % 8 == 0) else cout
    n_co = cout // tco

    operands = [xph, wm, shift]
    in_specs = [
        pl.BlockSpec((1, xph.shape[1], wq, cin), lambda bi, ci: (bi, 0, 0, 0)),
        pl.BlockSpec((kh * kw, cin, tco), lambda bi, ci: (0, 0, ci)),
        pl.BlockSpec((1, tco), lambda bi, ci: (0, ci)),
    ]
    res_mode = 0
    if residual is not None:
        res_mode = 1
        operands.append(residual.astype(jnp.float32))
        in_specs.append(pl.BlockSpec((1, oh, ow, tco), lambda bi, ci: (bi, 0, 0, ci)))
    elif res_conv is not None:
        res_mode = 2
        rx, rw, rb = res_conv                      # rx already stride-subsampled
        rcout, rcin = rw.shape[0], rw.shape[1]
        assert rcout == cout and rx.shape[1:3] == (oh, ow)
        rscale, rshift = _fold_bn(rb, None)
        rwm = (jnp.transpose(rw, (2, 3, 1, 0)).reshape(rcin, rcout)
               * rscale[None, :]).astype(jnp.bfloat16)
        operands += [rx.astype(jnp.bfloat16), rwm, rshift.reshape(1, cout)]
        in_specs += [
            pl.BlockSpec((1, oh, ow, rcin), lambda bi, ci: (bi, 0, 0, 0)),
            pl.BlockSpec((rcin, tco), lambda bi, ci: (0, ci)),
            pl.BlockSpec((1, tco), lambda bi, ci: (0, ci)),
        ]

    return pl.pallas_call(
        functools.partial(_fused_conv_kernel, kh=kh, kw=kw, stride=stride,
                          oh=oh, ow=ow, hq=hq, apply_gelu=gelu, res_mode=res_mode),
        out_shape=jax.ShapeDtypeStruct((n, oh, ow, cout), out_dtype),
        grid_spec=pltpu.PrefetchScalarGridSpec(
            num_scalar_prefetch=0,
            grid=(n, n_co),
            in_specs=in_specs,
            out_specs=pl.BlockSpec((1, oh, ow, tco), lambda bi, ci: (bi, 0, 0, ci)),
        ),
        compiler_params=pltpu.CompilerParams(
            dimension_semantics=("parallel", "parallel"),
            vmem_limit_bytes=32 * 1024 * 1024),
    )(*operands)


# ---------------------------------------------------------------------------
# ConvResBlock forward (2 pallas_calls per block)
# ---------------------------------------------------------------------------
def conv_res_block(x, p, stride):
    """x: (N, H, W, Cin) f32 NHWC -> (N, OH, OW, Cout) f32 NHWC."""
    # conv1 + bn1 + GELU; output stored in bf16 (it is only a matmul operand).
    out = fused_conv(x, p['w1'], p['b1'], stride=stride, pad=1, gelu=True,
                     bn=p['bn1'], out_dtype=jnp.bfloat16)
    if stride != 1:
        # conv2 + bn2 + fused 1x1 downsample of x + residual add + GELU.
        rx = x[:, ::stride, ::stride, :]
        return fused_conv(out, p['w2'], p['b2'], stride=1, pad=1, gelu=True,
                          bn=p['bn2'], res_conv=(rx, p['wd'], p['bd']))
    return fused_conv(out, p['w2'], p['b2'], stride=1, pad=1, gelu=True,
                      bn=p['bn2'], residual=x)


def conv_res_block_nchw(x_nchw, p, stride):
    x = jnp.transpose(x_nchw, (0, 2, 3, 1)).astype(jnp.float32)
    y = conv_res_block(x, p, stride)
    return jnp.transpose(y, (0, 3, 1, 2))


# ---------------------------------------------------------------------------
# Pure-JAX reference (eval-mode BN), for validation
# ---------------------------------------------------------------------------
def _conv_ref(x, w, b, stride, pad):
    y = jax.lax.conv_general_dilated(
        x, jnp.transpose(w, (2, 3, 1, 0)), (stride, stride),
        ((pad, pad), (pad, pad)),
        dimension_numbers=('NHWC', 'HWIO', 'NHWC'),
        precision=jax.lax.Precision.HIGHEST)
    return y + b.reshape(1, 1, 1, -1)


def _bn_ref(y, bn):
    gamma, beta, mean, var = bn
    return (y - mean) * gamma * jax.lax.rsqrt(var + BN_EPS) + beta


def conv_res_block_ref(x, p, stride):
    identity = x if stride == 1 else _conv_ref(x, p['wd'], p['bd'], stride, 0)
    out = _gelu_exact(_bn_ref(_conv_ref(x, p['w1'], p['b1'], stride, 1), p['bn1']))
    out = _bn_ref(_conv_ref(out, p['w2'], p['b2'], 1, 1), p['bn2'])
    return _gelu_exact(out + identity)


# ---------------------------------------------------------------------------
# Deterministic parameter init (shapes from the PyTorch __init__)
# ---------------------------------------------------------------------------
def init_block_params(key, cin, cout, stride):
    ks = jax.random.split(key, 8)

    def conv_w(k, co, ci, ksz):
        std = math.sqrt(2.0 / (co * ksz * ksz))          # kaiming_normal_, fan_out
        return jax.random.normal(k, (co, ci, ksz, ksz), jnp.float32) * std

    def bn(k, c):
        k1, k2, k3, k4 = jax.random.split(k, 4)
        return (jax.random.uniform(k1, (c,), jnp.float32, 0.5, 1.5),   # gamma
                jax.random.normal(k2, (c,), jnp.float32) * 0.1,        # beta
                jax.random.normal(k3, (c,), jnp.float32) * 0.1,        # running_mean
                jax.random.uniform(k4, (c,), jnp.float32, 0.5, 1.5))   # running_var

    p = {'w1': conv_w(ks[0], cout, cin, 3),
         'b1': jax.random.normal(ks[1], (cout,), jnp.float32) * 0.05,
         'bn1': bn(ks[2], cout),
         'w2': conv_w(ks[3], cout, cout, 3),
         'b2': jax.random.normal(ks[4], (cout,), jnp.float32) * 0.05,
         'bn2': bn(ks[5], cout)}
    if stride != 1:
        p['wd'] = conv_w(ks[6], cout, cin, 1)
        p['bd'] = jax.random.normal(ks[7], (cout,), jnp.float32) * 0.05
    return p


if __name__ == "__main__":
    key = jax.random.PRNGKey(0)
    kx, k1, k2 = jax.random.split(key, 3)

    x = jax.random.normal(kx, (2, 8, 16, 16), jnp.float32)     # NCHW
    p1 = init_block_params(k1, 8, 16, 2)    # downsampling block (stride 2)
    p2 = init_block_params(k2, 16, 16, 1)   # identity block     (stride 1)

    @jax.jit
    def forward(x_nchw, p1, p2):
        y = conv_res_block_nchw(x_nchw, p1, 2)
        return conv_res_block_nchw(y, p2, 1)

    y = jax.block_until_ready(forward(x, p1, p2))
    assert y.shape == (2, 16, 8, 8), y.shape
    assert bool(jnp.all(jnp.isfinite(y)))

    # Validate against a pure-JAX f32 reference (loose tol: bf16 matmul operands).
    x_nhwc = jnp.transpose(x, (0, 2, 3, 1))
    ref = conv_res_block_ref(conv_res_block_ref(x_nhwc, p1, 2), p2, 1)
    ref = jnp.transpose(ref, (0, 3, 1, 2))
    assert bool(jnp.allclose(y, ref, atol=1e-1, rtol=1e-1)), \
        float(jnp.max(jnp.abs(y - ref)))

    print("KERNEL_OK")
</pallas_src>

<mosaic_0001>
module attributes {stable_mosaic.version = 11 : i64} {
  func.func @_fused_conv_kernel(%arg0: i32, %arg1: i32, %arg2: memref<1x36x9x8xbf16, #tpu.memory_space<vmem>>, %arg3: memref<9x8x16xbf16, #tpu.memory_space<vmem>>, %arg4: memref<1x16xf32, #tpu.memory_space<vmem>>, %arg5: memref<1x8x8x16xbf16, #tpu.memory_space<vmem>>) attributes {dimension_semantics = [#tpu.dimension_semantics<parallel>, #tpu.dimension_semantics<parallel>], iteration_bounds = array<i64: 2, 1>, scalar_prefetch = 0 : i64, scratch_operands = 0 : i64, tpu.core_type = #tpu.core_type<tc>, window_params = [{transform_indices = @transform_0, window_bounds = array<i64: 1, 36, 9, 8>}, {transform_indices = @transform_1, window_bounds = array<i64: 9, 8, 16>}, {transform_indices = @transform_2, window_bounds = array<i64: 1, 16>}, {transform_indices = @transform_3, window_bounds = array<i64: 1, 8, 8, 16>}]} {
    %cst = arith.constant 0.000000e+00 : f32
    %0 = vector.broadcast %cst : f32 to vector<64x16xf32>
    %c0 = arith.constant 0 : index
    %c0_0 = arith.constant 0 : index
    %c0_1 = arith.constant 0 : index
    %c0_2 = arith.constant 0 : index
    %1 = vector.load %arg2[%c0, %c0_0, %c0_1, %c0_2] : memref<1x36x9x8xbf16, #tpu.memory_space<vmem>>, vector<1x8x8x8xbf16>
    %2 = vector.shape_cast %1 : vector<1x8x8x8xbf16> to vector<8x8x8xbf16>
    %3 = vector.shape_cast %2 : vector<8x8x8xbf16> to vector<64x8xbf16>
    %c0_3 = arith.constant 0 : index
    %c0_4 = arith.constant 0 : index
    %c0_5 = arith.constant 0 : index
    %4 = vector.load %arg3[%c0_3, %c0_4, %c0_5] : memref<9x8x16xbf16, #tpu.memory_space<vmem>>, vector<1x8x16xbf16>
    %5 = vector.shape_cast %4 : vector<1x8x16xbf16> to vector<8x16xbf16>
    %cst_6 = arith.constant dense<0.000000e+00> : vector<64x16xf32>
    %6 = tpu.matmul %3, %5, %cst_6 {dimension_numbers = #tpu.dot_dimension_numbers<[1], [0], [0], [1], [0, 0, 1, 1], [], []>} : vector<64x8xbf16>, vector<8x16xbf16>, vector<64x16xf32> -> vector<64x16xf32>
    %7 = arith.addf %0, %6 : vector<64x16xf32>
    %c0_7 = arith.constant 0 : index
    %c9 = arith.constant 9 : index
    %c0_8 = arith.constant 0 : index
    %c0_9 = arith.constant 0 : index
    %8 = vector.load %arg2[%c0_7, %c9, %c0_8, %c0_9] : memref<1x36x9x8xbf16, #tpu.memory_space<vmem>>, vector<1x8x8x8xbf16>
    %9 = vector.shape_cast %8 : vector<1x8x8x8xbf16> to vector<8x8x8xbf16>
    %10 = vector.shape_cast %9 : vector<8x8x8xbf16> to vector<64x8xbf16>
    %c1 = arith.constant 1 : index
    %c0_10 = arith.constant 0 : index
    %c0_11 = arith.constant 0 : index
    %11 = vector.load %arg3[%c1, %c0_10, %c0_11] : memref<9x8x16xbf16, #tpu.memory_space<vmem>>, vector<1x8x16xbf16>
    %12 = vector.shape_cast %11 : vector<1x8x16xbf16> to vector<8x16xbf16>
    %cst_12 = arith.constant dense<0.000000e+00> : vector<64x16xf32>
    %13 = tpu.matmul %10, %12, %cst_12 {dimension_numbers = #tpu.dot_dimension_numbers<[1], [0], [0], [1], [0, 0, 1, 1], [], []>} : vector<64x8xbf16>, vector<8x16xbf16>, vector<64x16xf32> -> vector<64x16xf32>
    %14 = arith.addf %7, %13 : vector<64x16xf32>
    %c0_13 = arith.constant 0 : index
    %c0_14 = arith.constant 0 : index
    %c1_15 = arith.constant 1 : index
    %c0_16 = arith.constant 0 : index
    %15 = vector.load %arg2[%c0_13, %c0_14, %c1_15, %c0_16] : memref<1x36x9x8xbf16, #tpu.memory_space<vmem>>, vector<1x8x8x8xbf16>
    %16 = vector.shape_cast %15 : vector<1x8x8x8xbf16> to vector<8x8x8xbf16>
    %17 = vector.shape_cast %16 : vector<8x8x8xbf16> to vector<64x8xbf16>
    %c2 = arith.constant 2 : index
    %c0_17 = arith.constant 0 : index
    %c0_18 = arith.constant 0 : index
    %18 = vector.load %arg3[%c2, %c0_17, %c0_18] : memref<9x8x16xbf16, #tpu.memory_space<vmem>>, vector<1x8x16xbf16>
    %19 = vector.shape_cast %18 : vector<1x8x16xbf16> to vector<8x16xbf16>
    %cst_19 = arith.constant dense<0.000000e+00> : vector<64x16xf32>
    %20 = tpu.matmul %17, %19, %cst_19 {dimension_numbers = #tpu.dot_dimension_numbers<[1], [0], [0], [1], [0, 0, 1, 1], [], []>} : vector<64x8xbf16>, vector<8x16xbf16>, vector<64x16xf32> -> vector<64x16xf32>
    %21 = arith.addf %14, %20 : vector<64x16xf32>
    %c0_20 = arith.constant 0 : index
    %c18 = arith.constant 18 : index
    %c0_21 = arith.constant 0 : index
    %c0_22 = arith.constant 0 : index
    %22 = vector.load %arg2[%c0_20, %c18, %c0_21, %c0_22] : memref<1x36x9x8xbf16, #tpu.memory_space<vmem>>, vector<1x8x8x8xbf16>
    %23 = vector.shape_cast %22 : vector<1x8x8x8xbf16> to vector<8x8x8xbf16>
    %24 = vector.shape_cast %23 : vector<8x8x8xbf16> to vector<64x8xbf16>
    %c3 = arith.constant 3 : index
    %c0_23 = arith.constant 0 : index
    %c0_24 = arith.constant 0 : index
    %25 = vector.load %arg3[%c3, %c0_23, %c0_24] : memref<9x8x16xbf16, #tpu.memory_space<vmem>>, vector<1x8x16xbf16>
    %26 = vector.shape_cast %25 : vector<1x8x16xbf16> to vector<8x16xbf16>
    %cst_25 = arith.constant dense<0.000000e+00> : vector<64x16xf32>
    %27 = tpu.matmul %24, %26, %cst_25 {dimension_numbers = #tpu.dot_dimension_numbers<[1], [0], [0], [1], [0, 0, 1, 1], [], []>} : vector<64x8xbf16>, vector<8x16xbf16>, vector<64x16xf32> -> vector<64x16xf32>
    %28 = arith.addf %21, %27 : vector<64x16xf32>
    %c0_26 = arith.constant 0 : index
    %c27 = arith.constant 27 : index
    %c0_27 = arith.constant 0 : index
    %c0_28 = arith.constant 0 : index
    %29 = vector.load %arg2[%c0_26, %c27, %c0_27, %c0_28] : memref<1x36x9x8xbf16, #tpu.memory_space<vmem>>, vector<1x8x8x8xbf16>
    %30 = vector.shape_cast %29 : vector<1x8x8x8xbf16> to vector<8x8x8xbf16>
    %31 = vector.shape_cast %30 : vector<8x8x8xbf16> to vector<64x8xbf16>
    %c4 = arith.constant 4 : index
    %c0_29 = arith.constant 0 : index
    %c0_30 = arith.constant 0 : index
    %32 = vector.load %arg3[%c4, %c0_29, %c0_30] : memref<9x8x16xbf16, #tpu.memory_space<vmem>>, vector<1x8x16xbf16>
    %33 = vector.shape_cast %32 : vector<1x8x16xbf16> to vector<8x16xbf16>
    %cst_31 = arith.constant dense<0.000000e+00> : vector<64x16xf32>
    %34 = tpu.matmul %31, %33, %cst_31 {dimension_numbers = #tpu.dot_dimension_numbers<[1], [0], [0], [1], [0, 0, 1, 1], [], []>} : vector<64x8xbf16>, vector<8x16xbf16>, vector<64x16xf32> -> vector<64x16xf32>
    %35 = arith.addf %28, %34 : vector<64x16xf32>
    %c0_32 = arith.constant 0 : index
    %c18_33 = arith.constant 18 : index
    %c1_34 = arith.constant 1 : index
    %c0_35 = arith.constant 0 : index
    %36 = vector.load %arg2[%c0_32, %c18_33, %c1_34, %c0_35] : memref<1x36x9x8xbf16, #tpu.memory_space<vmem>>, vector<1x8x8x8xbf16>
    %37 = vector.shape_cast %36 : vector<1x8x8x8xbf16> to vector<8x8x8xbf16>
    %38 = vector.shape_cast %37 : vector<8x8x8xbf16> to vector<64x8xbf16>
    %c5 = arith.constant 5 : index
    %c0_36 = arith.constant 0 : index
    %c0_37 = arith.constant 0 : index
    %39 = vector.load %arg3[%c5, %c0_36, %c0_37] : memref<9x8x16xbf16, #tpu.memory_space<vmem>>, vector<1x8x16xbf16>
    %40 = vector.shape_cast %39 : vector<1x8x16xbf16> to vector<8x16xbf16>
    %cst_38 = arith.constant dense<0.000000e+00> : vector<64x16xf32>
    %41 = tpu.matmul %38, %40, %cst_38 {dimension_numbers = #tpu.dot_dimension_numbers<[1], [0], [0], [1], [0, 0, 1, 1], [], []>} : vector<64x8xbf16>, vector<8x16xbf16>, vector<64x16xf32> -> vector<64x16xf32>
    %42 = arith.addf %35, %41 : vector<64x16xf32>
    %c0_39 = arith.constant 0 : index
    %c1_40 = arith.constant 1 : index
    %c0_41 = arith.constant 0 : index
    %c0_42 = arith.constant 0 : index
    %43 = vector.load %arg2[%c0_39, %c1_40, %c0_41, %c0_42] : memref<1x36x9x8xbf16, #tpu.memory_space<vmem>>, vector<1x8x8x8xbf16>
    %44 = vector.shape_cast %43 : vector<1x8x8x8xbf16> to vector<8x8x8xbf16>
    %45 = vector.shape_cast %44 : vector<8x8x8xbf16> to vector<64x8xbf16>
    %c6 = arith.constant 6 : index
    %c0_43 = arith.constant 0 : index
    %c0_44 = arith.constant 0 : index
    %46 = vector.load %arg3[%c6, %c0_43, %c0_44] : memref<9x8x16xbf16, #tpu.memory_space<vmem>>, vector<1x8x16xbf16>
    %47 = vector.shape_cast %46 : vector<1x8x16xbf16> to vector<8x16xbf16>
    %cst_45 = arith.constant dense<0.000000e+00> : vector<64x16xf32>
    %48 = tpu.matmul %45, %47, %cst_45 {dimension_numbers = #tpu.dot_dimension_numbers<[1], [0], [0], [1], [0, 0, 1, 1], [], []>} : vector<64x8xbf16>, vector<8x16xbf16>, vector<64x16xf32> -> vector<64x16xf32>
    %49 = arith.addf %42, %48 : vector<64x16xf32>
    %c0_46 = arith.constant 0 : index
    %c10 = arith.constant 10 : index
    %c0_47 = arith.constant 0 : index
    %c0_48 = arith.constant 0 : index
    %50 = vector.load %arg2[%c0_46, %c10, %c0_47, %c0_48] : memref<1x36x9x8xbf16, #tpu.memory_space<vmem>>, vector<1x8x8x8xbf16>
    %51 = vector.shape_cast %50 : vector<1x8x8x8xbf16> to vector<8x8x8xbf16>
    %52 = vector.shape_cast %51 : vector<8x8x8xbf16> to vector<64x8xbf16>
    %c7 = arith.constant 7 : index
    %c0_49 = arith.constant 0 : index
    %c0_50 = arith.constant 0 : index
    %53 = vector.load %arg3[%c7, %c0_49, %c0_50] : memref<9x8x16xbf16, #tpu.memory_space<vmem>>, vector<1x8x16xbf16>
    %54 = vector.shape_cast %53 : vector<1x8x16xbf16> to vector<8x16xbf16>
    %cst_51 = arith.constant dense<0.000000e+00> : vector<64x16xf32>
    %55 = tpu.matmul %52, %54, %cst_51 {dimension_numbers = #tpu.dot_dimension_numbers<[1], [0], [0], [1], [0, 0, 1, 1], [], []>} : vector<64x8xbf16>, vector<8x16xbf16>, vector<64x16xf32> -> vector<64x16xf32>
    %56 = arith.addf %49, %55 : vector<64x16xf32>
    %c0_52 = arith.constant 0 : index
    %c1_53 = arith.constant 1 : index
    %c1_54 = arith.constant 1 : index
    %c0_55 = arith.constant 0 : index
    %57 = vector.load %arg2[%c0_52, %c1_53, %c1_54, %c0_55] : memref<1x36x9x8xbf16, #tpu.memory_space<vmem>>, vector<1x8x8x8xbf16>
    %58 = vector.shape_cast %57 : vector<1x8x8x8xbf16> to vector<8x8x8xbf16>
    %59 = vector.shape_cast %58 : vector<8x8x8xbf16> to vector<64x8xbf16>
    %c8 = arith.constant 8 : index
    %c0_56 = arith.constant 0 : index
    %c0_57 = arith.constant 0 : index
    %60 = vector.load %arg3[%c8, %c0_56, %c0_57] : memref<9x8x16xbf16, #tpu.memory_space<vmem>>, vector<1x8x16xbf16>
    %61 = vector.shape_cast %60 : vector<1x8x16xbf16> to vector<8x16xbf16>
    %cst_58 = arith.constant dense<0.000000e+00> : vector<64x16xf32>
    %62 = tpu.matmul %59, %61, %cst_58 {dimension_numbers = #tpu.dot_dimension_numbers<[1], [0], [0], [1], [0, 0, 1, 1], [], []>} : vector<64x8xbf16>, vector<8x16xbf16>, vector<64x16xf32> -> vector<64x16xf32>
    %63 = arith.addf %56, %62 : vector<64x16xf32>
    %c0_59 = arith.constant 0 : index
    %c0_60 = arith.constant 0 : index
    %64 = vector.load %arg4[%c0_59, %c0_60] : memref<1x16xf32, #tpu.memory_space<vmem>>, vector<1x16xf32>
    %65 = vector.broadcast %64 : vector<1x16xf32> to vector<64x16xf32>
    %66 = arith.addf %63, %65 : vector<64x16xf32>
    %cst_61 = arith.constant 5.000000e-01 : f32
    %67 = vector.broadcast %cst_61 : f32 to vector<64x16xf32>
    %68 = arith.mulf %67, %66 : vector<64x16xf32>
    %cst_62 = arith.constant 0.707106769 : f32
    %69 = vector.broadcast %cst_62 : f32 to vector<64x16xf32>
    %70 = arith.mulf %66, %69 : vector<64x16xf32>
    %71 = math.erf %70 : vector<64x16xf32>
    %cst_63 = arith.constant 1.000000e+00 : f32
    %72 = vector.broadcast %cst_63 : f32 to vector<64x16xf32>
    %73 = arith.addf %72, %71 : vector<64x16xf32>
    %74 = arith.mulf %68, %73 : vector<64x16xf32>
    %75 = vector.shape_cast %74 : vector<64x16xf32> to vector<8x8x16xf32>
    %76 = arith.truncf %75 : vector<8x8x16xf32> to vector<8x8x16xbf16>
    %c0_64 = arith.constant 0 : index
    %c0_65 = arith.constant 0 : index
    %c0_66 = arith.constant 0 : index
    %c0_67 = arith.constant 0 : index
    %77 = vector.load %arg5[%c0_64, %c0_65, %c0_66, %c0_67] : memref<1x8x8x16xbf16, #tpu.memory_space<vmem>>, vector<1x8x8x16xbf16>
    %78 = vector.shape_cast %77 : vector<1x8x8x16xbf16> to vector<8x8x16xbf16>
    %79 = vector.shape_cast %76 : vector<8x8x16xbf16> to vector<1x8x8x16xbf16>
    tpu.vector_store %arg5[%c0_64, %c0_65, %c0_66, %c0_67], %79 {strides = array<i32>} : memref<1x8x8x16xbf16, #tpu.memory_space<vmem>>, vector<1x8x8x16xbf16>,
    return
  }
  func.func @transform_0(%arg0: i32, %arg1: i32) -> (i32, i32, i32, i32) {
    %c0_i32 = arith.constant 0 : i32
    %c0_i32_0 = arith.constant 0 : i32
    %c0_i32_1 = arith.constant 0 : i32
    %c0_i32_2 = arith.constant 0 : i32
    return %arg0, %c0_i32, %c0_i32_0, %c0_i32_1 : i32, i32, i32, i32
  }
  func.func @transform_1(%arg0: i32, %arg1: i32) -> (i32, i32, i32) {
    %c0_i32 = arith.constant 0 : i32
    %c0_i32_0 = arith.constant 0 : i32
    %c0_i32_1 = arith.constant 0 : i32
    return %c0_i32, %c0_i32_0, %arg1 : i32, i32, i32
  }
  func.func @transform_2(%arg0: i32, %arg1: i32) -> (i32, i32) {
    %c0_i32 = arith.constant 0 : i32
    %c0_i32_0 = arith.constant 0 : i32
    return %c0_i32, %arg1 : i32, i32
  }
  func.func @transform_3(%arg0: i32, %arg1: i32) -> (i32, i32, i32, i32) {
    %c0_i32 = arith.constant 0 : i32
    %c0_i32_0 = arith.constant 0 : i32
    %c0_i32_1 = arith.constant 0 : i32
    return %arg0, %c0_i32, %c0_i32_0, %arg1 : i32, i32, i32, i32
  }
}

module attributes {stable_mosaic.version = 11 : i64} {
  func.func @_fused_conv_kernel(%arg0: i32, %arg1: i32, %arg2: memref<1x10x10x16xbf16, #tpu.memory_space<vmem>>, %arg3: memref<9x16x16xbf16, #tpu.memory_space<vmem>>, %arg4: memref<1x16xf32, #tpu.memory_space<vmem>>, %arg5: memref<1x8x8x8xbf16, #tpu.memory_space<vmem>>, %arg6: memref<8x16xbf16, #tpu.memory_space<vmem>>, %arg7: memref<1x16xf32, #tpu.memory_space<vmem>>, %arg8: memref<1x8x8x16xf32, #tpu.memory_space<vmem>>) attributes {dimension_semantics = [#tpu.dimension_semantics<parallel>, #tpu.dimension_semantics<parallel>], iteration_bounds = array<i64: 2, 1>, scalar_prefetch = 0 : i64, scratch_operands = 0 : i64, tpu.core_type = #tpu.core_type<tc>, window_params = [{transform_indices = @transform_0, window_bounds = array<i64: 1, 10, 10, 16>}, {transform_indices = @transform_1, window_bounds = array<i64: 9, 16, 16>}, {transform_indices = @transform_2, window_bounds = array<i64: 1, 16>}, {transform_indices = @transform_3, window_bounds = array<i64: 1, 8, 8, 8>}, {transform_indices = @transform_4, window_bounds = array<i64: 8, 16>}, {transform_indices = @transform_5, window_bounds = array<i64: 1, 16>}, {transform_indices = @transform_6, window_bounds = array<i64: 1, 8, 8, 16>}]} {
    %cst = arith.constant 0.000000e+00 : f32
    %0 = vector.broadcast %cst : f32 to vector<64x16xf32>
    %c0 = arith.constant 0 : index
    %c0_0 = arith.constant 0 : index
    %c0_1 = arith.constant 0 : index
    %c0_2 = arith.constant 0 : index
    %1 = vector.load %arg2[%c0, %c0_0, %c0_1, %c0_2] : memref<1x10x10x16xbf16, #tpu.memory_space<vmem>>, vector<1x8x8x16xbf16>
    %2 = vector.shape_cast %1 : vector<1x8x8x16xbf16> to vector<8x8x16xbf16>
    %3 = vector.shape_cast %2 : vector<8x8x16xbf16> to vector<64x16xbf16>
    %c0_3 = arith.constant 0 : index
    %c0_4 = arith.constant 0 : index
    %c0_5 = arith.constant 0 : index
    %4 = vector.load %arg3[%c0_3, %c0_4, %c0_5] : memref<9x16x16xbf16, #tpu.memory_space<vmem>>, vector<1x16x16xbf16>
    %5 = vector.shape_cast %4 : vector<1x16x16xbf16> to vector<16x16xbf16>
    %cst_6 = arith.constant dense<0.000000e+00> : vector<64x16xf32>
    %6 = tpu.matmul %3, %5, %cst_6 {dimension_numbers = #tpu.dot_dimension_numbers<[1], [0], [0], [1], [0, 0, 1, 1], [], []>} : vector<64x16xbf16>, vector<16x16xbf16>, vector<64x16xf32> -> vector<64x16xf32>
    %7 = arith.addf %0, %6 : vector<64x16xf32>
    %c0_7 = arith.constant 0 : index
    %c0_8 = arith.constant 0 : index
    %c1 = arith.constant 1 : index
    %c0_9 = arith.constant 0 : index
    %8 = vector.load %arg2[%c0_7, %c0_8, %c1, %c0_9] : memref<1x10x10x16xbf16, #tpu.memory_space<vmem>>, vector<1x8x8x16xbf16>
    %9 = vector.shape_cast %8 : vector<1x8x8x16xbf16> to vector<8x8x16xbf16>
    %10 = vector.shape_cast %9 : vector<8x8x16xbf16> to vector<64x16xbf16>
    %c1_10 = arith.constant 1 : index
    %c0_11 = arith.constant 0 : index
    %c0_12 = arith.constant 0 : index
    %11 = vector.load %arg3[%c1_10, %c0_11, %c0_12] : memref<9x16x16xbf16, #tpu.memory_space<vmem>>, vector<1x16x16xbf16>
    %12 = vector.shape_cast %11 : vector<1x16x16xbf16> to vector<16x16xbf16>
    %cst_13 = arith.constant dense<0.000000e+00> : vector<64x16xf32>
    %13 = tpu.matmul %10, %12, %cst_13 {dimension_numbers = #tpu.dot_dimension_numbers<[1], [0], [0], [1], [0, 0, 1, 1], [], []>} : vector<64x16xbf16>, vector<16x16xbf16>, vector<64x16xf32> -> vector<64x16xf32>
    %14 = arith.addf %7, %13 : vector<64x16xf32>
    %c0_14 = arith.constant 0 : index
    %c0_15 = arith.constant 0 : index
    %c2 = arith.constant 2 : index
    %c0_16 = arith.constant 0 : index
    %15 = vector.load %arg2[%c0_14, %c0_15, %c2, %c0_16] : memref<1x10x10x16xbf16, #tpu.memory_space<vmem>>, vector<1x8x8x16xbf16>
    %16 = vector.shape_cast %15 : vector<1x8x8x16xbf16> to vector<8x8x16xbf16>
    %17 = vector.shape_cast %16 : vector<8x8x16xbf16> to vector<64x16xbf16>
    %c2_17 = arith.constant 2 : index
    %c0_18 = arith.constant 0 : index
    %c0_19 = arith.constant 0 : index
    %18 = vector.load %arg3[%c2_17, %c0_18, %c0_19] : memref<9x16x16xbf16, #tpu.memory_space<vmem>>, vector<1x16x16xbf16>
    %19 = vector.shape_cast %18 : vector<1x16x16xbf16> to vector<16x16xbf16>
    %cst_20 = arith.constant dense<0.000000e+00> : vector<64x16xf32>
    %20 = tpu.matmul %17, %19, %cst_20 {dimension_numbers = #tpu.dot_dimension_numbers<[1], [0], [0], [1], [0, 0, 1, 1], [], []>} : vector<64x16xbf16>, vector<16x16xbf16>, vector<64x16xf32> -> vector<64x16xf32>
    %21 = arith.addf %14, %20 : vector<64x16xf32>
    %c0_21 = arith.constant 0 : index
    %c1_22 = arith.constant 1 : index
    %c0_23 = arith.constant 0 : index
    %c0_24 = arith.constant 0 : index
    %22 = vector.load %arg2[%c0_21, %c1_22, %c0_23, %c0_24] : memref<1x10x10x16xbf16, #tpu.memory_space<vmem>>, vector<1x8x8x16xbf16>
    %23 = vector.shape_cast %22 : vector<1x8x8x16xbf16> to vector<8x8x16xbf16>
    %24 = vector.shape_cast %23 : vector<8x8x16xbf16> to vector<64x16xbf16>
    %c3 = arith.constant 3 : index
    %c0_25 = arith.constant 0 : index
    %c0_26 = arith.constant 0 : index
    %25 = vector.load %arg3[%c3, %c0_25, %c0_26] : memref<9x16x16xbf16, #tpu.memory_space<vmem>>, vector<1x16x16xbf16>
    %26 = vector.shape_cast %25 : vector<1x16x16xbf16> to vector<16x16xbf16>
    %cst_27 = arith.constant dense<0.000000e+00> : vector<64x16xf32>
    %27 = tpu.matmul %24, %26, %cst_27 {dimension_numbers = #tpu.dot_dimension_numbers<[1], [0], [0], [1], [0, 0, 1, 1], [], []>} : vector<64x16xbf16>, vector<16x16xbf16>, vector<64x16xf32> -> vector<64x16xf32>
    %28 = arith.addf %21, %27 : vector<64x16xf32>
    %c0_28 = arith.constant 0 : index
    %c1_29 = arith.constant 1 : index
    %c1_30 = arith.constant 1 : index
    %c0_31 = arith.constant 0 : index
    %29 = vector.load %arg2[%c0_28, %c1_29, %c1_30, %c0_31] : memref<1x10x10x16xbf16, #tpu.memory_space<vmem>>, vector<1x8x8x16xbf16>
    %30 = vector.shape_cast %29 : vector<1x8x8x16xbf16> to vector<8x8x16xbf16>
    %31 = vector.shape_cast %30 : vector<8x8x16xbf16> to vector<64x16xbf16>
    %c4 = arith.constant 4 : index
    %c0_32 = arith.constant 0 : index
    %c0_33 = arith.constant 0 : index
    %32 = vector.load %arg3[%c4, %c0_32, %c0_33] : memref<9x16x16xbf16, #tpu.memory_space<vmem>>, vector<1x16x16xbf16>
    %33 = vector.shape_cast %32 : vector<1x16x16xbf16> to vector<16x16xbf16>
    %cst_34 = arith.constant dense<0.000000e+00> : vector<64x16xf32>
    %34 = tpu.matmul %31, %33, %cst_34 {dimension_numbers = #tpu.dot_dimension_numbers<[1], [0], [0], [1], [0, 0, 1, 1], [], []>} : vector<64x16xbf16>, vector<16x16xbf16>, vector<64x16xf32> -> vector<64x16xf32>
    %35 = arith.addf %28, %34 : vector<64x16xf32>
    %c0_35 = arith.constant 0 : index
    %c1_36 = arith.constant 1 : index
    %c2_37 = arith.constant 2 : index
    %c0_38 = arith.constant 0 : index
    %36 = vector.load %arg2[%c0_35, %c1_36, %c2_37, %c0_38] : memref<1x10x10x16xbf16, #tpu.memory_space<vmem>>, vector<1x8x8x16xbf16>
    %37 = vector.shape_cast %36 : vector<1x8x8x16xbf16> to vector<8x8x16xbf16>
    %38 = vector.shape_cast %37 : vector<8x8x16xbf16> to vector<64x16xbf16>
    %c5 = arith.constant 5 : index
    %c0_39 = arith.constant 0 : index
    %c0_40 = arith.constant 0 : index
    %39 = vector.load %arg3[%c5, %c0_39, %c0_40] : memref<9x16x16xbf16, #tpu.memory_space<vmem>>, vector<1x16x16xbf16>
    %40 = vector.shape_cast %39 : vector<1x16x16xbf16> to vector<16x16xbf16>
    %cst_41 = arith.constant dense<0.000000e+00> : vector<64x16xf32>
    %41 = tpu.matmul %38, %40, %cst_41 {dimension_numbers = #tpu.dot_dimension_numbers<[1], [0], [0], [1], [0, 0, 1, 1], [], []>} : vector<64x16xbf16>, vector<16x16xbf16>, vector<64x16xf32> -> vector<64x16xf32>
    %42 = arith.addf %35, %41 : vector<64x16xf32>
    %c0_42 = arith.constant 0 : index
    %c2_43 = arith.constant 2 : index
    %c0_44 = arith.constant 0 : index
    %c0_45 = arith.constant 0 : index
    %43 = vector.load %arg2[%c0_42, %c2_43, %c0_44, %c0_45] : memref<1x10x10x16xbf16, #tpu.memory_space<vmem>>, vector<1x8x8x16xbf16>
    %44 = vector.shape_cast %43 : vector<1x8x8x16xbf16> to vector<8x8x16xbf16>
    %45 = vector.shape_cast %44 : vector<8x8x16xbf16> to vector<64x16xbf16>
    %c6 = arith.constant 6 : index
    %c0_46 = arith.constant 0 : index
    %c0_47 = arith.constant 0 : index
    %46 = vector.load %arg3[%c6, %c0_46, %c0_47] : memref<9x16x16xbf16, #tpu.memory_space<vmem>>, vector<1x16x16xbf16>
    %47 = vector.shape_cast %46 : vector<1x16x16xbf16> to vector<16x16xbf16>
    %cst_48 = arith.constant dense<0.000000e+00> : vector<64x16xf32>
    %48 = tpu.matmul %45, %47, %cst_48 {dimension_numbers = #tpu.dot_dimension_numbers<[1], [0], [0], [1], [0, 0, 1, 1], [], []>} : vector<64x16xbf16>, vector<16x16xbf16>, vector<64x16xf32> -> vector<64x16xf32>
    %49 = arith.addf %42, %48 : vector<64x16xf32>
    %c0_49 = arith.constant 0 : index
    %c2_50 = arith.constant 2 : index
    %c1_51 = arith.constant 1 : index
    %c0_52 = arith.constant 0 : index
    %50 = vector.load %arg2[%c0_49, %c2_50, %c1_51, %c0_52] : memref<1x10x10x16xbf16, #tpu.memory_space<vmem>>, vector<1x8x8x16xbf16>
    %51 = vector.shape_cast %50 : vector<1x8x8x16xbf16> to vector<8x8x16xbf16>
    %52 = vector.shape_cast %51 : vector<8x8x16xbf16> to vector<64x16xbf16>
    %c7 = arith.constant 7 : index
    %c0_53 = arith.constant 0 : index
    %c0_54 = arith.constant 0 : index
    %53 = vector.load %arg3[%c7, %c0_53, %c0_54] : memref<9x16x16xbf16, #tpu.memory_space<vmem>>, vector<1x16x16xbf16>
    %54 = vector.shape_cast %53 : vector<1x16x16xbf16> to vector<16x16xbf16>
    %cst_55 = arith.constant dense<0.000000e+00> : vector<64x16xf32>
    %55 = tpu.matmul %52, %54, %cst_55 {dimension_numbers = #tpu.dot_dimension_numbers<[1], [0], [0], [1], [0, 0, 1, 1], [], []>} : vector<64x16xbf16>, vector<16x16xbf16>, vector<64x16xf32> -> vector<64x16xf32>
    %56 = arith.addf %49, %55 : vector<64x16xf32>
    %c0_56 = arith.constant 0 : index
    %c2_57 = arith.constant 2 : index
    %c2_58 = arith.constant 2 : index
    %c0_59 = arith.constant 0 : index
    %57 = vector.load %arg2[%c0_56, %c2_57, %c2_58, %c0_59] : memref<1x10x10x16xbf16, #tpu.memory_space<vmem>>, vector<1x8x8x16xbf16>
    %58 = vector.shape_cast %57 : vector<1x8x8x16xbf16> to vector<8x8x16xbf16>
    %59 = vector.shape_cast %58 : vector<8x8x16xbf16> to vector<64x16xbf16>
    %c8 = arith.constant 8 : index
    %c0_60 = arith.constant 0 : index
    %c0_61 = arith.constant 0 : index
    %60 = vector.load %arg3[%c8, %c0_60, %c0_61] : memref<9x16x16xbf16, #tpu.memory_space<vmem>>, vector<1x16x16xbf16>
    %61 = vector.shape_cast %60 : vector<1x16x16xbf16> to vector<16x16xbf16>
    %cst_62 = arith.constant dense<0.000000e+00> : vector<64x16xf32>
    %62 = tpu.matmul %59, %61, %cst_62 {dimension_numbers = #tpu.dot_dimension_numbers<[1], [0], [0], [1], [0, 0, 1, 1], [], []>} : vector<64x16xbf16>, vector<16x16xbf16>, vector<64x16xf32> -> vector<64x16xf32>
    %63 = arith.addf %56, %62 : vector<64x16xf32>
    %c0_63 = arith.constant 0 : index
    %c0_64 = arith.constant 0 : index
    %64 = vector.load %arg4[%c0_63, %c0_64] : memref<1x16xf32, #tpu.memory_space<vmem>>, vector<1x16xf32>
    %65 = vector.broadcast %64 : vector<1x16xf32> to vector<64x16xf32>
    %66 = arith.addf %63, %65 : vector<64x16xf32>
    %c0_65 = arith.constant 0 : index
    %c0_66 = arith.constant 0 : index
    %c0_67 = arith.constant 0 : index
    %c0_68 = arith.constant 0 : index
    %67 = vector.load %arg5[%c0_65, %c0_66, %c0_67, %c0_68] : memref<1x8x8x8xbf16, #tpu.memory_space<vmem>>, vector<1x8x8x8xbf16>
    %68 = vector.shape_cast %67 : vector<1x8x8x8xbf16> to vector<8x8x8xbf16>
    %69 = vector.shape_cast %68 : vector<8x8x8xbf16> to vector<64x8xbf16>
    %c0_69 = arith.constant 0 : index
    %c0_70 = arith.constant 0 : index
    %70 = vector.load %arg6[%c0_69, %c0_70] : memref<8x16xbf16, #tpu.memory_space<vmem>>, vector<8x16xbf16>
    %cst_71 = arith.constant dense<0.000000e+00> : vector<64x16xf32>
    %71 = tpu.matmul %69, %70, %cst_71 {dimension_numbers = #tpu.dot_dimension_numbers<[1], [0], [0], [1], [0, 0, 1, 1], [], []>} : vector<64x8xbf16>, vector<8x16xbf16>, vector<64x16xf32> -> vector<64x16xf32>
    %c0_72 = arith.constant 0 : index
    %c0_73 = arith.constant 0 : index
    %72 = vector.load %arg7[%c0_72, %c0_73] : memref<1x16xf32, #tpu.memory_space<vmem>>, vector<1x16xf32>
    %73 = vector.broadcast %72 : vector<1x16xf32> to vector<64x16xf32>
    %74 = arith.addf %71, %73 : vector<64x16xf32>
    %75 = arith.addf %66, %74 : vector<64x16xf32>
    %cst_74 = arith.constant 5.000000e-01 : f32
    %76 = vector.broadcast %cst_74 : f32 to vector<64x16xf32>
    %77 = arith.mulf %76, %75 : vector<64x16xf32>
    %cst_75 = arith.constant 0.707106769 : f32
    %78 = vector.broadcast %cst_75 : f32 to vector<64x16xf32>
    %79 = arith.mulf %75, %78 : vector<64x16xf32>
    %80 = math.erf %79 : vector<64x16xf32>
    %cst_76 = arith.constant 1.000000e+00 : f32
    %81 = vector.broadcast %cst_76 : f32 to vector<64x16xf32>
    %82 = arith.addf %81, %80 : vector<64x16xf32>
    %83 = arith.mulf %77, %82 : vector<64x16xf32>
    %84 = vector.shape_cast %83 : vector<64x16xf32> to vector<8x8x16xf32>
    %c0_77 = arith.constant 0 : index
    %c0_78 = arith.constant 0 : index
    %c0_79 = arith.constant 0 : index
    %c0_80 = arith.constant 0 : index
    %85 = vector.load %arg8[%c0_77, %c0_78, %c0_79, %c0_80] : memref<1x8x8x16xf32, #tpu.memory_space<vmem>>, vector<1x8x8x16xf32>
    %86 = vector.shape_cast %85 : vector<1x8x8x16xf32> to vector<8x8x16xf32>
    %87 = vector.shape_cast %84 : vector<8x8x16xf32> to vector<1x8x8x16xf32>
    tpu.vector_store %arg8[%c0_77, %c0_78, %c0_79, %c0_80], %87 {strides = array<i32>} : memref<1x8x8x16xf32, #tpu.memory_space<vmem>>, vector<1x8x8x16xf32>,
    return
  }
  func.func @transform_0(%arg0: i32, %arg1: i32) -> (i32, i32, i32, i32) {
    %c0_i32 = arith.constant 0 : i32
    %c0_i32_0 = arith.constant 0 : i32
    %c0_i32_1 = arith.constant 0 : i32
    %c0_i32_2 = arith.constant 0 : i32
    return %arg0, %c0_i32, %c0_i32_0, %c0_i32_1 : i32, i32, i32, i32
  }
  func.func @transform_1(%arg0: i32, %arg1: i32) -> (i32, i32, i32) {
    %c0_i32 = arith.constant 0 : i32
    %c0_i32_0 = arith.constant 0 : i32
    %c0_i32_1 = arith.constant 0 : i32
    return %c0_i32, %c0_i32_0, %arg1 : i32, i32, i32
  }
  func.func @transform_2(%arg0: i32, %arg1: i32) -> (i32, i32) {
    %c0_i32 = arith.constant 0 : i32
    %c0_i32_0 = arith.constant 0 : i32
    return %c0_i32, %arg1 : i32, i32
  }
  func.func @transform_3(%arg0: i32, %arg1: i32) -> (i32, i32, i32, i32) {
    %c0_i32 = arith.constant 0 : i32
    %c0_i32_0 = arith.constant 0 : i32
    %c0_i32_1 = arith.constant 0 : i32
    %c0_i32_2 = arith.constant 0 : i32
    return %arg0, %c0_i32, %c0_i32_0, %c0_i32_1 : i32, i32, i32, i32
  }
  func.func @transform_4(%arg0: i32, %arg1: i32) -> (i32, i32) {
    %c0_i32 = arith.constant 0 : i32
    %c0_i32_0 = arith.constant 0 : i32
    return %c0_i32, %arg1 : i32, i32
  }
  func.func @transform_5(%arg0: i32, %arg1: i32) -> (i32, i32) {
    %c0_i32 = arith.constant 0 : i32
    %c0_i32_0 = arith.constant 0 : i32
    return %c0_i32, %arg1 : i32, i32
  }
  func.func @transform_6(%arg0: i32, %arg1: i32) -> (i32, i32, i32, i32) {
    %c0_i32 = arith.constant 0 : i32
    %c0_i32_0 = arith.constant 0 : i32
    %c0_i32_1 = arith.constant 0 : i32
    return %arg0, %c0_i32, %c0_i32_0, %arg1 : i32, i32, i32, i32
  }
}

module attributes {stable_mosaic.version = 11 : i64} {
  func.func @_fused_conv_kernel(%arg0: i32, %arg1: i32, %arg2: memref<1x10x10x16xbf16, #tpu.memory_space<vmem>>, %arg3: memref<9x16x16xbf16, #tpu.memory_space<vmem>>, %arg4: memref<1x16xf32, #tpu.memory_space<vmem>>, %arg5: memref<1x8x8x16xf32, #tpu.memory_space<vmem>>, %arg6: memref<1x8x8x16xf32, #tpu.memory_space<vmem>>) attributes {dimension_semantics = [#tpu.dimension_semantics<parallel>, #tpu.dimension_semantics<parallel>], iteration_bounds = array<i64: 2, 1>, scalar_prefetch = 0 : i64, scratch_operands = 0 : i64, tpu.core_type = #tpu.core_type<tc>, window_params = [{transform_indices = @transform_0, window_bounds = array<i64: 1, 10, 10, 16>}, {transform_indices = @transform_1, window_bounds = array<i64: 9, 16, 16>}, {transform_indices = @transform_2, window_bounds = array<i64: 1, 16>}, {transform_indices = @transform_3, window_bounds = array<i64: 1, 8, 8, 16>}, {transform_indices = @transform_4, window_bounds = array<i64: 1, 8, 8, 16>}]} {
    %cst = arith.constant 0.000000e+00 : f32
    %0 = vector.broadcast %cst : f32 to vector<64x16xf32>
    %c0 = arith.constant 0 : index
    %c0_0 = arith.constant 0 : index
    %c0_1 = arith.constant 0 : index
    %c0_2 = arith.constant 0 : index
    %1 = vector.load %arg2[%c0, %c0_0, %c0_1, %c0_2] : memref<1x10x10x16xbf16, #tpu.memory_space<vmem>>, vector<1x8x8x16xbf16>
    %2 = vector.shape_cast %1 : vector<1x8x8x16xbf16> to vector<8x8x16xbf16>
    %3 = vector.shape_cast %2 : vector<8x8x16xbf16> to vector<64x16xbf16>
    %c0_3 = arith.constant 0 : index
    %c0_4 = arith.constant 0 : index
    %c0_5 = arith.constant 0 : index
    %4 = vector.load %arg3[%c0_3, %c0_4, %c0_5] : memref<9x16x16xbf16, #tpu.memory_space<vmem>>, vector<1x16x16xbf16>
    %5 = vector.shape_cast %4 : vector<1x16x16xbf16> to vector<16x16xbf16>
    %cst_6 = arith.constant dense<0.000000e+00> : vector<64x16xf32>
    %6 = tpu.matmul %3, %5, %cst_6 {dimension_numbers = #tpu.dot_dimension_numbers<[1], [0], [0], [1], [0, 0, 1, 1], [], []>} : vector<64x16xbf16>, vector<16x16xbf16>, vector<64x16xf32> -> vector<64x16xf32>
    %7 = arith.addf %0, %6 : vector<64x16xf32>
    %c0_7 = arith.constant 0 : index
    %c0_8 = arith.constant 0 : index
    %c1 = arith.constant 1 : index
    %c0_9 = arith.constant 0 : index
    %8 = vector.load %arg2[%c0_7, %c0_8, %c1, %c0_9] : memref<1x10x10x16xbf16, #tpu.memory_space<vmem>>, vector<1x8x8x16xbf16>
    %9 = vector.shape_cast %8 : vector<1x8x8x16xbf16> to vector<8x8x16xbf16>
    %10 = vector.shape_cast %9 : vector<8x8x16xbf16> to vector<64x16xbf16>
    %c1_10 = arith.constant 1 : index
    %c0_11 = arith.constant 0 : index
    %c0_12 = arith.constant 0 : index
    %11 = vector.load %arg3[%c1_10, %c0_11, %c0_12] : memref<9x16x16xbf16, #tpu.memory_space<vmem>>, vector<1x16x16xbf16>
    %12 = vector.shape_cast %11 : vector<1x16x16xbf16> to vector<16x16xbf16>
    %cst_13 = arith.constant dense<0.000000e+00> : vector<64x16xf32>
    %13 = tpu.matmul %10, %12, %cst_13 {dimension_numbers = #tpu.dot_dimension_numbers<[1], [0], [0], [1], [0, 0, 1, 1], [], []>} : vector<64x16xbf16>, vector<16x16xbf16>, vector<64x16xf32> -> vector<64x16xf32>
    %14 = arith.addf %7, %13 : vector<64x16xf32>
    %c0_14 = arith.constant 0 : index
    %c0_15 = arith.constant 0 : index
    %c2 = arith.constant 2 : index
    %c0_16 = arith.constant 0 : index
    %15 = vector.load %arg2[%c0_14, %c0_15, %c2, %c0_16] : memref<1x10x10x16xbf16, #tpu.memory_space<vmem>>, vector<1x8x8x16xbf16>
    %16 = vector.shape_cast %15 : vector<1x8x8x16xbf16> to vector<8x8x16xbf16>
    %17 = vector.shape_cast %16 : vector<8x8x16xbf16> to vector<64x16xbf16>
    %c2_17 = arith.constant 2 : index
    %c0_18 = arith.constant 0 : index
    %c0_19 = arith.constant 0 : index
    %18 = vector.load %arg3[%c2_17, %c0_18, %c0_19] : memref<9x16x16xbf16, #tpu.memory_space<vmem>>, vector<1x16x16xbf16>
    %19 = vector.shape_cast %18 : vector<1x16x16xbf16> to vector<16x16xbf16>
    %cst_20 = arith.constant dense<0.000000e+00> : vector<64x16xf32>
    %20 = tpu.matmul %17, %19, %cst_20 {dimension_numbers = #tpu.dot_dimension_numbers<[1], [0], [0], [1], [0, 0, 1, 1], [], []>} : vector<64x16xbf16>, vector<16x16xbf16>, vector<64x16xf32> -> vector<64x16xf32>
    %21 = arith.addf %14, %20 : vector<64x16xf32>
    %c0_21 = arith.constant 0 : index
    %c1_22 = arith.constant 1 : index
    %c0_23 = arith.constant 0 : index
    %c0_24 = arith.constant 0 : index
    %22 = vector.load %arg2[%c0_21, %c1_22, %c0_23, %c0_24] : memref<1x10x10x16xbf16, #tpu.memory_space<vmem>>, vector<1x8x8x16xbf16>
    %23 = vector.shape_cast %22 : vector<1x8x8x16xbf16> to vector<8x8x16xbf16>
    %24 = vector.shape_cast %23 : vector<8x8x16xbf16> to vector<64x16xbf16>
    %c3 = arith.constant 3 : index
    %c0_25 = arith.constant 0 : index
    %c0_26 = arith.constant 0 : index
    %25 = vector.load %arg3[%c3, %c0_25, %c0_26] : memref<9x16x16xbf16, #tpu.memory_space<vmem>>, vector<1x16x16xbf16>
    %26 = vector.shape_cast %25 : vector<1x16x16xbf16> to vector<16x16xbf16>
    %cst_27 = arith.constant dense<0.000000e+00> : vector<64x16xf32>
    %27 = tpu.matmul %24, %26, %cst_27 {dimension_numbers = #tpu.dot_dimension_numbers<[1], [0], [0], [1], [0, 0, 1, 1], [], []>} : vector<64x16xbf16>, vector<16x16xbf16>, vector<64x16xf32> -> vector<64x16xf32>
    %28 = arith.addf %21, %27 : vector<64x16xf32>
    %c0_28 = arith.constant 0 : index
    %c1_29 = arith.constant 1 : index
    %c1_30 = arith.constant 1 : index
    %c0_31 = arith.constant 0 : index
    %29 = vector.load %arg2[%c0_28, %c1_29, %c1_30, %c0_31] : memref<1x10x10x16xbf16, #tpu.memory_space<vmem>>, vector<1x8x8x16xbf16>
    %30 = vector.shape_cast %29 : vector<1x8x8x16xbf16> to vector<8x8x16xbf16>
    %31 = vector.shape_cast %30 : vector<8x8x16xbf16> to vector<64x16xbf16>
    %c4 = arith.constant 4 : index
    %c0_32 = arith.constant 0 : index
    %c0_33 = arith.constant 0 : index
    %32 = vector.load %arg3[%c4, %c0_32, %c0_33] : memref<9x16x16xbf16, #tpu.memory_space<vmem>>, vector<1x16x16xbf16>
    %33 = vector.shape_cast %32 : vector<1x16x16xbf16> to vector<16x16xbf16>
    %cst_34 = arith.constant dense<0.000000e+00> : vector<64x16xf32>
    %34 = tpu.matmul %31, %33, %cst_34 {dimension_numbers = #tpu.dot_dimension_numbers<[1], [0], [0], [1], [0, 0, 1, 1], [], []>} : vector<64x16xbf16>, vector<16x16xbf16>, vector<64x16xf32> -> vector<64x16xf32>
    %35 = arith.addf %28, %34 : vector<64x16xf32>
    %c0_35 = arith.constant 0 : index
    %c1_36 = arith.constant 1 : index
    %c2_37 = arith.constant 2 : index
    %c0_38 = arith.constant 0 : index
    %36 = vector.load %arg2[%c0_35, %c1_36, %c2_37, %c0_38] : memref<1x10x10x16xbf16, #tpu.memory_space<vmem>>, vector<1x8x8x16xbf16>
    %37 = vector.shape_cast %36 : vector<1x8x8x16xbf16> to vector<8x8x16xbf16>
    %38 = vector.shape_cast %37 : vector<8x8x16xbf16> to vector<64x16xbf16>
    %c5 = arith.constant 5 : index
    %c0_39 = arith.constant 0 : index
    %c0_40 = arith.constant 0 : index
    %39 = vector.load %arg3[%c5, %c0_39, %c0_40] : memref<9x16x16xbf16, #tpu.memory_space<vmem>>, vector<1x16x16xbf16>
    %40 = vector.shape_cast %39 : vector<1x16x16xbf16> to vector<16x16xbf16>
    %cst_41 = arith.constant dense<0.000000e+00> : vector<64x16xf32>
    %41 = tpu.matmul %38, %40, %cst_41 {dimension_numbers = #tpu.dot_dimension_numbers<[1], [0], [0], [1], [0, 0, 1, 1], [], []>} : vector<64x16xbf16>, vector<16x16xbf16>, vector<64x16xf32> -> vector<64x16xf32>
    %42 = arith.addf %35, %41 : vector<64x16xf32>
    %c0_42 = arith.constant 0 : index
    %c2_43 = arith.constant 2 : index
    %c0_44 = arith.constant 0 : index
    %c0_45 = arith.constant 0 : index
    %43 = vector.load %arg2[%c0_42, %c2_43, %c0_44, %c0_45] : memref<1x10x10x16xbf16, #tpu.memory_space<vmem>>, vector<1x8x8x16xbf16>
    %44 = vector.shape_cast %43 : vector<1x8x8x16xbf16> to vector<8x8x16xbf16>
    %45 = vector.shape_cast %44 : vector<8x8x16xbf16> to vector<64x16xbf16>
    %c6 = arith.constant 6 : index
    %c0_46 = arith.constant 0 : index
    %c0_47 = arith.constant 0 : index
    %46 = vector.load %arg3[%c6, %c0_46, %c0_47] : memref<9x16x16xbf16, #tpu.memory_space<vmem>>, vector<1x16x16xbf16>
    %47 = vector.shape_cast %46 : vector<1x16x16xbf16> to vector<16x16xbf16>
    %cst_48 = arith.constant dense<0.000000e+00> : vector<64x16xf32>
    %48 = tpu.matmul %45, %47, %cst_48 {dimension_numbers = #tpu.dot_dimension_numbers<[1], [0], [0], [1], [0, 0, 1, 1], [], []>} : vector<64x16xbf16>, vector<16x16xbf16>, vector<64x16xf32> -> vector<64x16xf32>
    %49 = arith.addf %42, %48 : vector<64x16xf32>
    %c0_49 = arith.constant 0 : index
    %c2_50 = arith.constant 2 : index
    %c1_51 = arith.constant 1 : index
    %c0_52 = arith.constant 0 : index
    %50 = vector.load %arg2[%c0_49, %c2_50, %c1_51, %c0_52] : memref<1x10x10x16xbf16, #tpu.memory_space<vmem>>, vector<1x8x8x16xbf16>
    %51 = vector.shape_cast %50 : vector<1x8x8x16xbf16> to vector<8x8x16xbf16>
    %52 = vector.shape_cast %51 : vector<8x8x16xbf16> to vector<64x16xbf16>
    %c7 = arith.constant 7 : index
    %c0_53 = arith.constant 0 : index
    %c0_54 = arith.constant 0 : index
    %53 = vector.load %arg3[%c7, %c0_53, %c0_54] : memref<9x16x16xbf16, #tpu.memory_space<vmem>>, vector<1x16x16xbf16>
    %54 = vector.shape_cast %53 : vector<1x16x16xbf16> to vector<16x16xbf16>
    %cst_55 = arith.constant dense<0.000000e+00> : vector<64x16xf32>
    %55 = tpu.matmul %52, %54, %cst_55 {dimension_numbers = #tpu.dot_dimension_numbers<[1], [0], [0], [1], [0, 0, 1, 1], [], []>} : vector<64x16xbf16>, vector<16x16xbf16>, vector<64x16xf32> -> vector<64x16xf32>
    %56 = arith.addf %49, %55 : vector<64x16xf32>
    %c0_56 = arith.constant 0 : index
    %c2_57 = arith.constant 2 : index
    %c2_58 = arith.constant 2 : index
    %c0_59 = arith.constant 0 : index
    %57 = vector.load %arg2[%c0_56, %c2_57, %c2_58, %c0_59] : memref<1x10x10x16xbf16, #tpu.memory_space<vmem>>, vector<1x8x8x16xbf16>
    %58 = vector.shape_cast %57 : vector<1x8x8x16xbf16> to vector<8x8x16xbf16>
    %59 = vector.shape_cast %58 : vector<8x8x16xbf16> to vector<64x16xbf16>
    %c8 = arith.constant 8 : index
    %c0_60 = arith.constant 0 : index
    %c0_61 = arith.constant 0 : index
    %60 = vector.load %arg3[%c8, %c0_60, %c0_61] : memref<9x16x16xbf16, #tpu.memory_space<vmem>>, vector<1x16x16xbf16>
    %61 = vector.shape_cast %60 : vector<1x16x16xbf16> to vector<16x16xbf16>
    %cst_62 = arith.constant dense<0.000000e+00> : vector<64x16xf32>
    %62 = tpu.matmul %59, %61, %cst_62 {dimension_numbers = #tpu.dot_dimension_numbers<[1], [0], [0], [1], [0, 0, 1, 1], [], []>} : vector<64x16xbf16>, vector<16x16xbf16>, vector<64x16xf32> -> vector<64x16xf32>
    %63 = arith.addf %56, %62 : vector<64x16xf32>
    %c0_63 = arith.constant 0 : index
    %c0_64 = arith.constant 0 : index
    %64 = vector.load %arg4[%c0_63, %c0_64] : memref<1x16xf32, #tpu.memory_space<vmem>>, vector<1x16xf32>
    %65 = vector.broadcast %64 : vector<1x16xf32> to vector<64x16xf32>
    %66 = arith.addf %63, %65 : vector<64x16xf32>
    %c0_65 = arith.constant 0 : index
    %c0_66 = arith.constant 0 : index
    %c0_67 = arith.constant 0 : index
    %c0_68 = arith.constant 0 : index
    %67 = vector.load %arg5[%c0_65, %c0_66, %c0_67, %c0_68] : memref<1x8x8x16xf32, #tpu.memory_space<vmem>>, vector<1x8x8x16xf32>
    %68 = vector.shape_cast %67 : vector<1x8x8x16xf32> to vector<8x8x16xf32>
    %69 = vector.shape_cast %68 : vector<8x8x16xf32> to vector<64x16xf32>
    %70 = arith.addf %66, %69 : vector<64x16xf32>
    %cst_69 = arith.constant 5.000000e-01 : f32
    %71 = vector.broadcast %cst_69 : f32 to vector<64x16xf32>
    %72 = arith.mulf %71, %70 : vector<64x16xf32>
    %cst_70 = arith.constant 0.707106769 : f32
    %73 = vector.broadcast %cst_70 : f32 to vector<64x16xf32>
    %74 = arith.mulf %70, %73 : vector<64x16xf32>
    %75 = math.erf %74 : vector<64x16xf32>
    %cst_71 = arith.constant 1.000000e+00 : f32
    %76 = vector.broadcast %cst_71 : f32 to vector<64x16xf32>
    %77 = arith.addf %76, %75 : vector<64x16xf32>
    %78 = arith.mulf %72, %77 : vector<64x16xf32>
    %79 = vector.shape_cast %78 : vector<64x16xf32> to vector<8x8x16xf32>
    %c0_72 = arith.constant 0 : index
    %c0_73 = arith.constant 0 : index
    %c0_74 = arith.constant 0 : index
    %c0_75 = arith.constant 0 : index
    %80 = vector.load %arg6[%c0_72, %c0_73, %c0_74, %c0_75] : memref<1x8x8x16xf32, #tpu.memory_space<vmem>>, vector<1x8x8x16xf32>
    %81 = vector.shape_cast %80 : vector<1x8x8x16xf32> to vector<8x8x16xf32>
    %82 = vector.shape_cast %79 : vector<8x8x16xf32> to vector<1x8x8x16xf32>
    tpu.vector_store %arg6[%c0_72, %c0_73, %c0_74, %c0_75], %82 {strides = array<i32>} : memref<1x8x8x16xf32, #tpu.memory_space<vmem>>, vector<1x8x8x16xf32>,
    return
  }
  func.func @transform_0(%arg0: i32, %arg1: i32) -> (i32, i32, i32, i32) {
    %c0_i32 = arith.constant 0 : i32
    %c0_i32_0 = arith.constant 0 : i32
    %c0_i32_1 = arith.constant 0 : i32
    %c0_i32_2 = arith.constant 0 : i32
    return %arg0, %c0_i32, %c0_i32_0, %c0_i32_1 : i32, i32, i32, i32
  }
  func.func @transform_1(%arg0: i32, %arg1: i32) -> (i32, i32, i32) {
    %c0_i32 = arith.constant 0 : i32
    %c0_i32_0 = arith.constant 0 : i32
    %c0_i32_1 = arith.constant 0 : i32
    return %c0_i32, %c0_i32_0, %arg1 : i32, i32, i32
  }
  func.func @transform_2(%arg0: i32, %arg1: i32) -> (i32, i32) {
    %c0_i32 = arith.constant 0 : i32
    %c0_i32_0 = arith.constant 0 : i32
    return %c0_i32, %arg1 : i32, i32
  }
  func.func @transform_3(%arg0: i32, %arg1: i32) -> (i32, i32, i32, i32) {
    %c0_i32 = arith.constant 0 : i32
    %c0_i32_0 = arith.constant 0 : i32
    %c0_i32_1 = arith.constant 0 : i32
    return %arg0, %c0_i32, %c0_i32_0, %arg1 : i32, i32, i32, i32
  }
  func.func @transform_4(%arg0: i32, %arg1: i32) -> (i32, i32, i32, i32) {
    %c0_i32 = arith.constant 0 : i32
    %c0_i32_0 = arith.constant 0 : i32
    %c0_i32_1 = arith.constant 0 : i32
    return %arg0, %c0_i32, %c0_i32_0, %arg1 : i32, i32, i32, i32
  }
}

module attributes {stable_mosaic.version = 11 : i64} {
  func.func @_fused_conv_kernel(%arg0: i32, %arg1: i32, %arg2: memref<1x10x10x16xbf16, #tpu.memory_space<vmem>>, %arg3: memref<9x16x16xbf16, #tpu.memory_space<vmem>>, %arg4: memref<1x16xf32, #tpu.memory_space<vmem>>, %arg5: memref<1x8x8x16xbf16, #tpu.memory_space<vmem>>) attributes {dimension_semantics = [#tpu.dimension_semantics<parallel>, #tpu.dimension_semantics<parallel>], iteration_bounds = array<i64: 2, 1>, scalar_prefetch = 0 : i64, scratch_operands = 0 : i64, tpu.core_type = #tpu.core_type<tc>, window_params = [{transform_indices = @transform_0, window_bounds = array<i64: 1, 10, 10, 16>}, {transform_indices = @transform_1, window_bounds = array<i64: 9, 16, 16>}, {transform_indices = @transform_2, window_bounds = array<i64: 1, 16>}, {transform_indices = @transform_3, window_bounds = array<i64: 1, 8, 8, 16>}]} {
    %cst = arith.constant 0.000000e+00 : f32
    %0 = vector.broadcast %cst : f32 to vector<64x16xf32>
    %c0 = arith.constant 0 : index
    %c0_0 = arith.constant 0 : index
    %c0_1 = arith.constant 0 : index
    %c0_2 = arith.constant 0 : index
    %1 = vector.load %arg2[%c0, %c0_0, %c0_1, %c0_2] : memref<1x10x10x16xbf16, #tpu.memory_space<vmem>>, vector<1x8x8x16xbf16>
    %2 = vector.shape_cast %1 : vector<1x8x8x16xbf16> to vector<8x8x16xbf16>
    %3 = vector.shape_cast %2 : vector<8x8x16xbf16> to vector<64x16xbf16>
    %c0_3 = arith.constant 0 : index
    %c0_4 = arith.constant 0 : index
    %c0_5 = arith.constant 0 : index
    %4 = vector.load %arg3[%c0_3, %c0_4, %c0_5] : memref<9x16x16xbf16, #tpu.memory_space<vmem>>, vector<1x16x16xbf16>
    %5 = vector.shape_cast %4 : vector<1x16x16xbf16> to vector<16x16xbf16>
    %cst_6 = arith.constant dense<0.000000e+00> : vector<64x16xf32>
    %6 = tpu.matmul %3, %5, %cst_6 {dimension_numbers = #tpu.dot_dimension_numbers<[1], [0], [0], [1], [0, 0, 1, 1], [], []>} : vector<64x16xbf16>, vector<16x16xbf16>, vector<64x16xf32> -> vector<64x16xf32>
    %7 = arith.addf %0, %6 : vector<64x16xf32>
    %c0_7 = arith.constant 0 : index
    %c0_8 = arith.constant 0 : index
    %c1 = arith.constant 1 : index
    %c0_9 = arith.constant 0 : index
    %8 = vector.load %arg2[%c0_7, %c0_8, %c1, %c0_9] : memref<1x10x10x16xbf16, #tpu.memory_space<vmem>>, vector<1x8x8x16xbf16>
    %9 = vector.shape_cast %8 : vector<1x8x8x16xbf16> to vector<8x8x16xbf16>
    %10 = vector.shape_cast %9 : vector<8x8x16xbf16> to vector<64x16xbf16>
    %c1_10 = arith.constant 1 : index
    %c0_11 = arith.constant 0 : index
    %c0_12 = arith.constant 0 : index
    %11 = vector.load %arg3[%c1_10, %c0_11, %c0_12] : memref<9x16x16xbf16, #tpu.memory_space<vmem>>, vector<1x16x16xbf16>
    %12 = vector.shape_cast %11 : vector<1x16x16xbf16> to vector<16x16xbf16>
    %cst_13 = arith.constant dense<0.000000e+00> : vector<64x16xf32>
    %13 = tpu.matmul %10, %12, %cst_13 {dimension_numbers = #tpu.dot_dimension_numbers<[1], [0], [0], [1], [0, 0, 1, 1], [], []>} : vector<64x16xbf16>, vector<16x16xbf16>, vector<64x16xf32> -> vector<64x16xf32>
    %14 = arith.addf %7, %13 : vector<64x16xf32>
    %c0_14 = arith.constant 0 : index
    %c0_15 = arith.constant 0 : index
    %c2 = arith.constant 2 : index
    %c0_16 = arith.constant 0 : index
    %15 = vector.load %arg2[%c0_14, %c0_15, %c2, %c0_16] : memref<1x10x10x16xbf16, #tpu.memory_space<vmem>>, vector<1x8x8x16xbf16>
    %16 = vector.shape_cast %15 : vector<1x8x8x16xbf16> to vector<8x8x16xbf16>
    %17 = vector.shape_cast %16 : vector<8x8x16xbf16> to vector<64x16xbf16>
    %c2_17 = arith.constant 2 : index
    %c0_18 = arith.constant 0 : index
    %c0_19 = arith.constant 0 : index
    %18 = vector.load %arg3[%c2_17, %c0_18, %c0_19] : memref<9x16x16xbf16, #tpu.memory_space<vmem>>, vector<1x16x16xbf16>
    %19 = vector.shape_cast %18 : vector<1x16x16xbf16> to vector<16x16xbf16>
    %cst_20 = arith.constant dense<0.000000e+00> : vector<64x16xf32>
    %20 = tpu.matmul %17, %19, %cst_20 {dimension_numbers = #tpu.dot_dimension_numbers<[1], [0], [0], [1], [0, 0, 1, 1], [], []>} : vector<64x16xbf16>, vector<16x16xbf16>, vector<64x16xf32> -> vector<64x16xf32>
    %21 = arith.addf %14, %20 : vector<64x16xf32>
    %c0_21 = arith.constant 0 : index
    %c1_22 = arith.constant 1 : index
    %c0_23 = arith.constant 0 : index
    %c0_24 = arith.constant 0 : index
    %22 = vector.load %arg2[%c0_21, %c1_22, %c0_23, %c0_24] : memref<1x10x10x16xbf16, #tpu.memory_space<vmem>>, vector<1x8x8x16xbf16>
    %23 = vector.shape_cast %22 : vector<1x8x8x16xbf16> to vector<8x8x16xbf16>
    %24 = vector.shape_cast %23 : vector<8x8x16xbf16> to vector<64x16xbf16>
    %c3 = arith.constant 3 : index
    %c0_25 = arith.constant 0 : index
    %c0_26 = arith.constant 0 : index
    %25 = vector.load %arg3[%c3, %c0_25, %c0_26] : memref<9x16x16xbf16, #tpu.memory_space<vmem>>, vector<1x16x16xbf16>
    %26 = vector.shape_cast %25 : vector<1x16x16xbf16> to vector<16x16xbf16>
    %cst_27 = arith.constant dense<0.000000e+00> : vector<64x16xf32>
    %27 = tpu.matmul %24, %26, %cst_27 {dimension_numbers = #tpu.dot_dimension_numbers<[1], [0], [0], [1], [0, 0, 1, 1], [], []>} : vector<64x16xbf16>, vector<16x16xbf16>, vector<64x16xf32> -> vector<64x16xf32>
    %28 = arith.addf %21, %27 : vector<64x16xf32>
    %c0_28 = arith.constant 0 : index
    %c1_29 = arith.constant 1 : index
    %c1_30 = arith.constant 1 : index
    %c0_31 = arith.constant 0 : index
    %29 = vector.load %arg2[%c0_28, %c1_29, %c1_30, %c0_31] : memref<1x10x10x16xbf16, #tpu.memory_space<vmem>>, vector<1x8x8x16xbf16>
    %30 = vector.shape_cast %29 : vector<1x8x8x16xbf16> to vector<8x8x16xbf16>
    %31 = vector.shape_cast %30 : vector<8x8x16xbf16> to vector<64x16xbf16>
    %c4 = arith.constant 4 : index
    %c0_32 = arith.constant 0 : index
    %c0_33 = arith.constant 0 : index
    %32 = vector.load %arg3[%c4, %c0_32, %c0_33] : memref<9x16x16xbf16, #tpu.memory_space<vmem>>, vector<1x16x16xbf16>
    %33 = vector.shape_cast %32 : vector<1x16x16xbf16> to vector<16x16xbf16>
    %cst_34 = arith.constant dense<0.000000e+00> : vector<64x16xf32>
    %34 = tpu.matmul %31, %33, %cst_34 {dimension_numbers = #tpu.dot_dimension_numbers<[1], [0], [0], [1], [0, 0, 1, 1], [], []>} : vector<64x16xbf16>, vector<16x16xbf16>, vector<64x16xf32> -> vector<64x16xf32>
    %35 = arith.addf %28, %34 : vector<64x16xf32>
    %c0_35 = arith.constant 0 : index
    %c1_36 = arith.constant 1 : index
    %c2_37 = arith.constant 2 : index
    %c0_38 = arith.constant 0 : index
    %36 = vector.load %arg2[%c0_35, %c1_36, %c2_37, %c0_38] : memref<1x10x10x16xbf16, #tpu.memory_space<vmem>>, vector<1x8x8x16xbf16>
    %37 = vector.shape_cast %36 : vector<1x8x8x16xbf16> to vector<8x8x16xbf16>
    %38 = vector.shape_cast %37 : vector<8x8x16xbf16> to vector<64x16xbf16>
    %c5 = arith.constant 5 : index
    %c0_39 = arith.constant 0 : index
    %c0_40 = arith.constant 0 : index
    %39 = vector.load %arg3[%c5, %c0_39, %c0_40] : memref<9x16x16xbf16, #tpu.memory_space<vmem>>, vector<1x16x16xbf16>
    %40 = vector.shape_cast %39 : vector<1x16x16xbf16> to vector<16x16xbf16>
    %cst_41 = arith.constant dense<0.000000e+00> : vector<64x16xf32>
    %41 = tpu.matmul %38, %40, %cst_41 {dimension_numbers = #tpu.dot_dimension_numbers<[1], [0], [0], [1], [0, 0, 1, 1], [], []>} : vector<64x16xbf16>, vector<16x16xbf16>, vector<64x16xf32> -> vector<64x16xf32>
    %42 = arith.addf %35, %41 : vector<64x16xf32>
    %c0_42 = arith.constant 0 : index
    %c2_43 = arith.constant 2 : index
    %c0_44 = arith.constant 0 : index
    %c0_45 = arith.constant 0 : index
    %43 = vector.load %arg2[%c0_42, %c2_43, %c0_44, %c0_45] : memref<1x10x10x16xbf16, #tpu.memory_space<vmem>>, vector<1x8x8x16xbf16>
    %44 = vector.shape_cast %43 : vector<1x8x8x16xbf16> to vector<8x8x16xbf16>
    %45 = vector.shape_cast %44 : vector<8x8x16xbf16> to vector<64x16xbf16>
    %c6 = arith.constant 6 : index
    %c0_46 = arith.constant 0 : index
    %c0_47 = arith.constant 0 : index
    %46 = vector.load %arg3[%c6, %c0_46, %c0_47] : memref<9x16x16xbf16, #tpu.memory_space<vmem>>, vector<1x16x16xbf16>
    %47 = vector.shape_cast %46 : vector<1x16x16xbf16> to vector<16x16xbf16>
    %cst_48 = arith.constant dense<0.000000e+00> : vector<64x16xf32>
    %48 = tpu.matmul %45, %47, %cst_48 {dimension_numbers = #tpu.dot_dimension_numbers<[1], [0], [0], [1], [0, 0, 1, 1], [], []>} : vector<64x16xbf16>, vector<16x16xbf16>, vector<64x16xf32> -> vector<64x16xf32>
    %49 = arith.addf %42, %48 : vector<64x16xf32>
    %c0_49 = arith.constant 0 : index
    %c2_50 = arith.constant 2 : index
    %c1_51 = arith.constant 1 : index
    %c0_52 = arith.constant 0 : index
    %50 = vector.load %arg2[%c0_49, %c2_50, %c1_51, %c0_52] : memref<1x10x10x16xbf16, #tpu.memory_space<vmem>>, vector<1x8x8x16xbf16>
    %51 = vector.shape_cast %50 : vector<1x8x8x16xbf16> to vector<8x8x16xbf16>
    %52 = vector.shape_cast %51 : vector<8x8x16xbf16> to vector<64x16xbf16>
    %c7 = arith.constant 7 : index
    %c0_53 = arith.constant 0 : index
    %c0_54 = arith.constant 0 : index
    %53 = vector.load %arg3[%c7, %c0_53, %c0_54] : memref<9x16x16xbf16, #tpu.memory_space<vmem>>, vector<1x16x16xbf16>
    %54 = vector.shape_cast %53 : vector<1x16x16xbf16> to vector<16x16xbf16>
    %cst_55 = arith.constant dense<0.000000e+00> : vector<64x16xf32>
    %55 = tpu.matmul %52, %54, %cst_55 {dimension_numbers = #tpu.dot_dimension_numbers<[1], [0], [0], [1], [0, 0, 1, 1], [], []>} : vector<64x16xbf16>, vector<16x16xbf16>, vector<64x16xf32> -> vector<64x16xf32>
    %56 = arith.addf %49, %55 : vector<64x16xf32>
    %c0_56 = arith.constant 0 : index
    %c2_57 = arith.constant 2 : index
    %c2_58 = arith.constant 2 : index
    %c0_59 = arith.constant 0 : index
    %57 = vector.load %arg2[%c0_56, %c2_57, %c2_58, %c0_59] : memref<1x10x10x16xbf16, #tpu.memory_space<vmem>>, vector<1x8x8x16xbf16>
    %58 = vector.shape_cast %57 : vector<1x8x8x16xbf16> to vector<8x8x16xbf16>
    %59 = vector.shape_cast %58 : vector<8x8x16xbf16> to vector<64x16xbf16>
    %c8 = arith.constant 8 : index
    %c0_60 = arith.constant 0 : index
    %c0_61 = arith.constant 0 : index
    %60 = vector.load %arg3[%c8, %c0_60, %c0_61] : memref<9x16x16xbf16, #tpu.memory_space<vmem>>, vector<1x16x16xbf16>
    %61 = vector.shape_cast %60 : vector<1x16x16xbf16> to vector<16x16xbf16>
    %cst_62 = arith.constant dense<0.000000e+00> : vector<64x16xf32>
    %62 = tpu.matmul %59, %61, %cst_62 {dimension_numbers = #tpu.dot_dimension_numbers<[1], [0], [0], [1], [0, 0, 1, 1], [], []>} : vector<64x16xbf16>, vector<16x16xbf16>, vector<64x16xf32> -> vector<64x16xf32>
    %63 = arith.addf %56, %62 : vector<64x16xf32>
    %c0_63 = arith.constant 0 : index
    %c0_64 = arith.constant 0 : index
    %64 = vector.load %arg4[%c0_63, %c0_64] : memref<1x16xf32, #tpu.memory_space<vmem>>, vector<1x16xf32>
    %65 = vector.broadcast %64 : vector<1x16xf32> to vector<64x16xf32>
    %66 = arith.addf %63, %65 : vector<64x16xf32>
    %cst_65 = arith.constant 5.000000e-01 : f32
    %67 = vector.broadcast %cst_65 : f32 to vector<64x16xf32>
    %68 = arith.mulf %67, %66 : vector<64x16xf32>
    %cst_66 = arith.constant 0.707106769 : f32
    %69 = vector.broadcast %cst_66 : f32 to vector<64x16xf32>
    %70 = arith.mulf %66, %69 : vector<64x16xf32>
    %71 = math.erf %70 : vector<64x16xf32>
    %cst_67 = arith.constant 1.000000e+00 : f32
    %72 = vector.broadcast %cst_67 : f32 to vector<64x16xf32>
    %73 = arith.addf %72, %71 : vector<64x16xf32>
    %74 = arith.mulf %68, %73 : vector<64x16xf32>
    %75 = vector.shape_cast %74 : vector<64x16xf32> to vector<8x8x16xf32>
    %76 = arith.truncf %75 : vector<8x8x16xf32> to vector<8x8x16xbf16>
    %c0_68 = arith.constant 0 : index
    %c0_69 = arith.constant 0 : index
    %c0_70 = arith.constant 0 : index
    %c0_71 = arith.constant 0 : index
    %77 = vector.load %arg5[%c0_68, %c0_69, %c0_70, %c0_71] : memref<1x8x8x16xbf16, #tpu.memory_space<vmem>>, vector<1x8x8x16xbf16>
    %78 = vector.shape_cast %77 : vector<1x8x8x16xbf16> to vector<8x8x16xbf16>
    %79 = vector.shape_cast %76 : vector<8x8x16xbf16> to vector<1x8x8x16xbf16>
    tpu.vector_store %arg5[%c0_68, %c0_69, %c0_70, %c0_71], %79 {strides = array<i32>} : memref<1x8x8x16xbf16, #tpu.memory_space<vmem>>, vector<1x8x8x16xbf16>,
    return
  }
  func.func @transform_0(%arg0: i32, %arg1: i32) -> (i32, i32, i32, i32) {
    %c0_i32 = arith.constant 0 : i32
    %c0_i32_0 = arith.constant 0 : i32
    %c0_i32_1 = arith.constant 0 : i32
    %c0_i32_2 = arith.constant 0 : i32
    return %arg0, %c0_i32, %c0_i32_0, %c0_i32_1 : i32, i32, i32, i32
  }
  func.func @transform_1(%arg0: i32, %arg1: i32) -> (i32, i32, i32) {
    %c0_i32 = arith.constant 0 : i32
    %c0_i32_0 = arith.constant 0 : i32
    %c0_i32_1 = arith.constant 0 : i32
    return %c0_i32, %c0_i32_0, %arg1 : i32, i32, i32
  }
  func.func @transform_2(%arg0: i32, %arg1: i32) -> (i32, i32) {
    %c0_i32 = arith.constant 0 : i32
    %c0_i32_0 = arith.constant 0 : i32
    return %c0_i32, %arg1 : i32, i32
  }
  func.func @transform_3(%arg0: i32, %arg1: i32) -> (i32, i32, i32, i32) {
    %c0_i32 = arith.constant 0 : i32
    %c0_i32_0 = arith.constant 0 : i32
    %c0_i32_1 = arith.constant 0 : i32
    return %arg0, %c0_i32, %c0_i32_0, %arg1 : i32, i32, i32, i32
  }
}

</mosaic_0001>

<bundles_post_ra>
// kernel: forward.4
= control target key start
LH: loop header
LB: loop body
LE: loop exit
PB: predicated region body
PF: predicated region fallthrough
CT: control target
= control target key end

     0   :  { %s2122_s12 = smov 0   ;;  %s2124_s13 = smov 0   ;;  %s2653_s0 = inlined_call_operand.vmem [shape: bf16[2,36,9,8], index: 0, kind: input, shape index: {}]   ;;  %s2654_s1 = inlined_call_operand.vmem [shape: bf16[9,8,16], index: 1, kind: input, shape index: {}]   ;;  %s2655_s2 = inlined_call_operand.vmem [shape: f32[1,16], index: 2, kind: input, shape index: {}]   ;;  %s2656_s3 = inlined_call_operand.vmem [shape: bf16[2,8,8,16], index: 3, kind: output, shape index: {}]  }
   0x1   :  { %s2126_s14 = smov 0  }
   0x2 LB: > { %s25_s15 = sadd.s32 1, %s2096_s13  ;;  %p1782_p0 = scmp.ge.s32.totalorder %s2100_s14, 1  ;;  %s2100_s14 = sphi %s2126_s14, %s13_s14   ;;  %s2096_s13 = sphi %s2124_s13, %s2666_s13   ;;  %s2092_s12 = sphi %s2122_s12, %s2665_s12  }
   0x3   : > { %p27_p1 = scmp.ge.s32.totalorder %s25_s15, 2  ;;  %p168_p2 = scmp.lt.s32.totalorder %s2100_s14, 3 }
   0x5   : > { %s2668_s15 = smov (%p27_p1, %s25_s15), 0  ;;  %p169_p3 = pnand %p1782_p0, %p168_p2 }
   0x6   : > { %p202_p4 = scmp.lt.s32.totalorder (!%p169_p3), %s2092_s12, 1 }
   0x7   : > { %172 = sbr.rel (%p169_p3) target bundleno = 368 (0x170), region = 32 }
   0xc   : > { %v1794_v0 = vld [vmem:[%s2654_s1 + $0x4] sm:$0xf]  ;;  %vm276_vm0 = vcmask 1043456   ;;  %v1835_v2 = vld [vmem:[%s2654_s1 + $0x8] sm:$0xf]  ;;  %s2670_s12 = smov (!%p202_p4, %s2092_s12), 1 }
   0xd   : > { %v278_v1 = vsel %vm276_vm0, %v1794_v0, 0  ;;  %v1848_v3 = vld [vmem:[%s2654_s1 + $0xc] sm:$0xf]  ;;  %v531_v4 = vsel %vm276_vm0, %v1835_v2, 0  ;;  %v231_v6 = vld [vmem:[%s2654_s1] sm:$0xf] }
   0xe   : > { %2033 = vmatpush.bf16.msra.mxu1 %v278_v1  ;;  %2034 = vmatpush.bf16.msra.mxu2 %v278_v1  ;;  %v614_v5 = vsel %vm276_vm0, %v1848_v3, 0  ;;  %v342_v7 = vsel %vm276_vm0, %v231_v6, 0  ;;  %v1877_v8 = vld [vmem:[%s2654_s1 + $0x10] sm:$0xf]  ;;  %s2036_s26 = smul.u32 288, %s2670_s12  ;;  %vm263_vm1 = vcmask 64512  }
   0xf   : > { %2035 = vmatpush.bf16.msra.mxu3 %v278_v1  ;;  %287 = vmatpush.bf16.msra.mxu0 %v278_v1  ;;  %v697_v9 = vsel %vm276_vm0, %v1877_v8, 0  ;;  %v1927_v10 = vld [vmem:[%s2654_s1 + $0x18] sm:$0xf]  ;;  %v1956_v11 = vld [vmem:[%s2654_s1 + $0x1c] sm:$0xf]  ;;  %vm1662_vm9 = vcmask 125952  }
  0x10   : > { %s2169_s4 = scalar_lea.vmem %s2653_s0, %s2036_s26  ;;  %v1914_v12 = vld [vmem:[%s2654_s1 + $0x14] sm:$0xf]  ;;  %v974_v24 = vsel %vm276_vm0, %v1927_v10, 0  ;;  %v1057_v28 = vsel %vm276_vm0, %v1956_v11, 0  ;;  %v1993_v38 = vld [vmem:[%s2654_s1 + $0x20] sm:$0xf] }
  0x11   : > { %v1801_v13 = vld [vmem:[%s2169_s4 + $0x58] sm:$0xf]  ;;  %v2014_v14 = vld [vmem:[%s2169_s4 + $0x5c] sm:$0xf0]  ;;  %v1805_v15 = vld [vmem:[%s2169_s4 + $0x68] sm:$0xf] }
  0x12   : > { %540 = vmatpush.bf16.msrb.mxu2 %v531_v4  ;;  %351 = vmatpush.bf16.msrb.mxu1 %v342_v7  ;;  %v1802_v16 = vor.u32 %v2014_v14, %v1801_v13  ;;  %v2015_v17 = vld [vmem:[%s2169_s4 + $0x6c] sm:$0xf0]  ;;  %v1809_v18 = vld [vmem:[%s2169_s4 + $0x78] sm:$0xf]  ;;  %v2016_v19 = vld [vmem:[%s2169_s4 + $0x7c] sm:$0xf0] }
  0x13   : > { %623 = vmatpush.bf16.msrb.mxu3 %v614_v5  ;;  %706 = vmatpush.bf16.msrb.mxu0 %v697_v9  ;;  %v1806_v20 = vor.u32 %v2015_v17, %v1805_v15  ;;  %v1810_v21 = vor.u32 %v2016_v19, %v1809_v18  ;;  %v1797_v22 = vld [vmem:[%s2169_s4 + $0x48] sm:$0xf]  ;;  %v2013_v23 = vld [vmem:[%s2169_s4 + $0x4c] sm:$0xf0]  ;;  %v373_v26 = vld [vmem:[%s2169_s4] sm:$0xf] }
  0x14   : > { %1812 = vmatmul.msk.bf16.vlgmr.msra.gmra.mxu1 %vm263_vm1, %v1802_v16  ;;  %v1798_v25 = vor.u32 %v2013_v23, %v1797_v22  ;;  %v374_v27 = vld [vmem:[%s2169_s4 + $0x4] sm:$0x1]  ;;  %v891_v29 = vsel %vm276_vm0, %v1914_v12, 0  ;;  %v375_v30 = vld [vmem:[%s2169_s4 + $0x8] sm:$0xf]  ;;  %v393_v32 = vshrl.u32 %v373_v26, 16 }
  0x15   : > { %1813 = vmatmul.msk.bf16.vlgmr.msra.gmra.mxu2 %vm263_vm1, %v1806_v20  ;;  %1814 = vmatmul.msk.bf16.vlgmr.msra.gmra.mxu3 %vm263_vm1, %v1810_v21  ;;  %v376_v31 = vld [vmem:[%s2169_s4 + $0xc] sm:$0x1]  ;;  %v396_v33 = vshll.u32 %v373_v26, 16  ;;  %v402_v34 = vshll.u32 %v374_v27, 16  ;;  %v407_v35 = vshrl.u32 %v375_v30, 16  ;;  %v410_v36 = vshll.u32 %v375_v30, 16 }
  0x16   : > { %1811 = vmatmul.msk.bf16.vlgmr.msra.gmra.mxu0 %vm263_vm1, %v1798_v25  ;;  %v416_v37 = vshll.u32 %v376_v31, 16  ;;  %983 = vmatpush.bf16.msra.mxu2 %v974_v24  ;;  %vm389_vm2 = vsmask.f32 3328  ;;  %vm390_vm3 = vsmask.f32 7440  ;;  %v395_v39 = vrot.slane %v393_v32, 4 }
  0x17   : > { %v398_v40 = vrot.slane %v396_v33, 5  ;;  %1066 = vmatpush.bf16.msra.mxu3 %v1057_v28  ;;  %900 = vmatpush.bf16.msra.mxu1 %v891_v29  ;;  %v409_v41 = vrot.slane %v407_v35, 4  ;;  %v412_v42 = vrot.slane %v410_v36, 5  ;;  %v404_v44 = vrot.slane %v402_v34, 5  ;;  %vm2200_vm4 = vmor %vm389_vm2, %vm390_vm3  ;;  %v377_v49 = vld [vmem:[%s2169_s4 + $0x10] sm:$0xf] }
  0x18   : > { %v1251_v45 = vsel %vm276_vm0, %v1993_v38, 0  ;;  %v418_v48 = vrot.slane %v416_v37, 5  ;;  %v379_v50 = vld [vmem:[%s2169_s4 + $0x18] sm:$0xf]  ;;  %v1817_v51 = vld [vmem:[%s2169_s4] sm:$0xf] }
  0x19   : > { %v399_v43 = vor.u32 %v398_v40, %v395_v39  ;;  %v413_v47 = vor.u32 %v412_v42, %v409_v41  ;;  %1260 = vmatpush.bf16.msra.mxu0 %v1251_v45  ;;  %v421_v53 = vshrl.u32 %v377_v49, 16  ;;  %v424_v54 = vshll.u32 %v377_v49, 16  ;;  %v2009_v55 = vld [vmem:[%s2169_s4 + $0x4] sm:$0xf0]  ;;  %v1851_v60 = vld [vmem:[%s2169_s4 + $0x90] sm:$0xf] }
  0x1a   : > { %v435_v57 = vshrl.u32 %v379_v50, 16  ;;  %v438_v58 = vshll.u32 %v379_v50, 16  ;;  %v2017_v61 = vld [vmem:[%s2169_s4 + $0x94] sm:$0xf0]  ;;  %v2021_v3 = vld [vmem:[%s2169_s4 + $0xdc] sm:$0xf0]  ;;  %v1818_v9 = vor.u32 %v2009_v55, %v1817_v51 }
  0x1b   : > { %v400_v52 = vrot.slane %v399_v43, 4  ;;  %v414_v56 = vrot.slane %v413_v47, 4  ;;  %v423_v62 = vrot.slane %v421_v53, 4  ;;  %v426_v63 = vrot.slane %v424_v54, 5  ;;  %v1880_v2 = vld [vmem:[%s2169_s4 + $0xd8] sm:$0xf] }
  0x1c   : > { %v437_v4 = vrot.slane %v435_v57, 4  ;;  %v440_v5 = vrot.slane %v438_v58, 5  ;;  %v378_v7 = vld [vmem:[%s2169_s4 + $0x14] sm:$0x1]  ;;  %v380_v8 = vld [vmem:[%s2169_s4 + $0x1c] sm:$0x1]  ;;  %v1852_v11 = vor.u32 %v2017_v61, %v1851_v60  ;;  %v1881_v12 = vor.u32 %v2021_v3, %v1880_v2 }
  0x1d   : > { %v405_v59 = vsel %vm2200_vm4, %v400_v52, %v404_v44  ;;  %v419_v0 = vsel %vm2200_vm4, %v414_v56, %v418_v48  ;;  %v427_v13 = vor.u32 %v426_v63, %v423_v62  ;;  %v430_v14 = vshll.u32 %v378_v7, 16  ;;  %v381_v21 = vld [vmem:[%s2169_s4 + $0x20] sm:$0xf]  ;;  %v383_v22 = vld [vmem:[%s2169_s4 + $0x28] sm:$0xf]  ;;  %s2008_s17 = sshll.u32 %s2670_s12, 5 }
  0x1e   : > { %v506_v1 = vunpack.c.l.b16 %v405_v59  ;;  %v507_v6 = vunpack.c.l.b16 %v419_v0  ;;  %v441_v15 = vor.u32 %v440_v5, %v437_v4  ;;  %v444_v16 = vshll.u32 %v380_v8, 16  ;;  %v1821_v29 = vld [vmem:[%s2169_s4 + $0x10] sm:$0xf]  ;;  %v2010_v30 = vld [vmem:[%s2169_s4 + $0x14] sm:$0xf0]  ;;  %s2517_s19 = scalar_lea.vmem %s2656_s3, %s2008_s17 }
  0x1f   : > { %v428_v17 = vrot.slane %v427_v13, 4  ;;  %v432_v18 = vrot.slane %v430_v14, 5  ;;  %v449_v23 = vshrl.u32 %v381_v21, 16  ;;  %v452_v24 = vshll.u32 %v381_v21, 16  ;;  %v1855_v33 = vld [vmem:[%s2169_s4 + $0xa0] sm:$0xf] }
  0x20   : > { %v514_v10 = vpack.c.b16 %v507_v6, %v506_v1  ;;  %v442_v19 = vrot.slane %v441_v15, 4  ;;  %v446_v20 = vrot.slane %v444_v16, 5  ;;  %v463_v27 = vshrl.u32 %v383_v22, 16  ;;  %v2018_v34 = vld [vmem:[%s2169_s4 + $0xa4] sm:$0xf0] }
  0x21   : > { %v433_v25 = vsel %vm2200_vm4, %v428_v17, %v432_v18  ;;  %v466_v28 = vshll.u32 %v383_v22, 16  ;;  %v1884_v35 = vld [vmem:[%s2169_s4 + $0xe8] sm:$0xf]  ;;  %v2022_v36 = vld [vmem:[%s2169_s4 + $0xec] sm:$0xf0]  ;;  %v451_v37 = vrot.slane %v449_v23, 4  ;;  %v1822_v43 = vor.u32 %v2010_v30, %v1821_v29 }
  0x22   : > { %v447_v26 = vsel %vm2200_vm4, %v442_v19, %v446_v20  ;;  %v508_v31 = vunpack.c.l.b16 %v433_v25  ;;  %v454_v38 = vrot.slane %v452_v24, 5  ;;  %v465_v39 = vrot.slane %v463_v27, 4  ;;  %v382_v41 = vld [vmem:[%s2169_s4 + $0x24] sm:$0x1]  ;;  %v384_v42 = vld [vmem:[%s2169_s4 + $0x2c] sm:$0x1] }
  0x23   : > { %v509_v32 = vunpack.c.l.b16 %v447_v26  ;;  %v468_v40 = vrot.slane %v466_v28, 5  ;;  %v1856_v45 = vor.u32 %v2018_v34, %v1855_v33  ;;  %v1885_v47 = vor.u32 %v2022_v36, %v1884_v35  ;;  %v385_v52 = vld [vmem:[%s2169_s4 + $0x30] sm:$0xf]  ;;  %v387_v53 = vld [vmem:[%s2169_s4 + $0x38] sm:$0xf] }
  0x24   : > { %1831 = vmatmul.msk.bf16.vlgmr.msrb.gmra.mxu1 %vm263_vm1, %v1818_v9  ;;  %v455_v48 = vor.u32 %v454_v38, %v451_v37  ;;  %v458_v49 = vshll.u32 %v382_v41, 16  ;;  %v472_v51 = vshll.u32 %v384_v42, 16  ;;  %v477_v58 = vshrl.u32 %v385_v52, 16  ;;  %v386_v4 = vld [vmem:[%s2169_s4 + $0x34] sm:$0x1] }
  0x25   : > { %1836 = vmatmul.msk.bf16.vlgmr.msrb.gmra.mxu2 %vm263_vm1, %v514_v10  ;;  %1865 = vmatmul.msk.bf16.vlgmr.msrb.gmra.mxu3 %vm263_vm1, %v1852_v11  ;;  %v515_v44 = vpack.c.b16 %v509_v32, %v508_v31  ;;  %v469_v50 = vor.u32 %v468_v40, %v465_v39  ;;  %v480_v59 = vshll.u32 %v385_v52, 16  ;;  %v491_v60 = vshrl.u32 %v387_v53, 16  ;;  %v388_v5 = vld [vmem:[%s2169_s4 + $0x3c] sm:$0x1]  ;;  %v1825_v6 = vld [vmem:[%s2169_s4 + $0x20] sm:$0xf] }
  0x26   : > { %1894 = vmatmul.msk.bf16.vlgmr.msrb.gmra.mxu0 %vm263_vm1, %v1881_v12  ;;  %v456_v54 = vrot.slane %v455_v48, 4  ;;  %v460_v55 = vrot.slane %v458_v49, 5  ;;  %v474_v57 = vrot.slane %v472_v51, 5  ;;  %v494_v61 = vshll.u32 %v387_v53, 16  ;;  %v2011_v7 = vld [vmem:[%s2169_s4 + $0x24] sm:$0xf0] }
  0x27   : > { %v470_v56 = vrot.slane %v469_v50, 4  ;;  %v479_v0 = vrot.slane %v477_v58, 4  ;;  %v482_v1 = vrot.slane %v480_v59, 5  ;;  %v493_v2 = vrot.slane %v491_v60, 4  ;;  %v1859_v10 = vld [vmem:[%s2169_s4 + $0xb0] sm:$0xf] }
  0x28   : > { %v461_v62 = vsel %vm2200_vm4, %v456_v54, %v460_v55  ;;  %v496_v3 = vrot.slane %v494_v61, 5  ;;  %v2019_v11 = vld [vmem:[%s2169_s4 + $0xb4] sm:$0xf0]  ;;  %v2023_v13 = vld [vmem:[%s2169_s4 + $0xfc] sm:$0xf0]  ;;  %v486_v15 = vshll.u32 %v386_v4, 16  ;;  %v1826_v18 = vor.u32 %v2011_v7, %v1825_v6 }
  0x29   : > { %v475_v63 = vsel %vm2200_vm4, %v470_v56, %v474_v57  ;;  %v510_v8 = vunpack.c.l.b16 %v461_v62  ;;  %v1888_v12 = vld [vmem:[%s2169_s4 + $0xf8] sm:$0xf]  ;;  %v483_v14 = vor.u32 %v482_v1, %v479_v0  ;;  %v500_v17 = vshll.u32 %v388_v5, 16  ;;  %v1898_v26 = vld [vmem:[%s2169_s4 + $0x90] sm:$0xf] }
  0x2a   : > { %v511_v9 = vunpack.c.l.b16 %v475_v63  ;;  %v497_v16 = vor.u32 %v496_v3, %v493_v2  ;;  %v1860_v20 = vor.u32 %v2019_v11, %v1859_v10  ;;  %v1889_v21 = vor.u32 %v2023_v13, %v1888_v12  ;;  %v1900_v27 = vld [vmem:[%s2169_s4 + $0x98] sm:$0xf]  ;;  %v1977_v28 = vld [vmem:[%s2169_s4 + $0x8] sm:$0xf]  ;;  %v1979_v29 = vld [vmem:[%s2169_s4 + $0x10] sm:$0xf] }
  0x2b   : > { %v484_v22 = vrot.slane %v483_v14, 4  ;;  %v488_v23 = vrot.slane %v486_v15, 5  ;;  %v502_v25 = vrot.slane %v500_v17, 5  ;;  %v753_v32 = vshrl.u32 %v1898_v26, 16  ;;  %v1829_v40 = vld [vmem:[%s2169_s4 + $0x30] sm:$0xf] }
  0x2c   : > { %v516_v19 = vpack.c.b16 %v511_v9, %v510_v8  ;;  %v498_v24 = vrot.slane %v497_v16, 4  ;;  %v756_v33 = vshll.u32 %v1898_v26, 16  ;;  %v767_v34 = vshrl.u32 %v1900_v27, 16  ;;  %v2012_v41 = vld [vmem:[%s2169_s4 + $0x34] sm:$0xf0] }
  0x2d   : > { %v489_v30 = vsel %vm2200_vm4, %v484_v22, %v488_v23  ;;  %v770_v35 = vshll.u32 %v1900_v27, 16  ;;  %v1113_v36 = vshrl.u32 %v1977_v28, 16  ;;  %v1116_v37 = vshll.u32 %v1977_v28, 16  ;;  %v1901_v52 = vld [vmem:[%s2169_s4 + $0x9c] sm:$0x1] }
  0x2e   : > { %v503_v31 = vsel %vm2200_vm4, %v498_v24, %v502_v25  ;;  %v1127_v38 = vshrl.u32 %v1979_v29, 16  ;;  %v1130_v39 = vshll.u32 %v1979_v29, 16  ;;  %v512_v42 = vunpack.c.l.b16 %v489_v30  ;;  %v1978_v57 = vld [vmem:[%s2169_s4 + $0xc] sm:$0x1]  ;;  %v1980_v58 = vld [vmem:[%s2169_s4 + $0x14] sm:$0x1] }
  0x2f   : > { %v755_v48 = vrot.slane %v753_v32, 4  ;;  %v758_v49 = vrot.slane %v756_v33, 5  ;;  %v769_v50 = vrot.slane %v767_v34, 4  ;;  %v772_v51 = vrot.slane %v770_v35, 5  ;;  %v1892_v62 = vld [vmem:[%s2169_s4 + $0x108] sm:$0xf] }
  0x30   : > { %v1115_v53 = vrot.slane %v1113_v36, 4  ;;  %v1118_v54 = vrot.slane %v1116_v37, 5  ;;  %v1129_v55 = vrot.slane %v1127_v38, 4  ;;  %v1132_v56 = vrot.slane %v1130_v39, 5  ;;  %v2024_v63 = vld [vmem:[%s2169_s4 + $0x10c] sm:$0xf0] }
  0x31   : > { %v1830_v59 = vor.u32 %v2012_v41, %v1829_v40  ;;  %v759_v0 = vor.u32 %v758_v49, %v755_v48  ;;  %v773_v2 = vor.u32 %v772_v51, %v769_v50  ;;  %v776_v3 = vshll.u32 %v1901_v52, 16  ;;  %v1902_v9 = vld [vmem:[%s2169_s4 + $0xa0] sm:$0xf]  ;;  %v1904_v10 = vld [vmem:[%s2169_s4 + $0xa8] sm:$0xf] }
  0x32   : > { %v1119_v4 = vor.u32 %v1118_v54, %v1115_v53  ;;  %v1122_v5 = vshll.u32 %v1978_v57, 16  ;;  %v1133_v6 = vor.u32 %v1132_v56, %v1129_v55  ;;  %v1136_v7 = vshll.u32 %v1980_v58, 16  ;;  %v1981_v23 = vld [vmem:[%s2169_s4 + $0x18] sm:$0xf]  ;;  %v1983_v24 = vld [vmem:[%s2169_s4 + $0x20] sm:$0xf] }
  0x33   : > { %v1893_v8 = vor.u32 %v2024_v63, %v1892_v62  ;;  %v760_v11 = vrot.slane %v759_v0, 4  ;;  %v774_v13 = vrot.slane %v773_v2, 4  ;;  %v778_v14 = vrot.slane %v776_v3, 5  ;;  %v1903_v29 = vld [vmem:[%s2169_s4 + $0xa4] sm:$0x1] }
  0x34   : > { %1832 = vmatmul.msk.bf16.gmra.mxu1 %vm263_vm1, %v1822_v43  ;;  %v513_v43 = vunpack.c.l.b16 %v503_v31  ;;  %v1120_v15 = vrot.slane %v1119_v4, 4  ;;  %v1124_v16 = vrot.slane %v1122_v5, 5  ;;  %v1134_v17 = vrot.slane %v1133_v6, 4  ;;  %v1905_v34 = vld [vmem:[%s2169_s4 + $0xac] sm:$0x1] }
  0x35   : > { %1837 = vmatmul.msk.bf16.gmra.mxu2 %vm263_vm1, %v515_v44  ;;  %1866 = vmatmul.msk.bf16.gmra.mxu3 %vm263_vm1, %v1856_v45  ;;  %v1863_v44 = vld [vmem:[%s2169_s4 + $0xc0] sm:$0xf]  ;;  %v2020_v45 = vld [vmem:[%s2169_s4 + $0xc4] sm:$0xf0]  ;;  %v798_v22 = vshll.u32 %v1904_v10, 16  ;;  %v779_v26 = vsel %vm2200_vm4, %v774_v13, %v778_v14  ;;  %v1141_v35 = vshrl.u32 %v1981_v23, 16 }
  0x36   : > { %1895 = vmatmul.msk.bf16.gmra.mxu0 %vm263_vm1, %v1885_v47  ;;  %v1899_v47 = vld [vmem:[%s2169_s4 + $0x94] sm:$0x1]  ;;  %v517_v60 = vpack.c.b16 %v513_v43, %v512_v42  ;;  %v1864_v61 = vor.u32 %v2020_v45, %v1863_v44  ;;  %v1125_v27 = vsel %vm2200_vm4, %v1120_v15, %v1124_v16  ;;  %v1144_v36 = vshll.u32 %v1981_v23, 16  ;;  %v1930_v41 = vld [vmem:[%s2169_s4 + $0x8] sm:$0xf] }
  0x37   : > { %v762_v1 = vshll.u32 %v1899_v47, 16  ;;  %v800_v33 = vrot.slane %v798_v22, 5  ;;  %v1155_v37 = vshrl.u32 %v1983_v24, 16  ;;  %v1158_v38 = vshll.u32 %v1983_v24, 16  ;;  %v2025_v42 = vld [vmem:[%s2169_s4 + $0xc] sm:$0xf0] }
  0x38   : > { %v867_v40 = vunpack.c.l.b16 %v779_v26  ;;  %v1226_v43 = vunpack.c.l.b16 %v1125_v27  ;;  %v1959_v45 = vld [vmem:[%s2169_s4 + $0x50] sm:$0xf]  ;;  %v2029_v47 = vld [vmem:[%s2169_s4 + $0x54] sm:$0xf0]  ;;  %v790_v49 = vshll.u32 %v1903_v29, 16  ;;  %v804_v51 = vshll.u32 %v1905_v34, 16 }
  0x39   : > { %v764_v12 = vrot.slane %v762_v1, 5  ;;  %v1143_v52 = vrot.slane %v1141_v35, 4  ;;  %v1146_v53 = vrot.slane %v1144_v36, 5  ;;  %v1157_v54 = vrot.slane %v1155_v37, 4  ;;  %v1982_v57 = vld [vmem:[%s2169_s4 + $0x1c] sm:$0x1] }
  0x3a   : > { %v1160_v55 = vrot.slane %v1158_v38, 5  ;;  %v1984_v58 = vld [vmem:[%s2169_s4 + $0x24] sm:$0x1]  ;;  %v792_v63 = vrot.slane %v790_v49, 5  ;;  %v806_v1 = vrot.slane %v804_v51, 5  ;;  %v1150_v3 = vshll.u32 %v1982_v57, 16 }
  0x3b   : > { %v765_v25 = vsel %vm2200_vm4, %v760_v11, %v764_v12  ;;  %v1147_v2 = vor.u32 %v1146_v53, %v1143_v52  ;;  %v1164_v5 = vshll.u32 %v1984_v58, 16  ;;  %v1906_v6 = vld [vmem:[%s2169_s4 + $0xb0] sm:$0xf]  ;;  %v2026_v29 = vld [vmem:[%s2169_s4 + $0x1c] sm:$0xf0] }
  0x3c   : > { %v866_v39 = vunpack.c.l.b16 %v765_v25  ;;  %v1161_v4 = vor.u32 %v1160_v55, %v1157_v54  ;;  %v1152_v12 = vrot.slane %v1150_v3, 5  ;;  %v1987_v15 = vld [vmem:[%s2169_s4 + $0x30] sm:$0xf]  ;;  %v809_v16 = vshrl.u32 %v1906_v6, 16  ;;  %v1907_v35 = vld [vmem:[%s2169_s4 + $0xb4] sm:$0x1] }
  0x3d   : > { %v1148_v11 = vrot.slane %v1147_v2, 4  ;;  %v1166_v14 = vrot.slane %v1164_v5, 5  ;;  %v1183_v22 = vshrl.u32 %v1987_v15, 16  ;;  %v1186_v23 = vshll.u32 %v1987_v15, 16  ;;  %v1909_v36 = vld [vmem:[%s2169_s4 + $0xbc] sm:$0x1] }
  0x3e   : > { %v874_v56 = vpack.c.b16 %v867_v40, %v866_v39  ;;  %v1162_v13 = vrot.slane %v1161_v4, 4  ;;  %v2030_v39 = vld [vmem:[%s2169_s4 + $0x64] sm:$0xf0]  ;;  %v818_v49 = vshll.u32 %v1907_v35, 16  ;;  %v832_v51 = vshll.u32 %v1909_v36, 16 }
  0x3f   : > { %v1153_v26 = vsel %vm2200_vm4, %v1148_v11, %v1152_v12  ;;  %v1910_v3 = vld [vmem:[%s2169_s4 + $0xc0] sm:$0xf]  ;;  %v1912_v4 = vld [vmem:[%s2169_s4 + $0xc8] sm:$0xf] }
  0x40   : > { %v1167_v27 = vsel %vm2200_vm4, %v1162_v13, %v1166_v14  ;;  %v1228_v40 = vunpack.c.l.b16 %v1153_v26  ;;  %v851_v11 = vshrl.u32 %v1912_v4, 16  ;;  %v854_v12 = vshll.u32 %v1912_v4, 16  ;;  %v1971_v4 = vld [vmem:[%s2169_s4 + $0x80] sm:$0xf] }
  0x44   : > { %1833 = vmatmul.msk.bf16.gmra.mxu1 %vm263_vm1, %v1826_v18  ;;  %v1138_v18 = vrot.slane %v1136_v7, 5  ;;  %v1908_v7 = vld [vmem:[%s2169_s4 + $0xb8] sm:$0xf] }
  0x45   : > { %1838 = vmatmul.msk.bf16.gmra.mxu2 %vm263_vm1, %v516_v19  ;;  %1867 = vmatmul.msk.bf16.gmra.mxu3 %vm263_vm1, %v1860_v20  ;;  %v781_v19 = vshrl.u32 %v1902_v9, 16  ;;  %v784_v20 = vshll.u32 %v1902_v9, 16 }
  0x46   : > { %1896 = vmatmul.msk.bf16.gmra.mxu0 %vm263_vm1, %v1889_v21  ;;  %v795_v21 = vshrl.u32 %v1904_v10, 16  ;;  %v1139_v28 = vsel %vm2200_vm4, %v1134_v17, %v1138_v18  ;;  %v1985_v10 = vld [vmem:[%s2169_s4 + $0x28] sm:$0xf]  ;;  %v812_v17 = vshll.u32 %v1906_v6, 16  ;;  %v823_v18 = vshrl.u32 %v1908_v7, 16 }
  0x47   : > { %v783_v30 = vrot.slane %v781_v19, 4  ;;  %v786_v31 = vrot.slane %v784_v20, 5  ;;  %v1227_v44 = vunpack.c.l.b16 %v1139_v28  ;;  %v826_v19 = vshll.u32 %v1908_v7, 16  ;;  %v1934_v28 = vld [vmem:[%s2169_s4 + $0x18] sm:$0xf] }
  0x48   : > { %v797_v32 = vrot.slane %v795_v21, 4  ;;  %v1169_v20 = vshrl.u32 %v1985_v10, 16  ;;  %v1172_v21 = vshll.u32 %v1985_v10, 16  ;;  %v1935_v52 = vor.u32 %v2026_v29, %v1934_v28  ;;  %v1989_v7 = vld [vmem:[%s2169_s4 + $0x38] sm:$0xf] }
  0x49   : > { %v787_v48 = vor.u32 %v786_v31, %v783_v30  ;;  %v1963_v30 = vld [vmem:[%s2169_s4 + $0x60] sm:$0xf]  ;;  %v811_v31 = vrot.slane %v809_v16, 4  ;;  %v828_v34 = vrot.slane %v826_v19, 5  ;;  %v840_v10 = vshll.u32 %v1910_v3, 16 }
  0x4a   : > { %v801_v50 = vor.u32 %v800_v33, %v797_v32  ;;  %v814_v32 = vrot.slane %v812_v17, 5  ;;  %v825_v33 = vrot.slane %v823_v18, 4  ;;  %v1171_v37 = vrot.slane %v1169_v20, 4 }
  0x4b   : > { %v788_v62 = vrot.slane %v787_v48, 4  ;;  %v1174_v38 = vrot.slane %v1172_v21, 5  ;;  %v1964_v53 = vor.u32 %v2030_v39, %v1963_v30  ;;  %v1197_v15 = vshrl.u32 %v1989_v7, 16  ;;  %v1938_v21 = vld [vmem:[%s2169_s4 + $0x28] sm:$0xf] }
  0x4c   : > { %v802_v0 = vrot.slane %v801_v50, 4  ;;  %v815_v48 = vor.u32 %v814_v32, %v811_v31  ;;  %v829_v50 = vor.u32 %v828_v34, %v825_v33  ;;  %v1200_v16 = vshll.u32 %v1989_v7, 16  ;;  %v1911_v31 = vld [vmem:[%s2169_s4 + $0xc4] sm:$0x1]  ;;  %v1913_v32 = vld [vmem:[%s2169_s4 + $0xcc] sm:$0x1] }
  0x4d   : > { %v1175_v54 = vor.u32 %v1174_v38, %v1171_v37  ;;  %v842_v26 = vrot.slane %v840_v10, 5  ;;  %v856_v28 = vrot.slane %v854_v12, 5  ;;  %v1199_v33 = vrot.slane %v1197_v15, 4 }
  0x4e   : > { %v807_v9 = vsel %vm2200_vm4, %v802_v0, %v806_v1  ;;  %v1202_v34 = vrot.slane %v1200_v16, 5 }
  0x4f   : > { %v869_v25 = vunpack.c.l.b16 %v807_v9  ;;  %v837_v9 = vshrl.u32 %v1910_v3, 16  ;;  %v2028_v3 = vld [vmem:[%s2169_s4 + $0x3c] sm:$0xf0] }
  0x54   : > { %1834 = vmatmul.msk.bf16.gmra.mxu1 %vm263_vm1, %v1830_v59  ;;  %v1931_v59 = vor.u32 %v2025_v42, %v1930_v41  ;;  %v1229_v41 = vunpack.c.l.b16 %v1167_v27  ;;  %v1986_v42 = vld [vmem:[%s2169_s4 + $0x2c] sm:$0x1]  ;;  %v853_v27 = vrot.slane %v851_v11, 4 }
  0x55   : > { %1839 = vmatmul.msk.bf16.gmra.mxu2 %vm263_vm1, %v517_v60  ;;  %1868 = vmatmul.msk.bf16.gmra.mxu3 %vm263_vm1, %v1864_v61  ;;  %v1960_v60 = vor.u32 %v2029_v47, %v1959_v45  ;;  %v1234_v61 = vpack.c.b16 %v1227_v44, %v1226_v43  ;;  %v1185_v43 = vrot.slane %v1183_v22, 4  ;;  %v1188_v44 = vrot.slane %v1186_v23, 5  ;;  %v1988_v47 = vld [vmem:[%s2169_s4 + $0x34] sm:$0x1]  ;;  %v2027_v22 = vld [vmem:[%s2169_s4 + $0x2c] sm:$0xf0] }
  0x56   : > { %1897 = vmatmul.msk.bf16.gmra.mxu0 %vm263_vm1, %v1893_v8  ;;  %v793_v8 = vsel %vm2200_vm4, %v788_v62, %v792_v63  ;;  %v1178_v55 = vshll.u32 %v1986_v42, 16  ;;  %v1192_v58 = vshll.u32 %v1988_v47, 16  ;;  %v834_v62 = vrot.slane %v832_v51, 5  ;;  %v1967_v23 = vld [vmem:[%s2169_s4 + $0x70] sm:$0xf] }
  0x57   : > { %v868_v24 = vunpack.c.l.b16 %v793_v8  ;;  %v1189_v57 = vor.u32 %v1188_v44, %v1185_v43  ;;  %v1176_v63 = vrot.slane %v1175_v54, 4  ;;  %v1991_v8 = vld [vmem:[%s2169_s4 + $0x40] sm:$0xf]  ;;  %v1939_v38 = vor.u32 %v2027_v22, %v1938_v21 }
  0x58   : > { %v1180_v0 = vrot.slane %v1178_v55, 5  ;;  %v1194_v2 = vrot.slane %v1192_v58, 5  ;;  %v1211_v17 = vshrl.u32 %v1991_v8, 16  ;;  %v1214_v18 = vshll.u32 %v1991_v8, 16 }
  0x59   : > { %v875_v45 = vpack.c.b16 %v869_v25, %v868_v24  ;;  %v1190_v1 = vrot.slane %v1189_v57, 4  ;;  %v2031_v24 = vld [vmem:[%s2169_s4 + $0x74] sm:$0xf0]  ;;  %v839_v25 = vrot.slane %v837_v9, 4  ;;  %v846_v43 = vshll.u32 %v1911_v31, 16 }
  0x5a   : > { %v1181_v13 = vsel %vm2200_vm4, %v1176_v63, %v1180_v0  ;;  %v1213_v35 = vrot.slane %v1211_v17, 4  ;;  %v1216_v36 = vrot.slane %v1214_v18, 5  ;;  %v1968_v39 = vor.u32 %v2031_v24, %v1967_v23 }
  0x5b   : > { %v1195_v14 = vsel %vm2200_vm4, %v1190_v1, %v1194_v2  ;;  %v1230_v29 = vunpack.c.l.b16 %v1181_v13  ;;  %v843_v42 = vor.u32 %v842_v26, %v839_v25  ;;  %v857_v44 = vor.u32 %v856_v28, %v853_v27  ;;  %v1942_v2 = vld [vmem:[%s2169_s4 + $0x38] sm:$0xf] }
  0x5c   : > { %v1231_v30 = vunpack.c.l.b16 %v1195_v14  ;;  %v1943_v10 = vor.u32 %v2028_v3, %v1942_v2 }
  0x5d   : > { %v858_v54 = vrot.slane %v857_v44, 4 }
  0x5e   : > { %v1236_v47 = vpack.c.b16 %v1231_v30, %v1230_v29 }
  0x64   : > { %1915 = vmatmul.msk.bf16.vlgmr.msra.gmra.mxu1 %vm263_vm1, %v874_v56  ;;  %v1235_v56 = vpack.c.b16 %v1229_v41, %v1228_v40  ;;  %v1990_v40 = vld [vmem:[%s2169_s4 + $0x3c] sm:$0x1]  ;;  %v1992_v41 = vld [vmem:[%s2169_s4 + $0x44] sm:$0x1] }
  0x65   : > { %1944 = vmatmul.msk.bf16.vlgmr.msra.gmra.mxu2 %vm263_vm1, %v1931_v59  ;;  %1973 = vmatmul.msk.bf16.vlgmr.msra.gmra.mxu3 %vm263_vm1, %v1960_v60  ;;  %v816_v59 = vrot.slane %v815_v48, 4  ;;  %v820_v60 = vrot.slane %v818_v49, 5  ;;  %v1203_v48 = vor.u32 %v1202_v34, %v1199_v33  ;;  %v1206_v49 = vshll.u32 %v1990_v40, 16 }
  0x66   : > { %1994 = vmatmul.msk.bf16.vlgmr.msra.gmra.mxu0 %vm263_vm1, %v1234_v61  ;;  %v830_v61 = vrot.slane %v829_v50, 4  ;;  %v1217_v50 = vor.u32 %v1216_v36, %v1213_v35  ;;  %v1220_v51 = vshll.u32 %v1992_v41, 16 }
  0x67   : > { %v821_v5 = vsel %vm2200_vm4, %v816_v59, %v820_v60  ;;  %v1208_v57 = vrot.slane %v1206_v49, 5 }
  0x68   : > { %v835_v6 = vsel %vm2200_vm4, %v830_v61, %v834_v62  ;;  %v870_v19 = vunpack.c.l.b16 %v821_v5  ;;  %v1218_v58 = vrot.slane %v1217_v50, 4  ;;  %v1222_v59 = vrot.slane %v1220_v51, 5  ;;  %v2032_v5 = vld [vmem:[%s2169_s4 + $0x84] sm:$0xf0] }
  0x69   : > { %v871_v20 = vunpack.c.l.b16 %v835_v6  ;;  %v1972_v11 = vor.u32 %v2032_v5, %v1971_v4 }
  0x6a   : > { %v1223_v63 = vsel %vm2200_vm4, %v1218_v58, %v1222_v59 }
  0x6b   : > { %v876_v37 = vpack.c.b16 %v871_v20, %v870_v19  ;;  %v1233_v7 = vunpack.c.l.b16 %v1223_v63 }
  0x74   : > { %1916 = vmatmul.msk.bf16.gmra.mxu1 %vm263_vm1, %v875_v45  ;;  %v860_v45 = vshll.u32 %v1913_v32, 16 }
  0x75   : > { %1945 = vmatmul.msk.bf16.gmra.mxu2 %vm263_vm1, %v1935_v52  ;;  %1974 = vmatmul.msk.bf16.gmra.mxu3 %vm263_vm1, %v1964_v53  ;;  %v844_v52 = vrot.slane %v843_v42, 4  ;;  %v848_v53 = vrot.slane %v846_v43, 5 }
  0x76   : > { %1995 = vmatmul.msk.bf16.gmra.mxu0 %vm263_vm1, %v1235_v56  ;;  %v862_v55 = vrot.slane %v860_v45, 5  ;;  %v1204_v56 = vrot.slane %v1203_v48, 4 }
  0x77   : > { %v849_v60 = vsel %vm2200_vm4, %v844_v52, %v848_v53 }
  0x78   : > { %v863_v61 = vsel %vm2200_vm4, %v858_v54, %v862_v55  ;;  %v1209_v62 = vsel %vm2200_vm4, %v1204_v56, %v1208_v57  ;;  %v872_v0 = vunpack.c.l.b16 %v849_v60 }
  0x79   : > { %v873_v1 = vunpack.c.l.b16 %v863_v61  ;;  %v1232_v6 = vunpack.c.l.b16 %v1209_v62 }
  0x7b   : > { %v877_v8 = vpack.c.b16 %v873_v1, %v872_v0  ;;  %v1237_v12 = vpack.c.b16 %v1233_v7, %v1232_v6 }
  0x84   : > { %1917 = vmatmul.msk.bf16.gmra.mxu1 %vm263_vm1, %v876_v37 }
  0x85   : > { %1946 = vmatmul.msk.bf16.gmra.mxu2 %vm263_vm1, %v1939_v38  ;;  %1975 = vmatmul.msk.bf16.gmra.mxu3 %vm263_vm1, %v1968_v39 }
  0x86   : > { %1996 = vmatmul.msk.bf16.gmra.mxu0 %vm263_vm1, %v1236_v47 }
  0x91   : > { %v2364_v9 = vpop.f32.mrf.mxu1 }
  0x93   : > { %v289_v13 = vpop.f32.mrf.mxu0 }
  0x94   : > { %1918 = vmatmul.msk.bf16.gmra.mxu1 %vm263_vm1, %v877_v8 }
  0x95   : > { %1947 = vmatmul.msk.bf16.gmra.mxu2 %vm263_vm1, %v1943_v10  ;;  %1976 = vmatmul.msk.bf16.gmra.mxu3 %vm263_vm1, %v1972_v11 }
  0x96   : > { %1997 = vmatmul.msk.bf16.gmra.mxu0 %vm263_vm1, %v1237_v12 }
  0x98   : > { %v299_v46 = vpop.f32.mrf.mxu2  ;;  %v304_v14 = vpop.f32.mrf.mxu3 }
  0x99   : > { %v2370_v15 = vpop.f32.mrf.mxu1 }
  0x9b   : > { %v291_v16 = vpop.f32.mrf.mxu0 }
  0xa0   : > { %v301_v17 = vpop.f32.mrf.mxu2  ;;  %v306_v18 = vpop.f32.mrf.mxu3 }
  0xa1   : > { %v353_v19 = vpop.f32.mrf.mxu1 }
  0xa2   : > { %v354_v60 = vadd.f32 %v353_v19, %v289_v13 }
  0xa3   : > { %v708_v20 = vpop.f32.mrf.mxu0 }
  0xa8   : > { %v542_v21 = vpop.f32.mrf.mxu2  ;;  %v625_v22 = vpop.f32.mrf.mxu3 }
  0xa9   : > { %v355_v23 = vpop.f32.mrf.mxu1  ;;  %v562_v63 = vadd.f32 %v542_v21, %v354_v60 }
  0xaa   : > { %v356_v6 = vadd.f32 %v355_v23, %v291_v16 }
  0xab   : > { %v710_v24 = vpop.f32.mrf.mxu0  ;;  %v645_v3 = vadd.f32 %v625_v22, %v562_v63  ;;  %v2394_v22 = vld [vmem:[%s2655_s2] ss:$0 sm:$0xff] }
  0xad   : > { %v728_v10 = vadd.f32 %v708_v20, %v645_v3 }
  0xb0   : > { %v544_v25 = vpop.f32.mrf.mxu2  ;;  %v627_v26 = vpop.f32.mrf.mxu3 }
  0xb1   : > { %v358_v27 = vpop.f32.mrf.mxu1  ;;  %v563_v8 = vadd.f32 %v544_v25, %v356_v6 }
  0xb2   : > { %v359_v21 = vadd.f32 %v358_v27, %v2364_v9 }
  0xb3   : > { %v2372_v28 = vpop.f32.mrf.mxu0 }
  0xb8   : > { %v547_v29 = vpop.f32.mrf.mxu2  ;;  %v630_v30 = vpop.f32.mrf.mxu3 }
  0xb9   : > { %v2374_v31 = vpop.f32.mrf.mxu1  ;;  %v564_v16 = vadd.f32 %v547_v29, %v359_v21 }
  0xbb   : > { %v2376_v32 = vpop.f32.mrf.mxu0 }
  0xc0   : > { %v2378_v33 = vpop.f32.mrf.mxu2  ;;  %v2380_v34 = vpop.f32.mrf.mxu3 }
  0xc1   : > { %v363_v35 = vpop.f32.mrf.mxu1 }
  0xc2   : > { %v364_v36 = vadd.f32 %v363_v35, %v299_v46 }
  0xc3   : > { %v718_v37 = vpop.f32.mrf.mxu0 }
  0xc8   : > { %v552_v38 = vpop.f32.mrf.mxu2  ;;  %v635_v39 = vpop.f32.mrf.mxu3 }
  0xc9   : > { %v566_v40 = vadd.f32 %v552_v38, %v364_v36  ;;  %v365_v41 = vpop.f32.mrf.mxu1 }
  0xca   : > { %v366_v42 = vadd.f32 %v365_v41, %v301_v17  ;;  %v646_v17 = vadd.f32 %v627_v26, %v563_v8  ;;  %v361_v41 = vadd.f32 %v2374_v31, %v2370_v15 }
  0xcb   : > { %v649_v43 = vadd.f32 %v635_v39, %v566_v40  ;;  %v720_v44 = vpop.f32.mrf.mxu0  ;;  %v647_v39 = vadd.f32 %v630_v30, %v564_v16 }
  0xcc   : > { %v729_v20 = vadd.f32 %v710_v24, %v646_v17 }
  0xcd   : > { %v2382_v45 = vadd.f32 %v718_v37, %v649_v43 }
  0xd0   : > { %v554_v47 = vpop.f32.mrf.mxu2  ;;  %v637_v48 = vpop.f32.mrf.mxu3 }
  0xd1   : > { %v567_v49 = vadd.f32 %v554_v47, %v366_v42  ;;  %v368_v50 = vpop.f32.mrf.mxu1  ;;  %v565_v42 = vadd.f32 %v2378_v33, %v361_v41  ;;  %v730_v47 = vadd.f32 %v2372_v28, %v647_v39 }
  0xd2   : > { %v369_v51 = vadd.f32 %v368_v50, %v304_v14 }
  0xd3   : > { %v650_v52 = vadd.f32 %v637_v48, %v567_v49  ;;  %v723_v53 = vpop.f32.mrf.mxu0 }
  0xd5   : > { %v2384_v54 = vadd.f32 %v720_v44, %v650_v52 }
  0xd8   : > { %v557_v55 = vpop.f32.mrf.mxu2  ;;  %v640_v56 = vpop.f32.mrf.mxu3 }
  0xd9   : > { %v568_v57 = vadd.f32 %v557_v55, %v369_v51  ;;  %v370_v58 = vpop.f32.mrf.mxu1  ;;  %v648_v51 = vadd.f32 %v2380_v34, %v565_v42 }
  0xda   : > { %v371_v59 = vadd.f32 %v370_v58, %v306_v18 }
  0xdb   : > { %v651_v61 = vadd.f32 %v640_v56, %v568_v57  ;;  %v725_v62 = vpop.f32.mrf.mxu0  ;;  %v731_v34 = vadd.f32 %v2376_v32, %v648_v51 }
  0xdd   : > { %v2386_v0 = vadd.f32 %v723_v53, %v651_v61 }
  0xe0   : > { %v559_v1 = vpop.f32.mrf.mxu2  ;;  %v642_v2 = vpop.f32.mrf.mxu3 }
  0xe1   : > { %v569_v4 = vadd.f32 %v559_v1, %v371_v59  ;;  %v902_v5 = vpop.f32.mrf.mxu1 }
  0xe2   : > { %v922_v46 = vadd.f32 %v902_v5, %v728_v10 }
  0xe3   : > { %v652_v7 = vadd.f32 %v642_v2, %v569_v4  ;;  %v1262_v11 = vpop.f32.mrf.mxu0 }
  0xe5   : > { %v2388_v12 = vadd.f32 %v725_v62, %v652_v7 }
  0xe8   : > { %v985_v14 = vpop.f32.mrf.mxu2  ;;  %v1068_v13 = vpop.f32.mrf.mxu3 }
  0xe9   : > { %v1005_v18 = vadd.f32 %v985_v14, %v922_v46  ;;  %v904_v19 = vpop.f32.mrf.mxu1 }
  0xea   : > { %v923_v36 = vadd.f32 %v904_v19, %v729_v20 }
  0xeb   : > { %v1088_v35 = vadd.f32 %v1068_v13, %v1005_v18  ;;  %v1264_v37 = vpop.f32.mrf.mxu0 }
  0xed   : > { %v1282_v23 = vadd.f32 %v1262_v11, %v1088_v35 }
  0xef   : > { %v2397_v25 = vadd.f32 %v2394_v22, %v1282_v23 }
  0xf0   : > { %v987_v38 = vpop.f32.mrf.mxu2  ;;  %v1070_v26 = vpop.f32.mrf.mxu3 }
  0xf1   : > { %v2400_v40 = vmul.f32 0.70710677, %v2397_v25  ;;  %v1006_v9 = vadd.f32 %v987_v38, %v923_v36  ;;  %v907_v27 = vpop.f32.mrf.mxu1 }
  0xf2   : > { %v924_v50 = vadd.f32 %v907_v27, %v730_v47 }
  0xf3   : > { %v1318_v29 = vmul.f32 %v2400_v40, %v2400_v40  ;;  %v1089_v24 = vadd.f32 %v1070_v26, %v1006_v9  ;;  %v1267_v56 = vpop.f32.mrf.mxu0 }
  0xf5   : > { %v2407_v43 = vmin.f32 %v1318_v29, 16.0  ;;  %v1283_v44 = vadd.f32 %v1264_v37, %v1089_v24 }
  0xf7   : > { %v1320_v30 = vmul.f32 2.1237322e-06, %v2407_v43  ;;  %v1331_v48 = vmul.f32 3.8918573e-05, %v2407_v43  ;;  %v2413_v49 = vadd.f32 %v2394_v22, %v1283_v44 }
  0xf8   : > { %v990_v15 = vpop.f32.mrf.mxu2  ;;  %v1073_v31 = vpop.f32.mrf.mxu3 }
  0xf9   : > { %v1321_v52 = vadd.f32 0.00028619796, %v1320_v30  ;;  %v1332_v53 = vadd.f32 0.001143296, %v1331_v48  ;;  %v1007_v33 = vadd.f32 %v990_v15, %v924_v50  ;;  %v2417_v55 = vmul.f32 0.70710677, %v2413_v49  ;;  %v909_v28 = vpop.f32.mrf.mxu1 }
  0xfa   : > { %v925_v5 = vadd.f32 %v909_v28, %v731_v34 }
  0xfb   : > { %v1322_v57 = vmul.f32 %v1321_v52, %v2407_v43  ;;  %v1333_v58 = vmul.f32 %v1332_v53, %v2407_v43  ;;  %v1090_v59 = vadd.f32 %v1073_v31, %v1007_v33  ;;  %v1358_v60 = vmul.f32 %v2417_v55, %v2417_v55  ;;  %v1269_v20 = vpop.f32.mrf.mxu0 }
  0xfd   : > { %v1323_v61 = vadd.f32 0.0036580483, %v1322_v57  ;;  %v1334_v62 = vadd.f32 0.014752088, %v1333_v58  ;;  %v1284_v63 = vadd.f32 %v1267_v56, %v1090_v59  ;;  %v1359_v1 = vmin.f32 %v1358_v60, 16.0 }
  0xff   : > { %v1324_v2 = vmul.f32 %v1323_v61, %v2407_v43  ;;  %v1335_v3 = vmul.f32 %v1334_v62, %v2407_v43  ;;  %v2427_v4 = vadd.f32 %v2394_v22, %v1284_v63  ;;  %v1360_v6 = vmul.f32 2.1237322e-06, %v1359_v1 }
 0x100   : > { %v1371_v7 = vmul.f32 3.8918573e-05, %v1359_v1  ;;  %v992_v8 = vpop.f32.mrf.mxu2  ;;  %v1075_v32 = vpop.f32.mrf.mxu3 }
 0x101   : > { %v1325_v10 = vadd.f32 0.05243302, %v1324_v2  ;;  %v1336_v11 = vadd.f32 0.112945676, %v1335_v3  ;;  %v1008_v46 = vadd.f32 %v992_v8, %v925_v5  ;;  %v1361_v14 = vadd.f32 0.00028619796, %v1360_v6  ;;  %v912_v36 = vpop.f32.mrf.mxu1 }
 0x102   : > { %v1372_v13 = vadd.f32 0.001143296, %v1371_v7  ;;  %v2430_v17 = vmul.f32 0.70710677, %v2427_v4  ;;  %v926_v29 = vadd.f32 %v912_v36, %v2382_v45 }
 0x103   : > { %v1337_v18 = vmul.f32 %v1336_v11, %v2407_v43  ;;  %v1091_v19 = vadd.f32 %v1075_v32, %v1008_v46  ;;  %v1326_v21 = vmul.f32 %v1325_v10, %v2407_v43  ;;  %v1362_v35 = vmul.f32 %v1361_v14, %v1359_v1  ;;  %v1272_v46 = vpop.f32.mrf.mxu0 }
 0x104   : > { %v1373_v16 = vmul.f32 %v1372_v13, %v1359_v1  ;;  %v1398_v23 = vmul.f32 %v2430_v17, %v2430_v17 }
 0x105   : > { %v1338_v37 = vadd.f32 0.4994258, %v1337_v18  ;;  %v1285_v38 = vadd.f32 %v1269_v20, %v1091_v19  ;;  %v1363_v26 = vadd.f32 0.0036580483, %v1362_v35  ;;  %v1327_v24 = vadd.f32 0.18741608, %v1326_v21 }
 0x106   : > { %v1374_v39 = vadd.f32 0.014752088, %v1373_v16  ;;  %v2436_v9 = vmin.f32 %v1398_v23, 16.0  ;;  %v2462_v23 = vmul.f32 0.5, %v2397_v25 }
 0x107   : > { %v1339_v27 = vmul.f32 %v1338_v37, %v2407_v43  ;;  %v2440_v41 = vadd.f32 %v2394_v22, %v1285_v38  ;;  %v1364_v42 = vmul.f32 %v1363_v26, %v1359_v1  ;;  %v1328_v33 = vmul.f32 %v1327_v24, %v2407_v43 }
 0x108   : > { %v1375_v44 = vmul.f32 %v1374_v39, %v1359_v1  ;;  %v1400_v47 = vmul.f32 2.1237322e-06, %v2436_v9  ;;  %v995_v30 = vpop.f32.mrf.mxu2  ;;  %v1411_v50 = vmul.f32 3.8918573e-05, %v2436_v9  ;;  %v1078_v59 = vpop.f32.mrf.mxu3 }
 0x109   : > { %v1340_v48 = vadd.f32 1.0, %v1339_v27  ;;  %v2446_v15 = vmul.f32 0.70710677, %v2440_v41  ;;  %v1365_v31 = vadd.f32 0.05243302, %v1364_v42  ;;  %v1009_v53 = vadd.f32 %v995_v30, %v926_v29 }
 0x10a   : > { %v1376_v51 = vadd.f32 0.112945676, %v1375_v44  ;;  %v1401_v52 = vadd.f32 0.00028619796, %v1400_v47  ;;  %v1412_v57 = vadd.f32 0.001143296, %v1411_v50 }
 0x10b   : > { %2062 = vrcp.f32 %v1340_v48  ;;  %v1366_v45 = vmul.f32 %v1365_v31, %v1359_v1  ;;  %v1438_v58 = vmul.f32 %v2446_v15, %v2446_v15  ;;  %v1092_v62 = vadd.f32 %v1078_v59, %v1009_v53 }
 0x10c   : > { %v1377_v56 = vmul.f32 %v1376_v51, %v1359_v1  ;;  %v1402_v28 = vmul.f32 %v1401_v52, %v2436_v9  ;;  %v1413_v34 = vmul.f32 %v1412_v57, %v2436_v9  ;;  %v1329_v3 = vadd.f32 1.1283791, %v1328_v33 }
 0x10d   : > { %v1367_v60 = vadd.f32 0.18741608, %v1366_v45  ;;  %v2453_v2 = vmin.f32 %v1438_v58, 16.0  ;;  %v1350_v13 = vand.u32 2147483647, %v1340_v48  ;;  %v1286_v18 = vadd.f32 %v1272_v46, %v1092_v62 }
 0x10e   : > { %v1378_v61 = vadd.f32 0.4994258, %v1377_v56  ;;  %v1403_v63 = vadd.f32 0.0036580483, %v1402_v28  ;;  %v1414_v8 = vadd.f32 0.014752088, %v1413_v34  ;;  %v1330_v20 = vmul.f32 %v1329_v3, %v2400_v40 }
 0x10f   : > { %v1368_v5 = vmul.f32 %v1367_v60, %v1359_v1  ;;  %v1440_v10 = vmul.f32 2.1237322e-06, %v2453_v2  ;;  %v1451_v11 = vmul.f32 3.8918573e-05, %v2453_v2  ;;  %v1352_v37 = vand.u32 2147483648, %v1340_v48 }
 0x110   : > { %v1379_v43 = vmul.f32 %v1378_v61, %v1359_v1  ;;  %v1404_v7 = vmul.f32 %v1403_v63, %v2436_v9  ;;  %v1415_v21 = vmul.f32 %v1414_v8, %v2436_v9  ;;  %v914_v1 = vpop.f32.mrf.mxu1  ;;  %v2469_v24 = vadd.f32 %v2394_v22, %v1286_v18  ;;  %v997_v42 = vpop.f32.mrf.mxu2 }
 0x111   : > { %v2063_v6 = vpop.eup %2062  ;;  %v1441_v35 = vadd.f32 0.00028619796, %v1440_v10  ;;  %v1452_v16 = vadd.f32 0.001143296, %v1451_v11  ;;  %v1369_v38 = vadd.f32 1.1283791, %v1368_v5  ;;  %vm1346_vm6 = vweird.f32 %v1340_v48  ;;  %v1080_v34 = vpop.f32.mrf.mxu3 }
 0x112   : > { %v1342_v14 = vmul.f32 %v2063_v6, %v1340_v48  ;;  %v2458_v32 = vadd.f32 1.0, %v1379_v43  ;;  %v1405_v19 = vadd.f32 0.05243302, %v1404_v7  ;;  %vm1347_vm5 = vweird.f32 %v2063_v6 }
 0x113   : > { %v1416_v26 = vadd.f32 0.112945676, %v1415_v21  ;;  %v1442_v27 = vmul.f32 %v1441_v35, %v2453_v2  ;;  %v1453_v29 = vmul.f32 %v1452_v16, %v2453_v2  ;;  %vm2471_vm7 = vcmp.eq.f32.partialorder %v1350_v13, 8.507059e+37  ;;  %vm1348_vm8 = vmor %vm1346_vm6, %vm1347_vm5  ;;  %v1274_v35 = vpop.f32.mrf.mxu0 }
 0x114   : > { %v1343_v36 = vsub.f32 1.0, %v1342_v14  ;;  %2064 = vrcp.f32 %v2458_v32  ;;  %v1406_v40 = vmul.f32 %v1405_v19, %v2436_v9  ;;  %v927_v31 = vadd.f32 %v914_v1, %v2384_v54 }
 0x115   : > { %v1417_v44 = vmul.f32 %v1416_v26, %v2436_v9  ;;  %v1443_v30 = vadd.f32 0.0036580483, %v1442_v27  ;;  %v1454_v50 = vadd.f32 0.014752088, %v1453_v29  ;;  %v1353_v51 = vor.u32 1.1754944e-38, %v1352_v37 }
 0x116   : > { %v1344_v39 = vmul.f32 %v2063_v6, %v1343_v36  ;;  %v1370_v52 = vmul.f32 %v1369_v38, %v2417_v55  ;;  %v2481_v48 = vmul.f32 0.70710677, %v2469_v24  ;;  %v1010_v57 = vadd.f32 %v997_v42, %v927_v31 }
 0x117   : > { %v1418_v53 = vadd.f32 0.4994258, %v1417_v44  ;;  %v1444_v56 = vmul.f32 %v1443_v30, %v2453_v2  ;;  %v1455_v28 = vmul.f32 %v1454_v50, %v2453_v2  ;;  %v1390_v59 = vand.u32 2147483647, %v2458_v32 }
 0x118   : > { %v1345_v47 = vadd.f32 %v2063_v6, %v1344_v39  ;;  %v1407_v55 = vadd.f32 0.18741608, %v1406_v40  ;;  %v1392_v61 = vand.u32 2147483648, %v2458_v32  ;;  %vm1386_vm10 = vweird.f32 %v2458_v32  ;;  %v1000_v16 = vpop.f32.mrf.mxu2 }
 0x119   : > { %v1419_v62 = vmul.f32 %v1418_v53, %v2436_v9  ;;  %v1456_v63 = vadd.f32 0.112945676, %v1455_v28  ;;  %v1445_v5 = vadd.f32 0.05243302, %v1444_v56  ;;  %v1478_v43 = vmul.f32 %v2481_v48, %v2481_v48 }
 0x11a   : > { %v2065_v33 = vpop.eup %2064  ;;  %v1349_v45 = vsel %vm1348_vm8, %v2063_v6, %v1345_v47  ;;  %v917_v6 = vpop.f32.mrf.mxu1  ;;  %v1093_v11 = vadd.f32 %v1080_v34, %v1010_v57  ;;  %v1408_v14 = vmul.f32 %v1407_v55, %v2436_v9  ;;  %vm2501_vm12 = vcmp.eq.f32.partialorder %v1390_v59, 8.507059e+37 }
 0x11b   : > { %v1354_v58 = vsel %vm2471_vm7, %v1353_v51, %v1349_v45  ;;  %v1382_v54 = vmul.f32 %v2065_v33, %v2458_v32  ;;  %v2494_v8 = vadd.f32 1.0, %v1419_v62  ;;  %v1457_v10 = vmul.f32 %v1456_v63, %v2453_v2  ;;  %v1083_v45 = vpop.f32.mrf.mxu3 }
 0x11c   : > { %v1355_v60 = vmul.f32 %v1354_v58, %v1330_v20  ;;  %vm1387_vm11 = vweird.f32 %v2065_v33  ;;  %v2498_v13 = vmin.f32 %v1478_v43, 16.0  ;;  %v1393_v21 = vor.u32 1.1754944e-38, %v1392_v61 }
 0x11d   : > { %v1383_v3 = vsub.f32 1.0, %v1382_v54  ;;  %2066 = vrcp.f32 %v2494_v8  ;;  %v1446_v20 = vmul.f32 %v1445_v5, %v2453_v2  ;;  %v1458_v36 = vadd.f32 0.4994258, %v1457_v10  ;;  %vm1388_vm13 = vmor %vm1386_vm10, %vm1387_vm11 }
 0x11e   : > { %v1998_v7 = vclamps-f32 %v1355_v60, 1.0  ;;  %v928_v37 = vadd.f32 %v917_v6, %v2386_v0  ;;  %v1480_v38 = vmul.f32 2.1237322e-06, %v2498_v13  ;;  %v1491_v26 = vmul.f32 3.8918573e-05, %v2498_v13 }
 0x11f   : > { %v1384_v46 = vmul.f32 %v2065_v33, %v1383_v3  ;;  %v1287_v39 = vadd.f32 %v1274_v35, %v1093_v11  ;;  %v1409_v29 = vadd.f32 1.1283791, %v1408_v14  ;;  %v1459_v0 = vmul.f32 %v1458_v36, %v2453_v2 }
 0x120   : > { %v1638_v18 = vadd.f32 1.0, %v1998_v7  ;;  %v1481_v25 = vadd.f32 0.00028619796, %v1480_v38  ;;  %v1492_v40 = vadd.f32 0.001143296, %v1491_v26  ;;  %v1303_v44 = vmul.f32 0.5, %v2413_v49  ;;  %v1002_v3 = vpop.f32.mrf.mxu2 }
 0x121   : > { %v1385_v1 = vadd.f32 %v2065_v33, %v1384_v46  ;;  %v2523_v30 = vadd.f32 1.0, %v1459_v0  ;;  %v1447_v31 = vadd.f32 0.18741608, %v1446_v20  ;;  %v2533_v28 = vmul.f32 0.5, %v2427_v4 }
 0x122   : > { %v1646_v9 = vmul.f32 %v1638_v18, %v2462_v23  ;;  %v1011_v23 = vadd.f32 %v1000_v16, %v928_v37  ;;  %v1482_v51 = vmul.f32 %v1481_v25, %v2498_v13  ;;  %v1493_v53 = vmul.f32 %v1492_v40, %v2498_v13  ;;  %v919_v57 = vpop.f32.mrf.mxu1 }
 0x123   : > { %v1389_v27 = vsel %vm1388_vm13, %v2065_v33, %v1385_v1  ;;  %v2067_v50 = vpop.eup %2066  ;;  %v2530_v33 = vadd.f32 %v2394_v22, %v1287_v39  ;;  %v1410_v49 = vmul.f32 %v1409_v29, %v2430_v17  ;;  %v1430_v58 = vand.u32 2147483647, %v2494_v8  ;;  %v1277_v17 = vpop.f32.mrf.mxu0 }
 0x124   : > { %v1654_v42 = vpack.c.bf16 %v1646_v9, %v1646_v9  ;;  %v1394_v32 = vsel %vm2501_vm12, %v1393_v21, %v1389_v27  ;;  %v1432_v54 = vand.u32 2147483648, %v2494_v8  ;;  %2068 = vrcp.f32 %v2523_v30  ;;  %v1085_v27 = vpop.f32.mrf.mxu3 }
 0x125   : > { %v1395_v47 = vmul.f32 %v1394_v32, %v1370_v52  ;;  %v1422_v52 = vmul.f32 %v2067_v50, %v2494_v8  ;;  %v1094_v59 = vadd.f32 %v1083_v45, %v1011_v23  ;;  %v1483_v61 = vadd.f32 0.0036580483, %v1482_v51 }
 0x126   : > { %1663 = vst.msk [vmem:[%s2517_s19] sm:$0xf] %vm1662_vm9, %v1654_v42  ;;  %v1494_v62 = vadd.f32 0.014752088, %v1493_v53  ;;  %vm1427_vm14 = vweird.f32 %v2067_v50  ;;  %v1448_v4 = vmul.f32 %v1447_v31, %v2453_v2  ;;  %v2542_v63 = vmul.f32 0.70710677, %v2530_v33 }
 0x127   : > { %v1999_v56 = vclamps-f32 %v1395_v47, 1.0  ;;  %v1423_v60 = vsub.f32 1.0, %v1422_v52  ;;  %v929_v34 = vadd.f32 %v919_v57, %v2388_v12  ;;  %v1484_v6 = vmul.f32 %v1483_v61, %v2498_v13 }
 0x128   : > { %v1495_v7 = vmul.f32 %v1494_v62, %v2498_v13  ;;  %vm1426_vm15 = vweird.f32 %v2494_v8  ;;  %vm2548_vm0 = vcmp.eq.f32.partialorder %v1430_v58, 8.507059e+37  ;;  %v1518_v2 = vmul.f32 %v2542_v63, %v2542_v63 }
 0x129   : > { %v1639_v55 = vadd.f32 1.0, %v1999_v56  ;;  %v1424_v43 = vmul.f32 %v2067_v50, %v1423_v60  ;;  %v1288_v11 = vadd.f32 %v1277_v17, %v1094_v59  ;;  %v1012_v18 = vadd.f32 %v1002_v3, %v929_v34  ;;  %vm1428_vm1 = vmor %vm1426_vm15, %vm1427_vm14 }
 0x12a   : > { %v1496_v14 = vadd.f32 0.112945676, %v1495_v7  ;;  %v2069_v19 = vpop.eup %2068  ;;  %v1433_v21 = vor.u32 1.1754944e-38, %v1432_v54  ;;  %v1449_v35 = vadd.f32 1.1283791, %v1448_v4  ;;  %v2556_v8 = vmin.f32 %v1518_v2, 16.0 }
 0x12b   : > { %v1647_v5 = vmul.f32 %v1639_v55, %v1303_v44  ;;  %v1425_v12 = vadd.f32 %v2067_v50, %v1424_v43  ;;  %v1470_v16 = vand.u32 2147483647, %v2523_v30  ;;  %v1462_v20 = vmul.f32 %v2069_v19, %v2523_v30  ;;  %v1279_v56 = vpop.f32.mrf.mxu0 }
 0x12c   : > { %v1485_v36 = vadd.f32 0.05243302, %v1484_v6  ;;  %v2562_v37 = vadd.f32 %v2394_v22, %v1288_v11  ;;  %v1497_v38 = vmul.f32 %v1496_v14, %v2498_v13  ;;  %v1520_v26 = vmul.f32 2.1237322e-06, %v2556_v8 }
 0x12d   : > { %v1655_v46 = vpack.c.bf16 %v1647_v5, %v1647_v5  ;;  %v1429_v1 = vsel %vm1428_vm1, %v2067_v50, %v1425_v12  ;;  %v1531_v39 = vmul.f32 3.8918573e-05, %v2556_v8  ;;  %v1463_v0 = vsub.f32 1.0, %v1462_v20 }
 0x12e   : > { %v1434_v9 = vsel %vm2548_vm0, %v1433_v21, %v1429_v1  ;;  %v1472_v23 = vand.u32 2147483648, %v2523_v30  ;;  %v1095_v42 = vadd.f32 %v1085_v27, %v1012_v18  ;;  %vm1466_vm2 = vweird.f32 %v2523_v30 }
 0x12f   : > { %1664 = vst.msk [vmem:[%s2517_s19 + $0x4] sm:$0xf] %vm1662_vm9, %v1655_v46  ;;  %v1435_v29 = vmul.f32 %v1434_v9, %v1410_v49  ;;  %v1498_v32 = vadd.f32 0.4994258, %v1497_v38  ;;  %v1521_v25 = vadd.f32 0.00028619796, %v1520_v26  ;;  %v1464_v47 = vmul.f32 %v2069_v19, %v1463_v0 }
 0x130   : > { %v1532_v40 = vadd.f32 0.001143296, %v1531_v39  ;;  %vm1467_vm3 = vweird.f32 %v2069_v19  ;;  %v2572_v50 = vmul.f32 0.70710677, %v2562_v37  ;;  %v1486_v31 = vmul.f32 %v1485_v36, %v2498_v13 }
 0x131   : > { %v2000_v44 = vclamps-f32 %v1435_v29, 1.0  ;;  %v1499_v51 = vmul.f32 %v1498_v32, %v2498_v13  ;;  %v1522_v53 = vmul.f32 %v1521_v25, %v2556_v8  ;;  %v1465_v52 = vadd.f32 %v2069_v19, %v1464_v47  ;;  %vm1468_vm4 = vmor %vm1466_vm2, %vm1467_vm3 }
 0x132   : > { %v1533_v45 = vmul.f32 %v1532_v40, %v2556_v8  ;;  %v1558_v57 = vmul.f32 %v2572_v50, %v2572_v50  ;;  %v1289_v58 = vadd.f32 %v1279_v56, %v1095_v42  ;;  %v1450_v54 = vmul.f32 %v1449_v35, %v2446_v15 }
 0x133   : > { %v1640_v49 = vadd.f32 1.0, %v2000_v44  ;;  %v1473_v59 = vor.u32 1.1754944e-38, %v1472_v23  ;;  %v1500_v55 = vadd.f32 1.0, %v1499_v51  ;;  %v1469_v62 = vsel %vm1468_vm4, %v2069_v19, %v1465_v52 }
 0x134   : > { %v1534_v60 = vadd.f32 0.014752088, %v1533_v45  ;;  %vm1471_vm5 = vcmp.eq.f32.partialorder %v1470_v16, 8.507059e+37  ;;  %v2584_v4 = vmin.f32 %v1558_v57, 16.0  ;;  %v1523_v34 = vadd.f32 0.0036580483, %v1522_v53 }
 0x135   : > { %v1648_v61 = vmul.f32 %v1640_v49, %v2533_v28  ;;  %v1474_v17 = vsel %vm1471_vm5, %v1473_v59, %v1469_v62  ;;  %2070 = vrcp.f32 %v1500_v55  ;;  %v1487_v43 = vadd.f32 0.18741608, %v1486_v31 }
 0x136   : > { %v1475_v5 = vmul.f32 %v1474_v17, %v1450_v54  ;;  %v2587_v15 = vadd.f32 %v2394_v22, %v1289_v58  ;;  %v1535_v30 = vmul.f32 %v1534_v60, %v2556_v8  ;;  %v1560_v6 = vmul.f32 2.1237322e-06, %v2584_v4 }
 0x137   : > { %v1656_v3 = vpack.c.bf16 %v1648_v61, %v1648_v61  ;;  %v1571_v7 = vmul.f32 3.8918573e-05, %v2584_v4  ;;  %v1524_v10 = vmul.f32 %v1523_v34, %v2556_v8  ;;  %v1305_v12 = vmul.f32 0.5, %v2440_v41 }
 0x138   : > { %v2001_v28 = vclamps-f32 %v1475_v5, 1.0  ;;  %v1536_v2 = vadd.f32 0.112945676, %v1535_v30  ;;  %v1561_v11 = vadd.f32 0.00028619796, %v1560_v6  ;;  %v1488_v22 = vmul.f32 %v1487_v43, %v2498_v13 }
 0x139   : > { %1665 = vst.msk [vmem:[%s2517_s19 + $0x8] sm:$0xf] %vm1662_vm9, %v1656_v3  ;;  %v1572_v46 = vadd.f32 0.001143296, %v1571_v7  ;;  %v2598_v18 = vmul.f32 0.70710677, %v2587_v15  ;;  %vm1506_vm7 = vweird.f32 %v1500_v55 }
 0x13a   : > { %v1641_v14 = vadd.f32 1.0, %v2001_v28  ;;  %v1537_v21 = vmul.f32 %v1536_v2, %v2556_v8  ;;  %v1562_v35 = vmul.f32 %v1561_v11, %v2584_v4  ;;  %v1525_v36 = vadd.f32 0.05243302, %v1524_v10 }
 0x13b   : > { %v2071_v19 = vpop.eup %2070  ;;  %v1573_v16 = vmul.f32 %v1572_v46, %v2584_v4  ;;  %v1598_v41 = vmul.f32 %v2598_v18, %v2598_v18  ;;  %v1489_v26 = vadd.f32 1.1283791, %v1488_v22  ;;  %v1512_v27 = vand.u32 2147483648, %v1500_v55 }
 0x13c   : > { %v1649_v1 = vmul.f32 %v1641_v14, %v1305_v12  ;;  %v1502_v20 = vmul.f32 %v2071_v19, %v1500_v55  ;;  %v1538_v9 = vadd.f32 0.4994258, %v1537_v21  ;;  %v1563_v0 = vadd.f32 0.0036580483, %v1562_v35 }
 0x13d   : > { %v1574_v38 = vadd.f32 0.014752088, %v1573_v16  ;;  %v2607_v42 = vmin.f32 %v1598_v41, 16.0  ;;  %vm1507_vm6 = vweird.f32 %v2071_v19  ;;  %v1510_v25 = vand.u32 2147483647, %v1500_v55 }
 0x13e   : > { %v1657_v13 = vpack.c.bf16 %v1649_v1, %v1649_v1  ;;  %v1503_v39 = vsub.f32 1.0, %v1502_v20  ;;  %v1539_v29 = vmul.f32 %v1538_v9, %v2556_v8  ;;  %v1526_v40 = vmul.f32 %v1525_v36, %v2556_v8  ;;  %vm1508_vm8 = vmor %vm1506_vm7, %vm1507_vm6 }
 0x13f   : > { %v1575_v23 = vmul.f32 %v1574_v38, %v2584_v4  ;;  %v1600_v51 = vmul.f32 2.1237322e-06, %v2607_v42  ;;  %v1611_v53 = vmul.f32 3.8918573e-05, %v2607_v42  ;;  %v1490_v45 = vmul.f32 %v1489_v26, %v2481_v48 }
 0x140   : > { %1666 = vst.msk [vmem:[%s2517_s19 + $0xc] sm:$0xf] %vm1662_vm9, %v1657_v13  ;;  %v1504_v32 = vmul.f32 %v2071_v19, %v1503_v39  ;;  %v1540_v44 = vadd.f32 1.0, %v1539_v29  ;;  %v1513_v56 = vor.u32 1.1754944e-38, %v1512_v27  ;;  %v1564_v49 = vmul.f32 %v1563_v0, %v2584_v4 }
 0x141   : > { %v1576_v47 = vadd.f32 0.112945676, %v1575_v23  ;;  %vm1511_vm10 = vcmp.eq.f32.partialorder %v1510_v25, 8.507059e+37  ;;  %v1601_v58 = vadd.f32 0.00028619796, %v1600_v51  ;;  %v1306_v6 = vmul.f32 0.5, %v2469_v24 }
 0x142   : > { %v1505_v31 = vadd.f32 %v2071_v19, %v1504_v32  ;;  %2072 = vrcp.f32 %v1540_v44  ;;  %v1527_v59 = vadd.f32 0.18741608, %v1526_v40  ;;  %v1612_v60 = vadd.f32 0.001143296, %v1611_v53 }
 0x143   : > { %v1577_v57 = vmul.f32 %v1576_v47, %v2584_v4  ;;  %v1565_v62 = vadd.f32 0.05243302, %v1564_v49  ;;  %v1602_v17 = vmul.f32 %v1601_v58, %v2607_v42  ;;  %v1552_v21 = vand.u32 2147483648, %v1540_v44 }
 0x144   : > { %v1509_v52 = vsel %vm1508_vm8, %v2071_v19, %v1505_v31  ;;  %v1613_v48 = vmul.f32 %v1612_v60, %v2607_v42  ;;  %v1528_v43 = vmul.f32 %v1527_v59, %v2556_v8  ;;  %v1550_v19 = vand.u32 2147483647, %v1540_v44 }
 0x145   : > { %v1514_v54 = vsel %vm1511_vm10, %v1513_v56, %v1509_v52  ;;  %v1578_v61 = vadd.f32 0.4994258, %v1577_v57  ;;  %v1566_v10 = vmul.f32 %v1565_v62, %v2584_v4  ;;  %v1603_v11 = vadd.f32 0.0036580483, %v1602_v17 }
 0x146   : > { %v1515_v55 = vmul.f32 %v1514_v54, %v1490_v45  ;;  %v1614_v30 = vadd.f32 0.014752088, %v1613_v48  ;;  %v1529_v22 = vadd.f32 1.1283791, %v1528_v43  ;;  %vm1546_vm12 = vweird.f32 %v1540_v44 }
 0x147   : > { %v1579_v3 = vmul.f32 %v1578_v61, %v2584_v4  ;;  %v1567_v24 = vadd.f32 0.18741608, %v1566_v10  ;;  %v1604_v1 = vmul.f32 %v1603_v11, %v2607_v42  ;;  %v1553_v9 = vor.u32 1.1754944e-38, %v1552_v21 }
 0x148   : > { %v2002_v34 = vclamps-f32 %v1515_v55, 1.0  ;;  %v2073_v5 = vpop.eup %2072  ;;  %v1615_v46 = vmul.f32 %v1614_v30, %v2607_v42  ;;  %v1530_v38 = vmul.f32 %v1529_v22, %v2542_v63  ;;  %vm1551_vm14 = vcmp.eq.f32.partialorder %v1550_v19, 8.507059e+37 }
 0x149   : > { %v1542_v28 = vmul.f32 %v2073_v5, %v1540_v44  ;;  %v1580_v2 = vadd.f32 1.0, %v1579_v3  ;;  %vm1547_vm11 = vweird.f32 %v2073_v5  ;;  %v1568_v27 = vmul.f32 %v1567_v24, %v2584_v4 }
 0x14a   : > { %v1642_v7 = vadd.f32 1.0, %v2002_v34  ;;  %v1616_v16 = vadd.f32 0.112945676, %v1615_v46  ;;  %vm1548_vm13 = vmor %vm1546_vm12, %vm1547_vm11  ;;  %v1605_v29 = vadd.f32 0.05243302, %v1604_v1  ;;  %v1307_v25 = vmul.f32 0.5, %v2530_v33 }
 0x14b   : > { %v1543_v14 = vsub.f32 1.0, %v1542_v28  ;;  %2074 = vrcp.f32 %v1580_v2  ;;  %v1569_v47 = vadd.f32 1.1283791, %v1568_v27  ;;  %v1592_v31 = vand.u32 2147483648, %v1580_v2 }
 0x14c   : > { %v1650_v12 = vmul.f32 %v1642_v7, %v1306_v6  ;;  %v1617_v36 = vmul.f32 %v1616_v16, %v2607_v42  ;;  %v1606_v63 = vmul.f32 %v1605_v29, %v2607_v42  ;;  %v1590_v56 = vand.u32 2147483647, %v1580_v2 }
 0x14d   : > { %v1544_v8 = vmul.f32 %v2073_v5, %v1543_v14  ;;  %vm1586_vm0 = vweird.f32 %v1580_v2  ;;  %v1593_v52 = vor.u32 1.1754944e-38, %v1592_v31  ;;  %v1570_v58 = vmul.f32 %v1569_v47, %v2572_v50 }
 0x14e   : > { %v1658_v35 = vpack.c.bf16 %v1650_v12, %v1650_v12  ;;  %v1618_v13 = vadd.f32 0.4994258, %v1617_v36  ;;  %v1607_v57 = vadd.f32 0.18741608, %v1606_v63  ;;  %vm1591_vm2 = vcmp.eq.f32.partialorder %v1590_v56, 8.507059e+37 }
 0x14f   : > { %v1545_v20 = vadd.f32 %v2073_v5, %v1544_v8  ;;  %v1308_v48 = vmul.f32 0.5, %v2562_v37  ;;  %v1309_v12 = vmul.f32 0.5, %v2587_v15 }
 0x150   : > { %1667 = vst.msk [vmem:[%s2517_s19 + $0x10] sm:$0xf] %vm1662_vm9, %v1658_v35  ;;  %v1619_v32 = vmul.f32 %v1618_v13, %v2607_v42  ;;  %v1608_v61 = vmul.f32 %v1607_v57, %v2607_v42 }
 0x151   : > { %v1549_v41 = vsel %vm1548_vm13, %v2073_v5, %v1545_v20  ;;  %v2075_v26 = vpop.eup %2074 }
 0x152   : > { %v1554_v39 = vsel %vm1551_vm14, %v1553_v9, %v1549_v41  ;;  %v1582_v23 = vmul.f32 %v2075_v26, %v1580_v2  ;;  %v1620_v51 = vadd.f32 1.0, %v1619_v32  ;;  %vm1587_vm15 = vweird.f32 %v2075_v26 }
 0x153   : > { %v1555_v0 = vmul.f32 %v1554_v39, %v1530_v38  ;;  %vm1588_vm1 = vmor %vm1586_vm0, %vm1587_vm15  ;;  %v1609_v5 = vadd.f32 1.1283791, %v1608_v61 }
 0x154   : > { %v1583_v44 = vsub.f32 1.0, %v1582_v23  ;;  %2076 = vrcp.f32 %v1620_v51  ;;  %v1632_v43 = vand.u32 2147483648, %v1620_v51  ;;  %v1630_v6 = vand.u32 2147483647, %v1620_v51 }
 0x155   : > { %v2003_v40 = vclamps-f32 %v1555_v0, 1.0  ;;  %vm1626_vm4 = vweird.f32 %v1620_v51  ;;  %v1610_v42 = vmul.f32 %v1609_v5, %v2598_v18 }
 0x156   : > { %v1584_v45 = vmul.f32 %v2075_v26, %v1583_v44  ;;  %v1633_v10 = vor.u32 1.1754944e-38, %v1632_v43  ;;  %vm1631_vm6 = vcmp.eq.f32.partialorder %v1630_v6, 8.507059e+37 }
 0x157   : > { %v1643_v53 = vadd.f32 1.0, %v2003_v40 }
 0x158   : > { %v1585_v49 = vadd.f32 %v2075_v26, %v1584_v45 }
 0x159   : > { %v1651_v4 = vmul.f32 %v1643_v53, %v1307_v25 }
 0x15a   : > { %v1589_v54 = vsel %vm1588_vm1, %v2075_v26, %v1585_v49  ;;  %v2077_v55 = vpop.eup %2076 }
 0x15b   : > { %v1659_v33 = vpack.c.bf16 %v1651_v4, %v1651_v4  ;;  %v1594_v59 = vsel %vm1591_vm2, %v1593_v52, %v1589_v54  ;;  %v1622_v17 = vmul.f32 %v2077_v55, %v1620_v51  ;;  %vm1627_vm3 = vweird.f32 %v2077_v55 }
 0x15c   : > { %v1595_v60 = vmul.f32 %v1594_v59, %v1570_v58  ;;  %vm1628_vm5 = vmor %vm1626_vm4, %vm1627_vm3 }
 0x15d   : > { %1668 = vst.msk [vmem:[%s2517_s19 + $0x14] sm:$0xf] %vm1662_vm9, %v1659_v33  ;;  %v1623_v3 = vsub.f32 1.0, %v1622_v17 }
 0x15e   : > { %v2004_v62 = vclamps-f32 %v1595_v60, 1.0 }
 0x15f   : > { %v1624_v50 = vmul.f32 %v2077_v55, %v1623_v3 }
 0x160   : > { %v1644_v34 = vadd.f32 1.0, %v2004_v62 }
 0x161   : > { %v1625_v28 = vadd.f32 %v2077_v55, %v1624_v50 }
 0x162   : > { %v1652_v30 = vmul.f32 %v1644_v34, %v1308_v48 }
 0x163   : > { %v1629_v2 = vsel %vm1628_vm5, %v2077_v55, %v1625_v28 }
 0x164   : > { %v1660_v7 = vpack.c.bf16 %v1652_v30, %v1652_v30  ;;  %v1634_v37 = vsel %vm1631_vm6, %v1633_v10, %v1629_v2 }
 0x165   : > { %v1635_v11 = vmul.f32 %v1634_v37, %v1610_v42 }
 0x166   : > { %1669 = vst.msk [vmem:[%s2517_s19 + $0x18] sm:$0xf] %vm1662_vm9, %v1660_v7 }
 0x167   : > { %v2005_v46 = vclamps-f32 %v1635_v11, 1.0 }
 0x169   : > { %v1645_v14 = vadd.f32 1.0, %v2005_v46 }
 0x16b   : > { %v1653_v22 = vmul.f32 %v1645_v14, %v1309_v12 }
 0x16d   : > { %v1661_v19 = vpack.c.bf16 %v1653_v22, %v1653_v22 }
 0x16f   : > { %1670 = vst.msk [vmem:[%s2517_s19 + $0x1c] sm:$0xf] %vm1662_vm9, %v1661_v19 }
 0x170 PF: > { %s13_s14 = sadd.s32 1, %s2100_s14   ;;  %s2665_s12 = smov %s2096_s13 }
 0x171   : > { %p10_p5 = scmp.ge.s32.totalorder %s13_s14, 4   ;;  %s2666_s13 = smov %s2668_s15 }
 0x173   :  { %12 = sbr.rel (!%p10_p5) target bundleno = 2 (0x2), region = 81 }

// kernel: forward.5
= control target key start
LH: loop header
LB: loop body
LE: loop exit
PB: predicated region body
PF: predicated region fallthrough
CT: control target
= control target key end

     0   :  { %s2571_s21 = smov 0   ;;  %s2573_s22 = smov 0   ;;  %s3274_s0 = inlined_call_operand.vmem [shape: bf16[2,10,10,16], index: 0, kind: input, shape index: {}]   ;;  %s3275_s1 = inlined_call_operand.vmem [shape: bf16[9,16,16], index: 1, kind: input, shape index: {}]   ;;  %s3276_s2 = inlined_call_operand.vmem [shape: f32[1,16], index: 2, kind: input, shape index: {}]   ;;  %s3277_s3 = inlined_call_operand.vmem [shape: bf16[2,8,8,8], index: 3, kind: input, shape index: {}]   ;;  %s3278_s4 = inlined_call_operand.vmem [shape: bf16[8,16], index: 4, kind: input, shape index: {}]   ;;  %s3279_s5 = inlined_call_operand.vmem [shape: f32[1,16], index: 5, kind: input, shape index: {}]   ;;  %s3280_s6 = inlined_call_operand.vmem [shape: f32[2,8,8,16], index: 6, kind: output, shape index: {}]  }
   0x1   :  { %s2575_s23 = smov 0  }
   0x2 LB: > { %s28_s24 = sadd.s32 1, %s2530_s22  ;;  %p2180_p0 = scmp.ge.s32.totalorder %s2534_s23, 1  ;;  %s2534_s23 = sphi %s2575_s23, %s16_s23   ;;  %s2530_s22 = sphi %s2573_s22, %s3292_s22   ;;  %s2526_s21 = sphi %s2571_s21, %s3291_s21  }
   0x3   : > { %p30_p1 = scmp.ge.s32.totalorder %s28_s24, 2  ;;  %p270_p2 = scmp.lt.s32.totalorder %s2534_s23, 3 }
   0x5   : > { %s3294_s24 = smov (%p30_p1, %s28_s24), 0  ;;  %p271_p3 = pnand %p2180_p0, %p270_p2 }
   0x6   : > { %p322_p4 = scmp.lt.s32.totalorder (!%p271_p3), %s2526_s21, 1 }
   0x7   : > { %274 = sbr.rel (%p271_p3) target bundleno = 393 (0x189), region = 44 }
   0xc   : > { %v2446_v0 = vld [vmem:[%s3275_s1] sm:$0xff]  ;;  %v2447_v1 = vld [vmem:[%s3275_s1 + $0x8] sm:$0xff]  ;;  %v2448_v2 = vld [vmem:[%s3275_s1 + $0x10] sm:$0xff]  ;;  %s3296_s21 = smov (!%p322_p4, %s2526_s21), 1  ;;  %vm509_vm0 = vcmask 130048   ;;  %vm642_vm4 = vcmask 1042432  }
   0xd   : > { %v2453_v3 = vld [vmem:[%s3275_s1 + $0x18] sm:$0xff]  ;;  %v2454_v4 = vld [vmem:[%s3275_s1 + $0x20] sm:$0xff]  ;;  %2468 = vmatpush.bf16.msra.mxu3 %v2446_v0  ;;  %2467 = vmatpush.bf16.msra.mxu2 %v2447_v1  ;;  %v2455_v5 = vld [vmem:[%s3275_s1 + $0x28] sm:$0xff]  ;;  %s2469_s13 = smul.u32 80, %s3296_s21  ;;  %vm373_vm1 = vsmask.f32 3328 }
   0xe   : > { %529 = vmatpush.bf16.msra.mxu0 %v2447_v1  ;;  %596 = vmatpush.bf16.msra.mxu1 %v2446_v0  ;;  %vm374_vm2 = vsmask.f32 7440  ;;  %vm643_vm5 = vcmask 1046532   ;;  %vm1627_vm7 = vcmask 1043456   ;;  %s2440_s29 = sshll.u32 %s3296_s21, 5  ;;  %vm1614_vm8 = vcmask 64512  }
   0xf   : > { %s2613_s16 = scalar_lea.vmem %s3274_s0, %s2469_s13  ;;  %vm2641_vm3 = vmor %vm373_vm1, %vm374_vm2  ;;  %s2863_s8 = scalar_lea.vmem %s3277_s3, %s2440_s29 }
  0x10   : > { %v2206_v6 = vld [vmem:[%s2613_s16 + $0x20] sm:$0xf]  ;;  %v2444_v7 = vld [vmem:[%s2613_s16 + $0x24] sm:$0xf0]  ;;  %v2620_v11 = vld [vmem:[%s2613_s16 + $0x24] sm:$0x1] }
  0x11   : > { %717 = vmatpush.bf16.msrb.mxu2 %v2448_v2  ;;  %804 = vmatpush.bf16.msrb.mxu3 %v2453_v3  ;;  %v359_v8 = vld [vmem:[%s2613_s16 + $0x20] sm:$0xf]  ;;  %v2207_v9 = vor.u32 %v2444_v7, %v2206_v6  ;;  %v360_v10 = vld [vmem:[%s2613_s16 + $0x28] sm:$0xf]  ;;  %v2623_v12 = vld [vmem:[%s2613_s16 + $0x2c] sm:$0x1] }
  0x12   : > { %1002 = vmatpush.bf16.msrb.mxu0 %v2454_v4  ;;  %1128 = vmatpush.bf16.msrb.mxu1 %v2455_v5  ;;  %v433_v13 = vshrl.u32 %v359_v8, 16  ;;  %v436_v14 = vshll.u32 %v359_v8, 16  ;;  %v442_v15 = vshll.u32 %v2620_v11, 16  ;;  %v447_v16 = vshrl.u32 %v360_v10, 16  ;;  %v355_v17 = vld [vmem:[%s2613_s16] sm:$0xf]  ;;  %vm2716_vm6 = vmor %vm642_vm4, %vm643_vm5 }
  0x13   : > { %2218 = vmatmul.msk.bf16.vlgmr.msra.gmra.mxu3 %vm509_vm0, %v2207_v9  ;;  %v450_v18 = vshll.u32 %v360_v10, 16  ;;  %v456_v19 = vshll.u32 %v2623_v12, 16  ;;  %v356_v20 = vld [vmem:[%s2613_s16 + $0x8] sm:$0xf]  ;;  %v2631_v21 = vld [vmem:[%s2613_s16 + $0x4] sm:$0x1] }
  0x14   : > { %v435_v22 = vrot.slane %v433_v13, 4  ;;  %v438_v23 = vrot.slane %v436_v14, 5  ;;  %v444_v24 = vrot.slane %v442_v15, 5  ;;  %v449_v25 = vrot.slane %v447_v16, 4  ;;  %v2634_v26 = vld [vmem:[%s2613_s16 + $0xc] sm:$0x1] }
  0x15   : > { %v452_v27 = vrot.slane %v450_v18, 5  ;;  %v458_v28 = vrot.slane %v456_v19, 5  ;;  %v377_v29 = vshrl.u32 %v355_v17, 16  ;;  %v380_v30 = vshll.u32 %v355_v17, 16  ;;  %v2198_v31 = vld [vmem:[%s2613_s16] sm:$0xf] }
  0x16   : > { %v439_v32 = vor.u32 %v438_v23, %v435_v22  ;;  %v386_v33 = vshll.u32 %v2631_v21, 16  ;;  %v391_v34 = vshrl.u32 %v356_v20, 16  ;;  %v394_v35 = vshll.u32 %v356_v20, 16  ;;  %v2442_v36 = vld [vmem:[%s2613_s16 + $0x4] sm:$0xf0]  ;;  %s2441_s13 = sshll.u32 %s3296_s21, 6 }
  0x17   : > { %v453_v38 = vor.u32 %v452_v27, %v449_v25  ;;  %v379_v39 = vrot.slane %v377_v29, 4  ;;  %v382_v40 = vrot.slane %v380_v30, 5  ;;  %v400_v41 = vshll.u32 %v2634_v26, 16  ;;  %v2210_v42 = vld [vmem:[%s2613_s16 + $0x30] sm:$0xf]  ;;  %s3129_s15 = scalar_lea.vmem %s3280_s6, %s2441_s13 }
  0x18   : > { %v440_v43 = vrot.slane %v439_v32, 4  ;;  %v393_v44 = vrot.slane %v391_v34, 4  ;;  %v396_v45 = vrot.slane %v394_v35, 5  ;;  %v2445_v46 = vld [vmem:[%s2613_s16 + $0x34] sm:$0xf0]  ;;  %v388_v49 = vrot.slane %v386_v33, 5 }
  0x19   : > { %v454_v47 = vrot.slane %v453_v38, 4  ;;  %v383_v48 = vor.u32 %v382_v40, %v379_v39  ;;  %v361_v50 = vld [vmem:[%s2613_s16 + $0x30] sm:$0xf]  ;;  %v402_v53 = vrot.slane %v400_v41, 5  ;;  %v2199_v54 = vor.u32 %v2442_v36, %v2198_v31  ;;  %v362_v55 = vld [vmem:[%s2613_s16 + $0x38] sm:$0xf] }
  0x1a   : > { %v445_v51 = vsel %vm2641_vm3, %v440_v43, %v444_v24  ;;  %v397_v52 = vor.u32 %v396_v45, %v393_v44  ;;  %v2653_v56 = vld [vmem:[%s2613_s16 + $0x34] sm:$0x1]  ;;  %v2211_v60 = vor.u32 %v2445_v46, %v2210_v42  ;;  %v2659_v63 = vld [vmem:[%s2613_s16 + $0x3c] sm:$0x1]  ;;  %v461_v0 = vshrl.u32 %v361_v50, 16 }
  0x1b   : > { %v459_v57 = vsel %vm2641_vm3, %v454_v47, %v458_v28  ;;  %v495_v58 = vunpack.c.l.b16 %v445_v51  ;;  %v384_v59 = vrot.slane %v383_v48, 4  ;;  %2216 = vmatmul.msk.bf16.vlgmr.msra.gmra.mxu1 %vm509_vm0, %v2199_v54  ;;  %v464_v1 = vshll.u32 %v361_v50, 16  ;;  %v357_v6 = vld [vmem:[%s2613_s16 + $0x10] sm:$0xf]  ;;  %v358_v13 = vld [vmem:[%s2613_s16 + $0x18] sm:$0xf] }
  0x1c   : > { %v496_v61 = vunpack.c.l.b16 %v459_v57  ;;  %v398_v62 = vrot.slane %v397_v52, 4  ;;  %v470_v3 = vshll.u32 %v2653_v56, 16  ;;  %v475_v4 = vshrl.u32 %v362_v55, 16  ;;  %v2669_v14 = vld [vmem:[%s2613_s16 + $0x14] sm:$0x1]  ;;  %v2461_v48 = vld [vmem:[%s3275_s1 + $0x38] sm:$0xff] }
  0x1d   : > { %v389_v2 = vsel %vm2641_vm3, %v384_v59, %v388_v49  ;;  %v478_v5 = vshll.u32 %v362_v55, 16  ;;  %v463_v10 = vrot.slane %v461_v0, 4  ;;  %v466_v16 = vrot.slane %v464_v1, 5  ;;  %v2674_v27 = vld [vmem:[%s2613_s16 + $0x1c] sm:$0x1]  ;;  %v2460_v34 = vld [vmem:[%s3275_s1 + $0x30] sm:$0xff]  ;;  %1413 = vmatpush.bf16.msra.mxu3 %v2461_v48 }
  0x1e   : > { %v501_v7 = vpack.c.b16 %v496_v61, %v495_v58  ;;  %v403_v8 = vsel %vm2641_vm3, %v398_v62, %v402_v53  ;;  %v491_v9 = vunpack.c.l.b16 %v389_v2  ;;  %v472_v17 = vrot.slane %v470_v3, 5  ;;  %v2202_v39 = vld [vmem:[%s2613_s16 + $0x10] sm:$0xf]  ;;  %v2443_v44 = vld [vmem:[%s2613_s16 + $0x14] sm:$0xf0]  ;;  %v2462_v49 = vld [vmem:[%s3275_s1 + $0x40] sm:$0xff] }
  0x1f   : > { %v492_v15 = vunpack.c.l.b16 %v403_v8  ;;  %v477_v18 = vrot.slane %v475_v4, 4  ;;  %v480_v19 = vrot.slane %v478_v5, 5  ;;  %v484_v20 = vshll.u32 %v2659_v63, 16  ;;  %v2272_v47 = vld [vmem:[%s2613_s16 + $0x8] sm:$0xf] }
  0x20   : > { %2194 = vmatmul.msk.bf16.vlgmr.msra.gmra.mxu2 %vm509_vm0, %v501_v7  ;;  %v405_v22 = vshrl.u32 %v357_v6, 16  ;;  %v408_v23 = vshll.u32 %v357_v6, 16  ;;  %v467_v25 = vor.u32 %v466_v16, %v463_v10  ;;  %v414_v28 = vshll.u32 %v2669_v14, 16  ;;  %v2250_v57 = vld [vmem:[%s2613_s16 + $0x8] sm:$0xf] }
  0x21   : > { %v499_v24 = vpack.c.b16 %v492_v15, %v491_v9  ;;  %v419_v29 = vshrl.u32 %v358_v13, 16  ;;  %v481_v30 = vor.u32 %v480_v19, %v477_v18  ;;  %v486_v31 = vrot.slane %v484_v20, 5  ;;  %1215 = vmatpush.bf16.msra.mxu2 %v2460_v34  ;;  %v2449_v58 = vld [vmem:[%s2613_s16 + $0xc] sm:$0xf0]  ;;  %v618_v4 = vld [vmem:[%s2613_s16] sm:$0xe] }
  0x22   : > { %v407_v32 = vrot.slane %v405_v22, 4  ;;  %v410_v33 = vrot.slane %v408_v23, 5  ;;  %v468_v35 = vrot.slane %v467_v25, 4  ;;  %v422_v38 = vshll.u32 %v358_v13, 16  ;;  %v2274_v61 = vld [vmem:[%s2613_s16 + $0x10] sm:$0xf] }
  0x23   : > { %2192 = vmatmul.msk.bf16.vlgmr.msra.gmra.mxu0 %vm509_vm0, %v499_v24  ;;  %2219 = vmatmul.msk.bf16.gmra.mxu3 %vm509_vm0, %v2211_v60  ;;  %v421_v36 = vrot.slane %v419_v29, 4  ;;  %v482_v40 = vrot.slane %v481_v30, 4  ;;  %v416_v42 = vrot.slane %v414_v28, 5  ;;  %v428_v43 = vshll.u32 %v2674_v27, 16  ;;  %v619_v6 = vld [vmem:[%s2613_s16 + $0x8] sm:$0xe] }
  0x24   : > { %v411_v41 = vor.u32 %v410_v33, %v407_v32  ;;  %v473_v45 = vsel %vm2641_vm3, %v468_v35, %v472_v17  ;;  %v424_v46 = vrot.slane %v422_v38, 5  ;;  %v2203_v55 = vor.u32 %v2443_v44, %v2202_v39  ;;  %1539 = vmatpush.bf16.msra.mxu0 %v2462_v49  ;;  %v2298_v9 = vld [vmem:[%s2613_s16 + $0x8] sm:$0xe]  ;;  %v2273_v15 = vld [vmem:[%s2613_s16 + $0xc] sm:$0x1] }
  0x25   : > { %v487_v50 = vsel %vm2641_vm3, %v482_v40, %v486_v31  ;;  %v497_v52 = vunpack.c.l.b16 %v473_v45  ;;  %v430_v54 = vrot.slane %v428_v43, 5  ;;  %v851_v62 = vshrl.u32 %v2272_v47, 16  ;;  %v2275_v16 = vld [vmem:[%s2613_s16 + $0x14] sm:$0x1]  ;;  %v2299_v19 = vld [vmem:[%s2613_s16 + $0x10] sm:$0xe] }
  0x26   : > { %v412_v51 = vrot.slane %v411_v41, 4  ;;  %v425_v53 = vor.u32 %v424_v46, %v421_v36  ;;  %v498_v59 = vunpack.c.l.b16 %v487_v50  ;;  %v854_v0 = vshll.u32 %v2272_v47, 16  ;;  %v1589_v31 = vld [vmem:[%s3278_s4] sm:$0xf]  ;;  %v2276_v48 = vld [vmem:[%s2613_s16 + $0x18] sm:$0xf] }
  0x27   : > { %v647_v1 = vrot.slane %v2631_v21, 5  ;;  %v651_v2 = vrot.slane %v2634_v26, 5  ;;  %v2251_v5 = vor.u32 %v2449_v58, %v2250_v57  ;;  %v853_v7 = vrot.slane %v851_v62, 4  ;;  %v2450_v57 = vld [vmem:[%s2613_s16 + $0x1c] sm:$0xf0] }
  0x28   : > { %v417_v60 = vsel %vm2641_vm3, %v412_v51, %v416_v42  ;;  %v426_v3 = vrot.slane %v425_v53, 4  ;;  %v856_v8 = vrot.slane %v854_v0, 5  ;;  %v865_v17 = vshrl.u32 %v2274_v61, 16  ;;  %v2278_v51 = vld [vmem:[%s2613_s16 + $0x20] sm:$0xf] }
  0x29   : > { %v493_v13 = vunpack.c.l.b16 %v417_v60  ;;  %v502_v18 = vpack.c.b16 %v498_v59, %v497_v52  ;;  %v868_v26 = vshll.u32 %v2274_v61, 16  ;;  %v2220_v20 = vrot.slane %v618_v4, 9  ;;  %v620_v58 = vld [vmem:[%s2613_s16 + $0x10] sm:$0xe]  ;;  %v622_v0 = vld [vmem:[%s2613_s16 + $0x20] sm:$0xe] }
  0x2a   : > { %v431_v10 = vsel %vm2641_vm3, %v426_v3, %v430_v54  ;;  %v2221_v22 = vrot.slane %v619_v6, 9  ;;  %v867_v23 = vrot.slane %v865_v17, 4  ;;  %v2306_v24 = vrot.slane %v2298_v9, 9  ;;  %v2254_v54 = vld [vmem:[%s2613_s16 + $0x18] sm:$0xf] }
  0x2b   : > { %v494_v21 = vunpack.c.l.b16 %v431_v10  ;;  %2217 = vmatmul.msk.bf16.gmra.mxu1 %vm509_vm0, %v2203_v55  ;;  %v857_v25 = vor.u32 %v856_v8, %v853_v7  ;;  %v860_v28 = vshll.u32 %v2273_v15, 16  ;;  %v870_v29 = vrot.slane %v868_v26, 5  ;;  %v2300_v3 = vld [vmem:[%s2613_s16 + $0x18] sm:$0xe]  ;;  %v623_v9 = vld [vmem:[%s2613_s16 + $0x28] sm:$0xe] }
  0x2c   : > { %v874_v30 = vshll.u32 %v2275_v16, 16  ;;  %v1058_v34 = vrot.slane %v2273_v15, 5  ;;  %v2307_v35 = vrot.slane %v2299_v19, 9  ;;  %v1062_v36 = vrot.slane %v2275_v16, 5  ;;  %v621_v7 = vld [vmem:[%s2613_s16 + $0x18] sm:$0xe] }
  0x2d   : > { %v500_v32 = vpack.c.b16 %v494_v21, %v493_v13  ;;  %v871_v38 = vor.u32 %v870_v29, %v867_v23  ;;  %v1629_v41 = vsel %vm1627_vm7, %v1589_v31, 0  ;;  %v648_v42 = vsel %vm2716_vm6, %v2220_v20, %v647_v1  ;;  %v2301_v16 = vld [vmem:[%s2613_s16 + $0x20] sm:$0xe] }
  0x2e   : > { %v1059_v39 = vsel %vm2716_vm6, %v2306_v24, %v1058_v34  ;;  %v1063_v40 = vsel %vm2716_vm6, %v2307_v35, %v1062_v36  ;;  %v652_v43 = vsel %vm2716_vm6, %v2221_v22, %v651_v2  ;;  %v858_v44 = vrot.slane %v857_v25, 4  ;;  %1638 = vmatpush.bf16.msra.mxu1 %v1629_v41  ;;  %v2279_v22 = vld [vmem:[%s2613_s16 + $0x24] sm:$0x1]  ;;  %v2390_v37 = vld [vmem:[%s2613_s16 + $0x40] sm:$0xe] }
  0x2f   : > { %v862_v45 = vrot.slane %v860_v28, 5  ;;  %v872_v46 = vrot.slane %v871_v38, 4  ;;  %v876_v47 = vrot.slane %v874_v30, 5  ;;  %v1091_v49 = vunpack.c.l.b16 %v1059_v39 }
  0x30   : > { %2195 = vmatmul.msk.bf16.gmra.mxu2 %vm509_vm0, %v502_v18  ;;  %v1092_v50 = vunpack.c.l.b16 %v1063_v40  ;;  %v680_v52 = vunpack.c.l.b16 %v648_v42  ;;  %v681_v53 = vunpack.c.l.b16 %v652_v43  ;;  %v879_v59 = vshrl.u32 %v2276_v48, 16  ;;  %v2277_v18 = vld [vmem:[%s2613_s16 + $0x1c] sm:$0x1]  ;;  %v2280_v43 = vld [vmem:[%s2613_s16 + $0x28] sm:$0xf] }
  0x31   : > { %v863_v55 = vsel %vm2641_vm3, %v858_v44, %v862_v45  ;;  %v877_v60 = vsel %vm2641_vm3, %v872_v46, %v876_v47  ;;  %v882_v61 = vshll.u32 %v2276_v48, 16  ;;  %v893_v62 = vshrl.u32 %v2278_v51, 16  ;;  %v2282_v46 = vld [vmem:[%s2613_s16 + $0x30] sm:$0xf] }
  0x32   : > { %v1099_v1 = vpack.c.b16 %v1092_v50, %v1091_v49  ;;  %v896_v2 = vshll.u32 %v2278_v51, 16  ;;  %v688_v4 = vpack.c.b16 %v681_v53, %v680_v52  ;;  %v2255_v6 = vor.u32 %v2450_v57, %v2254_v54  ;;  %v624_v54 = vld [vmem:[%s2613_s16 + $0x30] sm:$0xe] }
  0x33   : > { %2193 = vmatmul.msk.bf16.gmra.mxu0 %vm509_vm0, %v500_v32  ;;  %2268 = vmatmul.msk.bf16.vlgmr.msrb.gmra.mxu3 %vm509_vm0, %v2251_v5  ;;  %v965_v5 = vunpack.c.l.b16 %v863_v55  ;;  %v2222_v8 = vrot.slane %v620_v58, 9  ;;  %v966_v10 = vunpack.c.l.b16 %v877_v60  ;;  %v655_v13 = vrot.slane %v2669_v14, 5  ;;  %v625_v60 = vld [vmem:[%s2613_s16 + $0x38] sm:$0xe] }
  0x34   : > { %v881_v15 = vrot.slane %v879_v59, 4  ;;  %v2224_v17 = vrot.slane %v622_v0, 9  ;;  %v884_v21 = vrot.slane %v882_v61, 5  ;;  %v895_v26 = vrot.slane %v893_v62, 4 }
  0x35   : > { %v2308_v19 = vrot.slane %v2300_v3, 9  ;;  %v663_v20 = vrot.slane %v2620_v11, 5  ;;  %v898_v23 = vrot.slane %v896_v2, 5  ;;  %v1066_v24 = vrot.slane %v2277_v18, 5 }
  0x36   : > { %v2225_v25 = vrot.slane %v623_v9, 9  ;;  %v667_v28 = vrot.slane %v2623_v12, 5  ;;  %v2223_v29 = vrot.slane %v621_v7, 9  ;;  %v2309_v30 = vrot.slane %v2301_v16, 9  ;;  %v2302_v7 = vld [vmem:[%s2613_s16 + $0x28] sm:$0xe] }
  0x37   : > { %v1070_v14 = vrot.slane %v2279_v22, 5  ;;  %v664_v31 = vsel %vm2716_vm6, %v2224_v17, %v663_v20  ;;  %v659_v32 = vrot.slane %v2674_v27, 5  ;;  %v888_v34 = vshll.u32 %v2277_v18, 16  ;;  %v2281_v17 = vld [vmem:[%s2613_s16 + $0x2c] sm:$0x1] }
  0x38   : > { %v668_v11 = vsel %vm2716_vm6, %v2225_v25, %v667_v28  ;;  %v684_v35 = vunpack.c.l.b16 %v664_v31  ;;  %v973_v36 = vpack.c.b16 %v966_v10, %v965_v5  ;;  %v885_v38 = vor.u32 %v884_v21, %v881_v15  ;;  %v2303_v15 = vld [vmem:[%s2613_s16 + $0x30] sm:$0xe]  ;;  %v2283_v18 = vld [vmem:[%s2613_s16 + $0x34] sm:$0x1]  ;;  %v2258_v20 = vld [vmem:[%s2613_s16 + $0x28] sm:$0xf] }
  0x39   : > { %v902_v39 = vshll.u32 %v2279_v22, 16  ;;  %v685_v40 = vunpack.c.l.b16 %v668_v11  ;;  %v899_v12 = vor.u32 %v898_v23, %v895_v26  ;;  %v1067_v41 = vsel %vm2716_vm6, %v2308_v19, %v1066_v24  ;;  %v2451_v23 = vld [vmem:[%s2613_s16 + $0x2c] sm:$0xf0] }
  0x3a   : > { %v1071_v27 = vsel %vm2716_vm6, %v2309_v30, %v1070_v14  ;;  %v656_v44 = vsel %vm2716_vm6, %v2222_v8, %v655_v13  ;;  %v660_v45 = vsel %vm2716_vm6, %v2223_v29, %v659_v32  ;;  %v886_v47 = vrot.slane %v885_v38, 4 }
  0x3b   : > { %2320 = vmatmul.msk.bf16.vlgmr.msrb.gmra.mxu1 %vm509_vm0, %v1099_v1  ;;  %v2761_v42 = vpack.c.b16 %v685_v40, %v684_v35  ;;  %v890_v48 = vrot.slane %v888_v34, 5  ;;  %v904_v49 = vrot.slane %v902_v39, 5  ;;  %v1093_v50 = vunpack.c.l.b16 %v1067_v41 }
  0x3c   : > { %v900_v51 = vrot.slane %v899_v12, 4  ;;  %v1094_v52 = vunpack.c.l.b16 %v1071_v27  ;;  %v907_v53 = vshrl.u32 %v2280_v43, 16  ;;  %v671_v55 = vrot.slane %v2653_v56, 5 }
  0x3d   : > { %v910_v57 = vshll.u32 %v2280_v43, 16  ;;  %v921_v58 = vshrl.u32 %v2282_v46, 16  ;;  %v924_v59 = vshll.u32 %v2282_v46, 16  ;;  %v2226_v61 = vrot.slane %v624_v54, 9  ;;  %v2284_v43 = vld [vmem:[%s2613_s16 + $0x38] sm:$0xf] }
  0x3e   : > { %v682_v62 = vunpack.c.l.b16 %v656_v44  ;;  %v683_v0 = vunpack.c.l.b16 %v660_v45  ;;  %v891_v1 = vsel %vm2641_vm3, %v886_v47, %v890_v48  ;;  %v2227_v3 = vrot.slane %v625_v60, 9  ;;  %v2286_v44 = vld [vmem:[%s2613_s16 + $0x40] sm:$0xf]  ;;  %v2358_v47 = vld [vmem:[%s2613_s16 + $0x10] sm:$0xf] }
  0x3f   : > { %v672_v2 = vsel %vm2716_vm6, %v2226_v61, %v671_v55  ;;  %v905_v56 = vsel %vm2641_vm3, %v900_v51, %v904_v49  ;;  %v1100_v5 = vpack.c.b16 %v1094_v52, %v1093_v50  ;;  %v912_v9 = vrot.slane %v910_v57, 5  ;;  %v2360_v48 = vld [vmem:[%s2613_s16 + $0x18] sm:$0xf]  ;;  %v2305_v55 = vld [vmem:[%s2613_s16 + $0x40] sm:$0xe] }
  0x40   : > { %2234 = vmatmul.msk.bf16.vlgmr.msrb.gmra.mxu2 %vm509_vm0, %v688_v4  ;;  %v675_v4 = vrot.slane %v2659_v63, 5  ;;  %v686_v8 = vunpack.c.l.b16 %v672_v2  ;;  %v923_v10 = vrot.slane %v921_v58, 4  ;;  %v926_v13 = vrot.slane %v924_v59, 5  ;;  %v2304_v54 = vld [vmem:[%s2613_s16 + $0x38] sm:$0xe] }
  0x41   : > { %v689_v63 = vpack.c.b16 %v683_v0, %v682_v62  ;;  %v967_v26 = vunpack.c.l.b16 %v891_v1  ;;  %v968_v19 = vunpack.c.l.b16 %v905_v56  ;;  %v2310_v22 = vrot.slane %v2302_v7, 9  ;;  %v2262_v0 = vld [vmem:[%s2613_s16 + $0x38] sm:$0xf]  ;;  %v2285_v1 = vld [vmem:[%s2613_s16 + $0x3c] sm:$0x1] }
  0x42   : > { %v676_v16 = vsel %vm2716_vm6, %v2227_v3, %v675_v4  ;;  %v1074_v24 = vrot.slane %v2281_v17, 5  ;;  %v2311_v25 = vrot.slane %v2303_v15, 9  ;;  %v1078_v28 = vrot.slane %v2283_v18, 5  ;;  %v2287_v2 = vld [vmem:[%s2613_s16 + $0x44] sm:$0x1] }
  0x43   : > { %2294 = vmatmul.msk.bf16.vlgmr.msrb.gmra.mxu0 %vm509_vm0, %v973_v36  ;;  %2269 = vmatmul.msk.bf16.gmra.mxu3 %vm509_vm0, %v2255_v6  ;;  %v909_v6 = vrot.slane %v907_v53, 4  ;;  %v687_v21 = vunpack.c.l.b16 %v676_v16  ;;  %v916_v14 = vshll.u32 %v2281_v17, 16  ;;  %v927_v31 = vor.u32 %v926_v13, %v923_v10 }
  0x44   : > { %v930_v32 = vshll.u32 %v2283_v18, 16  ;;  %v974_v34 = vpack.c.b16 %v968_v19, %v967_v26  ;;  %v2259_v11 = vor.u32 %v2451_v23, %v2258_v20  ;;  %v1075_v35 = vsel %vm2716_vm6, %v2310_v22, %v1074_v24  ;;  %v2815_v18 = vld [vmem:[%s2613_s16 + $0x14] sm:$0x1] }
  0x45   : > { %v2790_v29 = vpack.c.b16 %v687_v21, %v686_v8  ;;  %v913_v30 = vor.u32 %v912_v9, %v909_v6  ;;  %v1079_v36 = vsel %vm2716_vm6, %v2311_v25, %v1078_v28  ;;  %v918_v39 = vrot.slane %v916_v14, 5  ;;  %v2452_v6 = vld [vmem:[%s2613_s16 + $0x3c] sm:$0xf0]  ;;  %v2818_v21 = vld [vmem:[%s2613_s16 + $0x1c] sm:$0x1] }
  0x46   : > { %v928_v40 = vrot.slane %v927_v31, 4  ;;  %v932_v12 = vrot.slane %v930_v32, 5  ;;  %v1095_v41 = vunpack.c.l.b16 %v1075_v35  ;;  %v1096_v27 = vunpack.c.l.b16 %v1079_v36 }
  0x47   : > { %v914_v38 = vrot.slane %v913_v30, 4  ;;  %v935_v49 = vshrl.u32 %v2284_v43, 16  ;;  %v938_v50 = vshll.u32 %v2284_v43, 16  ;;  %v949_v51 = vshrl.u32 %v2286_v44, 16 }
  0x48   : > { %v933_v46 = vsel %vm2641_vm3, %v928_v40, %v932_v12  ;;  %v952_v52 = vshll.u32 %v2286_v44, 16  ;;  %v1101_v53 = vpack.c.b16 %v1096_v27, %v1095_v41  ;;  %v1262_v57 = vshrl.u32 %v2358_v47, 16  ;;  %v2364_v40 = vld [vmem:[%s2613_s16 + $0x28] sm:$0xf] }
  0x49   : > { %v919_v45 = vsel %vm2641_vm3, %v914_v38, %v918_v39  ;;  %v1265_v58 = vshll.u32 %v2358_v47, 16  ;;  %v1276_v59 = vshrl.u32 %v2360_v48, 16  ;;  %v1279_v60 = vshll.u32 %v2360_v48, 16  ;;  %v2362_v39 = vld [vmem:[%s2613_s16 + $0x20] sm:$0xf] }
  0x4a   : > { %v969_v61 = vunpack.c.l.b16 %v919_v45  ;;  %v970_v62 = vunpack.c.l.b16 %v933_v46  ;;  %v937_v3 = vrot.slane %v935_v49, 4  ;;  %v940_v4 = vrot.slane %v938_v50, 5 }
  0x4b   : > { %2321 = vmatmul.msk.bf16.gmra.mxu1 %vm509_vm0, %v1100_v5  ;;  %v951_v56 = vrot.slane %v949_v51, 4  ;;  %v954_v5 = vrot.slane %v952_v52, 5  ;;  %v2312_v7 = vrot.slane %v2304_v54, 9  ;;  %v1082_v8 = vrot.slane %v2285_v1, 5 }
  0x4c   : > { %v2313_v9 = vrot.slane %v2305_v55, 9  ;;  %v1086_v10 = vrot.slane %v2287_v2, 5  ;;  %v1264_v13 = vrot.slane %v1262_v57, 4  ;;  %v1267_v15 = vrot.slane %v1265_v58, 5 }
  0x4d   : > { %v1278_v16 = vrot.slane %v1276_v59, 4  ;;  %v1281_v17 = vrot.slane %v1279_v60, 5  ;;  %v2263_v26 = vor.u32 %v2452_v6, %v2262_v0  ;;  %v944_v19 = vshll.u32 %v2285_v1, 16  ;;  %v2384_v0 = vld [vmem:[%s2613_s16 + $0x10] sm:$0xe] }
  0x4e   : > { %v958_v20 = vshll.u32 %v2287_v2, 16  ;;  %v941_v22 = vor.u32 %v940_v4, %v937_v3  ;;  %v955_v23 = vor.u32 %v954_v5, %v951_v56  ;;  %v1083_v24 = vsel %vm2716_vm6, %v2312_v7, %v1082_v8  ;;  %v2385_v1 = vld [vmem:[%s2613_s16 + $0x18] sm:$0xe] }
  0x4f   : > { %v1087_v25 = vsel %vm2716_vm6, %v2313_v9, %v1086_v10  ;;  %v1268_v28 = vor.u32 %v1267_v15, %v1264_v13  ;;  %v1271_v30 = vshll.u32 %v2815_v18, 16  ;;  %v1282_v14 = vor.u32 %v1281_v17, %v1278_v16 }
  0x50   : > { %2235 = vmatmul.msk.bf16.gmra.mxu2 %vm509_vm0, %v689_v63  ;;  %v975_v63 = vpack.c.b16 %v970_v62, %v969_v61  ;;  %v1285_v31 = vshll.u32 %v2818_v21, 16  ;;  %v946_v32 = vrot.slane %v944_v19, 5  ;;  %v956_v35 = vrot.slane %v955_v23, 4  ;;  %v2841_v61 = vld [vmem:[%s2613_s16 + $0x24] sm:$0x1] }
  0x51   : > { %v1097_v36 = vunpack.c.l.b16 %v1083_v24  ;;  %v1098_v38 = vunpack.c.l.b16 %v1087_v25  ;;  %v1269_v12 = vrot.slane %v1268_v28, 4  ;;  %v1283_v41 = vrot.slane %v1282_v14, 4  ;;  %v2844_v62 = vld [vmem:[%s2613_s16 + $0x2c] sm:$0x1]  ;;  %v2463_v25 = vld [vmem:[%s2863_s8] sm:$0xff] }
  0x52   : > { %v1287_v27 = vrot.slane %v1285_v31, 5  ;;  %v1290_v43 = vshrl.u32 %v2362_v39, 16  ;;  %v1293_v44 = vshll.u32 %v2362_v39, 16  ;;  %v1304_v45 = vshrl.u32 %v2364_v40, 16  ;;  %v2336_v28 = vld [vmem:[%s2613_s16 + $0x10] sm:$0xf] }
  0x53   : > { %2295 = vmatmul.msk.bf16.gmra.mxu0 %vm509_vm0, %v974_v34  ;;  %2270 = vmatmul.msk.bf16.gmra.mxu3 %vm509_vm0, %v2259_v11  ;;  %v960_v34 = vrot.slane %v958_v20, 5  ;;  %v942_v11 = vrot.slane %v941_v22, 4  ;;  %v1307_v46 = vshll.u32 %v2364_v40, 16  ;;  %v1102_v49 = vpack.c.b16 %v1098_v38, %v1097_v36  ;;  %v2878_v40 = vld [vmem:[%s2613_s16 + $0x34] sm:$0x1] }
  0x54   : > { %v1288_v51 = vsel %vm2641_vm3, %v1283_v41, %v1287_v27  ;;  %v1292_v52 = vrot.slane %v1290_v43, 4  ;;  %v1306_v54 = vrot.slane %v1304_v45, 4  ;;  %v1299_v3 = vshll.u32 %v2841_v61, 16  ;;  %v2386_v27 = vld [vmem:[%s2613_s16 + $0x20] sm:$0xe] }
  0x55   : > { %v947_v47 = vsel %vm2641_vm3, %v942_v11, %v946_v32  ;;  %v961_v48 = vsel %vm2641_vm3, %v956_v35, %v960_v34  ;;  %v1309_v55 = vrot.slane %v1307_v46, 5  ;;  %v1377_v60 = vunpack.c.l.b16 %v1288_v51  ;;  %v2387_v43 = vld [vmem:[%s2613_s16 + $0x28] sm:$0xe] }
  0x56   : > { %v971_v57 = vunpack.c.l.b16 %v947_v47  ;;  %v972_v58 = vunpack.c.l.b16 %v961_v48  ;;  %v1313_v56 = vshll.u32 %v2844_v62, 16  ;;  %v2392_v7 = vrot.slane %v2384_v0, 9 }
  0x57   : > { %v1310_v4 = vor.u32 %v1309_v55, %v1306_v54  ;;  %v1469_v8 = vrot.slane %v2815_v18, 5  ;;  %v2393_v9 = vrot.slane %v2385_v1, 9  ;;  %v1473_v10 = vrot.slane %v2818_v21, 5 }
  0x58   : > { %v976_v5 = vpack.c.b16 %v972_v58, %v971_v57  ;;  %v1301_v15 = vrot.slane %v1299_v3, 5  ;;  %v1315_v17 = vrot.slane %v1313_v56, 5  ;;  %v1327_v45 = vshll.u32 %v2878_v40, 16  ;;  %v2370_v57 = vld [vmem:[%s2613_s16 + $0x40] sm:$0xf] }
  0x59   : > { %v1311_v16 = vrot.slane %v1310_v4, 4  ;;  %v1474_v18 = vsel %vm2716_vm6, %v2393_v9, %v1473_v10  ;;  %v2394_v48 = vrot.slane %v2386_v27, 9  ;;  %v1481_v51 = vrot.slane %v2844_v62, 5  ;;  %v2372_v58 = vld [vmem:[%s2613_s16 + $0x48] sm:$0xf] }
  0x5a   : > { %v1503_v31 = vunpack.c.l.b16 %v1474_v18  ;;  %v1346_v3 = vshrl.u32 %v2370_v57, 16  ;;  %v1349_v4 = vshll.u32 %v2370_v57, 16  ;;  %v1360_v56 = vshrl.u32 %v2372_v58, 16  ;;  %v2458_v27 = vld [vmem:[%s2613_s16 + $0x34] sm:$0xf0] }
  0x5b   : > { %2322 = vmatmul.msk.bf16.gmra.mxu1 %vm509_vm0, %v1101_v53  ;;  %v1295_v53 = vrot.slane %v1293_v44, 5  ;;  %v1316_v19 = vsel %vm2641_vm3, %v1311_v16, %v1315_v17  ;;  %v2398_v57 = vrot.slane %v2390_v37, 9 }
  0x5c   : > { %v1379_v34 = vunpack.c.l.b16 %v1316_v19  ;;  %v1362_v16 = vrot.slane %v1360_v56, 4  ;;  %v2389_v19 = vld [vmem:[%s2613_s16 + $0x38] sm:$0xe] }
  0x5d   : > { %v1296_v2 = vor.u32 %v1295_v53, %v1292_v52  ;;  %v1329_v53 = vrot.slane %v1327_v45, 5 }
  0x5f   : > { %v1297_v13 = vrot.slane %v1296_v2, 4  ;;  %v2464_v2 = vld [vmem:[%s2863_s8 + $0x8] sm:$0xff] }
  0x60   : > { %2236 = vmatmul.msk.bf16.gmra.mxu2 %vm509_vm0, %v2761_v42  ;;  %v1273_v42 = vrot.slane %v1271_v30, 5  ;;  %v2456_v30 = vld [vmem:[%s2613_s16 + $0x14] sm:$0xf0] }
  0x61   : > { %v1302_v21 = vsel %vm2641_vm3, %v1297_v13, %v1301_v15  ;;  %v2337_v39 = vor.u32 %v2456_v30, %v2336_v28  ;;  %v1348_v13 = vrot.slane %v1346_v3, 4  ;;  %v1351_v15 = vrot.slane %v1349_v4, 5  ;;  %v2466_v3 = vld [vmem:[%s2863_s8 + $0x18] sm:$0xff] }
  0x62   : > { %v1274_v50 = vsel %vm2641_vm3, %v1269_v12, %v1273_v42  ;;  %v1378_v32 = vunpack.c.l.b16 %v1302_v21  ;;  %v2881_v12 = vld [vmem:[%s2613_s16 + $0x3c] sm:$0x1]  ;;  %v2388_v21 = vld [vmem:[%s2613_s16 + $0x30] sm:$0xe]  ;;  %v1485_v28 = vrot.slane %v2878_v40, 5  ;;  %v2397_v30 = vrot.slane %v2389_v19, 9 }
  0x63   : > { %2296 = vmatmul.msk.bf16.gmra.mxu0 %vm509_vm0, %v975_v63  ;;  %2271 = vmatmul.msk.bf16.gmra.mxu3 %vm509_vm0, %v2263_v26  ;;  %v1376_v59 = vunpack.c.l.b16 %v1274_v50  ;;  %v2366_v63 = vld [vmem:[%s2613_s16 + $0x30] sm:$0xf]  ;;  %v2368_v26 = vld [vmem:[%s2613_s16 + $0x38] sm:$0xf]  ;;  %v1341_v47 = vshll.u32 %v2881_v12, 16  ;;  %v2395_v50 = vrot.slane %v2387_v43, 9 }
  0x64   : > { %v1318_v20 = vshrl.u32 %v2366_v63, 16  ;;  %v1321_v22 = vshll.u32 %v2366_v63, 16  ;;  %v1332_v23 = vshrl.u32 %v2368_v26, 16  ;;  %v1335_v24 = vshll.u32 %v2368_v26, 16  ;;  %v2371_v63 = vld [vmem:[%s2613_s16 + $0x44] sm:$0x1] }
  0x65   : > { %v1384_v6 = vpack.c.b16 %v1377_v60, %v1376_v59  ;;  %v1385_v41 = vpack.c.b16 %v1379_v34, %v1378_v32  ;;  %v1343_v55 = vrot.slane %v1341_v47, 5  ;;  %v2340_v59 = vld [vmem:[%s2613_s16 + $0x20] sm:$0xf]  ;;  %v2457_v60 = vld [vmem:[%s2613_s16 + $0x24] sm:$0xf0] }
  0x66   : > { %v1320_v11 = vrot.slane %v1318_v20, 4  ;;  %v1323_v35 = vrot.slane %v1321_v22, 5  ;;  %v1334_v36 = vrot.slane %v1332_v23, 4  ;;  %v1337_v38 = vrot.slane %v1335_v24, 5  ;;  %v2373_v26 = vld [vmem:[%s2613_s16 + $0x4c] sm:$0x1] }
  0x67   : > { %v1352_v20 = vor.u32 %v1351_v15, %v1348_v13  ;;  %v1355_v22 = vshll.u32 %v2371_v63, 16  ;;  %v1369_v24 = vshll.u32 %v2373_v26, 16 }
  0x68   : > { %v1324_v44 = vor.u32 %v1323_v35, %v1320_v11  ;;  %v1338_v46 = vor.u32 %v1337_v38, %v1334_v36 }
  0x69   : > { %v1357_v32 = vrot.slane %v1355_v22, 5  ;;  %v1371_v11 = vrot.slane %v1369_v24, 5 }
  0x6a   : > { %v1325_v52 = vrot.slane %v1324_v44, 4  ;;  %v1339_v54 = vrot.slane %v1338_v46, 4 }
  0x6b   : > { %2323 = vmatmul.msk.bf16.gmra.mxu1 %vm509_vm0, %v1102_v49  ;;  %v1477_v49 = vrot.slane %v2841_v61, 5  ;;  %v1482_v61 = vsel %vm2716_vm6, %v2395_v50, %v1481_v51 }
  0x6c   : > { %v1330_v62 = vsel %vm2641_vm3, %v1325_v52, %v1329_v53  ;;  %v1344_v1 = vsel %vm2641_vm3, %v1339_v54, %v1343_v55  ;;  %v2391_v54 = vld [vmem:[%s2613_s16 + $0x48] sm:$0xe] }
  0x6d   : > { %v1478_v0 = vsel %vm2716_vm6, %v2394_v48, %v1477_v49  ;;  %v1380_v9 = vunpack.c.l.b16 %v1330_v62  ;;  %v1381_v10 = vunpack.c.l.b16 %v1344_v1 }
  0x6f   : > { %v1386_v18 = vpack.c.b16 %v1381_v10, %v1380_v9 }
  0x70   : > { %2237 = vmatmul.msk.bf16.gmra.mxu2 %vm509_vm0, %v2790_v29  ;;  %v1470_v29 = vsel %vm2716_vm6, %v2392_v7, %v1469_v8  ;;  %v1504_v7 = vunpack.c.l.b16 %v1478_v0  ;;  %v1505_v8 = vunpack.c.l.b16 %v1482_v61  ;;  %v1497_v0 = vrot.slane %v2373_v26, 5 }
  0x71   : > { %v1502_v14 = vunpack.c.l.b16 %v1470_v29 }
  0x72   : > { %v1511_v29 = vpack.c.b16 %v1505_v8, %v1504_v7 }
  0x73   : > { %2297 = vmatmul.msk.bf16.gmra.mxu0 %vm509_vm0, %v976_v5  ;;  %2380 = vmatmul.msk.bf16.vlgmr.msra.gmra.mxu3 %vm509_vm0, %v1384_v6  ;;  %v1510_v42 = vpack.c.b16 %v1503_v31, %v1502_v14  ;;  %v1363_v5 = vshll.u32 %v2372_v58, 16  ;;  %v2341_v6 = vor.u32 %v2457_v60, %v2340_v59  ;;  %v1489_v14 = vrot.slane %v2881_v12, 5 }
  0x74   : > { %v1353_v31 = vrot.slane %v1352_v20, 4  ;;  %v1493_v59 = vrot.slane %v2371_v63, 5  ;;  %v2399_v60 = vrot.slane %v2391_v54, 9 }
  0x75   : > { %v1365_v17 = vrot.slane %v1363_v5, 5  ;;  %v1490_v38 = vsel %vm2716_vm6, %v2397_v30, %v1489_v14  ;;  %v2348_v5 = vld [vmem:[%s2613_s16 + $0x40] sm:$0xf] }
  0x76   : > { %v1507_v44 = vunpack.c.l.b16 %v1490_v38  ;;  %v1494_v1 = vsel %vm2716_vm6, %v2398_v57, %v1493_v59 }
  0x77   : > { %v1366_v23 = vor.u32 %v1365_v17, %v1362_v16  ;;  %v1508_v8 = vunpack.c.l.b16 %v1494_v1 }
  0x79   : > { %v1367_v34 = vrot.slane %v1366_v23, 4 }
  0x7b   : > { %2426 = vmatmul.msk.bf16.vlgmr.msra.gmra.mxu1 %vm1614_vm8, %v2463_v25  ;;  %v2396_v25 = vrot.slane %v2388_v21, 9  ;;  %v1372_v40 = vsel %vm2641_vm3, %v1367_v34, %v1371_v11 }
  0x7c   : > { %v1383_v46 = vunpack.c.l.b16 %v1372_v40 }
  0x7d   : > { %v1486_v36 = vsel %vm2716_vm6, %v2396_v25, %v1485_v28 }
  0x7e   : > { %v1506_v43 = vunpack.c.l.b16 %v1486_v36 }
  0x80   : > { %2354 = vmatmul.msk.bf16.vlgmr.msra.gmra.mxu2 %vm509_vm0, %v2337_v39  ;;  %v2465_v39 = vld [vmem:[%s2863_s8 + $0x10] sm:$0xff]  ;;  %v1512_v49 = vpack.c.b16 %v1507_v44, %v1506_v43 }
  0x83   : > { %2406 = vmatmul.msk.bf16.vlgmr.msra.gmra.mxu0 %vm509_vm0, %v1510_v42  ;;  %2381 = vmatmul.msk.bf16.gmra.mxu3 %vm509_vm0, %v1385_v41  ;;  %v1358_v42 = vsel %vm2641_vm3, %v1353_v31, %v1357_v32  ;;  %v2344_v41 = vld [vmem:[%s2613_s16 + $0x30] sm:$0xf] }
  0x84   : > { %v1382_v45 = vunpack.c.l.b16 %v1358_v42  ;;  %v2345_v47 = vor.u32 %v2458_v27, %v2344_v41 }
  0x86   : > { %v1387_v50 = vpack.c.b16 %v1383_v46, %v1382_v45 }
  0x8b   : > { %2427 = vmatmul.msk.bf16.gmra.mxu1 %vm1614_vm8, %v2464_v2  ;;  %v1498_v2 = vsel %vm2716_vm6, %v2399_v60, %v1497_v0 }
  0x8c   : > { %v1509_v9 = vunpack.c.l.b16 %v1498_v2 }
  0x8e   : > { %v1513_v16 = vpack.c.b16 %v1509_v9, %v1508_v8 }
  0x90   : > { %2355 = vmatmul.msk.bf16.gmra.mxu2 %vm509_vm0, %v2341_v6  ;;  %v2459_v6 = vld [vmem:[%s2613_s16 + $0x44] sm:$0xf0] }
  0x91   : > { %v2349_v13 = vor.u32 %v2459_v6, %v2348_v5 }
  0x93   : > { %2407 = vmatmul.msk.bf16.gmra.mxu0 %vm509_vm0, %v1511_v29  ;;  %2382 = vmatmul.msk.bf16.gmra.mxu3 %vm509_vm0, %v1386_v18 }
  0x96   : > { %v608_v35 = vpop.f32.mrf.mxu3 }
  0x98   : > { %v598_v12 = vpop.f32.mrf.mxu1 }
  0x9b   : > { %2428 = vmatmul.msk.bf16.gmra.mxu1 %vm1614_vm8, %v2465_v39 }
  0x9e   : > { %v610_v48 = vpop.f32.mrf.mxu3 }
  0xa0   : > { %v531_v51 = vpop.f32.mrf.mxu0  ;;  %2356 = vmatmul.msk.bf16.gmra.mxu2 %vm509_vm0, %v2345_v47  ;;  %v600_v53 = vpop.f32.mrf.mxu1 }
  0xa1   : > { %v2929_v52 = vadd.f32 %v598_v12, %v531_v51 }
  0xa3   : > { %2408 = vmatmul.msk.bf16.gmra.mxu0 %vm509_vm0, %v1512_v49  ;;  %v541_v55 = vpop.f32.mrf.mxu2  ;;  %2383 = vmatmul.msk.bf16.gmra.mxu3 %vm509_vm0, %v1387_v50 }
  0xa4   : > { %v609_v58 = vadd.f32 %v608_v35, %v541_v55 }
  0xa6   : > { %v613_v61 = vpop.f32.mrf.mxu3 }
  0xa8   : > { %v533_v62 = vpop.f32.mrf.mxu0  ;;  %v603_v56 = vpop.f32.mrf.mxu1 }
  0xa9   : > { %v2939_v4 = vadd.f32 %v600_v53, %v533_v62 }
  0xab   : > { %v543_v7 = vpop.f32.mrf.mxu2  ;;  %2429 = vmatmul.msk.bf16.gmra.mxu1 %vm1614_vm8, %v2466_v3 }
  0xac   : > { %v611_v10 = vadd.f32 %v610_v48, %v543_v7 }
  0xae   : > { %v615_v15 = vpop.f32.mrf.mxu3 }
  0xb0   : > { %v536_v17 = vpop.f32.mrf.mxu0  ;;  %2357 = vmatmul.msk.bf16.gmra.mxu2 %vm509_vm0, %v2349_v13  ;;  %v605_v63 = vpop.f32.mrf.mxu1 }
  0xb1   : > { %v2945_v33 = vadd.f32 %v603_v56, %v536_v17 }
  0xb3   : > { %2409 = vmatmul.msk.bf16.gmra.mxu0 %vm509_vm0, %v1513_v16  ;;  %v546_v26 = vpop.f32.mrf.mxu2 }
  0xb4   : > { %v614_v29 = vadd.f32 %v613_v61, %v546_v26 }
  0xb6   : > { %v806_v18 = vpop.f32.mrf.mxu3 }
  0xb8   : > { %v538_v21 = vpop.f32.mrf.mxu0  ;;  %v1130_v20 = vpop.f32.mrf.mxu1 }
  0xb9   : > { %v2948_v19 = vadd.f32 %v605_v63, %v538_v21 }
  0xbb   : > { %v548_v22 = vpop.f32.mrf.mxu2 }
  0xbc   : > { %v616_v23 = vadd.f32 %v615_v15, %v548_v22 }
  0xbe   : > { %v808_v24 = vpop.f32.mrf.mxu3 }
  0xc0   : > { %v1004_v25 = vpop.f32.mrf.mxu0  ;;  %v2950_v28 = vpop.f32.mrf.mxu1 }
  0xc3   : > { %v719_v30 = vpop.f32.mrf.mxu2 }
  0xc6   : > { %v811_v14 = vpop.f32.mrf.mxu3 }
  0xc8   : > { %v1006_v31 = vpop.f32.mrf.mxu0  ;;  %v2952_v32 = vpop.f32.mrf.mxu1 }
  0xcb   : > { %v721_v34 = vpop.f32.mrf.mxu2 }
  0xcc   : > { %v740_v9 = vadd.f32 %v721_v34, %v2939_v4 }
  0xce   : > { %v2954_v11 = vpop.f32.mrf.mxu3  ;;  %v827_v26 = vadd.f32 %v808_v24, %v740_v9 }
  0xd0   : > { %v2956_v35 = vpop.f32.mrf.mxu0  ;;  %v2958_v36 = vpop.f32.mrf.mxu1 }
  0xd3   : > { %v724_v38 = vpop.f32.mrf.mxu2 }
  0xd6   : > { %v816_v39 = vpop.f32.mrf.mxu3 }
  0xd8   : > { %v2960_v42 = vpop.f32.mrf.mxu0  ;;  %v1140_v40 = vpop.f32.mrf.mxu1 }
  0xdb   : > { %v726_v12 = vpop.f32.mrf.mxu2 }
  0xde   : > { %v818_v27 = vpop.f32.mrf.mxu3 }
  0xe0   : > { %v1014_v41 = vpop.f32.mrf.mxu0  ;;  %v1142_v43 = vpop.f32.mrf.mxu1 }
  0xe3   : > { %v729_v44 = vpop.f32.mrf.mxu2 }
  0xe4   : > { %v743_v45 = vadd.f32 %v729_v44, %v609_v58  ;;  %v739_v58 = vadd.f32 %v719_v30, %v2929_v52  ;;  %v1025_v30 = vadd.f32 %v1006_v31, %v827_v26 }
  0xe6   : > { %v830_v46 = vadd.f32 %v816_v39, %v743_v45  ;;  %v821_v50 = vpop.f32.mrf.mxu3  ;;  %v826_v5 = vadd.f32 %v806_v18, %v739_v58  ;;  %v2975_v18 = vld [vmem:[%s3279_s5] ss:$0 sm:$0xff] }
  0xe8   : > { %v1016_v47 = vpop.f32.mrf.mxu0  ;;  %v1028_v48 = vadd.f32 %v1014_v41, %v830_v46  ;;  %v1145_v49 = vpop.f32.mrf.mxu1  ;;  %v1024_v15 = vadd.f32 %v1004_v25, %v826_v5  ;;  %v2981_v25 = vld [vmem:[%s3276_s2] ss:$0 sm:$0xff]  ;;  %v742_v46 = vadd.f32 %v726_v12, %v2948_v19 }
  0xea   : > { %v2962_v51 = vadd.f32 %v1140_v40, %v1028_v48 }
  0xeb   : > { %v731_v37 = vpop.f32.mrf.mxu2 }
  0xec   : > { %v744_v53 = vadd.f32 %v731_v37, %v611_v10 }
  0xee   : > { %v831_v54 = vadd.f32 %v818_v27, %v744_v53  ;;  %v823_v62 = vpop.f32.mrf.mxu3  ;;  %v1151_v27 = vadd.f32 %v2950_v28, %v1025_v30  ;;  %v829_v28 = vadd.f32 %v2954_v11, %v742_v46 }
  0xf0   : > { %v1019_v55 = vpop.f32.mrf.mxu0  ;;  %v1029_v57 = vadd.f32 %v1016_v47, %v831_v54  ;;  %v1147_v59 = vpop.f32.mrf.mxu1 }
  0xf2   : > { %v2964_v60 = vadd.f32 %v1142_v43, %v1029_v57 }
  0xf3   : > { %v734_v0 = vpop.f32.mrf.mxu2 }
  0xf4   : > { %v745_v61 = vadd.f32 %v734_v0, %v614_v29  ;;  %v1150_v29 = vadd.f32 %v1130_v20, %v1024_v15 }
  0xf6   : > { %v832_v1 = vadd.f32 %v821_v50, %v745_v61  ;;  %v1415_v13 = vpop.f32.mrf.mxu3 }
  0xf8   : > { %v1021_v2 = vpop.f32.mrf.mxu0  ;;  %v1030_v3 = vadd.f32 %v1019_v55, %v832_v1  ;;  %v1640_v56 = vpop.f32.mrf.mxu1 }
  0xf9   : > { %v1641_v20 = vadd.f32 %v2975_v18, %v1640_v56 }
  0xfa   : > { %v2967_v6 = vadd.f32 %v1145_v49, %v1030_v3 }
  0xfb   : > { %v736_v7 = vpop.f32.mrf.mxu2 }
  0xfc   : > { %v746_v8 = vadd.f32 %v736_v7, %v616_v23  ;;  %v741_v23 = vadd.f32 %v724_v38, %v2945_v33 }
  0xfe   : > { %v833_v10 = vadd.f32 %v823_v62, %v746_v8  ;;  %v1417_v34 = vpop.f32.mrf.mxu3  ;;  %v828_v39 = vadd.f32 %v811_v14, %v741_v23  ;;  %v1027_v62 = vadd.f32 %v2960_v42, %v829_v28 }
 0x100   : > { %v1541_v16 = vpop.f32.mrf.mxu0  ;;  %v1031_v17 = vadd.f32 %v1021_v2, %v833_v10  ;;  %v1642_v63 = vpop.f32.mrf.mxu1  ;;  %v1026_v45 = vadd.f32 %v2956_v35, %v828_v39  ;;  %v1153_v10 = vadd.f32 %v2958_v36, %v1027_v62 }
 0x101   : > { %v1643_v37 = vadd.f32 %v2975_v18, %v1642_v63 }
 0x102   : > { %v2970_v52 = vadd.f32 %v1147_v59, %v1031_v17  ;;  %v1152_v49 = vadd.f32 %v2952_v32, %v1026_v45 }
 0x103   : > { %v1217_v21 = vpop.f32.mrf.mxu2 }
 0x104   : > { %v1237_v22 = vadd.f32 %v1217_v21, %v1150_v29 }
 0x106   : > { %v1435_v4 = vadd.f32 %v1415_v13, %v1237_v22  ;;  %v1420_v53 = vpop.f32.mrf.mxu3 }
 0x108   : > { %v1561_v24 = vadd.f32 %v1541_v16, %v1435_v4  ;;  %v1543_v41 = vpop.f32.mrf.mxu0  ;;  %v1645_v44 = vpop.f32.mrf.mxu1 }
 0x109   : > { %v1646_v3 = vadd.f32 %v2975_v18, %v1645_v44 }
 0x10a   : > { %v1573_v40 = vadd.f32 %v2981_v25, %v1561_v24 }
 0x10b   : > { %v1219_v43 = vpop.f32.mrf.mxu2 }
 0x10c   : > { %v2986_v33 = vadd.f32 %v1641_v20, %v1573_v40  ;;  %v1238_v38 = vadd.f32 %v1219_v43, %v1151_v27 }
 0x10e   : > { %v2991_v31 = vmul.f32 0.70710677, %v2986_v33  ;;  %v1436_v47 = vadd.f32 %v1417_v34, %v1238_v38  ;;  %v1422_v63 = vpop.f32.mrf.mxu3 }
 0x110   : > { %v1684_v14 = vmul.f32 %v2991_v31, %v2991_v31  ;;  %v1562_v48 = vadd.f32 %v1543_v41, %v1436_v47  ;;  %v1546_v59 = vpop.f32.mrf.mxu0  ;;  %v1647_v0 = vpop.f32.mrf.mxu1 }
 0x111   : > { %v1648_v45 = vadd.f32 %v2975_v18, %v1647_v0 }
 0x112   : > { %v2997_v50 = vmin.f32 %v1684_v14, 16.0  ;;  %v1574_v35 = vadd.f32 %v2981_v25, %v1562_v48 }
 0x113   : > { %v1222_v19 = vpop.f32.mrf.mxu2 }
 0x114   : > { %v1686_v12 = vmul.f32 2.1237322e-06, %v2997_v50  ;;  %v1697_v54 = vmul.f32 3.8918573e-05, %v2997_v50  ;;  %v3003_v55 = vadd.f32 %v1643_v37, %v1574_v35  ;;  %v1239_v57 = vadd.f32 %v1222_v19, %v1152_v49 }
 0x116   : > { %v1687_v32 = vadd.f32 0.00028619796, %v1686_v12  ;;  %v1698_v61 = vadd.f32 0.001143296, %v1697_v54  ;;  %v1437_v11 = vadd.f32 %v1420_v53, %v1239_v57  ;;  %v3007_v58 = vmul.f32 0.70710677, %v3003_v55 }
 0x118   : > { %v1688_v1 = vmul.f32 %v1687_v32, %v2997_v50  ;;  %v1699_v2 = vmul.f32 %v1698_v61, %v2997_v50  ;;  %v1563_v56 = vadd.f32 %v1546_v59, %v1437_v11  ;;  %v1724_v5 = vmul.f32 %v3007_v58, %v3007_v58  ;;  %v1548_v24 = vpop.f32.mrf.mxu0  ;;  %v1650_v34 = vpop.f32.mrf.mxu1 }
 0x119   : > { %v1425_v32 = vpop.f32.mrf.mxu3 }
 0x11a   : > { %v1689_v7 = vadd.f32 0.0036580483, %v1688_v1  ;;  %v1700_v8 = vadd.f32 0.014752088, %v1699_v2  ;;  %v1575_v9 = vadd.f32 %v2981_v25, %v1563_v56  ;;  %v3016_v42 = vmin.f32 %v1724_v5, 16.0 }
 0x11b   : > { %v1224_v13 = vpop.f32.mrf.mxu2 }
 0x11c   : > { %v1690_v15 = vmul.f32 %v1689_v7, %v2997_v50  ;;  %v1701_v16 = vmul.f32 %v1700_v8, %v2997_v50  ;;  %v3020_v17 = vadd.f32 %v1646_v3, %v1575_v9  ;;  %v1240_v26 = vadd.f32 %v1224_v13, %v1153_v10 }
 0x11d   : > { %v1726_v29 = vmul.f32 2.1237322e-06, %v3016_v42  ;;  %v1737_v21 = vmul.f32 3.8918573e-05, %v3016_v42  ;;  %v3056_v7 = vmul.f32 0.5, %v2986_v33 }
 0x11e   : > { %v1691_v22 = vadd.f32 0.05243302, %v1690_v15  ;;  %v1702_v23 = vadd.f32 0.112945676, %v1701_v16  ;;  %v1438_v4 = vadd.f32 %v1422_v63, %v1240_v26  ;;  %v3025_v20 = vmul.f32 0.70710677, %v3020_v17 }
 0x11f   : > { %v1727_v30 = vadd.f32 0.00028619796, %v1726_v29  ;;  %v1738_v36 = vadd.f32 0.001143296, %v1737_v21  ;;  %v1651_v16 = vadd.f32 %v2975_v18, %v1650_v34 }
 0x120   : > { %v1703_v39 = vmul.f32 %v1702_v23, %v2997_v50  ;;  %v1564_v40 = vadd.f32 %v1548_v24, %v1438_v4  ;;  %v1692_v41 = vmul.f32 %v1691_v22, %v2997_v50  ;;  %v1764_v44 = vmul.f32 %v3025_v20, %v3025_v20  ;;  %v1652_v5 = vpop.f32.mrf.mxu1  ;;  %v1551_v10 = vpop.f32.mrf.mxu0 }
 0x121   : > { %v1728_v27 = vmul.f32 %v1727_v30, %v3016_v42  ;;  %v1739_v43 = vmul.f32 %v1738_v36, %v3016_v42  ;;  %v3065_v21 = vadd.f32 %v2975_v18, %v1652_v5 }
 0x122   : > { %v1704_v38 = vadd.f32 0.4994258, %v1703_v39  ;;  %v1576_v46 = vadd.f32 %v2981_v25, %v1564_v40  ;;  %v3035_v48 = vmin.f32 %v1764_v44, 16.0  ;;  %v1693_v53 = vadd.f32 0.18741608, %v1692_v41 }
 0x123   : > { %v1729_v47 = vadd.f32 0.0036580483, %v1728_v27  ;;  %v1740_v14 = vadd.f32 0.014752088, %v1739_v43  ;;  %v1227_v49 = vpop.f32.mrf.mxu2 }
 0x124   : > { %v1705_v28 = vmul.f32 %v1704_v38, %v2997_v50  ;;  %v3038_v37 = vadd.f32 %v1648_v45, %v1576_v46  ;;  %v1241_v35 = vadd.f32 %v1227_v49, %v2962_v51  ;;  %v1766_v54 = vmul.f32 2.1237322e-06, %v3035_v48 }
 0x125   : > { %v1730_v19 = vmul.f32 %v1729_v47, %v3016_v42  ;;  %v1741_v12 = vmul.f32 %v1740_v14, %v3016_v42  ;;  %v1777_v59 = vmul.f32 3.8918573e-05, %v3035_v48  ;;  %v1694_v51 = vmul.f32 %v1693_v53, %v2997_v50 }
 0x126   : > { %v3044_v57 = vadd.f32 1.0, %v1705_v28  ;;  %v3048_v0 = vmul.f32 0.70710677, %v3038_v37  ;;  %v1767_v62 = vadd.f32 0.00028619796, %v1766_v54  ;;  %v1439_v1 = vadd.f32 %v1425_v32, %v1241_v35 }
 0x127   : > { %v1731_v61 = vadd.f32 0.05243302, %v1730_v19  ;;  %v1742_v11 = vadd.f32 0.112945676, %v1741_v12  ;;  %v1778_v8 = vadd.f32 0.001143296, %v1777_v59 }
 0x128   : > { %2496 = vrcp.f32 %v3044_v57  ;;  %v1768_v56 = vmul.f32 %v1767_v62, %v3035_v48  ;;  %v1804_v9 = vmul.f32 %v3048_v0, %v3048_v0  ;;  %v1565_v50 = vadd.f32 %v1551_v10, %v1439_v1 }
 0x129   : > { %v1732_v2 = vmul.f32 %v1731_v61, %v3016_v42  ;;  %v1743_v3 = vmul.f32 %v1742_v11, %v3016_v42  ;;  %v1779_v26 = vmul.f32 %v1778_v8, %v3035_v48  ;;  %v1695_v33 = vadd.f32 1.1283791, %v1694_v51  ;;  %v1427_v11 = vpop.f32.mrf.mxu3 }
 0x12a   : > { %v1769_v63 = vadd.f32 0.0036580483, %v1768_v56  ;;  %v3062_v29 = vmin.f32 %v1804_v9, 16.0  ;;  %v1716_v22 = vand.u32 2147483647, %v3044_v57  ;;  %v1718_v27 = vand.u32 2147483648, %v3044_v57 }
 0x12b   : > { %v1733_v13 = vadd.f32 0.18741608, %v1732_v2  ;;  %v1744_v15 = vadd.f32 0.4994258, %v1743_v3  ;;  %v1229_v30 = vpop.f32.mrf.mxu2  ;;  %v1780_v34 = vadd.f32 0.014752088, %v1779_v26  ;;  %v1577_v44 = vadd.f32 %v2981_v25, %v1565_v50 }
 0x12c   : > { %v1770_v24 = vmul.f32 %v1769_v63, %v3035_v48  ;;  %v1806_v39 = vmul.f32 2.1237322e-06, %v3062_v29  ;;  %v1817_v40 = vmul.f32 3.8918573e-05, %v3062_v29  ;;  %v1696_v47 = vmul.f32 %v1695_v33, %v2991_v31  ;;  %v1553_v63 = vpop.f32.mrf.mxu0 }
 0x12d   : > { %v1734_v23 = vmul.f32 %v1733_v13, %v3016_v42  ;;  %v1745_v4 = vmul.f32 %v1744_v15, %v3016_v42  ;;  %v1781_v42 = vmul.f32 %v1780_v34, %v3035_v48  ;;  %vm1712_vm9 = vweird.f32 %v3044_v57 }
 0x12e   : > { %v2497_v36 = vpop.eup %2496  ;;  %v1771_v38 = vadd.f32 0.05243302, %v1770_v24  ;;  %v1807_v45 = vadd.f32 0.00028619796, %v1806_v39  ;;  %v1818_v46 = vadd.f32 0.001143296, %v1817_v40  ;;  %v1242_v35 = vadd.f32 %v1229_v30, %v2964_v60 }
 0x12f   : > { %v1708_v41 = vmul.f32 %v2497_v36, %v3044_v57  ;;  %v3075_v43 = vadd.f32 1.0, %v1745_v4  ;;  %v1735_v49 = vadd.f32 1.1283791, %v1734_v23  ;;  %vm1713_vm10 = vweird.f32 %v2497_v36 }
 0x130   : > { %v1782_v28 = vadd.f32 0.112945676, %v1781_v42  ;;  %v1808_v19 = vmul.f32 %v1807_v45, %v3062_v29  ;;  %v1819_v12 = vmul.f32 %v1818_v46, %v3062_v29  ;;  %v3085_v54 = vadd.f32 %v1651_v16, %v1577_v44  ;;  %vm1714_vm12 = vmor %vm1712_vm9, %vm1713_vm10 }
 0x131   : > { %v1709_v14 = vsub.f32 1.0, %v1708_v41  ;;  %2498 = vrcp.f32 %v3075_v43  ;;  %vm3087_vm11 = vcmp.eq.f32.partialorder %v1716_v22, 8.507059e+37  ;;  %v1719_v31 = vor.u32 1.1754944e-38, %v1718_v27 }
 0x132   : > { %v1772_v32 = vmul.f32 %v1771_v38, %v3035_v48  ;;  %v1783_v61 = vmul.f32 %v1782_v28, %v3035_v48  ;;  %v1736_v60 = vmul.f32 %v1735_v49, %v3007_v58  ;;  %v1809_v1 = vadd.f32 0.0036580483, %v1808_v19  ;;  %v1430_v49 = vpop.f32.mrf.mxu3 }
 0x133   : > { %v1710_v53 = vmul.f32 %v2497_v36, %v1709_v14  ;;  %v1820_v51 = vadd.f32 0.014752088, %v1819_v12  ;;  %vm1752_vm13 = vweird.f32 %v3075_v43  ;;  %v3099_v3 = vmul.f32 0.70710677, %v3085_v54  ;;  %v1232_v13 = vpop.f32.mrf.mxu2 }
 0x134   : > { %v1784_v2 = vadd.f32 0.4994258, %v1783_v61  ;;  %v1440_v56 = vadd.f32 %v1427_v11, %v1242_v35  ;;  %v1756_v9 = vand.u32 2147483647, %v3075_v43  ;;  %v1810_v10 = vmul.f32 %v1809_v1, %v3062_v29 }
 0x135   : > { %v1711_v62 = vadd.f32 %v2497_v36, %v1710_v53  ;;  %v1821_v58 = vmul.f32 %v1820_v51, %v3062_v29  ;;  %v1758_v16 = vand.u32 2147483648, %v3075_v43  ;;  %v1773_v50 = vadd.f32 0.18741608, %v1772_v32 }
 0x136   : > { %v1785_v33 = vmul.f32 %v1784_v2, %v3035_v48  ;;  %v1811_v22 = vadd.f32 0.05243302, %v1810_v10  ;;  %v1844_v30 = vmul.f32 %v3099_v3, %v3099_v3  ;;  %v1243_v24 = vadd.f32 %v1232_v13, %v2967_v6  ;;  %v1655_v10 = vpop.f32.mrf.mxu1 }
 0x137   : > { %v2499_v5 = vpop.eup %2498  ;;  %v1715_v8 = vsel %vm1714_vm12, %v2497_v36, %v1711_v62  ;;  %v1822_v23 = vadd.f32 0.112945676, %v1821_v58  ;;  %v1566_v36 = vadd.f32 %v1553_v63, %v1440_v56  ;;  %v1774_v44 = vmul.f32 %v1773_v50, %v3035_v48  ;;  %v1556_v56 = vpop.f32.mrf.mxu0 }
 0x138   : > { %v1720_v57 = vsel %vm3087_vm11, %v1719_v31, %v1715_v8  ;;  %v1748_v15 = vmul.f32 %v2499_v5, %v3075_v43  ;;  %v3113_v39 = vadd.f32 1.0, %v1785_v33  ;;  %v1812_v40 = vmul.f32 %v1811_v22, %v3062_v29 }
 0x139   : > { %v1721_v26 = vmul.f32 %v1720_v57, %v1696_v47  ;;  %v1823_v41 = vmul.f32 %v1822_v23, %v3062_v29  ;;  %vm1753_vm14 = vweird.f32 %v2499_v5  ;;  %v3118_v38 = vmin.f32 %v1844_v30, 16.0 }
 0x13a   : > { %v1749_v4 = vsub.f32 1.0, %v1748_v15  ;;  %vm3120_vm15 = vcmp.eq.f32.partialorder %v1756_v9, 8.507059e+37  ;;  %2500 = vrcp.f32 %v3113_v39  ;;  %v1578_v6 = vadd.f32 %v2981_v25, %v1566_v36  ;;  %vm1754_vm1 = vmor %vm1752_vm13, %vm1753_vm14 }
 0x13b   : > { %v2430_v34 = vclamps-f32 %v1721_v26, 1.0  ;;  %v1759_v47 = vor.u32 1.1754944e-38, %v1758_v16  ;;  %v1813_v48 = vadd.f32 0.18741608, %v1812_v40  ;;  %v1824_v14 = vadd.f32 0.4994258, %v1823_v41  ;;  %v1234_v33 = vpop.f32.mrf.mxu2 }
 0x13c   : > { %v1750_v27 = vmul.f32 %v2499_v5, %v1749_v4  ;;  %v1846_v35 = vmul.f32 2.1237322e-06, %v3118_v38  ;;  %v1857_v53 = vmul.f32 3.8918573e-05, %v3118_v38  ;;  %v1441_v19 = vadd.f32 %v1430_v49, %v1243_v24 }
 0x13d   : > { %v2004_v42 = vadd.f32 1.0, %v2430_v34  ;;  %v1775_v59 = vadd.f32 1.1283791, %v1774_v44  ;;  %v1814_v31 = vmul.f32 %v1813_v48, %v3062_v29  ;;  %v1825_v32 = vmul.f32 %v1824_v14, %v3062_v29 }
 0x13e   : > { %v1751_v46 = vadd.f32 %v2499_v5, %v1750_v27  ;;  %v1858_v11 = vadd.f32 0.001143296, %v1857_v53  ;;  %v3143_v43 = vadd.f32 %v3065_v21, %v1578_v6  ;;  %v1669_v62 = vmul.f32 0.5, %v3003_v55  ;;  %v1432_v6 = vpop.f32.mrf.mxu3 }
 0x13f   : > { %v2012_v28 = vmul.f32 %v2004_v42, %v3056_v7  ;;  %v1847_v7 = vadd.f32 0.00028619796, %v1846_v35  ;;  %v3147_v51 = vmul.f32 0.5, %v3020_v17  ;;  %v3149_v2 = vadd.f32 1.0, %v1825_v32 }
 0x140   : > { %v1755_v12 = vsel %vm1754_vm1, %v2499_v5, %v1751_v46  ;;  %v2501_v29 = vpop.eup %2500  ;;  %v1859_v8 = vmul.f32 %v1858_v11, %v3118_v38  ;;  %v3154_v9 = vmul.f32 0.70710677, %v3143_v43  ;;  %v1567_v21 = vadd.f32 %v1556_v56, %v1441_v19 }
 0x141   : > { %2020 = vst.msk [vmem:[%s3129_s15] sm:$0xff] %vm509_vm0, %v2012_v28  ;;  %v1760_v61 = vsel %vm3120_vm15, %v1759_v47, %v1755_v12  ;;  %v1848_v5 = vmul.f32 %v1847_v7, %v3118_v38  ;;  %v1776_v55 = vmul.f32 %v1775_v59, %v3025_v20  ;;  %v1656_v17 = vadd.f32 %v2975_v18, %v1655_v10 }
 0x142   : > { %v1761_v1 = vmul.f32 %v1760_v61, %v1736_v60  ;;  %v1788_v60 = vmul.f32 %v2501_v29, %v3113_v39  ;;  %v1796_v13 = vand.u32 2147483647, %v3113_v39  ;;  %v1798_v57 = vand.u32 2147483648, %v3113_v39  ;;  %v1558_v61 = vpop.f32.mrf.mxu0 }
 0x143   : > { %v1815_v15 = vadd.f32 1.1283791, %v1814_v31  ;;  %2502 = vrcp.f32 %v3149_v2  ;;  %v1849_v63 = vadd.f32 0.0036580483, %v1848_v5  ;;  %v1860_v26 = vadd.f32 0.014752088, %v1859_v8  ;;  %v1657_v8 = vpop.f32.mrf.mxu1 }
 0x144   : > { %v2431_v58 = vclamps-f32 %v1761_v1, 1.0  ;;  %v1789_v50 = vsub.f32 1.0, %v1788_v60  ;;  %vm1792_vm2 = vweird.f32 %v3113_v39  ;;  %vm1793_vm3 = vweird.f32 %v2501_v29 }
 0x145   : > { %v1884_v20 = vmul.f32 %v3154_v9, %v3154_v9  ;;  %v1579_v22 = vadd.f32 %v2981_v25, %v1567_v21  ;;  %v1850_v30 = vmul.f32 %v1849_v63, %v3118_v38  ;;  %v1861_v36 = vmul.f32 %v1860_v26, %v3118_v38  ;;  %vm1794_vm5 = vmor %vm1792_vm2, %vm1793_vm3 }
 0x146   : > { %v2005_v16 = vadd.f32 1.0, %v2431_v58  ;;  %v1790_v4 = vmul.f32 %v2501_v29, %v1789_v50  ;;  %vm3168_vm4 = vcmp.eq.f32.partialorder %v1796_v13, 8.507059e+37  ;;  %v1799_v34 = vor.u32 1.1754944e-38, %v1798_v57 }
 0x147   : > { %v3172_v40 = vmin.f32 %v1884_v20, 16.0  ;;  %v1244_v41 = vadd.f32 %v1234_v33, %v2970_v52  ;;  %v1816_v44 = vmul.f32 %v1815_v15, %v3048_v0  ;;  %v1862_v42 = vadd.f32 0.112945676, %v1861_v36 }
 0x148   : > { %v2013_v23 = vmul.f32 %v2005_v16, %v1669_v62  ;;  %v1791_v27 = vadd.f32 %v2501_v29, %v1790_v4  ;;  %v3178_v45 = vadd.f32 %v1656_v17, %v1579_v22  ;;  %vm1832_vm6 = vweird.f32 %v3149_v2 }
 0x149   : > { %v2503_v46 = vpop.eup %2502  ;;  %v1886_v47 = vmul.f32 2.1237322e-06, %v3172_v40  ;;  %v1897_v52 = vmul.f32 3.8918573e-05, %v3172_v40  ;;  %v1442_v48 = vadd.f32 %v1432_v6, %v1244_v41  ;;  %v1836_v0 = vand.u32 2147483647, %v3149_v2 }
 0x14a   : > { %2021 = vst.msk [vmem:[%s3129_s15 + $0x8] sm:$0xff] %vm509_vm0, %v2013_v23  ;;  %v1795_v14 = vsel %vm1794_vm5, %v2501_v29, %v1791_v27  ;;  %v1828_v49 = vmul.f32 %v2503_v46, %v3149_v2  ;;  %v1851_v28 = vadd.f32 0.05243302, %v1850_v30  ;;  %v1863_v53 = vmul.f32 %v1862_v42, %v3118_v38 }
 0x14b   : > { %v1800_v35 = vsel %vm3168_vm4, %v1799_v34, %v1795_v14  ;;  %v1887_v39 = vadd.f32 0.00028619796, %v1886_v47  ;;  %v1898_v19 = vadd.f32 0.001143296, %v1897_v52  ;;  %v1838_v31 = vand.u32 2147483648, %v3149_v2 }
 0x14c   : > { %v1801_v12 = vmul.f32 %v1800_v35, %v1776_v55  ;;  %v1829_v59 = vsub.f32 1.0, %v1828_v49  ;;  %v3193_v32 = vmul.f32 0.70710677, %v3178_v45  ;;  %v1864_v7 = vadd.f32 0.4994258, %v1863_v53 }
 0x14d   : > { %v1888_v11 = vmul.f32 %v1887_v39, %v3172_v40  ;;  %v1899_v62 = vmul.f32 %v1898_v19, %v3172_v40  ;;  %v1568_v1 = vadd.f32 %v1558_v61, %v1442_v48  ;;  %vm1833_vm7 = vweird.f32 %v2503_v46 }
 0x14e   : > { %v2432_v56 = vclamps-f32 %v1801_v12, 1.0  ;;  %v1830_v29 = vmul.f32 %v2503_v46, %v1829_v59  ;;  %v1924_v5 = vmul.f32 %v3193_v32, %v3193_v32  ;;  %v1852_v10 = vmul.f32 %v1851_v28, %v3118_v38  ;;  %vm1834_vm8 = vmor %vm1832_vm6, %vm1833_vm7 }
 0x14f   : > { %v1865_v21 = vmul.f32 %v1864_v7, %v3118_v38  ;;  %v1900_v58 = vadd.f32 0.014752088, %v1899_v62  ;;  %v1580_v55 = vadd.f32 %v2981_v25, %v1568_v1  ;;  %v1889_v13 = vadd.f32 0.0036580483, %v1888_v11 }
 0x150   : > { %v2006_v60 = vadd.f32 1.0, %v2432_v56  ;;  %v1831_v17 = vadd.f32 %v2503_v46, %v1830_v29  ;;  %v3202_v57 = vmin.f32 %v1924_v5, 16.0  ;;  %v1839_v15 = vor.u32 1.1754944e-38, %v1838_v31 }
 0x151   : > { %v1866_v16 = vadd.f32 1.0, %v1865_v21  ;;  %v1901_v50 = vmul.f32 %v1900_v58, %v3172_v40  ;;  %v1658_v63 = vadd.f32 %v2975_v18, %v1657_v8  ;;  %vm1837_vm9 = vcmp.eq.f32.partialorder %v1836_v0, 8.507059e+37 }
 0x152   : > { %v2014_v26 = vmul.f32 %v2006_v60, %v3147_v51  ;;  %v1835_v33 = vsel %vm1834_vm8, %v2503_v46, %v1831_v17  ;;  %v1926_v25 = vmul.f32 2.1237322e-06, %v3202_v57  ;;  %v1853_v23 = vadd.f32 0.18741608, %v1852_v10 }
 0x153   : > { %v1840_v20 = vsel %vm1837_vm9, %v1839_v15, %v1835_v33  ;;  %2504 = vrcp.f32 %v1866_v16  ;;  %v3210_v22 = vadd.f32 %v1658_v63, %v1580_v55  ;;  %v1890_v4 = vmul.f32 %v1889_v13, %v3172_v40 }
 0x154   : > { %2022 = vst.msk [vmem:[%s3129_s15 + $0x10] sm:$0xff] %vm509_vm0, %v2014_v26  ;;  %v1841_v2 = vmul.f32 %v1840_v20, %v1816_v44  ;;  %v1902_v30 = vadd.f32 0.112945676, %v1901_v50  ;;  %v1927_v36 = vadd.f32 0.00028619796, %v1926_v25  ;;  %v1671_v34 = vmul.f32 0.5, %v3038_v37 }
 0x155   : > { %v1937_v18 = vmul.f32 3.8918573e-05, %v3202_v57  ;;  %v3219_v27 = vmul.f32 0.70710677, %v3210_v22  ;;  %v1854_v44 = vmul.f32 %v1853_v23, %v3118_v38  ;;  %v1891_v6 = vadd.f32 0.05243302, %v1890_v4 }
 0x156   : > { %v2433_v24 = vclamps-f32 %v1841_v2, 1.0  ;;  %v1903_v51 = vmul.f32 %v1902_v30, %v3172_v40  ;;  %v1928_v52 = vmul.f32 %v1927_v36, %v3202_v57  ;;  %v1878_v39 = vand.u32 2147483648, %v1866_v16 }
 0x157   : > { %v1938_v41 = vadd.f32 0.001143296, %v1937_v18  ;;  %v1964_v14 = vmul.f32 %v3219_v27, %v3219_v27  ;;  %v1855_v38 = vadd.f32 1.1283791, %v1854_v44  ;;  %v1892_v19 = vmul.f32 %v1891_v6, %v3172_v40 }
 0x158   : > { %v2007_v42 = vadd.f32 1.0, %v2433_v24  ;;  %v1904_v46 = vadd.f32 0.4994258, %v1903_v51  ;;  %v1929_v59 = vadd.f32 0.0036580483, %v1928_v52  ;;  %vm1872_vm11 = vweird.f32 %v1866_v16 }
 0x159   : > { %v2505_v47 = vpop.eup %2504  ;;  %v1939_v48 = vmul.f32 %v1938_v41, %v3202_v57  ;;  %v3227_v35 = vmin.f32 %v1964_v14, 16.0  ;;  %v1876_v11 = vand.u32 2147483647, %v1866_v16  ;;  %v1893_v56 = vadd.f32 0.18741608, %v1892_v19 }
 0x15a   : > { %v2015_v49 = vmul.f32 %v2007_v42, %v1671_v34  ;;  %v1868_v37 = vmul.f32 %v2505_v47, %v1866_v16  ;;  %v1905_v0 = vmul.f32 %v1904_v46, %v3172_v40  ;;  %vm1873_vm10 = vweird.f32 %v2505_v47 }
 0x15b   : > { %v1940_v28 = vadd.f32 0.014752088, %v1939_v48  ;;  %v1966_v61 = vmul.f32 2.1237322e-06, %v3227_v35  ;;  %v1977_v62 = vmul.f32 3.8918573e-05, %v3227_v35  ;;  %vm1874_vm12 = vmor %vm1872_vm11, %vm1873_vm10  ;;  %v1930_v10 = vmul.f32 %v1929_v59, %v3202_v57 }
 0x15c   : > { %2023 = vst.msk [vmem:[%s3129_s15 + $0x18] sm:$0xff] %vm509_vm0, %v2015_v49  ;;  %v1869_v53 = vsub.f32 1.0, %v1868_v37  ;;  %v1906_v12 = vadd.f32 1.0, %v1905_v0  ;;  %v1879_v8 = vor.u32 1.1754944e-38, %v1878_v39  ;;  %v1856_v58 = vmul.f32 %v1855_v38, %v3099_v3 }
 0x15d   : > { %v1941_v31 = vmul.f32 %v1940_v28, %v3202_v57  ;;  %v1967_v5 = vadd.f32 0.00028619796, %v1966_v61  ;;  %v1978_v21 = vadd.f32 0.001143296, %v1977_v62  ;;  %vm1877_vm13 = vcmp.eq.f32.partialorder %v1876_v11, 8.507059e+37 }
 0x15e   : > { %v1870_v7 = vmul.f32 %v2505_v47, %v1869_v53  ;;  %2506 = vrcp.f32 %v1906_v12  ;;  %v1894_v50 = vmul.f32 %v1893_v56, %v3172_v40  ;;  %v1931_v33 = vadd.f32 0.05243302, %v1930_v10 }
 0x15f   : > { %v1942_v29 = vadd.f32 0.112945676, %v1941_v31  ;;  %v1968_v13 = vmul.f32 %v1967_v5, %v3227_v35  ;;  %v1979_v15 = vmul.f32 %v1978_v21, %v3227_v35  ;;  %v1672_v30 = vmul.f32 0.5, %v3085_v54 }
 0x160   : > { %v1871_v1 = vadd.f32 %v2505_v47, %v1870_v7  ;;  %v1895_v18 = vadd.f32 1.1283791, %v1894_v50  ;;  %v1918_v51 = vand.u32 2147483648, %v1906_v12  ;;  %v1932_v40 = vmul.f32 %v1931_v33, %v3202_v57 }
 0x161   : > { %v1943_v60 = vmul.f32 %v1942_v29, %v3202_v57  ;;  %v1980_v25 = vadd.f32 0.014752088, %v1979_v15  ;;  %v1969_v23 = vadd.f32 0.0036580483, %v1968_v13  ;;  %v1916_v6 = vand.u32 2147483647, %v1906_v12 }
 0x162   : > { %v1875_v55 = vsel %vm1874_vm12, %v2505_v47, %v1871_v1  ;;  %vm1912_vm15 = vweird.f32 %v1906_v12  ;;  %v1919_v52 = vor.u32 1.1754944e-38, %v1918_v51  ;;  %v1933_v48 = vadd.f32 0.18741608, %v1932_v40 }
 0x163   : > { %v1880_v17 = vsel %vm1877_vm13, %v1879_v8, %v1875_v55  ;;  %v1944_v63 = vadd.f32 0.4994258, %v1943_v60  ;;  %v1981_v4 = vmul.f32 %v1980_v25, %v3227_v35  ;;  %v1970_v46 = vmul.f32 %v1969_v23, %v3227_v35 }
 0x164   : > { %v1881_v16 = vmul.f32 %v1880_v17, %v1856_v58  ;;  %v2507_v26 = vpop.eup %2506  ;;  %v1896_v14 = vmul.f32 %v1895_v18, %v3154_v9  ;;  %vm1917_vm2 = vcmp.eq.f32.partialorder %v1916_v6, 8.507059e+37  ;;  %v1934_v19 = vmul.f32 %v1933_v48, %v3202_v57 }
 0x165   : > { %v1908_v2 = vmul.f32 %v2507_v26, %v1906_v12  ;;  %v1945_v3 = vmul.f32 %v1944_v63, %v3202_v57  ;;  %v1982_v41 = vadd.f32 0.112945676, %v1981_v4  ;;  %vm1913_vm14 = vweird.f32 %v2507_v26 }
 0x166   : > { %v2434_v20 = vclamps-f32 %v1881_v16, 1.0  ;;  %vm1914_vm1 = vmor %vm1912_vm15, %vm1913_vm14  ;;  %v1971_v28 = vadd.f32 0.05243302, %v1970_v46  ;;  %v1673_v7 = vmul.f32 0.5, %v3143_v43  ;;  %v1935_v62 = vadd.f32 1.1283791, %v1934_v19 }
 0x167   : > { %v1909_v24 = vsub.f32 1.0, %v1908_v2  ;;  %v1946_v34 = vadd.f32 1.0, %v1945_v3  ;;  %v1983_v54 = vmul.f32 %v1982_v41, %v3227_v35  ;;  %v1674_v50 = vmul.f32 0.5, %v3178_v45 }
 0x168   : > { %v2008_v36 = vadd.f32 1.0, %v2434_v20  ;;  %v1972_v31 = vmul.f32 %v1971_v28, %v3227_v35  ;;  %v1936_v21 = vmul.f32 %v1935_v62, %v3193_v32 }
 0x169   : > { %v1910_v44 = vmul.f32 %v2507_v26, %v1909_v24  ;;  %2508 = vrcp.f32 %v1946_v34  ;;  %v1984_v37 = vadd.f32 0.4994258, %v1983_v54  ;;  %v1958_v1 = vand.u32 2147483648, %v1946_v34 }
 0x16a   : > { %v2016_v42 = vmul.f32 %v2008_v36, %v1672_v30  ;;  %v1956_v5 = vand.u32 2147483647, %v1946_v34  ;;  %v1973_v8 = vadd.f32 0.18741608, %v1972_v31  ;;  %vm1952_vm4 = vweird.f32 %v1946_v34 }
 0x16b   : > { %v1911_v47 = vadd.f32 %v2507_v26, %v1910_v44  ;;  %v1985_v53 = vmul.f32 %v1984_v37, %v3227_v35  ;;  %v1959_v10 = vor.u32 1.1754944e-38, %v1958_v1  ;;  %v1675_v36 = vmul.f32 0.5, %v3210_v22 }
 0x16c   : > { %2024 = vst.msk [vmem:[%s3129_s15 + $0x20] sm:$0xff] %vm509_vm0, %v2016_v42  ;;  %vm1957_vm6 = vcmp.eq.f32.partialorder %v1956_v5, 8.507059e+37  ;;  %v1974_v60 = vmul.f32 %v1973_v8, %v3227_v35 }
 0x16d   : > { %v1915_v49 = vsel %vm1914_vm1, %v2507_v26, %v1911_v47  ;;  %v1986_v61 = vadd.f32 1.0, %v1985_v53 }
 0x16e   : > { %v1920_v0 = vsel %vm1917_vm2, %v1919_v52, %v1915_v49  ;;  %v1975_v63 = vadd.f32 1.1283791, %v1974_v60 }
 0x16f   : > { %v1921_v38 = vmul.f32 %v1920_v0, %v1896_v14  ;;  %v2509_v39 = vpop.eup %2508  ;;  %2510 = vrcp.f32 %v1986_v61  ;;  %v1998_v26 = vand.u32 2147483648, %v1986_v61  ;;  %v1996_v20 = vand.u32 2147483647, %v1986_v61 }
 0x170   : > { %v1948_v59 = vmul.f32 %v2509_v39, %v1946_v34  ;;  %vm1953_vm3 = vweird.f32 %v2509_v39  ;;  %vm1992_vm8 = vweird.f32 %v1986_v61  ;;  %v1976_v35 = vmul.f32 %v1975_v63, %v3219_v27 }
 0x171   : > { %v2435_v12 = vclamps-f32 %v1921_v38, 1.0  ;;  %vm1954_vm5 = vmor %vm1952_vm4, %vm1953_vm3  ;;  %v1999_v3 = vor.u32 1.1754944e-38, %v1998_v26  ;;  %vm1997_vm10 = vcmp.eq.f32.partialorder %v1996_v20, 8.507059e+37 }
 0x172   : > { %v1949_v11 = vsub.f32 1.0, %v1948_v59 }
 0x173   : > { %v2009_v9 = vadd.f32 1.0, %v2435_v12 }
 0x174   : > { %v1950_v29 = vmul.f32 %v2509_v39, %v1949_v11 }
 0x175   : > { %v2017_v56 = vmul.f32 %v2009_v9, %v1673_v7  ;;  %v2511_v43 = vpop.eup %2510 }
 0x176   : > { %v1951_v57 = vadd.f32 %v2509_v39, %v1950_v29  ;;  %v1988_v13 = vmul.f32 %v2511_v43, %v1986_v61  ;;  %vm1993_vm7 = vweird.f32 %v2511_v43 }
 0x177   : > { %2025 = vst.msk [vmem:[%s3129_s15 + $0x28] sm:$0xff] %vm509_vm0, %v2017_v56  ;;  %vm1994_vm9 = vmor %vm1992_vm8, %vm1993_vm7 }
 0x178   : > { %v1955_v58 = vsel %vm1954_vm5, %v2509_v39, %v1951_v57  ;;  %v1989_v16 = vsub.f32 1.0, %v1988_v13 }
 0x179   : > { %v1960_v55 = vsel %vm1957_vm6, %v1959_v10, %v1955_v58 }
 0x17a   : > { %v1961_v17 = vmul.f32 %v1960_v55, %v1936_v21  ;;  %v1990_v25 = vmul.f32 %v2511_v43, %v1989_v16 }
 0x17c   : > { %v2436_v15 = vclamps-f32 %v1961_v17, 1.0  ;;  %v1991_v2 = vadd.f32 %v2511_v43, %v1990_v25 }
 0x17e   : > { %v2010_v33 = vadd.f32 1.0, %v2436_v15  ;;  %v1995_v23 = vsel %vm1994_vm9, %v2511_v43, %v1991_v2 }
 0x17f   : > { %v2000_v4 = vsel %vm1997_vm10, %v1999_v3, %v1995_v23 }
 0x180   : > { %v2018_v32 = vmul.f32 %v2010_v33, %v1674_v50  ;;  %v2001_v45 = vmul.f32 %v2000_v4, %v1976_v35 }
 0x182   : > { %2026 = vst.msk [vmem:[%s3129_s15 + $0x30] sm:$0xff] %vm509_vm0, %v2018_v32  ;;  %v2437_v30 = vclamps-f32 %v2001_v45, 1.0 }
 0x184   : > { %v2011_v18 = vadd.f32 1.0, %v2437_v30 }
 0x186   : > { %v2019_v24 = vmul.f32 %v2011_v18, %v1675_v36 }
 0x188   : > { %2027 = vst.msk [vmem:[%s3129_s15 + $0x38] sm:$0xff] %vm509_vm0, %v2019_v24 }
 0x189 PF: > { %s16_s23 = sadd.s32 1, %s2534_s23   ;;  %s3291_s21 = smov %s2530_s22 }
 0x18a   : > { %p13_p5 = scmp.ge.s32.totalorder %s16_s23, 4   ;;  %s3292_s22 = smov %s3294_s24 }
 0x18c   :  { %15 = sbr.rel (!%p13_p5) target bundleno = 2 (0x2), region = 99 }

// kernel: forward.7
= control target key start
LH: loop header
LB: loop body
LE: loop exit
PB: predicated region body
PF: predicated region fallthrough
CT: control target
= control target key end

     0   :  { %9 = vsyncpa [#allocation3], 0  ;;  %s3197_s0 = inlined_call_operand.vmem [shape: bf16[2,10,10,16], index: 0, kind: input, shape index: {}]   ;;  %s3198_s1 = inlined_call_operand.vmem [shape: bf16[9,16,16], index: 1, kind: input, shape index: {}]   ;;  %s3199_s2 = inlined_call_operand.vmem [shape: f32[1,16], index: 2, kind: input, shape index: {}]   ;;  %s3200_s3 = inlined_call_operand.vmem [shape: f32[2,8,8,16], index: 3, kind: input, shape index: {}]   ;;  %s3201_s4 = inlined_call_operand.hbm [shape: f32[2,8,8,16], index: 4, kind: output, shape index: {}]  }
   0x1   :  { %11 = vsyncpa [#allocation3 + $0x1], 0  ;;  %s2465_s15 = smov 0   ;;  %s2467_s16 = smov 0  }
   0x2   :  { %s2469_s17 = smov 0   ;;  %s2471_s18 = smov 0  }
   0x3   :  { %s2473_s19 = smov 0   ;;  %s2475_s20 = smov 0  }
   0x4 LB: > { %s2009_s21 = sadd.s32 4294967295, %s2436_s20   ;;  %s2010_s22 = sadd.s32 4294967294, %s2436_s20   ;;  %s2436_s20 = sphi %s2475_s20, %s17_s20   ;;  %s2432_s19 = sphi %s2473_s19, %s3218_s19   ;;  %s2428_s18 = sphi %s2471_s18, %s3217_s18   ;;  %s2424_s17 = sphi %s2469_s17, %s3216_s17   ;;  %s2420_s16 = sphi %s2467_s16, %s3215_s16   ;;  %s2416_s15 = sphi %s2465_s15, %s3214_s15  }
   0x5   : > { %s29_s23 = sadd.s32 1, %s2432_s19  ;;  %s144_s24 = sadd.s32 1, %s2424_s17 }
   0x6   : > { %p31_p0 = scmp.ge.s32.totalorder %s29_s23, 2  ;;  %p154_p1 = scmp.ne.s32.totalorder %s2424_s17, %s2420_s16 }
   0x7   : > { %p155_p2 = scmp.eq.s32.totalorder %s2009_s21, 1  ;;  %p160_p3 = scmp.ne.s32.totalorder %s2420_s16, %s2416_s15 }
   0x8   : > { %s3220_s23 = smov (%p31_p0, %s29_s23), 0  ;;  %p161_p5 = scmp.eq.s32.totalorder %s2010_s22, 1 }
   0x9   : > { %p2505_p4 = por %p155_p2, %p154_p1  ;;  %s139_s26 = ssub.s32 %s2432_s19, %s3220_s23 }
   0xa   : > { %p2015_p6 = scmp.ge.s32.totalorder %s2436_s20, 1  ;;  %p142_p7 = scmp.eq.s32.totalorder %s139_s26, 0 }
   0xb   : > { %p2512_p8 = por %p161_p5, %p160_p3  ;;  %p211_p9 = scmp.lt.s32.totalorder %s2436_s20, 3 }
   0xc   : > { %s2518_s28 = scalar_select %p142_p7, %s2424_s17, %s144_s24  }
   0xd   : > { %p212_p10 = pnand %p2015_p6, %p211_p9 }
   0xe   : > { %p252_p11 = scmp.lt.s32.totalorder (!%p212_p10), %s2428_s18, 1  ;;  %s2279_s29 = sshll.u32 (!%p212_p10), %s2428_s18, 6 }
   0xf   : > { %215 = sbr.rel (%p212_p10) target bundleno = 397 (0x18d), region = 36  ;;  %s1888_s6 = scalar_lea.hbm (!%p212_p10), %s3201_s4, %s2279_s29 }
  0x14   : > { %v2263_v0 = vld [vmem:[%s3198_s1 + $0x8] sm:$0xff]  ;;  %v2264_v1 = vld [vmem:[%s3198_s1 + $0x10] sm:$0xff]  ;;  %s2528_s7 = scalar_select %p252_p11, %s2428_s18, 1  ;;  %v2269_v2 = vld [vmem:[%s3198_s1 + $0x18] sm:$0xff]  ;;  %vm291_vm0 = vsmask.f32 3328 }
  0x15   : > { %2280 = vmatpush.bf16.msra.mxu1 %v2263_v0  ;;  %2281 = vmatpush.bf16.msra.mxu2 %v2263_v0  ;;  %v2262_v3 = vld [vmem:[%s3198_s1] sm:$0xff]  ;;  %vm292_vm1 = vsmask.f32 7440  ;;  %vm427_vm2 = vcmask 130048   ;;  %vm560_vm4 = vcmask 1042432   ;;  %vm561_vm5 = vcmask 1046532  }
  0x16   : > { %2282 = vmatpush.bf16.msra.mxu3 %v2263_v0  ;;  %447 = vmatpush.bf16.msra.mxu0 %v2263_v0  ;;  %s2283_s8 = smul.u32 80, %s2528_s7  ;;  %v2270_v4 = vld [vmem:[%s3198_s1 + $0x20] sm:$0xff]  ;;  %vm2567_vm3 = vmor %vm291_vm0, %vm292_vm1  ;;  %s2257_s11 = sshll.u32 %s2528_s7, 6 }
  0x17   : > { %vm2607_vm6 = vmor %vm560_vm4, %vm561_vm5  ;;  %s2880_s14 = scalar_lea.vmem %s3200_s3, %s2257_s11  ;;  %s249_s7 = sand.u32 1, %s2420_s16  }
  0x18   : > { %s2543_s24 = scalar_lea.vmem %s3197_s0, %s2283_s8  ;;  %s1891_s18 = sshll.u32 %s1888_s6, 4  ;;  %s1892_s18 = int_to_ptr.hbm [resolvable:$true] %s1891_s18 }
  0x19   : > { %635 = vmatpush.bf16.msrb.mxu2 %v2264_v1  ;;  %514 = vmatpush.bf16.msrb.mxu1 %v2262_v3  ;;  %v275_v5 = vld [vmem:[%s2543_s24 + $0x10] sm:$0xf]  ;;  %v276_v6 = vld [vmem:[%s2543_s24 + $0x18] sm:$0xf]  ;;  %v2548_v7 = vld [vmem:[%s2543_s24 + $0x14] sm:$0x1] }
  0x1a   : > { %722 = vmatpush.bf16.msrb.mxu3 %v2269_v2  ;;  %920 = vmatpush.bf16.msrb.mxu0 %v2270_v4  ;;  %v2551_v8 = vld [vmem:[%s2543_s24 + $0x1c] sm:$0x1]  ;;  %v323_v9 = vshrl.u32 %v275_v5, 16  ;;  %v326_v10 = vshll.u32 %v275_v5, 16  ;;  %v332_v11 = vshll.u32 %v2548_v7, 16  ;;  %v337_v12 = vshrl.u32 %v276_v6, 16 }
  0x1b   : > { %v340_v13 = vshll.u32 %v276_v6, 16  ;;  %v346_v14 = vshll.u32 %v2551_v8, 16  ;;  %v277_v15 = vld [vmem:[%s2543_s24 + $0x20] sm:$0xf]  ;;  %v278_v16 = vld [vmem:[%s2543_s24 + $0x28] sm:$0xf] }
  0x1c   : > { %v325_v17 = vrot.slane %v323_v9, 4  ;;  %v328_v18 = vrot.slane %v326_v10, 5  ;;  %v334_v19 = vrot.slane %v332_v11, 5  ;;  %v339_v20 = vrot.slane %v337_v12, 4  ;;  %v2558_v21 = vld [vmem:[%s2543_s24 + $0x24] sm:$0x1] }
  0x1d   : > { %v342_v22 = vrot.slane %v340_v13, 5  ;;  %v348_v23 = vrot.slane %v346_v14, 5  ;;  %v2561_v24 = vld [vmem:[%s2543_s24 + $0x2c] sm:$0x1]  ;;  %v351_v25 = vshrl.u32 %v277_v15, 16  ;;  %v354_v26 = vshll.u32 %v277_v15, 16 }
  0x1e   : > { %v329_v27 = vor.u32 %v328_v18, %v325_v17  ;;  %v360_v28 = vshll.u32 %v2558_v21, 16  ;;  %v365_v29 = vshrl.u32 %v278_v16, 16  ;;  %v368_v30 = vshll.u32 %v278_v16, 16  ;;  %v279_v31 = vld [vmem:[%s2543_s24 + $0x30] sm:$0xf]  ;;  %s1876_s9 = scalar_lea.sflag [#allocation3], %s249_s7 }
  0x1f   : > { %v343_v33 = vor.u32 %v342_v22, %v339_v20  ;;  %v353_v34 = vrot.slane %v351_v25, 4  ;;  %v356_v35 = vrot.slane %v354_v26, 5  ;;  %v374_v36 = vshll.u32 %v2561_v24, 16  ;;  %v2573_v41 = vld [vmem:[%s2543_s24 + $0x34] sm:$0x1]  ;;  %s2372_s10 = sshra.s32 %s1892_s18, 4  ;;  %s2373_s10 = int_to_ptr.hbm [resolvable:$true] %s2372_s10 }
  0x20   : > { %v330_v37 = vrot.slane %v329_v27, 4  ;;  %v362_v38 = vrot.slane %v360_v28, 5  ;;  %v367_v39 = vrot.slane %v365_v29, 4  ;;  %v370_v40 = vrot.slane %v368_v30, 5  ;;  %v280_v48 = vld [vmem:[%s2543_s24 + $0x38] sm:$0xf]  ;;  %p2379_p1 = scmp.lt.s32.totalorder %s2373_s10, %s3201_s4 }
  0x21   : > { %v344_v42 = vrot.slane %v343_v33, 4  ;;  %v357_v43 = vor.u32 %v356_v35, %v353_v34  ;;  %v376_v44 = vrot.slane %v374_v36, 5  ;;  %v379_v45 = vshrl.u32 %v279_v31, 16  ;;  %v2579_v49 = vld [vmem:[%s2543_s24 + $0x3c] sm:$0x1]  ;;  %v2276_v17 = vld [vmem:[%s3198_s1 + $0x30] sm:$0xff] }
  0x22   : > { %v335_v46 = vsel %vm2567_vm3, %v330_v37, %v334_v19  ;;  %v371_v47 = vor.u32 %v370_v40, %v367_v39  ;;  %v382_v50 = vshll.u32 %v279_v31, 16  ;;  %v388_v51 = vshll.u32 %v2573_v41, 16  ;;  %v273_v60 = vld [vmem:[%s2543_s24] sm:$0xf]  ;;  %v283_v1 = vld [vmem:[%s2543_s24 + $0x4] sm:$0x1] }
  0x23   : > { %v349_v52 = vsel %vm2567_vm3, %v344_v42, %v348_v23  ;;  %v411_v53 = vunpack.c.l.b16 %v335_v46  ;;  %v358_v54 = vrot.slane %v357_v43, 4  ;;  %v381_v55 = vrot.slane %v379_v45, 4  ;;  %v274_v6 = vld [vmem:[%s2543_s24 + $0x8] sm:$0xf]  ;;  %v284_v20 = vld [vmem:[%s2543_s24 + $0xc] sm:$0x1] }
  0x24   : > { %v412_v56 = vunpack.c.l.b16 %v349_v52  ;;  %v372_v57 = vrot.slane %v371_v47, 4  ;;  %v384_v58 = vrot.slane %v382_v50, 5  ;;  %v390_v59 = vrot.slane %v388_v51, 5  ;;  %v536_v29 = vld [vmem:[%s2543_s24] sm:$0xe]  ;;  %v2271_v30 = vld [vmem:[%s3198_s1 + $0x28] sm:$0xff] }
  0x25   : > { %v363_v61 = vsel %vm2567_vm3, %v358_v54, %v362_v38  ;;  %v393_v62 = vshrl.u32 %v280_v48, 16  ;;  %v396_v63 = vshll.u32 %v280_v48, 16  ;;  %v402_v0 = vshll.u32 %v2579_v49, 16  ;;  %v537_v36 = vld [vmem:[%s2543_s24 + $0x8] sm:$0xe]  ;;  %s2374_s11 = scalar_lea.hbm %s2373_s10, 64 }
  0x26   : > { %v418_v2 = vpack.c.b16 %v412_v56, %v411_v53  ;;  %v377_v3 = vsel %vm2567_vm3, %v372_v57, %v376_v44  ;;  %v413_v4 = vunpack.c.l.b16 %v363_v61  ;;  %v385_v5 = vor.u32 %v384_v58, %v381_v55  ;;  %v2106_v43 = vld [vmem:[%s2543_s24 + $0x8] sm:$0xf]  ;;  %v2108_v54 = vld [vmem:[%s2543_s24 + $0x10] sm:$0xf]  ;;  %v2277_v56 = vld [vmem:[%s3198_s1 + $0x38] sm:$0xff]  ;;  %p2375_p12 = scmp.ne.s32.totalorder %s2373_s10, %s2374_s11 }
  0x27   : > { %v414_v9 = vunpack.c.l.b16 %v377_v3  ;;  %v395_v10 = vrot.slane %v393_v62, 4  ;;  %v398_v11 = vrot.slane %v396_v63, 5  ;;  %v404_v12 = vrot.slane %v402_v0, 5  ;;  %v2628_v61 = vld [vmem:[%s2543_s24 + $0x14] sm:$0x1] }
  0x28   : > { %2027 = vmatmul.msk.bf16.vlgmr.msra.gmra.mxu1 %vm427_vm2, %v418_v2  ;;  %v386_v13 = vrot.slane %v385_v5, 4  ;;  %v295_v14 = vshrl.u32 %v273_v60, 16  ;;  %v298_v15 = vshll.u32 %v273_v60, 16  ;;  %v304_v16 = vshll.u32 %v283_v1, 16  ;;  %v2625_v60 = vld [vmem:[%s2543_s24 + $0xc] sm:$0x1]  ;;  %p2376_p13 = pnand %p2375_p12, %p2505_p4 }
  0x29   : > { %v419_v18 = vpack.c.b16 %v414_v9, %v413_v4  ;;  %v399_v19 = vor.u32 %v398_v11, %v395_v10  ;;  %v309_v22 = vshrl.u32 %v274_v6, 16  ;;  %v312_v23 = vshll.u32 %v274_v6, 16  ;;  %1046 = vmatpush.bf16.msra.mxu1 %v2271_v30  ;;  %v2032_v0 = vld [vmem:[%s2543_s24] sm:$0xf] }
  0x2a   : > { %v391_v25 = vsel %vm2567_vm3, %v386_v13, %v390_v59  ;;  %v297_v26 = vrot.slane %v295_v14, 4  ;;  %v300_v27 = vrot.slane %v298_v15, 5  ;;  %v306_v28 = vrot.slane %v304_v16, 5  ;;  %v2278_v13 = vld [vmem:[%s3198_s1 + $0x40] sm:$0xff]  ;;  %p2377_p0 = pneg %p2376_p13 }
  0x2b   : > { %2028 = vmatmul.msk.bf16.vlgmr.msra.gmra.mxu2 %vm427_vm2, %v419_v18  ;;  %v400_v31 = vrot.slane %v399_v19, 4  ;;  %v415_v33 = vunpack.c.l.b16 %v391_v25  ;;  %v311_v34 = vrot.slane %v309_v22, 4  ;;  %v314_v35 = vrot.slane %v312_v23, 5 }
  0x2c   : > { %v301_v37 = vor.u32 %v300_v27, %v297_v26  ;;  %v318_v38 = vshll.u32 %v284_v20, 16  ;;  %v565_v39 = vrot.slane %v283_v1, 5  ;;  %v569_v40 = vrot.slane %v284_v20, 5  ;;  %1133 = vmatpush.bf16.msra.mxu2 %v2276_v17  ;;  %v2258_v1 = vld [vmem:[%s2543_s24 + $0x4] sm:$0xf0] }
  0x2d   : > { %v405_v44 = vsel %vm2567_vm3, %v400_v31, %v404_v12  ;;  %v315_v45 = vor.u32 %v314_v35, %v311_v34  ;;  %v2054_v46 = vrot.slane %v536_v29, 9  ;;  %v2055_v51 = vrot.slane %v537_v36, 9  ;;  %v538_v26 = vld [vmem:[%s2543_s24 + $0x10] sm:$0xe]  ;;  %v2110_v27 = vld [vmem:[%s2543_s24 + $0x18] sm:$0xf] }
  0x2e   : > { %v416_v47 = vunpack.c.l.b16 %v405_v44  ;;  %v302_v48 = vrot.slane %v301_v37, 4  ;;  %v320_v50 = vrot.slane %v318_v38, 5  ;;  %v769_v55 = vshrl.u32 %v2106_v43, 16  ;;  %v2112_v29 = vld [vmem:[%s2543_s24 + $0x20] sm:$0xf] }
  0x2f   : > { %v316_v52 = vrot.slane %v315_v45, 4  ;;  %v566_v53 = vsel %vm2607_vm6, %v2054_v46, %v565_v39  ;;  %v570_v59 = vsel %vm2607_vm6, %v2055_v51, %v569_v40  ;;  %v772_v5 = vshll.u32 %v2106_v43, 16  ;;  %v539_v31 = vld [vmem:[%s2543_s24 + $0x18] sm:$0xe]  ;;  %v2084_v37 = vld [vmem:[%s2543_s24 + $0x8] sm:$0xf] }
  0x30   : > { %v420_v57 = vpack.c.b16 %v416_v47, %v415_v33  ;;  %v307_v58 = vsel %vm2567_vm3, %v302_v48, %v306_v28  ;;  %v598_v2 = vunpack.c.l.b16 %v566_v53  ;;  %v771_v4 = vrot.slane %v769_v55, 4  ;;  %v2265_v38 = vld [vmem:[%s2543_s24 + $0xc] sm:$0xf0]  ;;  %v2658_v51 = vld [vmem:[%s2543_s24 + $0x1c] sm:$0x1] }
  0x31   : > { %v321_v62 = vsel %vm2567_vm3, %v316_v52, %v320_v50  ;;  %v409_v63 = vunpack.c.l.b16 %v307_v58  ;;  %v783_v6 = vshrl.u32 %v2108_v54, 16  ;;  %v599_v9 = vunpack.c.l.b16 %v570_v59  ;;  %v2036_v58 = vld [vmem:[%s2543_s24 + $0x10] sm:$0xf] }
  0x32   : > { %2029 = vmatmul.msk.bf16.vlgmr.msra.gmra.mxu3 %vm427_vm2, %v420_v57  ;;  %v410_v3 = vunpack.c.l.b16 %v321_v62  ;;  %v778_v10 = vshll.u32 %v2625_v60, 16  ;;  %v786_v11 = vshll.u32 %v2108_v54, 16  ;;  %v792_v12 = vshll.u32 %v2628_v61, 16  ;;  %v2663_v57 = vld [vmem:[%s2543_s24 + $0x24] sm:$0x1] }
  0x33   : > { %1331 = vmatpush.bf16.msra.mxu3 %v2277_v56  ;;  %v2033_v15 = vor.u32 %v2258_v1, %v2032_v0  ;;  %v774_v16 = vrot.slane %v772_v5, 5  ;;  %v785_v17 = vrot.slane %v783_v6, 4  ;;  %v606_v20 = vpack.c.b16 %v599_v9, %v598_v2  ;;  %v2114_v6 = vld [vmem:[%s2543_s24 + $0x28] sm:$0xf] }
  0x34   : > { %v417_v14 = vpack.c.b16 %v410_v3, %v409_v63  ;;  %v788_v18 = vrot.slane %v786_v11, 5  ;;  %v780_v22 = vrot.slane %v778_v10, 5  ;;  %v794_v25 = vrot.slane %v792_v12, 5 }
  0x35   : > { %v775_v19 = vor.u32 %v774_v16, %v771_v4  ;;  %v2056_v33 = vrot.slane %v538_v26, 9  ;;  %v573_v34 = vrot.slane %v2548_v7, 5  ;;  %v797_v35 = vshrl.u32 %v2110_v27, 16 }
  0x36   : > { %2026 = vmatmul.msk.bf16.vlgmr.msra.gmra.mxu0 %vm427_vm2, %v417_v14  ;;  %v789_v23 = vor.u32 %v788_v18, %v785_v17  ;;  %v800_v36 = vshll.u32 %v2110_v27, 16  ;;  %v811_v43 = vshrl.u32 %v2112_v29, 16  ;;  %v814_v44 = vshll.u32 %v2112_v29, 16  ;;  %v540_v14 = vld [vmem:[%s2543_s24 + $0x20] sm:$0xe] }
  0x37   : > { %1457 = vmatpush.bf16.msra.mxu0 %v2278_v13  ;;  %v776_v28 = vrot.slane %v775_v19, 4  ;;  %v2057_v45 = vrot.slane %v539_v31, 9  ;;  %v577_v7 = vrot.slane %v2551_v8, 5  ;;  %v2085_v46 = vor.u32 %v2265_v38, %v2084_v37  ;;  %v2259_v8 = vld [vmem:[%s2543_s24 + $0x14] sm:$0xf0] }
  0x38   : > { %2050 = vmatmul.msk.bf16.vlgmr.msrb.gmra.mxu1 %vm427_vm2, %v2033_v15  ;;  %v790_v30 = vrot.slane %v789_v23, 4  ;;  %v574_v50 = vsel %vm2607_vm6, %v2056_v33, %v573_v34  ;;  %v799_v52 = vrot.slane %v797_v35, 4  ;;  %v802_v53 = vrot.slane %v800_v36, 5  ;;  %v2116_v13 = vld [vmem:[%s2543_s24 + $0x30] sm:$0xf] }
  0x39   : > { %v781_v39 = vsel %vm2567_vm3, %v776_v28, %v780_v22  ;;  %v813_v54 = vrot.slane %v811_v43, 4  ;;  %v816_v55 = vrot.slane %v814_v44, 5  ;;  %v578_v56 = vsel %vm2607_vm6, %v2057_v45, %v577_v7  ;;  %v541_v15 = vld [vmem:[%s2543_s24 + $0x28] sm:$0xe]  ;;  %v2088_v18 = vld [vmem:[%s2543_s24 + $0x18] sm:$0xf] }
  0x3a   : > { %v795_v40 = vsel %vm2567_vm3, %v790_v30, %v794_v25  ;;  %v883_v47 = vunpack.c.l.b16 %v781_v39  ;;  %v600_v62 = vunpack.c.l.b16 %v574_v50  ;;  %v806_v63 = vshll.u32 %v2658_v51, 16  ;;  %v2266_v19 = vld [vmem:[%s2543_s24 + $0x1c] sm:$0xf0]  ;;  %v2686_v36 = vld [vmem:[%s2543_s24 + $0x2c] sm:$0x1] }
  0x3b   : > { %2068 = vmatmul.msk.bf16.vlgmr.msrb.gmra.mxu2 %vm427_vm2, %v606_v20  ;;  %v884_v48 = vunpack.c.l.b16 %v795_v40  ;;  %v601_v0 = vunpack.c.l.b16 %v578_v56  ;;  %v803_v1 = vor.u32 %v802_v53, %v799_v52  ;;  %v817_v2 = vor.u32 %v816_v55, %v813_v54  ;;  %v2040_v43 = vld [vmem:[%s2543_s24 + $0x20] sm:$0xf]  ;;  %v542_v55 = vld [vmem:[%s2543_s24 + $0x30] sm:$0xe] }
  0x3c   : > { %v820_v3 = vshll.u32 %v2663_v57, 16  ;;  %v2037_v4 = vor.u32 %v2259_v8, %v2036_v58  ;;  %v808_v5 = vrot.slane %v806_v63, 5  ;;  %v825_v16 = vshrl.u32 %v2114_v6, 16  ;;  %v2120_v63 = vld [vmem:[%s2543_s24 + $0x40] sm:$0xf] }
  0x3d   : > { %v891_v59 = vpack.c.b16 %v884_v48, %v883_v47  ;;  %v607_v9 = vpack.c.b16 %v601_v0, %v600_v62  ;;  %v804_v10 = vrot.slane %v803_v1, 4  ;;  %v818_v11 = vrot.slane %v817_v2, 4  ;;  %v2118_v62 = vld [vmem:[%s2543_s24 + $0x38] sm:$0xf]  ;;  %v2092_v0 = vld [vmem:[%s2543_s24 + $0x28] sm:$0xf] }
  0x3e   : > { %v822_v12 = vrot.slane %v820_v3, 5  ;;  %v828_v17 = vshll.u32 %v2114_v6, 16  ;;  %v839_v23 = vshrl.u32 %v2116_v13, 16  ;;  %v842_v25 = vshll.u32 %v2116_v13, 16  ;;  %v2267_v3 = vld [vmem:[%s2543_s24 + $0x2c] sm:$0xf0] }
  0x3f   : > { %v809_v20 = vsel %vm2567_vm3, %v804_v10, %v808_v5  ;;  %v2058_v26 = vrot.slane %v540_v14, 9  ;;  %v581_v27 = vrot.slane %v2558_v21, 5  ;;  %v2059_v28 = vrot.slane %v541_v15, 9  ;;  %v2693_v21 = vld [vmem:[%s2543_s24 + $0x34] sm:$0x1] }
  0x40   : > { %v823_v22 = vsel %vm2567_vm3, %v818_v11, %v822_v12  ;;  %v585_v29 = vrot.slane %v2561_v24, 5  ;;  %v827_v30 = vrot.slane %v825_v16, 4  ;;  %v830_v31 = vrot.slane %v828_v17, 5  ;;  %v2260_v24 = vld [vmem:[%s2543_s24 + $0x24] sm:$0xf0] }
  0x41   : > { %v2089_v33 = vor.u32 %v2266_v19, %v2088_v18  ;;  %v885_v34 = vunpack.c.l.b16 %v809_v20  ;;  %v886_v35 = vunpack.c.l.b16 %v823_v22  ;;  %v841_v37 = vrot.slane %v839_v23, 4  ;;  %v2720_v17 = vld [vmem:[%s2543_s24 + $0x3c] sm:$0x1]  ;;  %v2723_v18 = vld [vmem:[%s2543_s24 + $0x44] sm:$0x1] }
  0x42   : > { %2102 = vmatmul.msk.bf16.vlgmr.msrb.gmra.mxu3 %vm427_vm2, %v2085_v46  ;;  %v844_v38 = vrot.slane %v842_v25, 5  ;;  %v582_v39 = vsel %vm2607_vm6, %v2058_v26, %v581_v27  ;;  %v586_v40 = vsel %vm2607_vm6, %v2059_v28, %v585_v29  ;;  %v831_v44 = vor.u32 %v830_v31, %v827_v30  ;;  %v2044_v25 = vld [vmem:[%s2543_s24 + $0x30] sm:$0xf]  ;;  %v2261_v26 = vld [vmem:[%s2543_s24 + $0x34] sm:$0xf0] }
  0x43   : > { %v834_v45 = vshll.u32 %v2686_v36, 16  ;;  %v892_v7 = vpack.c.b16 %v886_v35, %v885_v34  ;;  %v602_v46 = vunpack.c.l.b16 %v582_v39  ;;  %v603_v47 = vunpack.c.l.b16 %v586_v40 }
  0x44   : > { %v845_v48 = vor.u32 %v844_v38, %v841_v37  ;;  %v848_v50 = vshll.u32 %v2693_v21, 16  ;;  %v2041_v52 = vor.u32 %v2260_v24, %v2040_v43  ;;  %v832_v53 = vrot.slane %v831_v44, 4  ;;  %v2194_v38 = vld [vmem:[%s2543_s24 + $0x18] sm:$0xf] }
  0x45   : > { %v836_v54 = vrot.slane %v834_v45, 5  ;;  %v608_v56 = vpack.c.b16 %v603_v47, %v602_v46  ;;  %v589_v2 = vrot.slane %v2573_v41, 5  ;;  %v593_v6 = vrot.slane %v2579_v49, 5  ;;  %v2132_v45 = vld [vmem:[%s2543_s24 + $0x8] sm:$0xe] }
  0x46   : > { %2128 = vmatmul.msk.bf16.vlgmr.msrb.gmra.mxu0 %vm427_vm2, %v891_v59  ;;  %v846_v58 = vrot.slane %v845_v48, 4  ;;  %v850_v8 = vrot.slane %v848_v50, 5  ;;  %v543_v59 = vld [vmem:[%s2543_s24 + $0x38] sm:$0xe]  ;;  %v856_v11 = vshll.u32 %v2118_v62, 16  ;;  %v867_v12 = vshrl.u32 %v2120_v63, 16 }
  0x47   : > { %v837_v1 = vsel %vm2567_vm3, %v832_v53, %v836_v54  ;;  %v2061_v5 = vrot.slane %v543_v59, 9  ;;  %v870_v13 = vshll.u32 %v2120_v63, 16  ;;  %v2093_v14 = vor.u32 %v2267_v3, %v2092_v0  ;;  %v2096_v59 = vld [vmem:[%s2543_s24 + $0x38] sm:$0xf] }
  0x48   : > { %2051 = vmatmul.msk.bf16.gmra.mxu1 %vm427_vm2, %v2037_v4  ;;  %v2060_v4 = vrot.slane %v542_v55, 9  ;;  %v851_v10 = vsel %vm2567_vm3, %v846_v58, %v850_v8  ;;  %v887_v41 = vunpack.c.l.b16 %v837_v1  ;;  %v858_v20 = vrot.slane %v856_v11, 5  ;;  %v2193_v8 = vld [vmem:[%s2543_s24 + $0x14] sm:$0x1] }
  0x49   : > { %v888_v15 = vunpack.c.l.b16 %v851_v10  ;;  %v594_v49 = vsel %vm2607_vm6, %v2061_v5, %v593_v6  ;;  %v869_v22 = vrot.slane %v867_v12, 4  ;;  %v872_v23 = vrot.slane %v870_v13, 5 }
  0x4a   : > { %v590_v16 = vsel %vm2607_vm6, %v2060_v4, %v589_v2  ;;  %v605_v29 = vunpack.c.l.b16 %v594_v49  ;;  %v862_v30 = vshll.u32 %v2720_v17, 16  ;;  %v876_v31 = vshll.u32 %v2723_v18, 16  ;;  %v2170_v49 = vld [vmem:[%s2543_s24 + $0x10] sm:$0xf] }
  0x4b   : > { %2069 = vmatmul.msk.bf16.gmra.mxu2 %vm427_vm2, %v607_v9  ;;  %v853_v9 = vshrl.u32 %v2118_v62, 16  ;;  %v604_v27 = vunpack.c.l.b16 %v590_v16  ;;  %v893_v28 = vpack.c.b16 %v888_v15, %v887_v41  ;;  %v873_v35 = vor.u32 %v872_v23, %v869_v22  ;;  %v2268_v62 = vld [vmem:[%s2543_s24 + $0x3c] sm:$0xf0]  ;;  %v2272_v22 = vld [vmem:[%s2543_s24 + $0x14] sm:$0xf0] }
  0x4c   : > { %v2045_v37 = vor.u32 %v2261_v26, %v2044_v25  ;;  %v864_v24 = vrot.slane %v862_v30, 5  ;;  %v878_v44 = vrot.slane %v876_v31, 5  ;;  %v1194_v48 = vshrl.u32 %v2194_v38, 16  ;;  %v2196_v26 = vld [vmem:[%s2543_s24 + $0x20] sm:$0xf] }
  0x4d   : > { %v855_v19 = vrot.slane %v853_v9, 4  ;;  %v609_v43 = vpack.c.b16 %v605_v29, %v604_v27  ;;  %v874_v47 = vrot.slane %v873_v35, 4  ;;  %v1197_v50 = vshll.u32 %v2194_v38, 16  ;;  %v2134_v35 = vld [vmem:[%s2543_s24 + $0x18] sm:$0xe] }
  0x4e   : > { %v980_v53 = vrot.slane %v2628_v61, 5  ;;  %v2140_v54 = vrot.slane %v2132_v45, 9  ;;  %v2195_v61 = vld [vmem:[%s2543_s24 + $0x1c] sm:$0x1]  ;;  %v1189_v5 = vshll.u32 %v2193_v8, 16  ;;  %v2097_v6 = vor.u32 %v2268_v62, %v2096_v59 }
  0x4f   : > { %v859_v34 = vor.u32 %v858_v20, %v855_v19  ;;  %v879_v0 = vsel %vm2567_vm3, %v874_v47, %v878_v44  ;;  %v1199_v1 = vrot.slane %v1197_v50, 5  ;;  %v1203_v12 = vshll.u32 %v2195_v61, 16  ;;  %v2218_v19 = vld [vmem:[%s2543_s24 + $0x10] sm:$0xe]  ;;  %v2219_v20 = vld [vmem:[%s2543_s24 + $0x18] sm:$0xe] }
  0x50   : > { %v890_v10 = vunpack.c.l.b16 %v879_v0  ;;  %v1191_v15 = vrot.slane %v1189_v5, 5  ;;  %v2226_v30 = vrot.slane %v2218_v19, 9  ;;  %v1387_v31 = vrot.slane %v2193_v8, 5  ;;  %v2199_v59 = vld [vmem:[%s2543_s24 + $0x2c] sm:$0x1] }
  0x51   : > { %v860_v46 = vrot.slane %v859_v34, 4  ;;  %v1205_v25 = vrot.slane %v1203_v12, 5  ;;  %v2171_v34 = vor.u32 %v2272_v22, %v2170_v49  ;;  %v1208_v38 = vshrl.u32 %v2196_v26, 16  ;;  %v2174_v5 = vld [vmem:[%s2543_s24 + $0x20] sm:$0xf] }
  0x52   : > { %2103 = vmatmul.msk.bf16.gmra.mxu3 %vm427_vm2, %v2089_v33  ;;  %v2192_v33 = vld [vmem:[%s2543_s24 + $0x10] sm:$0xf]  ;;  %v2202_v49 = vld [vmem:[%s2543_s24 + $0x38] sm:$0xf] }
  0x53   : > { %v1180_v39 = vshrl.u32 %v2192_v33, 16  ;;  %v1183_v40 = vshll.u32 %v2192_v33, 16  ;;  %v865_v63 = vsel %vm2567_vm3, %v860_v46, %v864_v24  ;;  %v2227_v33 = vrot.slane %v2219_v20, 9  ;;  %v2200_v12 = vld [vmem:[%s2543_s24 + $0x30] sm:$0xf] }
  0x54   : > { %v889_v9 = vunpack.c.l.b16 %v865_v63  ;;  %v984_v46 = vrot.slane %v2658_v51, 5  ;;  %v1236_v20 = vshrl.u32 %v2200_v12, 16  ;;  %v1239_v22 = vshll.u32 %v2200_v12, 16 }
  0x55   : > { %v1185_v58 = vrot.slane %v1183_v40, 5 }
  0x56   : > { %2129 = vmatmul.msk.bf16.gmra.mxu0 %vm427_vm2, %v892_v7  ;;  %v2133_v7 = vld [vmem:[%s2543_s24 + $0x10] sm:$0xe]  ;;  %v894_v16 = vpack.c.b16 %v890_v10, %v889_v9 }
  0x57   : > { %v2141_v55 = vrot.slane %v2133_v7, 9  ;;  %v2142_v7 = vrot.slane %v2134_v35, 9  ;;  %v992_v35 = vrot.slane %v2686_v36, 5  ;;  %v2203_v36 = vld [vmem:[%s2543_s24 + $0x3c] sm:$0x1] }
  0x58   : > { %2052 = vmatmul.msk.bf16.gmra.mxu1 %vm427_vm2, %v2041_v52  ;;  %v976_v52 = vrot.slane %v2625_v60, 5  ;;  %v1196_v60 = vrot.slane %v1194_v48, 4  ;;  %v988_v48 = vrot.slane %v2663_v57, 5 }
  0x59   : > { %v981_v3 = vsel %vm2607_vm6, %v2141_v55, %v980_v53  ;;  %v1210_v53 = vrot.slane %v1208_v38, 4  ;;  %v985_v57 = vsel %vm2607_vm6, %v2142_v7, %v984_v46 }
  0x5a   : > { %v977_v2 = vsel %vm2607_vm6, %v2140_v54, %v976_v52  ;;  %v1200_v11 = vor.u32 %v1199_v1, %v1196_v60  ;;  %v1388_v52 = vsel %vm2607_vm6, %v2226_v30, %v1387_v31  ;;  %v1399_v31 = vrot.slane %v2199_v59, 5 }
  0x5b   : > { %2070 = vmatmul.msk.bf16.gmra.mxu2 %vm427_vm2, %v608_v56  ;;  %v1182_v56 = vrot.slane %v1180_v39, 4  ;;  %v1009_v13 = vunpack.c.l.b16 %v977_v2  ;;  %v1211_v39 = vshll.u32 %v2196_v26, 16  ;;  %v1420_v51 = vunpack.c.l.b16 %v1388_v52 }
  0x5c   : > { %v1201_v23 = vrot.slane %v1200_v11, 4  ;;  %v1231_v2 = vshll.u32 %v2199_v59, 16  ;;  %v2220_v11 = vld [vmem:[%s2543_s24 + $0x20] sm:$0xe] }
  0x5d   : > { %v1186_v4 = vor.u32 %v1185_v58, %v1182_v56  ;;  %v1213_v54 = vrot.slane %v1211_v39, 5  ;;  %v2197_v56 = vld [vmem:[%s2543_s24 + $0x24] sm:$0x1]  ;;  %v2228_v19 = vrot.slane %v2220_v11, 9 }
  0x5e   : > { %v1206_v40 = vsel %vm2567_vm3, %v1201_v23, %v1205_v25  ;;  %v1217_v1 = vshll.u32 %v2197_v56, 16  ;;  %v1395_v26 = vrot.slane %v2197_v56, 5 }
  0x5f   : > { %v1187_v41 = vrot.slane %v1186_v4, 4  ;;  %v1295_v50 = vunpack.c.l.b16 %v1206_v40  ;;  %v1214_v60 = vor.u32 %v1213_v54, %v1210_v53  ;;  %v1238_v40 = vrot.slane %v1236_v20, 4 }
  0x60   : > { %v1219_v10 = vrot.slane %v1217_v1, 5  ;;  %v1396_v7 = vsel %vm2607_vm6, %v2228_v19, %v1395_v26  ;;  %v2223_v1 = vld [vmem:[%s2543_s24 + $0x38] sm:$0xe]  ;;  %v1407_v19 = vrot.slane %v2203_v36, 5  ;;  %v1000_v26 = vrot.slane %v2720_v17, 5 }
  0x61   : > { %v1192_v29 = vsel %vm2567_vm3, %v1187_v41, %v1191_v15  ;;  %v1215_v9 = vrot.slane %v1214_v60, 4  ;;  %v1233_v41 = vrot.slane %v1231_v2, 5  ;;  %v2221_v15 = vld [vmem:[%s2543_s24 + $0x28] sm:$0xe]  ;;  %v2222_v60 = vld [vmem:[%s2543_s24 + $0x30] sm:$0xe] }
  0x62   : > { %2104 = vmatmul.msk.bf16.gmra.mxu3 %vm427_vm2, %v2093_v14  ;;  %v1010_v14 = vunpack.c.l.b16 %v981_v3  ;;  %v1294_v45 = vunpack.c.l.b16 %v1192_v29  ;;  %v1011_v3 = vunpack.c.l.b16 %v985_v57  ;;  %v2137_v29 = vld [vmem:[%s2543_s24 + $0x30] sm:$0xe]  ;;  %v2231_v12 = vrot.slane %v2223_v1, 9 }
  0x63   : > { %v1220_v25 = vsel %vm2567_vm3, %v1215_v9, %v1219_v10  ;;  %v2145_v39 = vrot.slane %v2137_v29, 9  ;;  %v2230_v10 = vrot.slane %v2222_v60, 9 }
  0x64   : > { %v1017_v27 = vpack.c.b16 %v1010_v14, %v1009_v13  ;;  %v1302_v63 = vpack.c.b16 %v1295_v50, %v1294_v45  ;;  %v2273_v13 = vld [vmem:[%s2543_s24 + $0x24] sm:$0xf0]  ;;  %v2201_v45 = vld [vmem:[%s2543_s24 + $0x34] sm:$0x1] }
  0x65   : > { %v2175_v23 = vor.u32 %v2273_v13, %v2174_v5  ;;  %v1245_v53 = vshll.u32 %v2201_v45, 16  ;;  %v1403_v11 = vrot.slane %v2201_v45, 5 }
  0x66   : > { %2130 = vmatmul.msk.bf16.gmra.mxu0 %vm427_vm2, %v893_v28  ;;  %v2198_v28 = vld [vmem:[%s2543_s24 + $0x28] sm:$0xf] }
  0x67   : > { %v1222_v24 = vshrl.u32 %v2198_v28, 16  ;;  %v1225_v44 = vshll.u32 %v2198_v28, 16  ;;  %v2136_v28 = vld [vmem:[%s2543_s24 + $0x28] sm:$0xe] }
  0x68   : > { %2053 = vmatmul.msk.bf16.gmra.mxu1 %vm427_vm2, %v2045_v37  ;;  %v2135_v37 = vld [vmem:[%s2543_s24 + $0x20] sm:$0xe]  ;;  %v2144_v38 = vrot.slane %v2136_v28, 9  ;;  %v1004_v28 = vrot.slane %v2723_v18, 5 }
  0x69   : > { %v2143_v47 = vrot.slane %v2135_v37, 9  ;;  %v1224_v58 = vrot.slane %v1222_v24, 4  ;;  %v1227_v8 = vrot.slane %v1225_v44, 5  ;;  %v996_v37 = vrot.slane %v2693_v21, 5 }
  0x6a   : > { %v1296_v24 = vunpack.c.l.b16 %v1220_v25  ;;  %v993_v21 = vsel %vm2607_vm6, %v2144_v38, %v992_v35  ;;  %v2205_v35 = vld [vmem:[%s2543_s24 + $0x44] sm:$0x1] }
  0x6b   : > { %2071 = vmatmul.msk.bf16.gmra.mxu2 %vm427_vm2, %v609_v43  ;;  %v1391_v43 = vrot.slane %v2195_v61, 5  ;;  %v989_v62 = vsel %vm2607_vm6, %v2143_v47, %v988_v48  ;;  %v1228_v61 = vor.u32 %v1227_v8, %v1224_v58  ;;  %v997_v50 = vsel %vm2607_vm6, %v2145_v39, %v996_v37  ;;  %v2207_v39 = vld [vmem:[%s2543_s24 + $0x4c] sm:$0x1] }
  0x6c   : > { %v1012_v4 = vunpack.c.l.b16 %v989_v62  ;;  %v1259_v8 = vshll.u32 %v2203_v36, 16  ;;  %v1013_v59 = vunpack.c.l.b16 %v993_v21  ;;  %v1247_v62 = vrot.slane %v1245_v53, 5 }
  0x6d   : > { %v1392_v55 = vsel %vm2607_vm6, %v2227_v33, %v1391_v43  ;;  %v1229_v14 = vrot.slane %v1228_v61, 4  ;;  %v1250_v33 = vshrl.u32 %v2202_v49, 16  ;;  %v1241_v43 = vrot.slane %v1239_v22, 5  ;;  %v2274_v61 = vld [vmem:[%s2543_s24 + $0x34] sm:$0xf0] }
  0x6e   : > { %v1421_v0 = vunpack.c.l.b16 %v1392_v55  ;;  %v1422_v55 = vunpack.c.l.b16 %v1396_v7  ;;  %v1273_v45 = vshll.u32 %v2205_v35, 16  ;;  %v1415_v1 = vrot.slane %v2207_v39, 5 }
  0x6f   : > { %v1234_v30 = vsel %vm2567_vm3, %v1229_v14, %v1233_v41  ;;  %v1252_v47 = vrot.slane %v1250_v33, 4  ;;  %v1242_v52 = vor.u32 %v1241_v43, %v1238_v40  ;;  %v2138_v14 = vld [vmem:[%s2543_s24 + $0x38] sm:$0xe]  ;;  %v2139_v41 = vld [vmem:[%s2543_s24 + $0x40] sm:$0xe] }
  0x70   : > { %v1297_v44 = vunpack.c.l.b16 %v1234_v30  ;;  %v2146_v25 = vrot.slane %v2138_v14, 9  ;;  %v1404_v30 = vsel %vm2607_vm6, %v2230_v10, %v1403_v11 }
  0x71   : > { %v1243_v57 = vrot.slane %v1242_v52, 4  ;;  %v1424_v40 = vunpack.c.l.b16 %v1404_v30 }
  0x72   : > { %2105 = vmatmul.msk.bf16.gmra.mxu3 %vm427_vm2, %v2097_v6  ;;  %v1428_v6 = vpack.c.b16 %v1421_v0, %v1420_v51  ;;  %v1303_v54 = vpack.c.b16 %v1297_v44, %v1296_v24  ;;  %v1014_v51 = vunpack.c.l.b16 %v997_v50  ;;  %v2178_v0 = vld [vmem:[%s2543_s24 + $0x30] sm:$0xf]  ;;  %v1001_v17 = vsel %vm2607_vm6, %v2146_v25, %v1000_v26 }
  0x73   : > { %v1248_v9 = vsel %vm2567_vm3, %v1243_v57, %v1247_v62  ;;  %v2179_v13 = vor.u32 %v2274_v61, %v2178_v0  ;;  %v1275_v50 = vrot.slane %v1273_v45, 5  ;;  %v1411_v62 = vrot.slane %v2205_v35, 5 }
  0x74   : > { %v1019_v5 = vpack.c.b16 %v1014_v51, %v1013_v59 }
  0x76   : > { %2131 = vmatmul.msk.bf16.gmra.mxu0 %vm427_vm2, %v894_v16  ;;  %v1018_v16 = vpack.c.b16 %v1012_v4, %v1011_v3  ;;  %v1261_v3 = vrot.slane %v1259_v8, 5  ;;  %v2204_v4 = vld [vmem:[%s2543_s24 + $0x40] sm:$0xf]  ;;  %v2225_v8 = vld [vmem:[%s2543_s24 + $0x48] sm:$0xe] }
  0x77   : > { %v2233_v60 = vrot.slane %v2225_v8, 9 }
  0x78   : > { %2154 = vmatmul.msk.bf16.vlgmr.msra.gmra.mxu1 %vm427_vm2, %v1017_v27  ;;  %v2229_v27 = vrot.slane %v2221_v15, 9  ;;  %v1264_v15 = vshrl.u32 %v2204_v4, 16 }
  0x7a   : > { %v1400_v46 = vsel %vm2607_vm6, %v2229_v27, %v1399_v31  ;;  %v2147_v27 = vrot.slane %v2139_v41, 9  ;;  %v1266_v31 = vrot.slane %v1264_v15, 4 }
  0x7b   : > { %2188 = vmatmul.msk.bf16.vlgmr.msra.gmra.mxu2 %vm427_vm2, %v2171_v34  ;;  %v1253_v34 = vshll.u32 %v2202_v49, 16  ;;  %v1423_v56 = vunpack.c.l.b16 %v1400_v46  ;;  %v1287_v46 = vshll.u32 %v2207_v39, 16 }
  0x7c   : > { %v1005_v18 = vsel %vm2607_vm6, %v2147_v27, %v1004_v28 }
  0x7d   : > { %v1255_v48 = vrot.slane %v1253_v34, 5  ;;  %v1408_v34 = vsel %vm2607_vm6, %v2231_v12, %v1407_v19  ;;  %v1289_v53 = vrot.slane %v1287_v46, 5 }
  0x7e   : > { %v1425_v24 = vunpack.c.l.b16 %v1408_v34 }
  0x7f   : > { %v1256_v58 = vor.u32 %v1255_v48, %v1252_v47  ;;  %v1015_v47 = vunpack.c.l.b16 %v1001_v17  ;;  %v1016_v48 = vunpack.c.l.b16 %v1005_v18 }
  0x80   : > { %v1430_v36 = vpack.c.b16 %v1425_v24, %v1424_v40 }
  0x81   : > { %v1257_v2 = vrot.slane %v1256_v58, 4  ;;  %v2275_v58 = vld [vmem:[%s2543_s24 + $0x44] sm:$0xf0] }
  0x82   : > { %2214 = vmatmul.msk.bf16.vlgmr.msra.gmra.mxu3 %vm427_vm2, %v1302_v63  ;;  %v1429_v63 = vpack.c.b16 %v1423_v56, %v1422_v55  ;;  %v1020_v55 = vpack.c.b16 %v1016_v48, %v1015_v47  ;;  %v2182_v56 = vld [vmem:[%s2543_s24 + $0x40] sm:$0xf] }
  0x83   : > { %v1262_v49 = vsel %vm2567_vm3, %v1257_v2, %v1261_v3 }
  0x84   : > { %v1299_v29 = vunpack.c.l.b16 %v1262_v49 }
  0x86   : > { %2240 = vmatmul.msk.bf16.vlgmr.msra.gmra.mxu0 %vm427_vm2, %v1428_v6  ;;  %v2206_v6 = vld [vmem:[%s2543_s24 + $0x48] sm:$0xf] }
  0x87   : > { %v1278_v20 = vshrl.u32 %v2206_v6, 16  ;;  %v1281_v22 = vshll.u32 %v2206_v6, 16 }
  0x88   : > { %2155 = vmatmul.msk.bf16.gmra.mxu1 %vm427_vm2, %v1018_v16  ;;  %v1267_v16 = vshll.u32 %v2204_v4, 16  ;;  %v1416_v4 = vsel %vm2607_vm6, %v2233_v60, %v1415_v1 }
  0x89   : > { %v1280_v37 = vrot.slane %v1278_v20, 4  ;;  %v1283_v38 = vrot.slane %v1281_v22, 5  ;;  %v1427_v32 = vunpack.c.l.b16 %v1416_v4 }
  0x8a   : > { %v1269_v33 = vrot.slane %v1267_v16, 5 }
  0x8b   : > { %2189 = vmatmul.msk.bf16.gmra.mxu2 %vm427_vm2, %v2175_v23  ;;  %v1298_v23 = vunpack.c.l.b16 %v1248_v9  ;;  %v1284_v7 = vor.u32 %v1283_v38, %v1280_v37 }
  0x8c   : > { %v1270_v44 = vor.u32 %v1269_v33, %v1266_v31 }
  0x8d   : > { %v1304_v43 = vpack.c.b16 %v1299_v29, %v1298_v23  ;;  %v1285_v52 = vrot.slane %v1284_v7, 4 }
  0x8e   : > { %v1271_v21 = vrot.slane %v1270_v44, 4 }
  0x8f   : > { %v1290_v0 = vsel %vm2567_vm3, %v1285_v52, %v1289_v53 }
  0x90   : > { %v1276_v51 = vsel %vm2567_vm3, %v1271_v21, %v1275_v50  ;;  %v1301_v2 = vunpack.c.l.b16 %v1290_v0 }
  0x91   : > { %v1300_v61 = vunpack.c.l.b16 %v1276_v51 }
  0x92   : > { %2215 = vmatmul.msk.bf16.gmra.mxu3 %vm427_vm2, %v1303_v54  ;;  %v2224_v54 = vld [vmem:[%s2543_s24 + $0x40] sm:$0xe]  ;;  %s3003_s24 = sshll.u32 %s249_s7, 6 }
  0x93   : > { %v2232_v57 = vrot.slane %v2224_v54, 9  ;;  %v1305_v6 = vpack.c.b16 %v1301_v2, %v1300_v61  ;;  %s3029_s26 = scalar_lea.vmem [#allocation2], %s3003_s24 }
  0x94   : > { %s1889_s8 = sshll.u32 %s3029_s26, 4  ;;  %s1890_s8 = int_to_ptr.vmem [resolvable:$true] %s1889_s8 }
  0x95   : > { %v1412_v3 = vsel %vm2607_vm6, %v2232_v57, %v1411_v62 }
  0x96   : > { %2241 = vmatmul.msk.bf16.gmra.mxu0 %vm427_vm2, %v1429_v63  ;;  %v2183_v63 = vor.u32 %v2275_v58, %v2182_v56  ;;  %v1426_v9 = vunpack.c.l.b16 %v1412_v3 }
  0x98   : > { %2156 = vmatmul.msk.bf16.gmra.mxu1 %vm427_vm2, %v1019_v5  ;;  %v1431_v11 = vpack.c.b16 %v1427_v32, %v1426_v9 }
  0x9b   : > { %2190 = vmatmul.msk.bf16.gmra.mxu2 %vm427_vm2, %v2179_v13 }
  0xa2   : > { %2216 = vmatmul.msk.bf16.gmra.mxu3 %vm427_vm2, %v1304_v43 }
  0xa5   : > { %v2840_v59 = vpop.f32.mrf.mxu1 }
  0xa6   : > { %2242 = vmatmul.msk.bf16.gmra.mxu0 %vm427_vm2, %v1430_v36 }
  0xa8   : > { %2157 = vmatmul.msk.bf16.gmra.mxu1 %vm427_vm2, %v1020_v55 }
  0xab   : > { %2191 = vmatmul.msk.bf16.gmra.mxu2 %vm427_vm2, %v2183_v63 }
  0xad   : > { %v2853_v5 = vpop.f32.mrf.mxu1 }
  0xae   : > { %v459_v10 = vpop.f32.mrf.mxu2 }
  0xb2   : > { %2217 = vmatmul.msk.bf16.gmra.mxu3 %vm427_vm2, %v1305_v6 }
  0xb3   : > { %v449_v12 = vpop.f32.mrf.mxu0 }
  0xb5   : > { %v464_v13 = vpop.f32.mrf.mxu3  ;;  %v516_v14 = vpop.f32.mrf.mxu1 }
  0xb6   : > { %2243 = vmatmul.msk.bf16.gmra.mxu0 %vm427_vm2, %v1431_v11  ;;  %v461_v41 = vpop.f32.mrf.mxu2  ;;  %v517_v58 = vadd.f32 %v516_v14, %v449_v12 }
  0xbb   : > { %v451_v15 = vpop.f32.mrf.mxu0 }
  0xbd   : > { %v466_v16 = vpop.f32.mrf.mxu3  ;;  %v518_v49 = vpop.f32.mrf.mxu1 }
  0xbe   : > { %v637_v42 = vpop.f32.mrf.mxu2  ;;  %v519_v2 = vadd.f32 %v518_v49, %v451_v15  ;;  %v2885_v49 = vld [vmem:[%s3199_s2] ss:$0 sm:$0xff] }
  0xbf   : > { %v657_v57 = vadd.f32 %v637_v42, %v517_v58 }
  0xc3   : > { %v922_v19 = vpop.f32.mrf.mxu0 }
  0xc5   : > { %v724_v20 = vpop.f32.mrf.mxu3  ;;  %v521_v22 = vpop.f32.mrf.mxu1 }
  0xc6   : > { %v639_v23 = vpop.f32.mrf.mxu2  ;;  %v744_v1 = vadd.f32 %v724_v20, %v657_v57 }
  0xc7   : > { %v658_v4 = vadd.f32 %v639_v23, %v519_v2  ;;  %v1501_v2 = vld [vmem:[%s2880_s14 + $0x10] sm:$0xff] }
  0xc8   : > { %v942_v9 = vadd.f32 %v922_v19, %v744_v1 }
  0xcb   : > { %v924_v25 = vpop.f32.mrf.mxu0 }
  0xcd   : > { %v726_v26 = vpop.f32.mrf.mxu3  ;;  %v2857_v27 = vpop.f32.mrf.mxu1 }
  0xce   : > { %v642_v28 = vpop.f32.mrf.mxu2 }
  0xd3   : > { %v2859_v29 = vpop.f32.mrf.mxu0 }
  0xd5   : > { %v729_v30 = vpop.f32.mrf.mxu3  ;;  %v526_v31 = vpop.f32.mrf.mxu1 }
  0xd6   : > { %v2861_v33 = vpop.f32.mrf.mxu2  ;;  %v527_v34 = vadd.f32 %v526_v31, %v459_v10 }
  0xdb   : > { %v2863_v35 = vpop.f32.mrf.mxu0 }
  0xdd   : > { %v2865_v37 = vpop.f32.mrf.mxu3  ;;  %v528_v38 = vpop.f32.mrf.mxu1 }
  0xde   : > { %v647_v39 = vpop.f32.mrf.mxu2  ;;  %v529_v40 = vadd.f32 %v528_v38, %v461_v41 }
  0xdf   : > { %v661_v17 = vadd.f32 %v647_v39, %v527_v34  ;;  %v1499_v34 = vld [vmem:[%s2880_s14] sm:$0xff] }
  0xe3   : > { %v932_v18 = vpop.f32.mrf.mxu0 }
  0xe5   : > { %v734_v43 = vpop.f32.mrf.mxu3  ;;  %v531_v24 = vpop.f32.mrf.mxu1 }
  0xe6   : > { %v748_v44 = vadd.f32 %v734_v43, %v661_v17  ;;  %v649_v45 = vpop.f32.mrf.mxu2  ;;  %v532_v7 = vadd.f32 %v531_v24, %v464_v13  ;;  %v745_v13 = vadd.f32 %v726_v26, %v658_v4 }
  0xe7   : > { %v662_v46 = vadd.f32 %v649_v45, %v529_v40  ;;  %v524_v40 = vadd.f32 %v2857_v27, %v2853_v5 }
  0xe8   : > { %v2867_v47 = vadd.f32 %v932_v18, %v748_v44  ;;  %v943_v19 = vadd.f32 %v924_v25, %v745_v13 }
  0xe9   : > { %v660_v43 = vadd.f32 %v2861_v33, %v524_v40 }
  0xeb   : > { %v934_v48 = vpop.f32.mrf.mxu0  ;;  %v747_v5 = vadd.f32 %v2865_v37, %v660_v43 }
  0xed   : > { %v736_v36 = vpop.f32.mrf.mxu3  ;;  %v533_v21 = vpop.f32.mrf.mxu1 }
  0xee   : > { %v749_v50 = vadd.f32 %v736_v36, %v662_v46  ;;  %v652_v52 = vpop.f32.mrf.mxu2  ;;  %v534_v53 = vadd.f32 %v533_v21, %v466_v16  ;;  %v522_v16 = vadd.f32 %v521_v22, %v2840_v59 }
  0xef   : > { %v663_v54 = vadd.f32 %v652_v52, %v532_v7 }
  0xf0   : > { %v2869_v55 = vadd.f32 %v934_v48, %v749_v50  ;;  %v659_v31 = vadd.f32 %v642_v28, %v522_v16  ;;  %v1500_v48 = vld [vmem:[%s2880_s14 + $0x8] sm:$0xff] }
  0xf2   : > { %v746_v22 = vadd.f32 %v729_v30, %v659_v31 }
  0xf3   : > { %v937_v56 = vpop.f32.mrf.mxu0 }
  0xf4   : > { %v944_v44 = vadd.f32 %v2859_v29, %v746_v22 }
  0xf5   : > { %v739_v8 = vpop.f32.mrf.mxu3  ;;  %v1048_v51 = vpop.f32.mrf.mxu1 }
  0xf6   : > { %v750_v62 = vadd.f32 %v739_v8, %v663_v54  ;;  %v654_v63 = vpop.f32.mrf.mxu2  ;;  %v1068_v11 = vadd.f32 %v1048_v51, %v942_v9  ;;  %v945_v51 = vadd.f32 %v2863_v35, %v747_v5 }
  0xf7   : > { %v664_v0 = vadd.f32 %v654_v63, %v534_v53 }
  0xf8   : > { %v2871_v60 = vadd.f32 %v937_v56, %v750_v62 }
  0xfb   : > { %v939_v61 = vpop.f32.mrf.mxu0 }
  0xfd   : > { %v741_v3 = vpop.f32.mrf.mxu3  ;;  %v1050_v10 = vpop.f32.mrf.mxu1 }
  0xfe   : > { %v751_v6 = vadd.f32 %v741_v3, %v664_v0  ;;  %v1135_v32 = vpop.f32.mrf.mxu2  ;;  %v1069_v26 = vadd.f32 %v1050_v10, %v943_v19 }
  0xff   : > { %v1155_v14 = vadd.f32 %v1135_v32, %v1068_v11 }
 0x100   : > { %v2873_v12 = vadd.f32 %v939_v61, %v751_v6 }
 0x103   : > { %v1459_v41 = vpop.f32.mrf.mxu0 }
 0x105   : > { %v1333_v42 = vpop.f32.mrf.mxu3  ;;  %v1053_v59 = vpop.f32.mrf.mxu1 }
 0x106   : > { %v1353_v15 = vadd.f32 %v1333_v42, %v1155_v14  ;;  %v1137_v20 = vpop.f32.mrf.mxu2  ;;  %v1070_v46 = vadd.f32 %v1053_v59, %v944_v44 }
 0x107   : > { %v1156_v38 = vadd.f32 %v1137_v20, %v1069_v26 }
 0x108   : > { %v1479_v23 = vadd.f32 %v1459_v41, %v1353_v15 }
 0x10a   : > { %v1491_v28 = vadd.f32 %v2885_v49, %v1479_v23 }
 0x10b   : > { %v1461_v39 = vpop.f32.mrf.mxu0 }
 0x10c   : > { %v2891_v17 = vadd.f32 %v1499_v34, %v1491_v28 }
 0x10d   : > { %v1335_v18 = vpop.f32.mrf.mxu3  ;;  %v1055_v33 = vpop.f32.mrf.mxu1 }
 0x10e   : > { %v2895_v25 = vmul.f32 0.70710677, %v2891_v17  ;;  %v1354_v24 = vadd.f32 %v1335_v18, %v1156_v38  ;;  %v1140_v45 = vpop.f32.mrf.mxu2  ;;  %v1071_v1 = vadd.f32 %v1055_v33, %v945_v51  ;;  %v1502_v18 = vld [vmem:[%s2880_s14 + $0x18] sm:$0xff] }
 0x10f   : > { %v1157_v21 = vadd.f32 %v1140_v45, %v1070_v46 }
 0x110   : > { %v1531_v30 = vmul.f32 %v2895_v25, %v2895_v25  ;;  %v1480_v7 = vadd.f32 %v1461_v39, %v1354_v24 }
 0x112   : > { %v1532_v27 = vmin.f32 %v1531_v30, 16.0  ;;  %v1492_v36 = vadd.f32 %v2885_v49, %v1480_v7 }
 0x113   : > { %v1464_v29 = vpop.f32.mrf.mxu0 }
 0x114   : > { %v1533_v50 = vmul.f32 2.1237322e-06, %v1532_v27  ;;  %v1544_v52 = vmul.f32 3.8918573e-05, %v1532_v27  ;;  %v2903_v53 = vadd.f32 %v1500_v48, %v1492_v36 }
 0x115   : > { %v1338_v54 = vpop.f32.mrf.mxu3  ;;  %v1058_v16 = vpop.f32.mrf.mxu1 }
 0x116   : > { %v1534_v56 = vadd.f32 0.00028619796, %v1533_v50  ;;  %v1545_v58 = vadd.f32 0.001143296, %v1544_v52  ;;  %v1355_v8 = vadd.f32 %v1338_v54, %v1157_v21  ;;  %v1142_v57 = vpop.f32.mrf.mxu2  ;;  %v2907_v37 = vmul.f32 0.70710677, %v2903_v53 }
 0x117   : > { %v1158_v9 = vadd.f32 %v1142_v57, %v1071_v1  ;;  %v1072_v43 = vadd.f32 %v1058_v16, %v2867_v47 }
 0x118   : > { %v1535_v62 = vmul.f32 %v1534_v56, %v1532_v27  ;;  %v1546_v63 = vmul.f32 %v1545_v58, %v1532_v27  ;;  %v1481_v0 = vadd.f32 %v1464_v29, %v1355_v8  ;;  %v1571_v61 = vmul.f32 %v2907_v37, %v2907_v37 }
 0x11a   : > { %v1536_v3 = vadd.f32 0.0036580483, %v1535_v62  ;;  %v1547_v4 = vadd.f32 0.014752088, %v1546_v63  ;;  %v1493_v6 = vadd.f32 %v2885_v49, %v1481_v0  ;;  %v2913_v32 = vmin.f32 %v1571_v61, 16.0 }
 0x11b   : > { %v1466_v26 = vpop.f32.mrf.mxu0 }
 0x11c   : > { %v1537_v35 = vmul.f32 %v1536_v3, %v1532_v27  ;;  %v1548_v10 = vmul.f32 %v1547_v4, %v1532_v27  ;;  %v2915_v11 = vadd.f32 %v1501_v2, %v1493_v6  ;;  %v1573_v13 = vmul.f32 2.1237322e-06, %v2913_v32 }
 0x11d   : > { %v1584_v14 = vmul.f32 3.8918573e-05, %v2913_v32  ;;  %v1340_v41 = vpop.f32.mrf.mxu3  ;;  %v1060_v62 = vpop.f32.mrf.mxu1  ;;  %v2949_v4 = vmul.f32 0.5, %v2891_v17 }
 0x11e   : > { %v1538_v42 = vadd.f32 0.05243302, %v1537_v35  ;;  %v1549_v31 = vadd.f32 0.112945676, %v1548_v10  ;;  %v1356_v15 = vadd.f32 %v1340_v41, %v1158_v9  ;;  %v1574_v19 = vadd.f32 0.00028619796, %v1573_v13  ;;  %v1145_v28 = vpop.f32.mrf.mxu2 }
 0x11f   : > { %v1585_v20 = vadd.f32 0.001143296, %v1584_v14  ;;  %v2920_v23 = vmul.f32 0.70710677, %v2915_v11  ;;  %v1159_v48 = vadd.f32 %v1145_v28, %v1072_v43  ;;  %v1073_v41 = vadd.f32 %v1060_v62, %v2869_v55 }
 0x120   : > { %v1539_v34 = vmul.f32 %v1538_v42, %v1532_v27  ;;  %v1550_v59 = vmul.f32 %v1549_v31, %v1532_v27  ;;  %v1482_v22 = vadd.f32 %v1466_v26, %v1356_v15  ;;  %v1575_v38 = vmul.f32 %v1574_v19, %v2913_v32 }
 0x121   : > { %v1586_v39 = vmul.f32 %v1585_v20, %v2913_v32  ;;  %v1611_v40 = vmul.f32 %v2920_v23, %v2920_v23 }
 0x122   : > { %v1540_v24 = vadd.f32 0.18741608, %v1539_v34  ;;  %v1551_v44 = vadd.f32 0.4994258, %v1550_v59  ;;  %v1494_v45 = vadd.f32 %v2885_v49, %v1482_v22  ;;  %v1576_v30 = vadd.f32 0.0036580483, %v1575_v38 }
 0x123   : > { %v1587_v7 = vadd.f32 0.014752088, %v1586_v39  ;;  %v2929_v46 = vmin.f32 %v1611_v40, 16.0  ;;  %v1469_v3 = vpop.f32.mrf.mxu0  ;;  %v1503_v38 = vld [vmem:[%s2880_s14 + $0x20] sm:$0xff] }
 0x124   : > { %v1552_v5 = vmul.f32 %v1551_v44, %v1532_v27  ;;  %v2931_v36 = vadd.f32 %v1502_v18, %v1494_v45  ;;  %v1541_v21 = vmul.f32 %v1540_v24, %v1532_v27  ;;  %v1577_v33 = vmul.f32 %v1576_v30, %v2913_v32 }
 0x125   : > { %v1588_v50 = vmul.f32 %v1587_v7, %v2913_v32  ;;  %v1613_v52 = vmul.f32 2.1237322e-06, %v2929_v46  ;;  %v1624_v29 = vmul.f32 3.8918573e-05, %v2929_v46  ;;  %v1343_v56 = vpop.f32.mrf.mxu3  ;;  %v1063_v44 = vpop.f32.mrf.mxu1 }
 0x126   : > { %v2936_v47 = vadd.f32 1.0, %v1552_v5  ;;  %v2940_v54 = vmul.f32 0.70710677, %v2931_v36  ;;  %v1578_v58 = vadd.f32 0.05243302, %v1577_v33  ;;  %v1357_v57 = vadd.f32 %v1343_v56, %v1159_v48  ;;  %v1147_v15 = vpop.f32.mrf.mxu2 }
 0x127   : > { %v1589_v8 = vadd.f32 0.112945676, %v1588_v50  ;;  %v1614_v51 = vadd.f32 0.00028619796, %v1613_v52  ;;  %v1542_v27 = vadd.f32 1.1283791, %v1541_v21  ;;  %v1160_v7 = vadd.f32 %v1147_v15, %v1073_v41 }
 0x128   : > { %2342 = vrcp.f32 %v2936_v47  ;;  %v1579_v63 = vmul.f32 %v1578_v58, %v2913_v32  ;;  %v1625_v61 = vadd.f32 0.001143296, %v1624_v29  ;;  %v1651_v2 = vmul.f32 %v2940_v54, %v2940_v54 }
 0x129   : > { %v1590_v0 = vmul.f32 %v1589_v8, %v2913_v32  ;;  %v1615_v1 = vmul.f32 %v1614_v51, %v2929_v46  ;;  %v1483_v35 = vadd.f32 %v1469_v3, %v1357_v57  ;;  %v1543_v16 = vmul.f32 %v1542_v27, %v2895_v25 }
 0x12a   : > { %v1580_v6 = vadd.f32 0.18741608, %v1579_v63  ;;  %v1626_v13 = vmul.f32 %v1625_v61, %v2929_v46  ;;  %v2952_v14 = vmin.f32 %v1651_v2, 16.0  ;;  %v1563_v42 = vand.u32 2147483647, %v2936_v47 }
 0x12b   : > { %v1591_v9 = vadd.f32 0.4994258, %v1590_v0  ;;  %v1616_v10 = vadd.f32 0.0036580483, %v1615_v1  ;;  %v1565_v55 = vand.u32 2147483648, %v2936_v47  ;;  %v1495_v28 = vadd.f32 %v2885_v49, %v1483_v35 }
 0x12c   : > { %v1581_v31 = vmul.f32 %v1580_v6, %v2913_v32  ;;  %v1627_v26 = vadd.f32 0.014752088, %v1626_v13  ;;  %v1653_v34 = vmul.f32 2.1237322e-06, %v2952_v14  ;;  %v1664_v59 = vmul.f32 3.8918573e-05, %v2952_v14 }
 0x12d   : > { %v1592_v17 = vmul.f32 %v1591_v9, %v2913_v32  ;;  %v1617_v20 = vmul.f32 %v1616_v10, %v2929_v46  ;;  %vm1559_vm7 = vweird.f32 %v2936_v47  ;;  %vm2971_vm9 = vcmp.eq.f32.partialorder %v1563_v42, 8.507059e+37  ;;  %v1345_v56 = vpop.f32.mrf.mxu3  ;;  %v1471_v10 = vpop.f32.mrf.mxu0 }
 0x12e   : > { %v2343_v19 = vpop.eup %2342  ;;  %v1628_v32 = vmul.f32 %v1627_v26, %v2929_v46  ;;  %v1654_v40 = vadd.f32 0.00028619796, %v1653_v34  ;;  %v1665_v18 = vadd.f32 0.001143296, %v1664_v59  ;;  %v1582_v24 = vadd.f32 1.1283791, %v1581_v31  ;;  %v1150_v3 = vpop.f32.mrf.mxu2 }
 0x12f   : > { %v1555_v22 = vmul.f32 %v2343_v19, %v2936_v47  ;;  %v2964_v25 = vadd.f32 1.0, %v1592_v17  ;;  %v1618_v39 = vadd.f32 0.05243302, %v1617_v20  ;;  %vm1560_vm8 = vweird.f32 %v2343_v19 }
 0x130   : > { %v1629_v30 = vadd.f32 0.112945676, %v1628_v32  ;;  %v1655_v5 = vmul.f32 %v1654_v40, %v2952_v14  ;;  %v1666_v21 = vmul.f32 %v1665_v18, %v2952_v14  ;;  %v2977_v33 = vadd.f32 %v1503_v38, %v1495_v28  ;;  %vm1561_vm10 = vmor %vm1559_vm7, %vm1560_vm8 }
 0x131   : > { %v1556_v43 = vsub.f32 1.0, %v1555_v22  ;;  %2344 = vrcp.f32 %v2964_v25  ;;  %v1566_v50 = vor.u32 1.1754944e-38, %v1565_v55  ;;  %v1619_v52 = vmul.f32 %v1618_v39, %v2929_v46 }
 0x132   : > { %v1630_v29 = vmul.f32 %v1629_v30, %v2929_v46  ;;  %v1074_v58 = vadd.f32 %v1063_v44, %v2871_v60  ;;  %v2983_v51 = vmul.f32 %v1582_v24, %v2907_v37  ;;  %v1656_v57 = vadd.f32 0.0036580483, %v1655_v5  ;;  %v1504_v44 = vld [vmem:[%s2880_s14 + $0x28] sm:$0xff] }
 0x133   : > { %v1557_v48 = vmul.f32 %v2343_v19, %v1556_v43  ;;  %v1667_v62 = vadd.f32 0.014752088, %v1666_v21  ;;  %vm1599_vm11 = vweird.f32 %v2964_v25  ;;  %v2990_v63 = vmul.f32 0.70710677, %v2977_v33 }
 0x134   : > { %v1631_v27 = vadd.f32 0.4994258, %v1630_v29  ;;  %v1358_v0 = vadd.f32 %v1345_v56, %v1160_v7  ;;  %v1603_v37 = vand.u32 2147483647, %v2964_v25  ;;  %v1657_v61 = vmul.f32 %v1656_v57, %v2952_v14 }
 0x135   : > { %v1558_v8 = vadd.f32 %v2343_v19, %v1557_v48  ;;  %v1668_v2 = vmul.f32 %v1667_v62, %v2952_v14  ;;  %v1605_v9 = vand.u32 2147483648, %v2964_v25  ;;  %v1620_v35 = vadd.f32 0.18741608, %v1619_v52  ;;  %v1348_v45 = vpop.f32.mrf.mxu3  ;;  %v1474_v62 = vpop.f32.mrf.mxu0 }
 0x136   : > { %v1632_v41 = vmul.f32 %v1631_v27, %v2929_v46  ;;  %v1658_v42 = vadd.f32 0.05243302, %v1657_v61  ;;  %v1691_v15 = vmul.f32 %v2990_v63, %v2990_v63  ;;  %v1161_v20 = vadd.f32 %v1150_v3, %v1074_v58 }
 0x137   : > { %v2345_v1 = vpop.eup %2344  ;;  %v1562_v60 = vsel %vm1561_vm10, %v2343_v19, %v1558_v8  ;;  %v1669_v31 = vadd.f32 0.112945676, %v1668_v2  ;;  %v1484_v19 = vadd.f32 %v1471_v10, %v1358_v0  ;;  %v1621_v55 = vmul.f32 %v1620_v35, %v2929_v46 }
 0x138   : > { %v1567_v47 = vsel %vm2971_vm9, %v1566_v50, %v1562_v60  ;;  %v1595_v6 = vmul.f32 %v2345_v1, %v2964_v25  ;;  %v3007_v34 = vadd.f32 1.0, %v1632_v41  ;;  %v1659_v59 = vmul.f32 %v1658_v42, %v2952_v14  ;;  %v1505_v41 = vld [vmem:[%s2880_s14 + $0x30] sm:$0xff] }
 0x139   : > { %v1568_v13 = vmul.f32 %v1567_v47, %v1543_v16  ;;  %v1670_v16 = vmul.f32 %v1669_v31, %v2952_v14  ;;  %vm1600_vm12 = vweird.f32 %v2345_v1  ;;  %v3012_v28 = vmin.f32 %v1691_v15, 16.0 }
 0x13a   : > { %v1596_v17 = vsub.f32 1.0, %v1595_v6  ;;  %vm3014_vm13 = vcmp.eq.f32.partialorder %v1603_v37, 8.507059e+37  ;;  %2346 = vrcp.f32 %v3007_v34  ;;  %v1496_v32 = vadd.f32 %v2885_v49, %v1484_v19  ;;  %vm1601_vm14 = vmor %vm1599_vm11, %vm1600_vm12  ;;  %v1152_v19 = vpop.f32.mrf.mxu2 }
 0x13b   : > { %v2244_v26 = vclamps-f32 %v1568_v13, 1.0  ;;  %v1606_v18 = vor.u32 1.1754944e-38, %v1605_v9  ;;  %v1660_v43 = vadd.f32 0.18741608, %v1659_v59  ;;  %v1671_v24 = vadd.f32 0.4994258, %v1670_v16  ;;  %v1065_v13 = vpop.f32.mrf.mxu1 }
 0x13c   : > { %v1597_v22 = vmul.f32 %v2345_v1, %v1596_v17  ;;  %v1693_v30 = vmul.f32 2.1237322e-06, %v3012_v28  ;;  %v1704_v7 = vmul.f32 3.8918573e-05, %v3012_v28  ;;  %v1359_v48 = vadd.f32 %v1348_v45, %v1161_v20 }
 0x13d   : > { %v1851_v38 = vadd.f32 1.0, %v2244_v26  ;;  %v1622_v21 = vadd.f32 1.1283791, %v1621_v55  ;;  %v1661_v50 = vmul.f32 %v1660_v43, %v2952_v14  ;;  %v1672_v52 = vmul.f32 %v1671_v24, %v2952_v14 }
 0x13e   : > { %v1598_v40 = vadd.f32 %v2345_v1, %v1597_v22  ;;  %v1694_v25 = vadd.f32 0.00028619796, %v1693_v30  ;;  %v1705_v29 = vadd.f32 0.001143296, %v1704_v7  ;;  %v3035_v56 = vadd.f32 %v1504_v44, %v1496_v32 }
 0x13f   : > { %v1859_v46 = vmul.f32 %v1851_v38, %v2949_v4  ;;  %v1516_v58 = vmul.f32 0.5, %v2903_v53  ;;  %v3039_v57 = vadd.f32 1.0, %v1672_v52  ;;  %v1485_v60 = vadd.f32 %v1474_v62, %v1359_v48 }
 0x140   : > { %v1602_v5 = vsel %vm1601_vm14, %v2345_v1, %v1598_v40  ;;  %v2347_v14 = vpop.eup %2346  ;;  %v1695_v27 = vmul.f32 %v1694_v25, %v3012_v28  ;;  %v1706_v0 = vmul.f32 %v1705_v29, %v3012_v28  ;;  %v3044_v1 = vmul.f32 0.70710677, %v3035_v56 }
 0x141   : > { %1867 = vst.msk [vmem:[%s3029_s26] sm:$0xff] %vm427_vm2, %v1859_v46  ;;  %v1607_v4 = vsel %vm3014_vm13, %v1606_v18, %v1602_v5  ;;  %v3047_v61 = vmul.f32 0.5, %v2915_v11  ;;  %v1623_v53 = vmul.f32 %v1622_v21, %v2920_v23  ;;  %v1643_v2 = vand.u32 2147483647, %v3007_v34 }
 0x142   : > { %v1608_v8 = vmul.f32 %v1607_v4, %v2983_v51  ;;  %v1635_v51 = vmul.f32 %v2347_v14, %v3007_v34  ;;  %v1645_v3 = vand.u32 2147483648, %v3007_v34  ;;  %v1662_v47 = vadd.f32 1.1283791, %v1661_v50  ;;  %v1350_v50 = vpop.f32.mrf.mxu3 }
 0x143   : > { %2348 = vrcp.f32 %v3039_v57  ;;  %v1696_v35 = vadd.f32 0.0036580483, %v1695_v27  ;;  %v1707_v10 = vadd.f32 0.014752088, %v1706_v0  ;;  %vm1639_vm15 = vweird.f32 %v3007_v34 }
 0x144   : > { %v2245_v37 = vclamps-f32 %v1608_v8, 1.0  ;;  %v1636_v9 = vsub.f32 1.0, %v1635_v51  ;;  %vm1640_vm0 = vweird.f32 %v2347_v14  ;;  %v1731_v11 = vmul.f32 %v3044_v1, %v3044_v1 }
 0x145   : > { %v1497_v23 = vadd.f32 %v2885_v49, %v1485_v60  ;;  %v1697_v17 = vmul.f32 %v1696_v35, %v3012_v28  ;;  %v1708_v15 = vmul.f32 %v1707_v10, %v3012_v28  ;;  %vm3061_vm1 = vcmp.eq.f32.partialorder %v1643_v2, 8.507059e+37  ;;  %vm1641_vm3 = vmor %vm1639_vm15, %vm1640_vm0 }
 0x146   : > { %v1852_v6 = vadd.f32 1.0, %v2245_v37  ;;  %v1637_v31 = vmul.f32 %v2347_v14, %v1636_v9  ;;  %v1646_v26 = vor.u32 1.1754944e-38, %v1645_v3  ;;  %v3065_v59 = vmin.f32 %v1731_v11, 16.0 }
 0x147   : > { %v1075_v16 = vadd.f32 %v1065_v13, %v2873_v12  ;;  %v1663_v55 = vmul.f32 %v1662_v47, %v2940_v54  ;;  %v1709_v38 = vadd.f32 0.112945676, %v1708_v15  ;;  %v3071_v39 = vadd.f32 %v1505_v41, %v1497_v23  ;;  %v1506_v23 = vld [vmem:[%s2880_s14 + $0x38] sm:$0xff]  ;;  %s2378_s14 = scalar_lea.hbm %s3201_s4, 128 }
 0x148   : > { %v1860_v42 = vmul.f32 %v1852_v6, %v1516_v58  ;;  %v1638_v22 = vadd.f32 %v2347_v14, %v1637_v31  ;;  %vm1679_vm4 = vweird.f32 %v3039_v57  ;;  %v1733_v40 = vmul.f32 2.1237322e-06, %v3065_v59  ;;  %p2380_p2 = scmp.lt.s32.totalorder %s2378_s14, %s2374_s11 }
 0x149   : > { %v2349_v32 = vpop.eup %2348  ;;  %v1744_v18 = vmul.f32 3.8918573e-05, %v3065_v59  ;;  %v1162_v12 = vadd.f32 %v1152_v19, %v1075_v16  ;;  %v1683_v54 = vand.u32 2147483647, %v3039_v57  ;;  %v1698_v44 = vadd.f32 0.05243302, %v1697_v17 }
 0x14a   : > { %1868 = vst.msk [vmem:[%s3029_s26 + $0x8] sm:$0xff] %vm427_vm2, %v1860_v42  ;;  %v1642_v43 = vsel %vm1641_vm3, %v2347_v14, %v1638_v22  ;;  %v1675_v24 = vmul.f32 %v2349_v32, %v3039_v57  ;;  %v1710_v46 = vmul.f32 %v1709_v38, %v3012_v28  ;;  %v1734_v34 = vadd.f32 0.00028619796, %v1733_v40  ;;  %v1476_v14 = vpop.f32.mrf.mxu0  ;;  %p2381_p3 = por %p2380_p2, %p2379_p1 }
 0x14b   : > { %v1647_v45 = vsel %vm3061_vm1, %v1646_v26, %v1642_v43  ;;  %v1745_v30 = vadd.f32 0.001143296, %v1744_v18  ;;  %v1685_v5 = vand.u32 2147483648, %v3039_v57  ;;  %v3086_v21 = vmul.f32 0.70710677, %v3071_v39 }
 0x14c   : > { %v1648_v7 = vmul.f32 %v1647_v45, %v1623_v53  ;;  %v1676_v48 = vsub.f32 1.0, %v1675_v24  ;;  %v1711_v52 = vadd.f32 0.4994258, %v1710_v46  ;;  %v1735_v4 = vmul.f32 %v1734_v34, %v3065_v59  ;;  %p2382_p5 = pnand %p2381_p3, %p2377_p0 }
 0x14d   : > { %v1746_v25 = vmul.f32 %v1745_v30, %v3065_v59  ;;  %v1360_v29 = vadd.f32 %v1350_v50, %v1162_v12  ;;  %vm1680_vm5 = vweird.f32 %v2349_v32  ;;  %v1771_v62 = vmul.f32 %v3086_v21, %v3086_v21 }
 0x14e   : > { %v2246_v58 = vclamps-f32 %v1648_v7, 1.0  ;;  %v1677_v8 = vmul.f32 %v2349_v32, %v1676_v48  ;;  %v1699_v27 = vmul.f32 %v1698_v44, %v3012_v28  ;;  %v1712_v0 = vmul.f32 %v1711_v52, %v3012_v28  ;;  %vm1681_vm6 = vmor %vm1679_vm4, %vm1680_vm5 }
 0x14f   : > { %v1747_v60 = vadd.f32 0.014752088, %v1746_v25  ;;  %v1486_v37 = vadd.f32 %v1476_v14, %v1360_v29  ;;  %v1736_v2 = vadd.f32 0.0036580483, %v1735_v4  ;;  %v3094_v3 = vmin.f32 %v1771_v62, 16.0 }
 0x150   : > { %v1853_v53 = vadd.f32 1.0, %v2246_v58  ;;  %v1678_v51 = vadd.f32 %v2349_v32, %v1677_v8  ;;  %v1686_v47 = vor.u32 1.1754944e-38, %v1685_v5  ;;  %v1713_v6 = vadd.f32 1.0, %v1712_v0 }
 0x151   : > { %v1748_v9 = vmul.f32 %v1747_v60, %v3065_v59  ;;  %v1498_v35 = vadd.f32 %v2885_v49, %v1486_v37  ;;  %vm1684_vm7 = vcmp.eq.f32.partialorder %v1683_v54, 8.507059e+37  ;;  %v1773_v11 = vmul.f32 2.1237322e-06, %v3094_v3 }
 0x152   : > { %v1861_v10 = vmul.f32 %v1853_v53, %v3047_v61  ;;  %v1682_v13 = vsel %vm1681_vm6, %v2349_v32, %v1678_v51  ;;  %2350 = vrcp.f32 %v1713_v6  ;;  %v1700_v57 = vadd.f32 0.18741608, %v1699_v27 }
 0x153   : > { %v1687_v41 = vsel %vm1684_vm7, %v1686_v47, %v1682_v13  ;;  %v1737_v31 = vmul.f32 %v1736_v2, %v3065_v59  ;;  %v1749_v17 = vadd.f32 0.112945676, %v1748_v9  ;;  %v1774_v15 = vadd.f32 0.00028619796, %v1773_v11 }
 0x154   : > { %1869 = vst.msk [vmem:[%s3029_s26 + $0x10] sm:$0xff] %vm427_vm2, %v1861_v10  ;;  %v1688_v42 = vmul.f32 %v1687_v41, %v1663_v55  ;;  %v1784_v19 = vmul.f32 3.8918573e-05, %v3094_v3  ;;  %v3107_v49 = vadd.f32 %v1506_v23, %v1498_v35  ;;  %v1518_v26 = vmul.f32 0.5, %v2931_v36 }
 0x155   : > { %v1750_v20 = vmul.f32 %v1749_v17, %v3065_v59  ;;  %v1701_v38 = vmul.f32 %v1700_v57, %v3012_v28  ;;  %v1738_v32 = vadd.f32 0.05243302, %v1737_v31  ;;  %v1775_v12 = vmul.f32 %v1774_v15, %v3094_v3 }
 0x156   : > { %v2247_v61 = vclamps-f32 %v1688_v42, 1.0  ;;  %v1785_v16 = vadd.f32 0.001143296, %v1784_v19  ;;  %v3112_v22 = vmul.f32 0.70710677, %v3107_v49  ;;  %v1725_v30 = vand.u32 2147483648, %v1713_v6 }
 0x157   : > { %v1751_v40 = vadd.f32 0.4994258, %v1750_v20  ;;  %v1702_v28 = vadd.f32 1.1283791, %v1701_v38  ;;  %v1739_v7 = vmul.f32 %v1738_v32, %v3065_v59  ;;  %v1776_v5 = vadd.f32 0.0036580483, %v1775_v12 }
 0x158   : > { %v1854_v55 = vadd.f32 1.0, %v2247_v61  ;;  %v2351_v18 = vpop.eup %2350  ;;  %v1786_v43 = vmul.f32 %v1785_v16, %v3094_v3  ;;  %v1811_v24 = vmul.f32 %v3112_v22, %v3112_v22  ;;  %v1723_v25 = vand.u32 2147483647, %v1713_v6 }
 0x159   : > { %v1715_v36 = vmul.f32 %v2351_v18, %v1713_v6  ;;  %v1752_v44 = vmul.f32 %v1751_v40, %v3065_v59  ;;  %vm1720_vm8 = vweird.f32 %v2351_v18  ;;  %vm1719_vm9 = vweird.f32 %v1713_v6 }
 0x15a   : > { %v1862_v54 = vmul.f32 %v1854_v55, %v1518_v26  ;;  %v1787_v45 = vadd.f32 0.014752088, %v1786_v43  ;;  %v3120_v46 = vmin.f32 %v1811_v24, 16.0  ;;  %v1740_v8 = vadd.f32 0.18741608, %v1739_v7  ;;  %vm1721_vm10 = vmor %vm1719_vm9, %vm1720_vm8 }
 0x15b   : > { %v1716_v34 = vsub.f32 1.0, %v1715_v36  ;;  %v1753_v48 = vadd.f32 1.0, %v1752_v44  ;;  %v1726_v27 = vor.u32 1.1754944e-38, %v1725_v30  ;;  %v1777_v0 = vmul.f32 %v1776_v5, %v3094_v3 }
 0x15c   : > { %1870 = vst.msk [vmem:[%s3029_s26 + $0x18] sm:$0xff] %vm427_vm2, %v1862_v54  ;;  %v1788_v50 = vmul.f32 %v1787_v45, %v3094_v3  ;;  %v1813_v52 = vmul.f32 2.1237322e-06, %v3120_v46  ;;  %v1824_v29 = vmul.f32 3.8918573e-05, %v3120_v46  ;;  %v1703_v37 = vmul.f32 %v1702_v28, %v2990_v63 }
 0x15d   : > { %v1717_v4 = vmul.f32 %v2351_v18, %v1716_v34  ;;  %2352 = vrcp.f32 %v1753_v48  ;;  %vm1724_vm11 = vcmp.eq.f32.partialorder %v1723_v25, 8.507059e+37  ;;  %v1741_v35 = vmul.f32 %v1740_v8, %v3065_v59 }
 0x15e   : > { %v1789_v62 = vadd.f32 0.112945676, %v1788_v50  ;;  %v1814_v14 = vadd.f32 0.00028619796, %v1813_v52  ;;  %v1825_v60 = vadd.f32 0.001143296, %v1824_v29  ;;  %vm1759_vm13 = vweird.f32 %v1753_v48 }
 0x15f   : > { %v1718_v58 = vadd.f32 %v2351_v18, %v1717_v4  ;;  %v1778_v11 = vadd.f32 0.05243302, %v1777_v0  ;;  %v1519_v17 = vmul.f32 0.5, %v2977_v33  ;;  %v1742_v19 = vadd.f32 1.1283791, %v1741_v35 }
 0x160   : > { %v1790_v51 = vmul.f32 %v1789_v62, %v3094_v3  ;;  %v1815_v47 = vmul.f32 %v1814_v14, %v3120_v46  ;;  %v1826_v6 = vmul.f32 %v1825_v60, %v3120_v46  ;;  %v1765_v20 = vand.u32 2147483648, %v1753_v48 }
 0x161   : > { %v1722_v53 = vsel %vm1721_vm10, %v2351_v18, %v1718_v58  ;;  %v1779_v59 = vmul.f32 %v1778_v11, %v3094_v3  ;;  %v1763_v32 = vand.u32 2147483647, %v1753_v48  ;;  %v1743_v24 = vmul.f32 %v1742_v19, %v3044_v1 }
 0x162   : > { %v1727_v2 = vsel %vm1724_vm11, %v1726_v27, %v1722_v53  ;;  %v1791_v10 = vadd.f32 0.4994258, %v1790_v51  ;;  %v1827_v23 = vadd.f32 0.014752088, %v1826_v6  ;;  %v1816_v57 = vadd.f32 0.0036580483, %v1815_v47 }
 0x163   : > { %v1728_v9 = vmul.f32 %v1727_v2, %v1703_v37  ;;  %v2353_v13 = vpop.eup %2352  ;;  %v1766_v12 = vor.u32 1.1754944e-38, %v1765_v20  ;;  %v1780_v43 = vadd.f32 0.18741608, %v1779_v59  ;;  %vm1764_vm15 = vcmp.eq.f32.partialorder %v1763_v32, 8.507059e+37 }
 0x164   : > { %v1755_v42 = vmul.f32 %v2353_v13, %v1753_v48  ;;  %v1792_v63 = vmul.f32 %v1791_v10, %v3094_v3  ;;  %v1828_v31 = vmul.f32 %v1827_v23, %v3120_v46  ;;  %vm1760_vm12 = vweird.f32 %v2353_v13 }
 0x165   : > { %v2248_v41 = vclamps-f32 %v1728_v9, 1.0  ;;  %v1817_v40 = vmul.f32 %v1816_v57, %v3120_v46  ;;  %vm1761_vm14 = vmor %vm1759_vm13, %vm1760_vm12  ;;  %v1781_v7 = vmul.f32 %v1780_v43, %v3094_v3  ;;  %v1520_v4 = vmul.f32 0.5, %v3035_v56 }
 0x166   : > { %v1756_v61 = vsub.f32 1.0, %v1755_v42  ;;  %v1793_v26 = vadd.f32 1.0, %v1792_v63  ;;  %v1829_v16 = vadd.f32 0.112945676, %v1828_v31  ;;  %v1521_v35 = vmul.f32 0.5, %v3071_v39 }
 0x167   : > { %v1855_v15 = vadd.f32 1.0, %v2248_v41  ;;  %v1818_v45 = vadd.f32 0.05243302, %v1817_v40  ;;  %v1782_v29 = vadd.f32 1.1283791, %v1781_v7 }
 0x168   : > { %v1757_v38 = vmul.f32 %v2353_v13, %v1756_v61  ;;  %2354 = vrcp.f32 %v1793_v26  ;;  %v1830_v33 = vmul.f32 %v1829_v16, %v3120_v46  ;;  %v1805_v58 = vand.u32 2147483648, %v1793_v26 }
 0x169   : > { %v1863_v55 = vmul.f32 %v1855_v15, %v1519_v17  ;;  %v1819_v50 = vmul.f32 %v1818_v45, %v3120_v46  ;;  %v1803_v14 = vand.u32 2147483647, %v1793_v26  ;;  %vm1799_vm1 = vweird.f32 %v1793_v26 }
 0x16a   : > { %v1758_v18 = vadd.f32 %v2353_v13, %v1757_v38  ;;  %v1831_v36 = vadd.f32 0.4994258, %v1830_v33  ;;  %v1806_v0 = vor.u32 1.1754944e-38, %v1805_v58  ;;  %v1783_v60 = vmul.f32 %v1782_v29, %v3086_v21 }
 0x16b   : > { %1871 = vst.msk [vmem:[%s3029_s26 + $0x20] sm:$0xff] %vm427_vm2, %v1863_v55  ;;  %v1820_v27 = vadd.f32 0.18741608, %v1819_v50  ;;  %vm1804_vm4 = vcmp.eq.f32.partialorder %v1803_v14, 8.507059e+37  ;;  %v1522_v15 = vmul.f32 0.5, %v3107_v49 }
 0x16c   : > { %v1762_v54 = vsel %vm1761_vm14, %v2353_v13, %v1758_v18  ;;  %v1832_v34 = vmul.f32 %v1831_v36, %v3120_v46 }
 0x16d   : > { %v1767_v44 = vsel %vm1764_vm15, %v1766_v12, %v1762_v54  ;;  %v1821_v51 = vmul.f32 %v1820_v27, %v3120_v46 }
 0x16e   : > { %v1768_v28 = vmul.f32 %v1767_v44, %v1743_v24  ;;  %v2355_v30 = vpop.eup %2354  ;;  %v1833_v52 = vadd.f32 1.0, %v1832_v34 }
 0x16f   : > { %v1795_v5 = vmul.f32 %v2355_v30, %v1793_v26  ;;  %vm1800_vm0 = vweird.f32 %v2355_v30  ;;  %v1822_v10 = vadd.f32 1.1283791, %v1821_v51 }
 0x170   : > { %v2249_v48 = vclamps-f32 %v1768_v28, 1.0  ;;  %2356 = vrcp.f32 %v1833_v52  ;;  %vm1801_vm3 = vmor %vm1799_vm1, %vm1800_vm0  ;;  %v1845_v13 = vand.u32 2147483648, %v1833_v52  ;;  %v1843_v21 = vand.u32 2147483647, %v1833_v52 }
 0x171   : > { %v1796_v25 = vsub.f32 1.0, %v1795_v5  ;;  %vm1839_vm6 = vweird.f32 %v1833_v52  ;;  %v1823_v63 = vmul.f32 %v1822_v10, %v3112_v22 }
 0x172   : > { %v1856_v1 = vadd.f32 1.0, %v2249_v48  ;;  %v1846_v46 = vor.u32 1.1754944e-38, %v1845_v13  ;;  %vm1844_vm8 = vcmp.eq.f32.partialorder %v1843_v21, 8.507059e+37 }
 0x173   : > { %v1797_v62 = vmul.f32 %v2355_v30, %v1796_v25 }
 0x174   : > { %v1864_v8 = vmul.f32 %v1856_v1, %v1520_v4 }
 0x175   : > { %v1798_v3 = vadd.f32 %v2355_v30, %v1797_v62 }
 0x176   : > { %1872 = vst.msk [vmem:[%s3029_s26 + $0x28] sm:$0xff] %vm427_vm2, %v1864_v8  ;;  %v2357_v56 = vpop.eup %2356 }
 0x177   : > { %v1802_v37 = vsel %vm1801_vm3, %v2355_v30, %v1798_v3  ;;  %v1835_v47 = vmul.f32 %v2357_v56, %v1833_v52  ;;  %vm1840_vm5 = vweird.f32 %v2357_v56 }
 0x178   : > { %v1807_v53 = vsel %vm1804_vm4, %v1806_v0, %v1802_v37  ;;  %vm1841_vm7 = vmor %vm1839_vm6, %vm1840_vm5 }
 0x179   : > { %v1808_v2 = vmul.f32 %v1807_v53, %v1783_v60  ;;  %v1836_v9 = vsub.f32 1.0, %v1835_v47 }
 0x17b   : > { %v2250_v6 = vclamps-f32 %v1808_v2, 1.0  ;;  %v1837_v23 = vmul.f32 %v2357_v56, %v1836_v9 }
 0x17d   : > { %v1857_v11 = vadd.f32 1.0, %v2250_v6  ;;  %v1838_v42 = vadd.f32 %v2357_v56, %v1837_v23 }
 0x17f   : > { %v1865_v41 = vmul.f32 %v1857_v11, %v1521_v35  ;;  %v1842_v39 = vsel %vm1841_vm7, %v2357_v56, %v1838_v42 }
 0x180   : > { %v1847_v57 = vsel %vm1844_vm8, %v1846_v46, %v1842_v39 }
 0x181   : > { %1873 = vst.msk [vmem:[%s3029_s26 + $0x30] sm:$0xff] %vm427_vm2, %v1865_v41  ;;  %v1848_v31 = vmul.f32 %v1847_v57, %v1823_v63 }
 0x183   : > { %v2251_v17 = vclamps-f32 %v1848_v31, 1.0 }
 0x185   : > { %v1858_v19 = vadd.f32 1.0, %v2251_v17 }
 0x187   : > { %v1866_v61 = vmul.f32 %v1858_v19, %v1522_v15 }
 0x189   : > { %1874 = vst.msk [vmem:[%s3029_s26 + $0x38] sm:$0xff] %vm427_vm2, %v1866_v61 }
 0x18a   : > { %2385 = shalt.err (!%p2382_p5)
}
 0x18b   : > { %s2438_s7 = smov 128   ;;  %s2439_s24 = smov 8  }
 0x18c   : > { %2284 = dma.vmem_to_hbm [thread:$0]  (%p2505_p4), %s1890_s8, 1024, %s1892_s18, %s1876_s9, %s2438_s7, %s2438_s7, %s2439_s24  }
 0x18d PF: > { %p2290_p6 = scmp.ge.s32.totalorder %s2436_s20, 2  ;;  %s1906_s26 = sand.u32 1, %s2416_s15  }
 0x18e   : > { %s1907_s29 = scalar_lea.sflag [#allocation3], %s1906_s26 }
 0x18f   : > { %p2287_p7 = pnand %p2290_p6, %p2512_p8 }
 0x191   : > { %p2288_p9 = pneg %p2287_p7 }
 0x193   : > { %2411 = dma.done.wait (%p2288_p9), %s1907_s29, 1024  }
 0x194   : > { %2413 = vsyncadd (%p2288_p9), %s1907_s29, 4294966272  ;;  %s17_s20 = sadd.s32 1, %s2436_s20   ;;  %s3214_s15 = smov %s2420_s16 }
 0x195   : > { %p14_p10 = scmp.ge.s32.totalorder %s17_s20, 4   ;;  %s3215_s16 = smov %s2424_s17 }
 0x196   : > { %s3216_s17 = smov %s2518_s28  ;;  %s3217_s18 = smov %s2432_s19 }
 0x197   : > { %s3218_s19 = smov %s3220_s23  ;;  %16 = sbr.rel (!%p14_p10) target bundleno = 4 (0x4), region = 90 }
 0x19c   :  { %1913 = vsyncpa [#allocation3], 1 }
 0x19d   :  { %1915 = vsyncpa [#allocation3 + $0x1], 1 }

// kernel: forward.6
= control target key start
LH: loop header
LB: loop body
LE: loop exit
PB: predicated region body
PF: predicated region fallthrough
CT: control target
= control target key end

     0   :  { %s2278_s12 = smov 0   ;;  %s2280_s13 = smov 0   ;;  %s2917_s0 = inlined_call_operand.vmem [shape: bf16[2,10,10,16], index: 0, kind: input, shape index: {}]   ;;  %s2918_s1 = inlined_call_operand.vmem [shape: bf16[9,16,16], index: 1, kind: input, shape index: {}]   ;;  %s2919_s2 = inlined_call_operand.vmem [shape: f32[1,16], index: 2, kind: input, shape index: {}]   ;;  %s2920_s3 = inlined_call_operand.vmem [shape: bf16[2,8,8,16], index: 3, kind: output, shape index: {}]  }
   0x1   :  { %s2282_s14 = smov 0  }
   0x2 LB: > { %s25_s15 = sadd.s32 1, %s2252_s13  ;;  %p1929_p0 = scmp.ge.s32.totalorder %s2256_s14, 1  ;;  %s2256_s14 = sphi %s2282_s14, %s13_s14   ;;  %s2252_s13 = sphi %s2280_s13, %s2932_s13   ;;  %s2248_s12 = sphi %s2278_s12, %s2931_s12  }
   0x3   : > { %p27_p1 = scmp.ge.s32.totalorder %s25_s15, 2  ;;  %p168_p2 = scmp.lt.s32.totalorder %s2256_s14, 3 }
   0x5   : > { %s2934_s15 = smov (%p27_p1, %s25_s15), 0  ;;  %p169_p3 = pnand %p1929_p0, %p168_p2 }
   0x6   : > { %p202_p4 = scmp.lt.s32.totalorder (!%p169_p3), %s2248_s12, 1 }
   0x7   : > { %172 = sbr.rel (%p169_p3) target bundleno = 388 (0x184), region = 32 }
   0xc   : > { %v2173_v0 = vld [vmem:[%s2918_s1 + $0x8] sm:$0xff]  ;;  %v2174_v1 = vld [vmem:[%s2918_s1 + $0x10] sm:$0xff]  ;;  %s2936_s12 = smov (!%p202_p4, %s2248_s12), 1  ;;  %v2179_v2 = vld [vmem:[%s2918_s1 + $0x18] sm:$0xff]  ;;  %vm241_vm0 = vsmask.f32 3328 }
   0xd   : > { %2189 = vmatpush.bf16.msra.mxu1 %v2173_v0  ;;  %2190 = vmatpush.bf16.msra.mxu2 %v2173_v0  ;;  %s2192_s20 = smul.u32 80, %s2936_s12  ;;  %v2172_v3 = vld [vmem:[%s2918_s1] sm:$0xff]  ;;  %vm242_vm1 = vsmask.f32 7440  ;;  %vm377_vm2 = vcmask 130048   ;;  %vm510_vm4 = vcmask 1042432  }
   0xe   : > { %2191 = vmatpush.bf16.msra.mxu3 %v2173_v0  ;;  %397 = vmatpush.bf16.msra.mxu0 %v2173_v0  ;;  %v2180_v4 = vld [vmem:[%s2918_s1 + $0x20] sm:$0xff]  ;;  %vm2341_vm3 = vmor %vm241_vm0, %vm242_vm1  ;;  %vm511_vm5 = vcmask 1046532   ;;  %vm1809_vm12 = vcmask 125952   ;;  %s2167_s17 = sshll.u32 %s2936_s12, 5 }
   0xf   : > { %s2317_s29 = scalar_lea.vmem %s2917_s0, %s2192_s20  ;;  %vm2381_vm6 = vmor %vm510_vm4, %vm511_vm5  ;;  %s2775_s19 = scalar_lea.vmem %s2920_s3, %s2167_s17 }
  0x10   : > { %v225_v5 = vld [vmem:[%s2317_s29 + $0x10] sm:$0xf]  ;;  %v226_v6 = vld [vmem:[%s2317_s29 + $0x18] sm:$0xf]  ;;  %v2322_v7 = vld [vmem:[%s2317_s29 + $0x14] sm:$0x1] }
  0x11   : > { %585 = vmatpush.bf16.msrb.mxu2 %v2174_v1  ;;  %464 = vmatpush.bf16.msrb.mxu1 %v2172_v3  ;;  %v2325_v8 = vld [vmem:[%s2317_s29 + $0x1c] sm:$0x1]  ;;  %v273_v9 = vshrl.u32 %v225_v5, 16  ;;  %v276_v10 = vshll.u32 %v225_v5, 16  ;;  %v282_v11 = vshll.u32 %v2322_v7, 16  ;;  %v287_v12 = vshrl.u32 %v226_v6, 16 }
  0x12   : > { %672 = vmatpush.bf16.msrb.mxu3 %v2179_v2  ;;  %870 = vmatpush.bf16.msrb.mxu0 %v2180_v4  ;;  %v290_v13 = vshll.u32 %v226_v6, 16  ;;  %v296_v14 = vshll.u32 %v2325_v8, 16  ;;  %v227_v15 = vld [vmem:[%s2317_s29 + $0x20] sm:$0xf]  ;;  %v228_v16 = vld [vmem:[%s2317_s29 + $0x28] sm:$0xf] }
  0x13   : > { %v275_v17 = vrot.slane %v273_v9, 4  ;;  %v278_v18 = vrot.slane %v276_v10, 5  ;;  %v284_v19 = vrot.slane %v282_v11, 5  ;;  %v289_v20 = vrot.slane %v287_v12, 4  ;;  %v2332_v21 = vld [vmem:[%s2317_s29 + $0x24] sm:$0x1] }
  0x14   : > { %v292_v22 = vrot.slane %v290_v13, 5  ;;  %v298_v23 = vrot.slane %v296_v14, 5  ;;  %v2335_v24 = vld [vmem:[%s2317_s29 + $0x2c] sm:$0x1]  ;;  %v301_v25 = vshrl.u32 %v227_v15, 16  ;;  %v304_v26 = vshll.u32 %v227_v15, 16 }
  0x15   : > { %v279_v27 = vor.u32 %v278_v18, %v275_v17  ;;  %v310_v28 = vshll.u32 %v2332_v21, 16  ;;  %v315_v29 = vshrl.u32 %v228_v16, 16  ;;  %v318_v30 = vshll.u32 %v228_v16, 16  ;;  %v229_v31 = vld [vmem:[%s2317_s29 + $0x30] sm:$0xf] }
  0x16   : > { %v293_v33 = vor.u32 %v292_v22, %v289_v20  ;;  %v303_v34 = vrot.slane %v301_v25, 4  ;;  %v306_v35 = vrot.slane %v304_v26, 5  ;;  %v324_v36 = vshll.u32 %v2335_v24, 16  ;;  %v2347_v41 = vld [vmem:[%s2317_s29 + $0x34] sm:$0x1] }
  0x17   : > { %v280_v37 = vrot.slane %v279_v27, 4  ;;  %v312_v38 = vrot.slane %v310_v28, 5  ;;  %v317_v39 = vrot.slane %v315_v29, 4  ;;  %v320_v40 = vrot.slane %v318_v30, 5  ;;  %v230_v48 = vld [vmem:[%s2317_s29 + $0x38] sm:$0xf] }
  0x18   : > { %v294_v42 = vrot.slane %v293_v33, 4  ;;  %v307_v43 = vor.u32 %v306_v35, %v303_v34  ;;  %v326_v44 = vrot.slane %v324_v36, 5  ;;  %v329_v45 = vshrl.u32 %v229_v31, 16  ;;  %v2353_v49 = vld [vmem:[%s2317_s29 + $0x3c] sm:$0x1]  ;;  %v2186_v17 = vld [vmem:[%s2918_s1 + $0x30] sm:$0xff] }
  0x19   : > { %v285_v46 = vsel %vm2341_vm3, %v280_v37, %v284_v19  ;;  %v321_v47 = vor.u32 %v320_v40, %v317_v39  ;;  %v332_v50 = vshll.u32 %v229_v31, 16  ;;  %v338_v51 = vshll.u32 %v2347_v41, 16  ;;  %v223_v60 = vld [vmem:[%s2317_s29] sm:$0xf]  ;;  %v233_v1 = vld [vmem:[%s2317_s29 + $0x4] sm:$0x1] }
  0x1a   : > { %v299_v52 = vsel %vm2341_vm3, %v294_v42, %v298_v23  ;;  %v361_v53 = vunpack.c.l.b16 %v285_v46  ;;  %v308_v54 = vrot.slane %v307_v43, 4  ;;  %v331_v55 = vrot.slane %v329_v45, 4  ;;  %v224_v6 = vld [vmem:[%s2317_s29 + $0x8] sm:$0xf]  ;;  %v234_v20 = vld [vmem:[%s2317_s29 + $0xc] sm:$0x1] }
  0x1b   : > { %v362_v56 = vunpack.c.l.b16 %v299_v52  ;;  %v322_v57 = vrot.slane %v321_v47, 4  ;;  %v334_v58 = vrot.slane %v332_v50, 5  ;;  %v340_v59 = vrot.slane %v338_v51, 5  ;;  %v486_v29 = vld [vmem:[%s2317_s29] sm:$0xe]  ;;  %v2181_v30 = vld [vmem:[%s2918_s1 + $0x28] sm:$0xff] }
  0x1c   : > { %v313_v61 = vsel %vm2341_vm3, %v308_v54, %v312_v38  ;;  %v343_v62 = vshrl.u32 %v230_v48, 16  ;;  %v346_v63 = vshll.u32 %v230_v48, 16  ;;  %v352_v0 = vshll.u32 %v2353_v49, 16  ;;  %v487_v36 = vld [vmem:[%s2317_s29 + $0x8] sm:$0xe] }
  0x1d   : > { %v368_v2 = vpack.c.b16 %v362_v56, %v361_v53  ;;  %v327_v3 = vsel %vm2341_vm3, %v322_v57, %v326_v44  ;;  %v363_v4 = vunpack.c.l.b16 %v313_v61  ;;  %v335_v5 = vor.u32 %v334_v58, %v331_v55  ;;  %v2019_v43 = vld [vmem:[%s2317_s29 + $0x8] sm:$0xf]  ;;  %v2021_v54 = vld [vmem:[%s2317_s29 + $0x10] sm:$0xf]  ;;  %v2187_v56 = vld [vmem:[%s2918_s1 + $0x38] sm:$0xff] }
  0x1e   : > { %v364_v9 = vunpack.c.l.b16 %v327_v3  ;;  %v345_v10 = vrot.slane %v343_v62, 4  ;;  %v348_v11 = vrot.slane %v346_v63, 5  ;;  %v354_v12 = vrot.slane %v352_v0, 5  ;;  %v2402_v61 = vld [vmem:[%s2317_s29 + $0x14] sm:$0x1] }
  0x1f   : > { %1940 = vmatmul.msk.bf16.vlgmr.msra.gmra.mxu1 %vm377_vm2, %v368_v2  ;;  %v336_v13 = vrot.slane %v335_v5, 4  ;;  %v245_v14 = vshrl.u32 %v223_v60, 16  ;;  %v248_v15 = vshll.u32 %v223_v60, 16  ;;  %v254_v16 = vshll.u32 %v233_v1, 16  ;;  %v2399_v60 = vld [vmem:[%s2317_s29 + $0xc] sm:$0x1] }
  0x20   : > { %v369_v18 = vpack.c.b16 %v364_v9, %v363_v4  ;;  %v349_v19 = vor.u32 %v348_v11, %v345_v10  ;;  %v259_v22 = vshrl.u32 %v224_v6, 16  ;;  %v262_v23 = vshll.u32 %v224_v6, 16  ;;  %996 = vmatpush.bf16.msra.mxu1 %v2181_v30  ;;  %v1945_v0 = vld [vmem:[%s2317_s29] sm:$0xf] }
  0x21   : > { %v341_v25 = vsel %vm2341_vm3, %v336_v13, %v340_v59  ;;  %v247_v26 = vrot.slane %v245_v14, 4  ;;  %v250_v27 = vrot.slane %v248_v15, 5  ;;  %v256_v28 = vrot.slane %v254_v16, 5  ;;  %v2188_v13 = vld [vmem:[%s2918_s1 + $0x40] sm:$0xff] }
  0x22   : > { %1941 = vmatmul.msk.bf16.vlgmr.msra.gmra.mxu2 %vm377_vm2, %v369_v18  ;;  %v350_v31 = vrot.slane %v349_v19, 4  ;;  %v365_v33 = vunpack.c.l.b16 %v341_v25  ;;  %v261_v34 = vrot.slane %v259_v22, 4  ;;  %v264_v35 = vrot.slane %v262_v23, 5 }
  0x23   : > { %v251_v37 = vor.u32 %v250_v27, %v247_v26  ;;  %v268_v38 = vshll.u32 %v234_v20, 16  ;;  %v515_v39 = vrot.slane %v233_v1, 5  ;;  %v519_v40 = vrot.slane %v234_v20, 5  ;;  %1083 = vmatpush.bf16.msra.mxu2 %v2186_v17  ;;  %v2168_v1 = vld [vmem:[%s2317_s29 + $0x4] sm:$0xf0] }
  0x24   : > { %v355_v44 = vsel %vm2341_vm3, %v350_v31, %v354_v12  ;;  %v265_v45 = vor.u32 %v264_v35, %v261_v34  ;;  %v1967_v46 = vrot.slane %v486_v29, 9  ;;  %v1968_v51 = vrot.slane %v487_v36, 9  ;;  %v488_v26 = vld [vmem:[%s2317_s29 + $0x10] sm:$0xe]  ;;  %v2023_v27 = vld [vmem:[%s2317_s29 + $0x18] sm:$0xf] }
  0x25   : > { %v366_v47 = vunpack.c.l.b16 %v355_v44  ;;  %v252_v48 = vrot.slane %v251_v37, 4  ;;  %v270_v50 = vrot.slane %v268_v38, 5  ;;  %v719_v55 = vshrl.u32 %v2019_v43, 16  ;;  %v2025_v29 = vld [vmem:[%s2317_s29 + $0x20] sm:$0xf] }
  0x26   : > { %v266_v52 = vrot.slane %v265_v45, 4  ;;  %v516_v53 = vsel %vm2381_vm6, %v1967_v46, %v515_v39  ;;  %v520_v59 = vsel %vm2381_vm6, %v1968_v51, %v519_v40  ;;  %v722_v5 = vshll.u32 %v2019_v43, 16  ;;  %v489_v31 = vld [vmem:[%s2317_s29 + $0x18] sm:$0xe]  ;;  %v1997_v37 = vld [vmem:[%s2317_s29 + $0x8] sm:$0xf] }
  0x27   : > { %v370_v57 = vpack.c.b16 %v366_v47, %v365_v33  ;;  %v257_v58 = vsel %vm2341_vm3, %v252_v48, %v256_v28  ;;  %v548_v2 = vunpack.c.l.b16 %v516_v53  ;;  %v721_v4 = vrot.slane %v719_v55, 4  ;;  %v2175_v38 = vld [vmem:[%s2317_s29 + $0xc] sm:$0xf0]  ;;  %v2432_v51 = vld [vmem:[%s2317_s29 + $0x1c] sm:$0x1] }
  0x28   : > { %v271_v62 = vsel %vm2341_vm3, %v266_v52, %v270_v50  ;;  %v359_v63 = vunpack.c.l.b16 %v257_v58  ;;  %v733_v6 = vshrl.u32 %v2021_v54, 16  ;;  %v549_v9 = vunpack.c.l.b16 %v520_v59  ;;  %v1949_v58 = vld [vmem:[%s2317_s29 + $0x10] sm:$0xf] }
  0x29   : > { %1942 = vmatmul.msk.bf16.vlgmr.msra.gmra.mxu3 %vm377_vm2, %v370_v57  ;;  %v360_v3 = vunpack.c.l.b16 %v271_v62  ;;  %v728_v10 = vshll.u32 %v2399_v60, 16  ;;  %v736_v11 = vshll.u32 %v2021_v54, 16  ;;  %v742_v12 = vshll.u32 %v2402_v61, 16  ;;  %v2437_v57 = vld [vmem:[%s2317_s29 + $0x24] sm:$0x1] }
  0x2a   : > { %1281 = vmatpush.bf16.msra.mxu3 %v2187_v56  ;;  %v1946_v15 = vor.u32 %v2168_v1, %v1945_v0  ;;  %v724_v16 = vrot.slane %v722_v5, 5  ;;  %v735_v17 = vrot.slane %v733_v6, 4  ;;  %v556_v20 = vpack.c.b16 %v549_v9, %v548_v2  ;;  %v2027_v6 = vld [vmem:[%s2317_s29 + $0x28] sm:$0xf] }
  0x2b   : > { %v367_v14 = vpack.c.b16 %v360_v3, %v359_v63  ;;  %v738_v18 = vrot.slane %v736_v11, 5  ;;  %v730_v22 = vrot.slane %v728_v10, 5  ;;  %v744_v25 = vrot.slane %v742_v12, 5 }
  0x2c   : > { %v725_v19 = vor.u32 %v724_v16, %v721_v4  ;;  %v1969_v33 = vrot.slane %v488_v26, 9  ;;  %v523_v34 = vrot.slane %v2322_v7, 5  ;;  %v747_v35 = vshrl.u32 %v2023_v27, 16 }
  0x2d   : > { %1939 = vmatmul.msk.bf16.vlgmr.msra.gmra.mxu0 %vm377_vm2, %v367_v14  ;;  %v739_v23 = vor.u32 %v738_v18, %v735_v17  ;;  %v750_v36 = vshll.u32 %v2023_v27, 16  ;;  %v761_v43 = vshrl.u32 %v2025_v29, 16  ;;  %v764_v44 = vshll.u32 %v2025_v29, 16  ;;  %v490_v14 = vld [vmem:[%s2317_s29 + $0x20] sm:$0xe] }
  0x2e   : > { %1407 = vmatpush.bf16.msra.mxu0 %v2188_v13  ;;  %v726_v28 = vrot.slane %v725_v19, 4  ;;  %v1970_v45 = vrot.slane %v489_v31, 9  ;;  %v527_v7 = vrot.slane %v2325_v8, 5  ;;  %v1998_v46 = vor.u32 %v2175_v38, %v1997_v37  ;;  %v2169_v8 = vld [vmem:[%s2317_s29 + $0x14] sm:$0xf0] }
  0x2f   : > { %1963 = vmatmul.msk.bf16.vlgmr.msrb.gmra.mxu1 %vm377_vm2, %v1946_v15  ;;  %v740_v30 = vrot.slane %v739_v23, 4  ;;  %v524_v50 = vsel %vm2381_vm6, %v1969_v33, %v523_v34  ;;  %v749_v52 = vrot.slane %v747_v35, 4  ;;  %v752_v53 = vrot.slane %v750_v36, 5  ;;  %v2029_v13 = vld [vmem:[%s2317_s29 + $0x30] sm:$0xf] }
  0x30   : > { %v731_v39 = vsel %vm2341_vm3, %v726_v28, %v730_v22  ;;  %v763_v54 = vrot.slane %v761_v43, 4  ;;  %v766_v55 = vrot.slane %v764_v44, 5  ;;  %v528_v56 = vsel %vm2381_vm6, %v1970_v45, %v527_v7  ;;  %v491_v15 = vld [vmem:[%s2317_s29 + $0x28] sm:$0xe]  ;;  %v2001_v18 = vld [vmem:[%s2317_s29 + $0x18] sm:$0xf] }
  0x31   : > { %v745_v40 = vsel %vm2341_vm3, %v740_v30, %v744_v25  ;;  %v833_v47 = vunpack.c.l.b16 %v731_v39  ;;  %v550_v62 = vunpack.c.l.b16 %v524_v50  ;;  %v756_v63 = vshll.u32 %v2432_v51, 16  ;;  %v2176_v19 = vld [vmem:[%s2317_s29 + $0x1c] sm:$0xf0]  ;;  %v2460_v36 = vld [vmem:[%s2317_s29 + $0x2c] sm:$0x1] }
  0x32   : > { %1981 = vmatmul.msk.bf16.vlgmr.msrb.gmra.mxu2 %vm377_vm2, %v556_v20  ;;  %v834_v48 = vunpack.c.l.b16 %v745_v40  ;;  %v551_v0 = vunpack.c.l.b16 %v528_v56  ;;  %v753_v1 = vor.u32 %v752_v53, %v749_v52  ;;  %v767_v2 = vor.u32 %v766_v55, %v763_v54  ;;  %v1953_v43 = vld [vmem:[%s2317_s29 + $0x20] sm:$0xf]  ;;  %v492_v55 = vld [vmem:[%s2317_s29 + $0x30] sm:$0xe] }
  0x33   : > { %v770_v3 = vshll.u32 %v2437_v57, 16  ;;  %v1950_v4 = vor.u32 %v2169_v8, %v1949_v58  ;;  %v758_v5 = vrot.slane %v756_v63, 5  ;;  %v775_v16 = vshrl.u32 %v2027_v6, 16  ;;  %v2033_v63 = vld [vmem:[%s2317_s29 + $0x40] sm:$0xf] }
  0x34   : > { %v841_v59 = vpack.c.b16 %v834_v48, %v833_v47  ;;  %v557_v9 = vpack.c.b16 %v551_v0, %v550_v62  ;;  %v754_v10 = vrot.slane %v753_v1, 4  ;;  %v768_v11 = vrot.slane %v767_v2, 4  ;;  %v2031_v62 = vld [vmem:[%s2317_s29 + $0x38] sm:$0xf]  ;;  %v2005_v0 = vld [vmem:[%s2317_s29 + $0x28] sm:$0xf] }
  0x35   : > { %v772_v12 = vrot.slane %v770_v3, 5  ;;  %v778_v17 = vshll.u32 %v2027_v6, 16  ;;  %v789_v23 = vshrl.u32 %v2029_v13, 16  ;;  %v792_v25 = vshll.u32 %v2029_v13, 16  ;;  %v2177_v3 = vld [vmem:[%s2317_s29 + $0x2c] sm:$0xf0] }
  0x36   : > { %v759_v20 = vsel %vm2341_vm3, %v754_v10, %v758_v5  ;;  %v1971_v26 = vrot.slane %v490_v14, 9  ;;  %v531_v27 = vrot.slane %v2332_v21, 5  ;;  %v1972_v28 = vrot.slane %v491_v15, 9  ;;  %v2467_v21 = vld [vmem:[%s2317_s29 + $0x34] sm:$0x1] }
  0x37   : > { %v773_v22 = vsel %vm2341_vm3, %v768_v11, %v772_v12  ;;  %v535_v29 = vrot.slane %v2335_v24, 5  ;;  %v777_v30 = vrot.slane %v775_v16, 4  ;;  %v780_v31 = vrot.slane %v778_v17, 5  ;;  %v2170_v24 = vld [vmem:[%s2317_s29 + $0x24] sm:$0xf0] }
  0x38   : > { %v2002_v33 = vor.u32 %v2176_v19, %v2001_v18  ;;  %v835_v34 = vunpack.c.l.b16 %v759_v20  ;;  %v836_v35 = vunpack.c.l.b16 %v773_v22  ;;  %v791_v37 = vrot.slane %v789_v23, 4  ;;  %v2494_v17 = vld [vmem:[%s2317_s29 + $0x3c] sm:$0x1]  ;;  %v2497_v18 = vld [vmem:[%s2317_s29 + $0x44] sm:$0x1] }
  0x39   : > { %2015 = vmatmul.msk.bf16.vlgmr.msrb.gmra.mxu3 %vm377_vm2, %v1998_v46  ;;  %v794_v38 = vrot.slane %v792_v25, 5  ;;  %v532_v39 = vsel %vm2381_vm6, %v1971_v26, %v531_v27  ;;  %v536_v40 = vsel %vm2381_vm6, %v1972_v28, %v535_v29  ;;  %v781_v44 = vor.u32 %v780_v31, %v777_v30  ;;  %v1957_v25 = vld [vmem:[%s2317_s29 + $0x30] sm:$0xf]  ;;  %v2171_v26 = vld [vmem:[%s2317_s29 + $0x34] sm:$0xf0] }
  0x3a   : > { %v784_v45 = vshll.u32 %v2460_v36, 16  ;;  %v842_v7 = vpack.c.b16 %v836_v35, %v835_v34  ;;  %v552_v46 = vunpack.c.l.b16 %v532_v39  ;;  %v553_v47 = vunpack.c.l.b16 %v536_v40 }
  0x3b   : > { %v795_v48 = vor.u32 %v794_v38, %v791_v37  ;;  %v798_v50 = vshll.u32 %v2467_v21, 16  ;;  %v1954_v52 = vor.u32 %v2170_v24, %v1953_v43  ;;  %v782_v53 = vrot.slane %v781_v44, 4  ;;  %v2107_v38 = vld [vmem:[%s2317_s29 + $0x18] sm:$0xf] }
  0x3c   : > { %v786_v54 = vrot.slane %v784_v45, 5  ;;  %v558_v56 = vpack.c.b16 %v553_v47, %v552_v46  ;;  %v539_v2 = vrot.slane %v2347_v41, 5  ;;  %v543_v6 = vrot.slane %v2353_v49, 5  ;;  %v2045_v45 = vld [vmem:[%s2317_s29 + $0x8] sm:$0xe] }
  0x3d   : > { %2041 = vmatmul.msk.bf16.vlgmr.msrb.gmra.mxu0 %vm377_vm2, %v841_v59  ;;  %v796_v58 = vrot.slane %v795_v48, 4  ;;  %v800_v8 = vrot.slane %v798_v50, 5  ;;  %v493_v59 = vld [vmem:[%s2317_s29 + $0x38] sm:$0xe]  ;;  %v806_v11 = vshll.u32 %v2031_v62, 16  ;;  %v817_v12 = vshrl.u32 %v2033_v63, 16 }
  0x3e   : > { %v787_v1 = vsel %vm2341_vm3, %v782_v53, %v786_v54  ;;  %v1974_v5 = vrot.slane %v493_v59, 9  ;;  %v820_v13 = vshll.u32 %v2033_v63, 16  ;;  %v2006_v14 = vor.u32 %v2177_v3, %v2005_v0  ;;  %v2009_v59 = vld [vmem:[%s2317_s29 + $0x38] sm:$0xf] }
  0x3f   : > { %1964 = vmatmul.msk.bf16.gmra.mxu1 %vm377_vm2, %v1950_v4  ;;  %v1973_v4 = vrot.slane %v492_v55, 9  ;;  %v801_v10 = vsel %vm2341_vm3, %v796_v58, %v800_v8  ;;  %v837_v41 = vunpack.c.l.b16 %v787_v1  ;;  %v808_v20 = vrot.slane %v806_v11, 5  ;;  %v2106_v8 = vld [vmem:[%s2317_s29 + $0x14] sm:$0x1] }
  0x40   : > { %v838_v15 = vunpack.c.l.b16 %v801_v10  ;;  %v544_v49 = vsel %vm2381_vm6, %v1974_v5, %v543_v6  ;;  %v819_v22 = vrot.slane %v817_v12, 4  ;;  %v822_v23 = vrot.slane %v820_v13, 5 }
  0x41   : > { %v540_v16 = vsel %vm2381_vm6, %v1973_v4, %v539_v2  ;;  %v555_v29 = vunpack.c.l.b16 %v544_v49  ;;  %v812_v30 = vshll.u32 %v2494_v17, 16  ;;  %v826_v31 = vshll.u32 %v2497_v18, 16  ;;  %v2083_v49 = vld [vmem:[%s2317_s29 + $0x10] sm:$0xf] }
  0x42   : > { %1982 = vmatmul.msk.bf16.gmra.mxu2 %vm377_vm2, %v557_v9  ;;  %v803_v9 = vshrl.u32 %v2031_v62, 16  ;;  %v554_v27 = vunpack.c.l.b16 %v540_v16  ;;  %v843_v28 = vpack.c.b16 %v838_v15, %v837_v41  ;;  %v823_v35 = vor.u32 %v822_v23, %v819_v22  ;;  %v2178_v62 = vld [vmem:[%s2317_s29 + $0x3c] sm:$0xf0]  ;;  %v2182_v22 = vld [vmem:[%s2317_s29 + $0x14] sm:$0xf0] }
  0x43   : > { %v1958_v37 = vor.u32 %v2171_v26, %v1957_v25  ;;  %v814_v24 = vrot.slane %v812_v30, 5  ;;  %v828_v44 = vrot.slane %v826_v31, 5  ;;  %v1144_v48 = vshrl.u32 %v2107_v38, 16  ;;  %v2109_v26 = vld [vmem:[%s2317_s29 + $0x20] sm:$0xf] }
  0x44   : > { %v805_v19 = vrot.slane %v803_v9, 4  ;;  %v559_v43 = vpack.c.b16 %v555_v29, %v554_v27  ;;  %v824_v47 = vrot.slane %v823_v35, 4  ;;  %v1147_v50 = vshll.u32 %v2107_v38, 16  ;;  %v2047_v35 = vld [vmem:[%s2317_s29 + $0x18] sm:$0xe] }
  0x45   : > { %v930_v53 = vrot.slane %v2402_v61, 5  ;;  %v2053_v54 = vrot.slane %v2045_v45, 9  ;;  %v2108_v61 = vld [vmem:[%s2317_s29 + $0x1c] sm:$0x1]  ;;  %v1139_v5 = vshll.u32 %v2106_v8, 16  ;;  %v2010_v6 = vor.u32 %v2178_v62, %v2009_v59 }
  0x46   : > { %v809_v34 = vor.u32 %v808_v20, %v805_v19  ;;  %v829_v0 = vsel %vm2341_vm3, %v824_v47, %v828_v44  ;;  %v1149_v1 = vrot.slane %v1147_v50, 5  ;;  %v1153_v12 = vshll.u32 %v2108_v61, 16  ;;  %v2131_v19 = vld [vmem:[%s2317_s29 + $0x10] sm:$0xe]  ;;  %v2132_v20 = vld [vmem:[%s2317_s29 + $0x18] sm:$0xe] }
  0x47   : > { %v840_v10 = vunpack.c.l.b16 %v829_v0  ;;  %v1141_v15 = vrot.slane %v1139_v5, 5  ;;  %v2139_v30 = vrot.slane %v2131_v19, 9  ;;  %v1337_v31 = vrot.slane %v2106_v8, 5  ;;  %v2112_v59 = vld [vmem:[%s2317_s29 + $0x2c] sm:$0x1] }
  0x48   : > { %v810_v46 = vrot.slane %v809_v34, 4  ;;  %v1155_v25 = vrot.slane %v1153_v12, 5  ;;  %v2084_v34 = vor.u32 %v2182_v22, %v2083_v49  ;;  %v1158_v38 = vshrl.u32 %v2109_v26, 16  ;;  %v2087_v5 = vld [vmem:[%s2317_s29 + $0x20] sm:$0xf] }
  0x49   : > { %2016 = vmatmul.msk.bf16.gmra.mxu3 %vm377_vm2, %v2002_v33  ;;  %v2105_v33 = vld [vmem:[%s2317_s29 + $0x10] sm:$0xf]  ;;  %v2115_v49 = vld [vmem:[%s2317_s29 + $0x38] sm:$0xf] }
  0x4a   : > { %v1130_v39 = vshrl.u32 %v2105_v33, 16  ;;  %v1133_v40 = vshll.u32 %v2105_v33, 16  ;;  %v815_v63 = vsel %vm2341_vm3, %v810_v46, %v814_v24  ;;  %v2140_v33 = vrot.slane %v2132_v20, 9  ;;  %v2113_v12 = vld [vmem:[%s2317_s29 + $0x30] sm:$0xf] }
  0x4b   : > { %v839_v9 = vunpack.c.l.b16 %v815_v63  ;;  %v934_v46 = vrot.slane %v2432_v51, 5  ;;  %v1186_v20 = vshrl.u32 %v2113_v12, 16  ;;  %v1189_v22 = vshll.u32 %v2113_v12, 16 }
  0x4c   : > { %v1135_v58 = vrot.slane %v1133_v40, 5 }
  0x4d   : > { %2042 = vmatmul.msk.bf16.gmra.mxu0 %vm377_vm2, %v842_v7  ;;  %v2046_v7 = vld [vmem:[%s2317_s29 + $0x10] sm:$0xe]  ;;  %v844_v16 = vpack.c.b16 %v840_v10, %v839_v9 }
  0x4e   : > { %v2054_v55 = vrot.slane %v2046_v7, 9  ;;  %v2055_v7 = vrot.slane %v2047_v35, 9  ;;  %v942_v35 = vrot.slane %v2460_v36, 5  ;;  %v2116_v36 = vld [vmem:[%s2317_s29 + $0x3c] sm:$0x1] }
  0x4f   : > { %1965 = vmatmul.msk.bf16.gmra.mxu1 %vm377_vm2, %v1954_v52  ;;  %v926_v52 = vrot.slane %v2399_v60, 5  ;;  %v1146_v60 = vrot.slane %v1144_v48, 4  ;;  %v938_v48 = vrot.slane %v2437_v57, 5 }
  0x50   : > { %v931_v3 = vsel %vm2381_vm6, %v2054_v55, %v930_v53  ;;  %v1160_v53 = vrot.slane %v1158_v38, 4  ;;  %v935_v57 = vsel %vm2381_vm6, %v2055_v7, %v934_v46 }
  0x51   : > { %v927_v2 = vsel %vm2381_vm6, %v2053_v54, %v926_v52  ;;  %v1150_v11 = vor.u32 %v1149_v1, %v1146_v60  ;;  %v1338_v52 = vsel %vm2381_vm6, %v2139_v30, %v1337_v31  ;;  %v1349_v31 = vrot.slane %v2112_v59, 5 }
  0x52   : > { %1983 = vmatmul.msk.bf16.gmra.mxu2 %vm377_vm2, %v558_v56  ;;  %v1132_v56 = vrot.slane %v1130_v39, 4  ;;  %v959_v13 = vunpack.c.l.b16 %v927_v2  ;;  %v1161_v39 = vshll.u32 %v2109_v26, 16  ;;  %v1370_v51 = vunpack.c.l.b16 %v1338_v52 }
  0x53   : > { %v1151_v23 = vrot.slane %v1150_v11, 4  ;;  %v1181_v2 = vshll.u32 %v2112_v59, 16  ;;  %v2133_v11 = vld [vmem:[%s2317_s29 + $0x20] sm:$0xe] }
  0x54   : > { %v1136_v4 = vor.u32 %v1135_v58, %v1132_v56  ;;  %v1163_v54 = vrot.slane %v1161_v39, 5  ;;  %v2110_v56 = vld [vmem:[%s2317_s29 + $0x24] sm:$0x1]  ;;  %v2141_v19 = vrot.slane %v2133_v11, 9 }
  0x55   : > { %v1156_v40 = vsel %vm2341_vm3, %v1151_v23, %v1155_v25  ;;  %v1167_v1 = vshll.u32 %v2110_v56, 16  ;;  %v1345_v26 = vrot.slane %v2110_v56, 5 }
  0x56   : > { %v1137_v41 = vrot.slane %v1136_v4, 4  ;;  %v1245_v50 = vunpack.c.l.b16 %v1156_v40  ;;  %v1164_v60 = vor.u32 %v1163_v54, %v1160_v53  ;;  %v1188_v40 = vrot.slane %v1186_v20, 4 }
  0x57   : > { %v1169_v10 = vrot.slane %v1167_v1, 5  ;;  %v1346_v7 = vsel %vm2381_vm6, %v2141_v19, %v1345_v26  ;;  %v2136_v1 = vld [vmem:[%s2317_s29 + $0x38] sm:$0xe]  ;;  %v1357_v19 = vrot.slane %v2116_v36, 5  ;;  %v950_v26 = vrot.slane %v2494_v17, 5 }
  0x58   : > { %v1142_v29 = vsel %vm2341_vm3, %v1137_v41, %v1141_v15  ;;  %v1165_v9 = vrot.slane %v1164_v60, 4  ;;  %v1183_v41 = vrot.slane %v1181_v2, 5  ;;  %v2134_v15 = vld [vmem:[%s2317_s29 + $0x28] sm:$0xe]  ;;  %v2135_v60 = vld [vmem:[%s2317_s29 + $0x30] sm:$0xe] }
  0x59   : > { %2017 = vmatmul.msk.bf16.gmra.mxu3 %vm377_vm2, %v2006_v14  ;;  %v960_v14 = vunpack.c.l.b16 %v931_v3  ;;  %v1244_v45 = vunpack.c.l.b16 %v1142_v29  ;;  %v961_v3 = vunpack.c.l.b16 %v935_v57  ;;  %v2050_v29 = vld [vmem:[%s2317_s29 + $0x30] sm:$0xe]  ;;  %v2144_v12 = vrot.slane %v2136_v1, 9 }
  0x5a   : > { %v1170_v25 = vsel %vm2341_vm3, %v1165_v9, %v1169_v10  ;;  %v2058_v39 = vrot.slane %v2050_v29, 9  ;;  %v2143_v10 = vrot.slane %v2135_v60, 9 }
  0x5b   : > { %v967_v27 = vpack.c.b16 %v960_v14, %v959_v13  ;;  %v1252_v63 = vpack.c.b16 %v1245_v50, %v1244_v45  ;;  %v2183_v13 = vld [vmem:[%s2317_s29 + $0x24] sm:$0xf0]  ;;  %v2114_v45 = vld [vmem:[%s2317_s29 + $0x34] sm:$0x1] }
  0x5c   : > { %v2088_v23 = vor.u32 %v2183_v13, %v2087_v5  ;;  %v1195_v53 = vshll.u32 %v2114_v45, 16  ;;  %v1353_v11 = vrot.slane %v2114_v45, 5 }
  0x5d   : > { %2043 = vmatmul.msk.bf16.gmra.mxu0 %vm377_vm2, %v843_v28  ;;  %v2111_v28 = vld [vmem:[%s2317_s29 + $0x28] sm:$0xf] }
  0x5e   : > { %v1172_v24 = vshrl.u32 %v2111_v28, 16  ;;  %v1175_v44 = vshll.u32 %v2111_v28, 16  ;;  %v2049_v28 = vld [vmem:[%s2317_s29 + $0x28] sm:$0xe] }
  0x5f   : > { %1966 = vmatmul.msk.bf16.gmra.mxu1 %vm377_vm2, %v1958_v37  ;;  %v2048_v37 = vld [vmem:[%s2317_s29 + $0x20] sm:$0xe]  ;;  %v2057_v38 = vrot.slane %v2049_v28, 9  ;;  %v954_v28 = vrot.slane %v2497_v18, 5 }
  0x60   : > { %v2056_v47 = vrot.slane %v2048_v37, 9  ;;  %v1174_v58 = vrot.slane %v1172_v24, 4  ;;  %v1177_v8 = vrot.slane %v1175_v44, 5  ;;  %v946_v37 = vrot.slane %v2467_v21, 5 }
  0x61   : > { %v1246_v24 = vunpack.c.l.b16 %v1170_v25  ;;  %v943_v21 = vsel %vm2381_vm6, %v2057_v38, %v942_v35  ;;  %v2118_v35 = vld [vmem:[%s2317_s29 + $0x44] sm:$0x1] }
  0x62   : > { %1984 = vmatmul.msk.bf16.gmra.mxu2 %vm377_vm2, %v559_v43  ;;  %v1341_v43 = vrot.slane %v2108_v61, 5  ;;  %v939_v62 = vsel %vm2381_vm6, %v2056_v47, %v938_v48  ;;  %v1178_v61 = vor.u32 %v1177_v8, %v1174_v58  ;;  %v947_v50 = vsel %vm2381_vm6, %v2058_v39, %v946_v37  ;;  %v2120_v39 = vld [vmem:[%s2317_s29 + $0x4c] sm:$0x1] }
  0x63   : > { %v962_v4 = vunpack.c.l.b16 %v939_v62  ;;  %v1209_v8 = vshll.u32 %v2116_v36, 16  ;;  %v963_v59 = vunpack.c.l.b16 %v943_v21  ;;  %v1197_v62 = vrot.slane %v1195_v53, 5 }
  0x64   : > { %v1342_v55 = vsel %vm2381_vm6, %v2140_v33, %v1341_v43  ;;  %v1179_v14 = vrot.slane %v1178_v61, 4  ;;  %v1200_v33 = vshrl.u32 %v2115_v49, 16  ;;  %v1191_v43 = vrot.slane %v1189_v22, 5  ;;  %v2184_v61 = vld [vmem:[%s2317_s29 + $0x34] sm:$0xf0] }
  0x65   : > { %v1371_v0 = vunpack.c.l.b16 %v1342_v55  ;;  %v1372_v55 = vunpack.c.l.b16 %v1346_v7  ;;  %v1223_v45 = vshll.u32 %v2118_v35, 16  ;;  %v1365_v1 = vrot.slane %v2120_v39, 5 }
  0x66   : > { %v1184_v30 = vsel %vm2341_vm3, %v1179_v14, %v1183_v41  ;;  %v1202_v47 = vrot.slane %v1200_v33, 4  ;;  %v1192_v52 = vor.u32 %v1191_v43, %v1188_v40  ;;  %v2051_v14 = vld [vmem:[%s2317_s29 + $0x38] sm:$0xe]  ;;  %v2052_v41 = vld [vmem:[%s2317_s29 + $0x40] sm:$0xe] }
  0x67   : > { %v1247_v44 = vunpack.c.l.b16 %v1184_v30  ;;  %v2059_v25 = vrot.slane %v2051_v14, 9  ;;  %v1354_v30 = vsel %vm2381_vm6, %v2143_v10, %v1353_v11 }
  0x68   : > { %v1193_v57 = vrot.slane %v1192_v52, 4  ;;  %v1374_v40 = vunpack.c.l.b16 %v1354_v30 }
  0x69   : > { %2018 = vmatmul.msk.bf16.gmra.mxu3 %vm377_vm2, %v2010_v6  ;;  %v1378_v6 = vpack.c.b16 %v1371_v0, %v1370_v51  ;;  %v1253_v54 = vpack.c.b16 %v1247_v44, %v1246_v24  ;;  %v964_v51 = vunpack.c.l.b16 %v947_v50  ;;  %v2091_v0 = vld [vmem:[%s2317_s29 + $0x30] sm:$0xf]  ;;  %v951_v17 = vsel %vm2381_vm6, %v2059_v25, %v950_v26 }
  0x6a   : > { %v1198_v9 = vsel %vm2341_vm3, %v1193_v57, %v1197_v62  ;;  %v2092_v13 = vor.u32 %v2184_v61, %v2091_v0  ;;  %v1225_v50 = vrot.slane %v1223_v45, 5  ;;  %v1361_v62 = vrot.slane %v2118_v35, 5 }
  0x6b   : > { %v969_v5 = vpack.c.b16 %v964_v51, %v963_v59 }
  0x6d   : > { %2044 = vmatmul.msk.bf16.gmra.mxu0 %vm377_vm2, %v844_v16  ;;  %v968_v16 = vpack.c.b16 %v962_v4, %v961_v3  ;;  %v1211_v3 = vrot.slane %v1209_v8, 5  ;;  %v2117_v4 = vld [vmem:[%s2317_s29 + $0x40] sm:$0xf]  ;;  %v2138_v8 = vld [vmem:[%s2317_s29 + $0x48] sm:$0xe] }
  0x6e   : > { %v2146_v60 = vrot.slane %v2138_v8, 9 }
  0x6f   : > { %2067 = vmatmul.msk.bf16.vlgmr.msra.gmra.mxu1 %vm377_vm2, %v967_v27  ;;  %v2142_v27 = vrot.slane %v2134_v15, 9  ;;  %v1214_v15 = vshrl.u32 %v2117_v4, 16 }
  0x71   : > { %v1350_v46 = vsel %vm2381_vm6, %v2142_v27, %v1349_v31  ;;  %v2060_v27 = vrot.slane %v2052_v41, 9  ;;  %v1216_v31 = vrot.slane %v1214_v15, 4 }
  0x72   : > { %2101 = vmatmul.msk.bf16.vlgmr.msra.gmra.mxu2 %vm377_vm2, %v2084_v34  ;;  %v1203_v34 = vshll.u32 %v2115_v49, 16  ;;  %v1373_v56 = vunpack.c.l.b16 %v1350_v46  ;;  %v1237_v46 = vshll.u32 %v2120_v39, 16 }
  0x73   : > { %v955_v18 = vsel %vm2381_vm6, %v2060_v27, %v954_v28 }
  0x74   : > { %v1205_v48 = vrot.slane %v1203_v34, 5  ;;  %v1358_v34 = vsel %vm2381_vm6, %v2144_v12, %v1357_v19  ;;  %v1239_v53 = vrot.slane %v1237_v46, 5 }
  0x75   : > { %v1375_v24 = vunpack.c.l.b16 %v1358_v34 }
  0x76   : > { %v1206_v58 = vor.u32 %v1205_v48, %v1202_v47  ;;  %v965_v47 = vunpack.c.l.b16 %v951_v17  ;;  %v966_v48 = vunpack.c.l.b16 %v955_v18 }
  0x77   : > { %v1380_v36 = vpack.c.b16 %v1375_v24, %v1374_v40 }
  0x78   : > { %v1207_v2 = vrot.slane %v1206_v58, 4  ;;  %v2185_v58 = vld [vmem:[%s2317_s29 + $0x44] sm:$0xf0] }
  0x79   : > { %2127 = vmatmul.msk.bf16.vlgmr.msra.gmra.mxu3 %vm377_vm2, %v1252_v63  ;;  %v1379_v63 = vpack.c.b16 %v1373_v56, %v1372_v55  ;;  %v970_v55 = vpack.c.b16 %v966_v48, %v965_v47  ;;  %v2095_v56 = vld [vmem:[%s2317_s29 + $0x40] sm:$0xf] }
  0x7a   : > { %v1212_v49 = vsel %vm2341_vm3, %v1207_v2, %v1211_v3 }
  0x7b   : > { %v1249_v29 = vunpack.c.l.b16 %v1212_v49 }
  0x7d   : > { %2153 = vmatmul.msk.bf16.vlgmr.msra.gmra.mxu0 %vm377_vm2, %v1378_v6  ;;  %v2119_v6 = vld [vmem:[%s2317_s29 + $0x48] sm:$0xf] }
  0x7e   : > { %v1228_v20 = vshrl.u32 %v2119_v6, 16  ;;  %v1231_v22 = vshll.u32 %v2119_v6, 16 }
  0x7f   : > { %2068 = vmatmul.msk.bf16.gmra.mxu1 %vm377_vm2, %v968_v16  ;;  %v1217_v16 = vshll.u32 %v2117_v4, 16  ;;  %v1366_v4 = vsel %vm2381_vm6, %v2146_v60, %v1365_v1 }
  0x80   : > { %v1230_v37 = vrot.slane %v1228_v20, 4  ;;  %v1233_v38 = vrot.slane %v1231_v22, 5  ;;  %v1377_v32 = vunpack.c.l.b16 %v1366_v4 }
  0x81   : > { %v1219_v33 = vrot.slane %v1217_v16, 5 }
  0x82   : > { %2102 = vmatmul.msk.bf16.gmra.mxu2 %vm377_vm2, %v2088_v23  ;;  %v1248_v23 = vunpack.c.l.b16 %v1198_v9  ;;  %v1234_v7 = vor.u32 %v1233_v38, %v1230_v37 }
  0x83   : > { %v1220_v44 = vor.u32 %v1219_v33, %v1216_v31 }
  0x84   : > { %v1254_v43 = vpack.c.b16 %v1249_v29, %v1248_v23  ;;  %v1235_v52 = vrot.slane %v1234_v7, 4 }
  0x85   : > { %v1221_v21 = vrot.slane %v1220_v44, 4 }
  0x86   : > { %v1240_v0 = vsel %vm2341_vm3, %v1235_v52, %v1239_v53 }
  0x87   : > { %v1226_v51 = vsel %vm2341_vm3, %v1221_v21, %v1225_v50  ;;  %v1251_v2 = vunpack.c.l.b16 %v1240_v0 }
  0x88   : > { %v1250_v61 = vunpack.c.l.b16 %v1226_v51 }
  0x89   : > { %2128 = vmatmul.msk.bf16.gmra.mxu3 %vm377_vm2, %v1253_v54  ;;  %v2137_v54 = vld [vmem:[%s2317_s29 + $0x40] sm:$0xe] }
  0x8a   : > { %v2145_v57 = vrot.slane %v2137_v54, 9  ;;  %v1255_v6 = vpack.c.b16 %v1251_v2, %v1250_v61 }
  0x8c   : > { %v1362_v3 = vsel %vm2381_vm6, %v2145_v57, %v1361_v62 }
  0x8d   : > { %2154 = vmatmul.msk.bf16.gmra.mxu0 %vm377_vm2, %v1379_v63  ;;  %v2096_v63 = vor.u32 %v2185_v58, %v2095_v56  ;;  %v1376_v9 = vunpack.c.l.b16 %v1362_v3 }
  0x8f   : > { %2069 = vmatmul.msk.bf16.gmra.mxu1 %vm377_vm2, %v969_v5  ;;  %v1381_v11 = vpack.c.b16 %v1377_v32, %v1376_v9 }
  0x92   : > { %2103 = vmatmul.msk.bf16.gmra.mxu2 %vm377_vm2, %v2092_v13 }
  0x99   : > { %2129 = vmatmul.msk.bf16.gmra.mxu3 %vm377_vm2, %v1254_v43 }
  0x9c   : > { %v2614_v59 = vpop.f32.mrf.mxu1 }
  0x9d   : > { %2155 = vmatmul.msk.bf16.gmra.mxu0 %vm377_vm2, %v1380_v36 }
  0x9f   : > { %2070 = vmatmul.msk.bf16.gmra.mxu1 %vm377_vm2, %v970_v55 }
  0xa2   : > { %2104 = vmatmul.msk.bf16.gmra.mxu2 %vm377_vm2, %v2096_v63 }
  0xa4   : > { %v2627_v5 = vpop.f32.mrf.mxu1 }
  0xa5   : > { %v409_v10 = vpop.f32.mrf.mxu2 }
  0xa9   : > { %2130 = vmatmul.msk.bf16.gmra.mxu3 %vm377_vm2, %v1255_v6 }
  0xaa   : > { %v399_v12 = vpop.f32.mrf.mxu0 }
  0xac   : > { %v414_v13 = vpop.f32.mrf.mxu3  ;;  %v466_v14 = vpop.f32.mrf.mxu1 }
  0xad   : > { %2156 = vmatmul.msk.bf16.gmra.mxu0 %vm377_vm2, %v1381_v11  ;;  %v411_v41 = vpop.f32.mrf.mxu2  ;;  %v467_v58 = vadd.f32 %v466_v14, %v399_v12 }
  0xb2   : > { %v401_v15 = vpop.f32.mrf.mxu0 }
  0xb4   : > { %v416_v16 = vpop.f32.mrf.mxu3  ;;  %v468_v49 = vpop.f32.mrf.mxu1 }
  0xb5   : > { %v587_v42 = vpop.f32.mrf.mxu2  ;;  %v469_v2 = vadd.f32 %v468_v49, %v401_v15  ;;  %v2653_v15 = vld [vmem:[%s2919_s2] ss:$0 sm:$0xff] }
  0xb6   : > { %v607_v57 = vadd.f32 %v587_v42, %v467_v58 }
  0xba   : > { %v872_v19 = vpop.f32.mrf.mxu0 }
  0xbc   : > { %v674_v20 = vpop.f32.mrf.mxu3  ;;  %v471_v22 = vpop.f32.mrf.mxu1 }
  0xbd   : > { %v589_v23 = vpop.f32.mrf.mxu2  ;;  %v694_v1 = vadd.f32 %v674_v20, %v607_v57 }
  0xbe   : > { %v608_v6 = vadd.f32 %v589_v23, %v469_v2 }
  0xbf   : > { %v892_v32 = vadd.f32 %v872_v19, %v694_v1 }
  0xc2   : > { %v874_v25 = vpop.f32.mrf.mxu0 }
  0xc4   : > { %v676_v26 = vpop.f32.mrf.mxu3  ;;  %v2631_v27 = vpop.f32.mrf.mxu1 }
  0xc5   : > { %v592_v28 = vpop.f32.mrf.mxu2  ;;  %v695_v12 = vadd.f32 %v676_v26, %v608_v6 }
  0xc7   : > { %v893_v49 = vadd.f32 %v874_v25, %v695_v12 }
  0xca   : > { %v2633_v29 = vpop.f32.mrf.mxu0 }
  0xcc   : > { %v679_v30 = vpop.f32.mrf.mxu3  ;;  %v476_v31 = vpop.f32.mrf.mxu1 }
  0xcd   : > { %v2635_v33 = vpop.f32.mrf.mxu2  ;;  %v477_v34 = vadd.f32 %v476_v31, %v409_v10 }
  0xd2   : > { %v2637_v35 = vpop.f32.mrf.mxu0 }
  0xd4   : > { %v2639_v37 = vpop.f32.mrf.mxu3  ;;  %v478_v38 = vpop.f32.mrf.mxu1 }
  0xd5   : > { %v597_v39 = vpop.f32.mrf.mxu2  ;;  %v479_v40 = vadd.f32 %v478_v38, %v411_v41 }
  0xd6   : > { %v611_v17 = vadd.f32 %v597_v39, %v477_v34 }
  0xda   : > { %v882_v18 = vpop.f32.mrf.mxu0 }
  0xdc   : > { %v684_v43 = vpop.f32.mrf.mxu3  ;;  %v481_v24 = vpop.f32.mrf.mxu1 }
  0xdd   : > { %v698_v44 = vadd.f32 %v684_v43, %v611_v17  ;;  %v599_v45 = vpop.f32.mrf.mxu2  ;;  %v482_v7 = vadd.f32 %v481_v24, %v414_v13 }
  0xde   : > { %v612_v46 = vadd.f32 %v599_v45, %v479_v40 }
  0xdf   : > { %v2641_v47 = vadd.f32 %v882_v18, %v698_v44 }
  0xe2   : > { %v884_v48 = vpop.f32.mrf.mxu0 }
  0xe4   : > { %v686_v36 = vpop.f32.mrf.mxu3  ;;  %v483_v21 = vpop.f32.mrf.mxu1 }
  0xe5   : > { %v699_v50 = vadd.f32 %v686_v36, %v612_v46  ;;  %v602_v52 = vpop.f32.mrf.mxu2  ;;  %v484_v53 = vadd.f32 %v483_v21, %v416_v16  ;;  %v472_v16 = vadd.f32 %v471_v22, %v2614_v59  ;;  %v474_v59 = vadd.f32 %v2631_v27, %v2627_v5 }
  0xe6   : > { %v613_v54 = vadd.f32 %v602_v52, %v482_v7 }
  0xe7   : > { %v2643_v55 = vadd.f32 %v884_v48, %v699_v50  ;;  %v609_v31 = vadd.f32 %v592_v28, %v472_v16  ;;  %v610_v17 = vadd.f32 %v2635_v33, %v474_v59 }
  0xe9   : > { %v696_v39 = vadd.f32 %v679_v30, %v609_v31  ;;  %v697_v46 = vadd.f32 %v2639_v37, %v610_v17 }
  0xea   : > { %v887_v56 = vpop.f32.mrf.mxu0 }
  0xeb   : > { %v894_v30 = vadd.f32 %v2633_v29, %v696_v39 }
  0xec   : > { %v689_v8 = vpop.f32.mrf.mxu3  ;;  %v998_v51 = vpop.f32.mrf.mxu1 }
  0xed   : > { %v700_v62 = vadd.f32 %v689_v8, %v613_v54  ;;  %v604_v63 = vpop.f32.mrf.mxu2  ;;  %v1018_v11 = vadd.f32 %v998_v51, %v892_v32  ;;  %v895_v8 = vadd.f32 %v2637_v35, %v697_v46 }
  0xee   : > { %v614_v0 = vadd.f32 %v604_v63, %v484_v53 }
  0xef   : > { %v2645_v60 = vadd.f32 %v887_v56, %v700_v62 }
  0xf2   : > { %v889_v61 = vpop.f32.mrf.mxu0 }
  0xf4   : > { %v691_v3 = vpop.f32.mrf.mxu3  ;;  %v1000_v4 = vpop.f32.mrf.mxu1 }
  0xf5   : > { %v701_v9 = vadd.f32 %v691_v3, %v614_v0  ;;  %v1085_v10 = vpop.f32.mrf.mxu2  ;;  %v1019_v38 = vadd.f32 %v1000_v4, %v893_v49 }
  0xf6   : > { %v1105_v14 = vadd.f32 %v1085_v10, %v1018_v11 }
  0xf7   : > { %v2647_v13 = vadd.f32 %v889_v61, %v701_v9 }
  0xfa   : > { %v1409_v41 = vpop.f32.mrf.mxu0 }
  0xfc   : > { %v1283_v42 = vpop.f32.mrf.mxu3  ;;  %v1003_v19 = vpop.f32.mrf.mxu1 }
  0xfd   : > { %v1303_v34 = vadd.f32 %v1283_v42, %v1105_v14  ;;  %v1087_v20 = vpop.f32.mrf.mxu2  ;;  %v1020_v7 = vadd.f32 %v1003_v19, %v894_v30 }
  0xfe   : > { %v1106_v40 = vadd.f32 %v1087_v20, %v1019_v38 }
  0xff   : > { %v1429_v23 = vadd.f32 %v1409_v41, %v1303_v34 }
 0x101   : > { %v2656_v26 = vadd.f32 %v2653_v15, %v1429_v23 }
 0x102   : > { %v1411_v22 = vpop.f32.mrf.mxu0 }
 0x103   : > { %v2661_v28 = vmul.f32 0.70710677, %v2656_v26 }
 0x104   : > { %v1285_v18 = vpop.f32.mrf.mxu3  ;;  %v1005_v5 = vpop.f32.mrf.mxu1 }
 0x105   : > { %v1465_v25 = vmul.f32 %v2661_v28, %v2661_v28  ;;  %v1304_v43 = vadd.f32 %v1285_v18, %v1106_v40  ;;  %v1090_v24 = vpop.f32.mrf.mxu2  ;;  %v1021_v0 = vadd.f32 %v1005_v5, %v895_v8 }
 0x106   : > { %v1107_v33 = vadd.f32 %v1090_v24, %v1020_v7 }
 0x107   : > { %v1466_v44 = vmin.f32 %v1465_v25, 16.0  ;;  %v1430_v45 = vadd.f32 %v1411_v22, %v1304_v43 }
 0x109   : > { %v1467_v27 = vmul.f32 2.1237322e-06, %v1466_v44  ;;  %v1478_v48 = vmul.f32 3.8918573e-05, %v1466_v44  ;;  %v2669_v36 = vadd.f32 %v2653_v15, %v1430_v45 }
 0x10a   : > { %v1414_v53 = vpop.f32.mrf.mxu0 }
 0x10b   : > { %v1468_v21 = vadd.f32 0.00028619796, %v1467_v27  ;;  %v1479_v50 = vadd.f32 0.001143296, %v1478_v48  ;;  %v2672_v52 = vmul.f32 0.70710677, %v2669_v36 }
 0x10c   : > { %v1288_v29 = vpop.f32.mrf.mxu3  ;;  %v1008_v32 = vpop.f32.mrf.mxu1 }
 0x10d   : > { %v1469_v54 = vmul.f32 %v1468_v21, %v1466_v44  ;;  %v1480_v56 = vmul.f32 %v1479_v50, %v1466_v44  ;;  %v1305_v58 = vadd.f32 %v1288_v29, %v1107_v33  ;;  %v1505_v37 = vmul.f32 %v2672_v52, %v2672_v52  ;;  %v1092_v51 = vpop.f32.mrf.mxu2 }
 0x10e   : > { %v1108_v4 = vadd.f32 %v1092_v51, %v1021_v0  ;;  %v1022_v43 = vadd.f32 %v1008_v32, %v2641_v47 }
 0x10f   : > { %v1470_v57 = vadd.f32 0.0036580483, %v1469_v54  ;;  %v1481_v62 = vadd.f32 0.014752088, %v1480_v56  ;;  %v1431_v63 = vadd.f32 %v1414_v53, %v1305_v58  ;;  %v1506_v1 = vmin.f32 %v1505_v37, 16.0 }
 0x110   : > { %v2703_v37 = vmul.f32 0.5, %v2656_v26 }
 0x111   : > { %v1471_v61 = vmul.f32 %v1470_v57, %v1466_v44  ;;  %v1482_v2 = vmul.f32 %v1481_v62, %v1466_v44  ;;  %v2678_v3 = vadd.f32 %v2653_v15, %v1431_v63  ;;  %v1507_v6 = vmul.f32 2.1237322e-06, %v1506_v1 }
 0x112   : > { %v1518_v9 = vmul.f32 3.8918573e-05, %v1506_v1  ;;  %v1416_v19 = vpop.f32.mrf.mxu0 }
 0x113   : > { %v1472_v10 = vadd.f32 0.05243302, %v1471_v61  ;;  %v1483_v35 = vadd.f32 0.112945676, %v1482_v2  ;;  %v1508_v11 = vadd.f32 0.00028619796, %v1507_v6 }
 0x114   : > { %v1519_v12 = vadd.f32 0.001143296, %v1518_v9  ;;  %v2681_v14 = vmul.f32 0.70710677, %v2678_v3  ;;  %v1290_v41 = vpop.f32.mrf.mxu3  ;;  %v1010_v53 = vpop.f32.mrf.mxu1 }
 0x115   : > { %v1473_v16 = vmul.f32 %v1472_v10, %v1466_v44  ;;  %v1484_v42 = vmul.f32 %v1483_v35, %v1466_v44  ;;  %v1306_v31 = vadd.f32 %v1290_v41, %v1108_v4  ;;  %v1509_v34 = vmul.f32 %v1508_v11, %v1506_v1  ;;  %v1095_v17 = vpop.f32.mrf.mxu2 }
 0x116   : > { %v1520_v49 = vmul.f32 %v1519_v12, %v1506_v1  ;;  %v1545_v20 = vmul.f32 %v2681_v14, %v2681_v14  ;;  %v1109_v50 = vadd.f32 %v1095_v17, %v1022_v43  ;;  %v1023_v2 = vadd.f32 %v1010_v53, %v2643_v55 }
 0x117   : > { %v1474_v23 = vadd.f32 0.18741608, %v1473_v16  ;;  %v1485_v38 = vadd.f32 0.4994258, %v1484_v42  ;;  %v1432_v39 = vadd.f32 %v1416_v19, %v1306_v31  ;;  %v1510_v40 = vadd.f32 0.0036580483, %v1509_v34 }
 0x118   : > { %v1521_v59 = vadd.f32 0.014752088, %v1520_v49  ;;  %v2685_v22 = vmin.f32 %v1545_v20, 16.0 }
 0x119   : > { %v1486_v18 = vmul.f32 %v1485_v38, %v1466_v44  ;;  %v2688_v25 = vadd.f32 %v2653_v15, %v1432_v39  ;;  %v1475_v30 = vmul.f32 %v1474_v23, %v1466_v44  ;;  %v1511_v24 = vmul.f32 %v1510_v40, %v1506_v1 }
 0x11a   : > { %v1522_v45 = vmul.f32 %v1521_v59, %v1506_v1  ;;  %v1547_v7 = vmul.f32 2.1237322e-06, %v2685_v22  ;;  %v1558_v5 = vmul.f32 3.8918573e-05, %v2685_v22  ;;  %v1419_v16 = vpop.f32.mrf.mxu0 }
 0x11b   : > { %v2692_v46 = vadd.f32 1.0, %v1486_v18  ;;  %v2696_v27 = vmul.f32 0.70710677, %v2688_v25  ;;  %v1512_v48 = vadd.f32 0.05243302, %v1511_v24 }
 0x11c   : > { %v1523_v33 = vadd.f32 0.112945676, %v1522_v45  ;;  %v1548_v21 = vadd.f32 0.00028619796, %v1547_v7  ;;  %v1476_v47 = vadd.f32 1.1283791, %v1475_v30  ;;  %v1293_v8 = vpop.f32.mrf.mxu3  ;;  %v1013_v38 = vpop.f32.mrf.mxu1 }
 0x11d   : > { %2218 = vrcp.f32 %v2692_v46  ;;  %v1513_v44 = vmul.f32 %v1512_v48, %v1506_v1  ;;  %v1559_v56 = vadd.f32 0.001143296, %v1558_v5  ;;  %v1585_v58 = vmul.f32 %v2696_v27, %v2696_v27  ;;  %v1097_v10 = vpop.f32.mrf.mxu2 }
 0x11e   : > { %v1524_v29 = vmul.f32 %v1523_v33, %v1506_v1  ;;  %v1549_v54 = vmul.f32 %v1548_v21, %v2685_v22  ;;  %v1307_v62 = vadd.f32 %v1293_v8, %v1109_v50  ;;  %v1477_v4 = vmul.f32 %v1476_v47, %v2661_v28 }
 0x11f   : > { %v1514_v51 = vadd.f32 0.18741608, %v1513_v44  ;;  %v1560_v0 = vmul.f32 %v1559_v56, %v2685_v22  ;;  %v2706_v61 = vmin.f32 %v1585_v58, 16.0  ;;  %v1497_v6 = vand.u32 2147483647, %v2692_v46 }
 0x120   : > { %v1525_v57 = vadd.f32 0.4994258, %v1524_v29  ;;  %v1550_v63 = vadd.f32 0.0036580483, %v1549_v54  ;;  %v1499_v55 = vand.u32 2147483648, %v2692_v46  ;;  %v1433_v28 = vadd.f32 %v1419_v16, %v1307_v62 }
 0x121   : > { %v1515_v9 = vmul.f32 %v1514_v51, %v1506_v1  ;;  %v1561_v11 = vadd.f32 0.014752088, %v1560_v0  ;;  %v1587_v12 = vmul.f32 2.1237322e-06, %v2706_v61  ;;  %v1598_v41 = vmul.f32 3.8918573e-05, %v2706_v61 }
 0x122   : > { %v1526_v32 = vmul.f32 %v1525_v57, %v1506_v1  ;;  %v1551_v26 = vmul.f32 %v1550_v63, %v2685_v22  ;;  %vm1493_vm7 = vweird.f32 %v2692_v46  ;;  %vm2721_vm9 = vcmp.eq.f32.partialorder %v1497_v6, 8.507059e+37  ;;  %v1421_v63 = vpop.f32.mrf.mxu0 }
 0x123   : > { %v2219_v35 = vpop.eup %2218  ;;  %v1562_v1 = vmul.f32 %v1561_v11, %v2685_v22  ;;  %v1588_v49 = vadd.f32 0.00028619796, %v1587_v12  ;;  %v1599_v20 = vadd.f32 0.001143296, %v1598_v41  ;;  %v1516_v23 = vadd.f32 1.1283791, %v1515_v9 }
 0x124   : > { %v1489_v42 = vmul.f32 %v2219_v35, %v2692_v46  ;;  %v2716_v31 = vadd.f32 1.0, %v1526_v32  ;;  %v1552_v34 = vadd.f32 0.05243302, %v1551_v26  ;;  %vm1494_vm8 = vweird.f32 %v2219_v35  ;;  %v1295_v5 = vpop.f32.mrf.mxu3 }
 0x125   : > { %v1563_v40 = vadd.f32 0.112945676, %v1562_v1  ;;  %v1110_v59 = vadd.f32 %v1097_v10, %v1023_v2  ;;  %v1589_v18 = vmul.f32 %v1588_v49, %v2706_v61  ;;  %v1600_v43 = vmul.f32 %v1599_v20, %v2706_v61  ;;  %vm1495_vm10 = vmor %vm1493_vm7, %vm1494_vm8  ;;  %v1100_v8 = vpop.f32.mrf.mxu2 }
 0x126   : > { %v1490_v19 = vsub.f32 1.0, %v1489_v42  ;;  %2220 = vrcp.f32 %v2716_v31  ;;  %v2728_v30 = vadd.f32 %v2653_v15, %v1433_v28  ;;  %v1500_v24 = vor.u32 1.1754944e-38, %v1499_v55 }
 0x127   : > { %v1553_v45 = vmul.f32 %v1552_v34, %v2685_v22  ;;  %v1564_v7 = vmul.f32 %v1563_v40, %v2685_v22  ;;  %v1024_v48 = vadd.f32 %v1013_v38, %v2645_v60  ;;  %v1517_v21 = vmul.f32 %v1516_v23, %v2672_v52 }
 0x128   : > { %v1491_v17 = vmul.f32 %v2219_v35, %v1490_v19  ;;  %v1590_v50 = vadd.f32 0.0036580483, %v1589_v18  ;;  %v1601_v53 = vadd.f32 0.014752088, %v1600_v43  ;;  %vm1533_vm11 = vweird.f32 %v2716_v31 }
 0x129   : > { %v1565_v47 = vadd.f32 0.4994258, %v1564_v7  ;;  %v2739_v44 = vmul.f32 0.70710677, %v2728_v30  ;;  %v1308_v29 = vadd.f32 %v1295_v5, %v1110_v59  ;;  %v1537_v60 = vand.u32 2147483647, %v2716_v31 }
 0x12a   : > { %v1492_v33 = vadd.f32 %v2219_v35, %v1491_v17  ;;  %v1591_v58 = vmul.f32 %v1590_v50, %v2706_v61  ;;  %v1602_v52 = vmul.f32 %v1601_v53, %v2706_v61  ;;  %v1539_v57 = vand.u32 2147483648, %v2716_v31  ;;  %v1424_v53 = vpop.f32.mrf.mxu0 }
 0x12b   : > { %v1554_v62 = vadd.f32 0.18741608, %v1553_v45  ;;  %v1566_v2 = vmul.f32 %v1565_v47, %v2685_v22  ;;  %v1625_v10 = vmul.f32 %v2739_v44, %v2739_v44  ;;  %v1111_v26 = vadd.f32 %v1100_v8, %v1024_v48 }
 0x12c   : > { %v2221_v54 = vpop.eup %2220  ;;  %v1496_v56 = vsel %vm1495_vm10, %v2219_v35, %v1492_v33  ;;  %v1592_v6 = vadd.f32 0.05243302, %v1591_v58  ;;  %v1603_v9 = vadd.f32 0.112945676, %v1602_v52  ;;  %v1434_v35 = vadd.f32 %v1421_v63, %v1308_v29  ;;  %v1298_v38 = vpop.f32.mrf.mxu3 }
 0x12d   : > { %v1501_v46 = vsel %vm2721_vm9, %v1500_v24, %v1496_v56  ;;  %v1529_v51 = vmul.f32 %v2221_v54, %v2716_v31  ;;  %v2751_v12 = vadd.f32 1.0, %v1566_v2  ;;  %vm1534_vm13 = vweird.f32 %v2221_v54 }
 0x12e   : > { %v1502_v0 = vmul.f32 %v1501_v46, %v1477_v4  ;;  %v1593_v41 = vmul.f32 %v1592_v6, %v2706_v61  ;;  %v1604_v16 = vmul.f32 %v1603_v9, %v2706_v61  ;;  %v1555_v4 = vmul.f32 %v1554_v62, %v2685_v22  ;;  %vm1535_vm15 = vmor %vm1533_vm11, %vm1534_vm13 }
 0x12f   : > { %v1530_v32 = vsub.f32 1.0, %v1529_v51  ;;  %v2756_v55 = vmin.f32 %v1625_v10, 16.0  ;;  %vm2759_vm14 = vcmp.eq.f32.partialorder %v1537_v60, 8.507059e+37  ;;  %v1540_v1 = vor.u32 1.1754944e-38, %v1539_v57 }
 0x130   : > { %v2157_v11 = vclamps-f32 %v1502_v0, 1.0  ;;  %2222 = vrcp.f32 %v2751_v12  ;;  %v1594_v20 = vadd.f32 0.18741608, %v1593_v41  ;;  %v1605_v19 = vadd.f32 0.4994258, %v1604_v16 }
 0x131   : > { %v1531_v42 = vmul.f32 %v2221_v54, %v1530_v32  ;;  %v2765_v23 = vadd.f32 %v2653_v15, %v1434_v35  ;;  %v1627_v39 = vmul.f32 2.1237322e-06, %v2756_v55  ;;  %v1638_v40 = vmul.f32 3.8918573e-05, %v2756_v55 }
 0x132   : > { %v1785_v28 = vadd.f32 1.0, %v2157_v11  ;;  %v1309_v59 = vadd.f32 %v1298_v38, %v1111_v26  ;;  %v1556_v18 = vadd.f32 1.1283791, %v1555_v4  ;;  %v1595_v43 = vmul.f32 %v1594_v20, %v2706_v61  ;;  %v1015_v11 = vpop.f32.mrf.mxu1 }
 0x133   : > { %v1532_v49 = vadd.f32 %v2221_v54, %v1531_v42  ;;  %v1628_v45 = vadd.f32 0.00028619796, %v1627_v39  ;;  %v1639_v7 = vadd.f32 0.001143296, %v1638_v40  ;;  %v1450_v5 = vmul.f32 0.5, %v2669_v36 }
 0x134   : > { %v1793_v22 = vmul.f32 %v1785_v28, %v2703_v37  ;;  %v1606_v37 = vmul.f32 %v1605_v19, %v2706_v61  ;;  %v1577_v33 = vand.u32 2147483647, %v2751_v12  ;;  %v1435_v56 = vadd.f32 %v1424_v53, %v1309_v59 }
 0x135   : > { %v1536_v17 = vsel %vm1535_vm15, %v2221_v54, %v1532_v49  ;;  %v1629_v29 = vmul.f32 %v1628_v45, %v2756_v55  ;;  %v1640_v61 = vmul.f32 %v1639_v7, %v2756_v55  ;;  %v2790_v54 = vmul.f32 0.70710677, %v2765_v23 }
 0x136   : > { %v1801_v24 = vpack.c.bf16 %v1793_v22, %v1793_v22  ;;  %v1541_v31 = vsel %vm2759_vm14, %v1540_v1, %v1536_v17  ;;  %v2783_v50 = vadd.f32 1.0, %v1606_v37  ;;  %v2223_v47 = vpop.eup %2222  ;;  %v2793_v36 = vmul.f32 0.5, %v2678_v3  ;;  %v1102_v22 = vpop.f32.mrf.mxu2 }
 0x137   : > { %v1542_v48 = vmul.f32 %v1541_v31, %v1517_v21  ;;  %v1557_v21 = vmul.f32 %v1556_v18, %v2681_v14  ;;  %v1569_v58 = vmul.f32 %v2223_v47, %v2751_v12  ;;  %vm1573_vm0 = vweird.f32 %v2751_v12 }
 0x138   : > { %1810 = vst.msk [vmem:[%s2775_s19] sm:$0xf] %vm1809_vm12, %v1801_v24  ;;  %v1579_v52 = vand.u32 2147483648, %v2751_v12  ;;  %v1596_v8 = vadd.f32 1.1283791, %v1595_v43  ;;  %2224 = vrcp.f32 %v2783_v50  ;;  %vm1574_vm1 = vweird.f32 %v2223_v47 }
 0x139   : > { %v2158_v60 = vclamps-f32 %v1542_v48, 1.0  ;;  %v1570_v51 = vsub.f32 1.0, %v1569_v58  ;;  %v1630_v57 = vadd.f32 0.0036580483, %v1629_v29  ;;  %v1641_v62 = vadd.f32 0.014752088, %v1640_v61  ;;  %vm1575_vm4 = vmor %vm1573_vm0, %vm1574_vm1 }
 0x13a   : > { %vm2800_vm2 = vcmp.eq.f32.partialorder %v1577_v33, 8.507059e+37  ;;  %v1665_v3 = vmul.f32 %v2790_v54, %v2790_v54  ;;  %v2807_v14 = vadd.f32 %v2653_v15, %v1435_v56  ;;  %v1580_v32 = vor.u32 1.1754944e-38, %v1579_v52 }
 0x13b   : > { %v1786_v46 = vadd.f32 1.0, %v2158_v60  ;;  %v1571_v2 = vmul.f32 %v2223_v47, %v1570_v51  ;;  %v1631_v6 = vmul.f32 %v1630_v57, %v2756_v55  ;;  %v1642_v9 = vmul.f32 %v1641_v62, %v2756_v55  ;;  %v1300_v51 = vpop.f32.mrf.mxu3 }
 0x13c   : > { %v1597_v10 = vmul.f32 %v1596_v8, %v2696_v27  ;;  %v2812_v35 = vmin.f32 %v1665_v3, 16.0  ;;  %v2815_v26 = vmul.f32 0.70710677, %v2807_v14  ;;  %vm1613_vm3 = vweird.f32 %v2783_v50 }
 0x13d   : > { %v1794_v0 = vmul.f32 %v1786_v46, %v1450_v5  ;;  %v1572_v16 = vadd.f32 %v2223_v47, %v1571_v2  ;;  %v1643_v42 = vadd.f32 0.112945676, %v1642_v9  ;;  %v1617_v28 = vand.u32 2147483647, %v2783_v50 }
 0x13e   : > { %v2225_v4 = vpop.eup %2224  ;;  %v1667_v27 = vmul.f32 2.1237322e-06, %v2812_v35  ;;  %v1678_v34 = vmul.f32 3.8918573e-05, %v2812_v35  ;;  %v1705_v1 = vmul.f32 %v2815_v26, %v2815_v26  ;;  %v1632_v19 = vadd.f32 0.05243302, %v1631_v6 }
 0x13f   : > { %v1802_v41 = vpack.c.bf16 %v1794_v0, %v1794_v0  ;;  %v1576_v49 = vsel %vm1575_vm4, %v2223_v47, %v1572_v16  ;;  %v1609_v20 = vmul.f32 %v2225_v4, %v2783_v50  ;;  %v1025_v38 = vadd.f32 %v1015_v11, %v2647_v13 }
 0x140   : > { %v1581_v12 = vsel %vm2800_vm2, %v1580_v32, %v1576_v49  ;;  %v1644_v39 = vmul.f32 %v1643_v42, %v2756_v55  ;;  %v1668_v40 = vadd.f32 0.00028619796, %v1667_v27  ;;  %v1679_v59 = vadd.f32 0.001143296, %v1678_v34 }
 0x141   : > { %1811 = vst.msk [vmem:[%s2775_s19 + $0x4] sm:$0xf] %vm1809_vm12, %v1802_v41  ;;  %v1582_v17 = vmul.f32 %v1581_v12, %v1557_v21  ;;  %v1610_v18 = vsub.f32 1.0, %v1609_v20  ;;  %v1619_v43 = vand.u32 2147483648, %v2783_v50  ;;  %v2834_v37 = vmin.f32 %v1705_v1, 16.0  ;;  %v1426_v41 = vpop.f32.mrf.mxu0 }
 0x142   : > { %v1645_v24 = vadd.f32 0.4994258, %v1644_v39  ;;  %v1669_v31 = vmul.f32 %v1668_v40, %v2812_v35  ;;  %v1680_v45 = vmul.f32 %v1679_v59, %v2812_v35  ;;  %v1112_v13 = vadd.f32 %v1102_v22, %v1025_v38 }
 0x143   : > { %v2159_v7 = vclamps-f32 %v1582_v17, 1.0  ;;  %v1611_v5 = vmul.f32 %v2225_v4, %v1610_v18  ;;  %vm1614_vm5 = vweird.f32 %v2225_v4  ;;  %v1707_v48 = vmul.f32 2.1237322e-06, %v2834_v37 }
 0x144   : > { %v1633_v33 = vmul.f32 %v1632_v19, %v2756_v55  ;;  %v1646_v53 = vmul.f32 %v1645_v24, %v2756_v55  ;;  %v1681_v47 = vadd.f32 0.014752088, %v1680_v45  ;;  %v1718_v29 = vmul.f32 3.8918573e-05, %v2834_v37  ;;  %vm1615_vm6 = vmor %vm1613_vm3, %vm1614_vm5 }
 0x145   : > { %v1787_v61 = vadd.f32 1.0, %v2159_v7  ;;  %v1612_v56 = vadd.f32 %v2225_v4, %v1611_v5  ;;  %v1620_v60 = vor.u32 1.1754944e-38, %v1619_v43  ;;  %v1670_v21 = vadd.f32 0.0036580483, %v1669_v31 }
 0x146   : > { %v2844_v58 = vadd.f32 1.0, %v1646_v53  ;;  %v1682_v52 = vmul.f32 %v1681_v47, %v2812_v35  ;;  %v1708_v8 = vadd.f32 0.00028619796, %v1707_v48  ;;  %v1719_v46 = vadd.f32 0.001143296, %v1718_v29 }
 0x147   : > { %v1795_v57 = vmul.f32 %v1787_v61, %v2793_v36  ;;  %v1616_v62 = vsel %vm1615_vm6, %v2225_v4, %v1612_v56  ;;  %vm1618_vm7 = vcmp.eq.f32.partialorder %v1617_v28, 8.507059e+37  ;;  %v1310_v63 = vadd.f32 %v1300_v51, %v1112_v13 }
 0x148   : > { %v1621_v3 = vsel %vm1618_vm7, %v1620_v60, %v1616_v62  ;;  %v1634_v0 = vadd.f32 0.18741608, %v1633_v33  ;;  %2226 = vrcp.f32 %v2844_v58  ;;  %v1671_v6 = vmul.f32 %v1670_v21, %v2812_v35 }
 0x149   : > { %v1803_v2 = vpack.c.bf16 %v1795_v57, %v1795_v57  ;;  %v1622_v50 = vmul.f32 %v1621_v3, %v1597_v10  ;;  %v1683_v9 = vadd.f32 0.112945676, %v1682_v52  ;;  %v1709_v32 = vmul.f32 %v1708_v8, %v2834_v37 }
 0x14a   : > { %v1720_v11 = vmul.f32 %v1719_v46, %v2834_v37  ;;  %v1436_v16 = vadd.f32 %v1426_v41, %v1310_v63  ;;  %v1635_v42 = vmul.f32 %v1634_v0, %v2756_v55  ;;  %v1452_v27 = vmul.f32 0.5, %v2688_v25 }
 0x14b   : > { %1812 = vst.msk [vmem:[%s2775_s19 + $0x8] sm:$0xf] %vm1809_vm12, %v1803_v2  ;;  %v2160_v36 = vclamps-f32 %v1622_v50, 1.0  ;;  %v1684_v4 = vmul.f32 %v1683_v9, %v2812_v35  ;;  %v1672_v34 = vadd.f32 0.05243302, %v1671_v6  ;;  %v1659_v18 = vand.u32 2147483648, %v2844_v58 }
 0x14c   : > { %v1721_v28 = vadd.f32 0.014752088, %v1720_v11  ;;  %v2858_v1 = vadd.f32 %v2653_v15, %v1436_v16  ;;  %v1710_v19 = vadd.f32 0.0036580483, %v1709_v32  ;;  %v1636_v55 = vadd.f32 1.1283791, %v1635_v42 }
 0x14d   : > { %v1788_v10 = vadd.f32 1.0, %v2160_v36  ;;  %v1685_v20 = vadd.f32 0.4994258, %v1684_v4  ;;  %v1673_v17 = vmul.f32 %v1672_v34, %v2812_v35  ;;  %v1657_v13 = vand.u32 2147483647, %v2844_v58 }
 0x14e   : > { %v2227_v49 = vpop.eup %2226  ;;  %v1722_v38 = vmul.f32 %v1721_v28, %v2834_v37  ;;  %v2865_v15 = vmul.f32 0.70710677, %v2858_v1  ;;  %v1711_v24 = vmul.f32 %v1710_v19, %v2834_v37  ;;  %vm1653_vm9 = vweird.f32 %v2844_v58 }
 0x14f   : > { %v1796_v22 = vmul.f32 %v1788_v10, %v1452_v27  ;;  %v1649_v12 = vmul.f32 %v2227_v49, %v2844_v58  ;;  %v1686_v39 = vmul.f32 %v1685_v20, %v2812_v35  ;;  %vm1654_vm8 = vweird.f32 %v2227_v49 }
 0x150   : > { %v1723_v40 = vadd.f32 0.112945676, %v1722_v38  ;;  %v1745_v7 = vmul.f32 %v2865_v15, %v2865_v15  ;;  %v1674_v48 = vadd.f32 0.18741608, %v1673_v17  ;;  %v1637_v47 = vmul.f32 %v1636_v55, %v2739_v44  ;;  %vm1655_vm10 = vmor %vm1653_vm9, %vm1654_vm8 }
 0x151   : > { %v1804_v59 = vpack.c.bf16 %v1796_v22, %v1796_v22  ;;  %v1650_v25 = vsub.f32 1.0, %v1649_v12  ;;  %v1687_v43 = vadd.f32 1.0, %v1686_v39  ;;  %v1660_v29 = vor.u32 1.1754944e-38, %v1659_v18 }
 0x152   : > { %v1724_v31 = vmul.f32 %v1723_v40, %v2834_v37  ;;  %v2876_v53 = vmin.f32 %v1745_v7, 16.0  ;;  %v1712_v61 = vadd.f32 0.05243302, %v1711_v24  ;;  %vm1658_vm11 = vcmp.eq.f32.partialorder %v1657_v13, 8.507059e+37 }
 0x153   : > { %1813 = vst.msk [vmem:[%s2775_s19 + $0xc] sm:$0xf] %vm1809_vm12, %v1804_v59  ;;  %v1651_v45 = vmul.f32 %v2227_v49, %v1650_v25  ;;  %2228 = vrcp.f32 %v1687_v43  ;;  %v1675_v46 = vmul.f32 %v1674_v48, %v2812_v35  ;;  %v1453_v2 = vmul.f32 0.5, %v2728_v30 }
 0x154   : > { %v1725_v33 = vadd.f32 0.4994258, %v1724_v31  ;;  %v1747_v21 = vmul.f32 2.1237322e-06, %v2876_v53  ;;  %v1758_v58 = vmul.f32 3.8918573e-05, %v2876_v53  ;;  %v1713_v44 = vmul.f32 %v1712_v61, %v2834_v37 }
 0x155   : > { %v1652_v5 = vadd.f32 %v2227_v49, %v1651_v45  ;;  %v1676_v9 = vadd.f32 1.1283791, %v1675_v46  ;;  %v1697_v41 = vand.u32 2147483647, %v1687_v43  ;;  %v1699_v35 = vand.u32 2147483648, %v1687_v43 }
 0x156   : > { %v1726_v60 = vmul.f32 %v1725_v33, %v2834_v37  ;;  %v1748_v57 = vadd.f32 0.00028619796, %v1747_v21  ;;  %v1759_v63 = vadd.f32 0.001143296, %v1758_v58  ;;  %v1714_v36 = vadd.f32 0.18741608, %v1713_v44 }
 0x157   : > { %v1656_v56 = vsel %vm1655_vm10, %v2227_v49, %v1652_v5  ;;  %vm1693_vm14 = vweird.f32 %v1687_v43  ;;  %v1700_v49 = vor.u32 1.1754944e-38, %v1699_v35  ;;  %v1677_v38 = vmul.f32 %v1676_v9, %v2790_v54 }
 0x158   : > { %v1661_v52 = vsel %vm1658_vm11, %v1660_v29, %v1656_v56  ;;  %v1727_v51 = vadd.f32 1.0, %v1726_v60  ;;  %v1749_v50 = vmul.f32 %v1748_v57, %v2876_v53  ;;  %v1760_v11 = vmul.f32 %v1759_v63, %v2876_v53 }
 0x159   : > { %v1662_v8 = vmul.f32 %v1661_v52, %v1637_v47  ;;  %v2229_v62 = vpop.eup %2228  ;;  %v1715_v20 = vmul.f32 %v1714_v36, %v2834_v37  ;;  %vm1698_vm0 = vcmp.eq.f32.partialorder %v1697_v41, 8.507059e+37  ;;  %v1454_v13 = vmul.f32 0.5, %v2765_v23 }
 0x15a   : > { %v1689_v0 = vmul.f32 %v2229_v62, %v1687_v43  ;;  %2230 = vrcp.f32 %v1727_v51  ;;  %vm1694_vm13 = vweird.f32 %v2229_v62  ;;  %v1761_v4 = vadd.f32 0.014752088, %v1760_v11 }
 0x15b   : > { %v2161_v3 = vclamps-f32 %v1662_v8, 1.0  ;;  %v1750_v28 = vadd.f32 0.0036580483, %v1749_v50  ;;  %vm1695_vm15 = vmor %vm1693_vm14, %vm1694_vm13  ;;  %v1739_v25 = vand.u32 2147483648, %v1727_v51  ;;  %v1716_v18 = vadd.f32 1.1283791, %v1715_v20 }
 0x15c   : > { %v1690_v32 = vsub.f32 1.0, %v1689_v0  ;;  %v1762_v30 = vmul.f32 %v1761_v4, %v2876_v53  ;;  %v1737_v37 = vand.u32 2147483647, %v1727_v51  ;;  %vm1733_vm2 = vweird.f32 %v1727_v51 }
 0x15d   : > { %v1789_v6 = vadd.f32 1.0, %v2161_v3  ;;  %v1751_v40 = vmul.f32 %v1750_v28, %v2876_v53  ;;  %v1740_v5 = vor.u32 1.1754944e-38, %v1739_v25  ;;  %v1717_v33 = vmul.f32 %v1716_v18, %v2815_v26 }
 0x15e   : > { %v1691_v42 = vmul.f32 %v2229_v62, %v1690_v32  ;;  %v1763_v12 = vadd.f32 0.112945676, %v1762_v30  ;;  %vm1738_vm4 = vcmp.eq.f32.partialorder %v1737_v37, 8.507059e+37  ;;  %v1455_v58 = vmul.f32 0.5, %v2807_v14 }
 0x15f   : > { %v1797_v16 = vmul.f32 %v1789_v6, %v1453_v2  ;;  %v1752_v54 = vadd.f32 0.05243302, %v1751_v40  ;;  %v1456_v35 = vmul.f32 0.5, %v2858_v1 }
 0x160   : > { %v2231_v27 = vpop.eup %2230  ;;  %v1692_v34 = vadd.f32 %v2229_v62, %v1691_v42  ;;  %v1764_v17 = vmul.f32 %v1763_v12, %v2876_v53 }
 0x161   : > { %v1805_v10 = vpack.c.bf16 %v1797_v16, %v1797_v16  ;;  %v1729_v19 = vmul.f32 %v2231_v27, %v1727_v51  ;;  %vm1734_vm1 = vweird.f32 %v2231_v27  ;;  %v1753_v21 = vmul.f32 %v1752_v54, %v2876_v53 }
 0x162   : > { %v1696_v22 = vsel %vm1695_vm15, %v2229_v62, %v1692_v34  ;;  %v1765_v31 = vadd.f32 0.4994258, %v1764_v17  ;;  %vm1735_vm3 = vmor %vm1733_vm2, %vm1734_vm1 }
 0x163   : > { %1814 = vst.msk [vmem:[%s2775_s19 + $0x10] sm:$0xf] %vm1809_vm12, %v1805_v10  ;;  %v1701_v55 = vsel %vm1698_vm0, %v1700_v49, %v1696_v22  ;;  %v1730_v39 = vsub.f32 1.0, %v1729_v19  ;;  %v1754_v46 = vadd.f32 0.18741608, %v1753_v21 }
 0x164   : > { %v1702_v59 = vmul.f32 %v1701_v55, %v1677_v38  ;;  %v1766_v48 = vmul.f32 %v1765_v31, %v2876_v53 }
 0x165   : > { %v1731_v43 = vmul.f32 %v2231_v27, %v1730_v39  ;;  %v1755_v62 = vmul.f32 %v1754_v46, %v2876_v53 }
 0x166   : > { %v2162_v24 = vclamps-f32 %v1702_v59, 1.0  ;;  %v1767_v56 = vadd.f32 1.0, %v1766_v48 }
 0x167   : > { %v1732_v45 = vadd.f32 %v2231_v27, %v1731_v43  ;;  %v1756_v0 = vadd.f32 1.1283791, %v1755_v62 }
 0x168   : > { %v1790_v7 = vadd.f32 1.0, %v2162_v24  ;;  %2232 = vrcp.f32 %v1767_v56  ;;  %v1779_v3 = vand.u32 2147483648, %v1767_v56  ;;  %v1777_v50 = vand.u32 2147483647, %v1767_v56 }
 0x169   : > { %v1736_v47 = vsel %vm1735_vm3, %v2231_v27, %v1732_v45  ;;  %vm1773_vm6 = vweird.f32 %v1767_v56  ;;  %v1757_v9 = vmul.f32 %v1756_v0, %v2865_v15 }
 0x16a   : > { %v1798_v29 = vmul.f32 %v1790_v7, %v1454_v13  ;;  %v1741_v61 = vsel %vm1738_vm4, %v1740_v5, %v1736_v47  ;;  %v1780_v14 = vor.u32 1.1754944e-38, %v1779_v3  ;;  %vm1778_vm8 = vcmp.eq.f32.partialorder %v1777_v50, 8.507059e+37 }
 0x16b   : > { %v1742_v60 = vmul.f32 %v1741_v61, %v1717_v33 }
 0x16c   : > { %v1806_v52 = vpack.c.bf16 %v1798_v29, %v1798_v29 }
 0x16d   : > { %v2163_v23 = vclamps-f32 %v1742_v60, 1.0 }
 0x16e   : > { %1815 = vst.msk [vmem:[%s2775_s19 + $0x14] sm:$0xf] %vm1809_vm12, %v1806_v52  ;;  %v2233_v26 = vpop.eup %2232 }
 0x16f   : > { %v1791_v8 = vadd.f32 1.0, %v2163_v23  ;;  %v1769_v44 = vmul.f32 %v2233_v26, %v1767_v56  ;;  %vm1774_vm5 = vweird.f32 %v2233_v26 }
 0x170   : > { %vm1775_vm7 = vmor %vm1773_vm6, %vm1774_vm5 }
 0x171   : > { %v1799_v51 = vmul.f32 %v1791_v8, %v1455_v58  ;;  %v1770_v63 = vsub.f32 1.0, %v1769_v44 }
 0x173   : > { %v1807_v57 = vpack.c.bf16 %v1799_v51, %v1799_v51  ;;  %v1771_v2 = vmul.f32 %v2233_v26, %v1770_v63 }
 0x175   : > { %1816 = vst.msk [vmem:[%s2775_s19 + $0x18] sm:$0xf] %vm1809_vm12, %v1807_v57  ;;  %v1772_v6 = vadd.f32 %v2233_v26, %v1771_v2 }
 0x177   : > { %v1776_v32 = vsel %vm1775_vm7, %v2233_v26, %v1772_v6 }
 0x178   : > { %v1781_v11 = vsel %vm1778_vm8, %v1780_v14, %v1776_v32 }
 0x179   : > { %v1782_v53 = vmul.f32 %v1781_v11, %v1757_v9 }
 0x17b   : > { %v2164_v41 = vclamps-f32 %v1782_v53, 1.0 }
 0x17d   : > { %v1792_v36 = vadd.f32 1.0, %v2164_v41 }
 0x17f   : > { %v1800_v16 = vmul.f32 %v1792_v36, %v1456_v35 }
 0x181   : > { %v1808_v42 = vpack.c.bf16 %v1800_v16, %v1800_v16 }
 0x183   : > { %1817 = vst.msk [vmem:[%s2775_s19 + $0x1c] sm:$0xf] %vm1809_vm12, %v1808_v42 }
 0x184 PF: > { %s13_s14 = sadd.s32 1, %s2256_s14   ;;  %s2931_s12 = smov %s2252_s13 }
 0x185   : > { %p10_p5 = scmp.ge.s32.totalorder %s13_s14, 4   ;;  %s2932_s13 = smov %s2934_s15 }
 0x187   :  { %12 = sbr.rel (!%p10_p5) target bundleno = 2 (0x2), region = 78 }

</bundles_post_ra>
